<compile_context>
chip_gen: v7x
topology: tpu7x:2x2x1
jax: 0.10.0
libtpu: 0.0.40
codegen_flags: <defaults>
</compile_context>

<pallas_src>
import functools

import jax
import jax.numpy as jnp
from jax.experimental import pallas as pl
from jax.experimental.pallas import tpu as pltpu


def _round_up(x, m):
    return (x + m - 1) // m * m


# ---------------------------------------------------------------------------
# The single fused kernel.
#   xq_ref: (BB, KP)       f32   [flattened states (c-major) | q | 0-pad]
#   wc_ref: (KP, H*L)      bf16  conv folded into a dense matrix (q rows = 0)
#   bc_ref: (1, H*L)       f32   conv bias, repeated over L (h-major)
#   w1_ref: (H*L, 2H+2E)   bf16  [hw1_0 | hw2_0 | hb2_0 | hb1_0]
#   b1_ref: (1, 2H+2E)     f32
#   w2_ref: (2H+2E, N2P)   bf16  block-diag [hw1_1 | hw2_1 | hb2_1 | 0-pad]
#   b2_ref: (1, N2P)       f32
#   o_ref : (BB, 8)        f32   y broadcast over 8 lanes (sliced outside)
# ---------------------------------------------------------------------------
def fused_convmixer_kernel(xq_ref, wc_ref, bc_ref, w1_ref, b1_ref,
                           w2_ref, b2_ref, o_ref, *, n_agents, hyp, embed,
                           state_w, abs_w):
    A, H, E = n_agents, hyp, embed
    f32, bf16 = jnp.float32, jnp.bfloat16

    xq = xq_ref[...]                                            # (BB, KP) f32

    # 1) Conv1d(k=3, 'same') + bias + ReLU as ONE MXU matmul.  Rows of wc
    #    beyond the state lanes (including the q lanes) are zero, so the full
    #    128-deep operand needs no slicing.  Output columns are ordered
    #    h*L + l, i.e. exactly torch's `.view(b, -1)` flatten.
    s = jnp.dot(xq.astype(bf16), wc_ref[...], preferred_element_type=f32)
    s = jnp.maximum(s + bc_ref[...], 0.0)                       # (BB, H*L) f32

    # 2) All four stage-1 hypernet linears fused into one 128-wide matmul.
    z = jnp.dot(s.astype(bf16), w1_ref[...], preferred_element_type=f32)
    z = z + b1_ref[...]                                         # (BB, 2H+2E)
    b1_vec = z[:, 2 * H + E: 2 * H + 2 * E]                     # hyper_b1: NO ReLU
    # INVARIANT: the blanket ReLU below is harmless on the b1 columns ONLY
    # because pack_params keeps w2 rows [2H+E : 2H+2E) exactly zero (hyper_b1
    # bypasses stage 2).  b1_vec itself is sliced BEFORE the ReLU.
    za = jnp.maximum(z, 0.0)

    # 3) Stage-2 hypernet linears fused as one block-diagonal matmul.
    u = jnp.dot(za.astype(bf16), w2_ref[...], preferred_element_type=f32)
    u = u + b2_ref[...]                                         # (BB, N2P)
    w1_flat = u[:, :A * E]              # hyper_w1 out, a-major (= .view(-1,A,E))
    w2_vec = u[:, A * E:A * E + E]      # hyper_w2 out
    b2_sc = u[:, A * E + E:A * E + E + 1]                       # hyper_b2 out
    if abs_w:
        w1_flat = jnp.abs(w1_flat)
        w2_vec = jnp.abs(w2_vec)

    # 4) Mixing: hidden = ELU(q @ |w1| + b1); y = hidden @ |w2| + b2.
    #    w1 is a per-row hypernet output, so there is no shared matmul; with
    #    A=8, E=32 the per-row matvec is A unrolled lane-slice FMAs on the
    #    VPU in f32 (q stays f32).  The kernel is latency/DMA-bound and VALU
    #    has slack, so the MXU-replicate + XLU roll-tree alternative is not
    #    used at these shapes.
    h = b1_vec
    for a in range(A):
        h = h + xq[:, state_w + a:state_w + a + 1] * w1_flat[:, a * E:(a + 1) * E]
    h = jnp.where(h > 0, h, jnp.exp(jnp.minimum(h, 0.0)) - 1.0)  # safe ELU
    y = jnp.sum(h * w2_vec, axis=-1, keepdims=True) + b2_sc      # (BB, 1)

    # Narrow (8-lane) output slab: 16x less HBM writeback than a 128-wide
    # broadcast; sliced to [:, :1] outside.
    o_ref[...] = jnp.broadcast_to(y, o_ref.shape).astype(o_ref.dtype)


# ---------------------------------------------------------------------------
# Wrapper: one grid step for typical batches, weights VMEM-resident.
# ---------------------------------------------------------------------------
def conv_mixer_forward(packed, qvals, states, *, n_agents, obs_dim,
                       hypernet_embed, embed_dim, abs_w=True,
                       block_b_cap=2048):
    b, t, _ = qvals.shape
    A, H, E = n_agents, hypernet_embed, embed_dim
    # Same implicit constraints the PyTorch module has.
    assert A == obs_dim and t == 1, \
        "ConvMixer only type-checks for n_agents == obs_dim and t == 1."

    B = b * t
    CL = A * obs_dim          # conv input width  (c-major flatten)
    HL = H * obs_dim          # conv output width (h-major flatten) == input_dim
    Z = 2 * H + 2 * E         # fused stage-1 output width
    KP = packed["wc"].shape[0]            # padded contraction width (>= 128)
    N2P = packed["w2"].shape[1]
    OUT_W = 8                 # narrow lane-count output slab

    q = qvals.reshape(B, A).astype(jnp.float32)
    x = states.reshape(B, CL).astype(jnp.float32)
    pad_w = KP - CL - A
    parts = [x, q]
    if pad_w > 0:
        parts.append(jnp.zeros((B, pad_w), jnp.float32))
    xq = jnp.concatenate(parts, axis=1)   # (B, KP) = [states | q | 0-pad]

    # Batch blocking: whole batch in one grid step whenever possible.  Cap BB
    # so the per-block VMEM footprint (~6 KiB/row of live intermediates) stays
    # well inside every generation's scoped VMEM (v7x has 64 MiB physical).
    BB = min(_round_up(B, 8), block_b_cap)
    Bp = _round_up(B, BB)
    if Bp != B:
        xq = jnp.pad(xq, ((0, Bp - B), (0, 0)))
    nblk = Bp // BB

    cost = pl.CostEstimate(
        flops=2 * Bp * (KP * HL + HL * Z + Z * N2P + A * E + E),
        transcendentals=Bp * E,
        bytes_accessed=Bp * (KP * 4 + OUT_W * 4)
        + 2 * (KP * HL + HL * Z + Z * N2P) + 4 * (HL + Z + N2P))

    kernel = functools.partial(fused_convmixer_kernel, n_agents=A, hyp=H,
                               embed=E, state_w=CL, abs_w=abs_w)
    y = pl.pallas_call(
        kernel,
        out_shape=jax.ShapeDtypeStruct((Bp, OUT_W), jnp.float32),
        grid=(nblk,),
        in_specs=[
            pl.BlockSpec((BB, KP), lambda i: (i, 0)),     # states|q combined
            pl.BlockSpec((KP, HL), lambda i: (0, 0)),     # conv matrix (resident)
            pl.BlockSpec((1, HL), lambda i: (0, 0)),      # conv bias
            pl.BlockSpec((HL, Z), lambda i: (0, 0)),      # fused stage-1 W
            pl.BlockSpec((1, Z), lambda i: (0, 0)),       # fused stage-1 b
            pl.BlockSpec((Z, N2P), lambda i: (0, 0)),     # fused stage-2 W
            pl.BlockSpec((1, N2P), lambda i: (0, 0)),     # fused stage-2 b
        ],
        out_specs=pl.BlockSpec((BB, OUT_W), lambda i: (i, 0)),
        compiler_params=pltpu.CompilerParams(
            # Only split across TensorCores when there is real work to split.
            dimension_semantics=(("parallel",) if nblk > 1 else ("arbitrary",)),
            vmem_limit_bytes=32 * 1024 * 1024),
        cost_estimate=cost,
    )(xq, packed["wc"], packed["bc"], packed["w1"], packed["b1"],
      packed["w2"], packed["b2"])

    return y[:B, :1].reshape(b, t, 1)


# ---------------------------------------------------------------------------
# Parameter construction (PyTorch-default-like uniform init) and packing of
# the per-layer weights into the fused matrices the kernel consumes.
# ---------------------------------------------------------------------------
def init_params(key, n_agents, obs_dim, hypernet_embed, embed_dim):
    input_dim = hypernet_embed * n_agents
    ks = list(jax.random.split(key, 16))

    def lin(k, fan_in, fan_out):
        kw, kb = jax.random.split(k)
        bound = 1.0 / jnp.sqrt(fan_in)
        w = jax.random.uniform(kw, (fan_in, fan_out), jnp.float32, -bound, bound)
        b = jax.random.uniform(kb, (fan_out,), jnp.float32, -bound, bound)
        return w, b

    kw, kb = jax.random.split(ks[0])
    cbound = 1.0 / jnp.sqrt(obs_dim * 3)
    return {
        "conv_w": jax.random.uniform(kw, (hypernet_embed, obs_dim, 3),
                                     jnp.float32, -cbound, cbound),
        "conv_b": jax.random.uniform(kb, (hypernet_embed,), jnp.float32,
                                     -cbound, cbound),
        "hw1_0": lin(ks[1], input_dim, hypernet_embed),
        "hw1_1": lin(ks[2], hypernet_embed, n_agents * embed_dim),
        "hb1_0": lin(ks[3], input_dim, embed_dim),
        "hw2_0": lin(ks[4], input_dim, hypernet_embed),
        "hw2_1": lin(ks[5], hypernet_embed, embed_dim),
        "hb2_0": lin(ks[6], input_dim, embed_dim),
        "hb2_1": lin(ks[7], embed_dim, 1),
    }


def pack_params(p, *, n_agents, obs_dim, hypernet_embed, embed_dim):
    A, C, L = n_agents, obs_dim, obs_dim
    H, E = hypernet_embed, embed_dim
    f32, bf16 = jnp.float32, jnp.bfloat16

    # Conv1d(k=3, 'same') folded into a dense matrix:
    #   Wc[c*L+lp, h*L+l] = conv_w[h, c, lp-l+1]   (zero outside |lp-l|<=1)
    # S[k, lp, l] = 1 iff lp == l + k - 1  (zero padding handled by omission).
    S = jnp.stack([jnp.eye(L, k=1), jnp.eye(L), jnp.eye(L, k=-1)])
    Wc = jnp.einsum("hck,kpl->cphl", p["conv_w"], S).reshape(C * L, H * L)
    # Pad the contraction dim to a multiple of 128; the extra rows (which
    # include the q lanes of the combined input) are zero.
    KP = _round_up(C * L + A, 128)
    Wc_pad = jnp.zeros((KP, H * L), f32).at[:C * L, :].set(Wc)
    bc = jnp.repeat(p["conv_b"], L).reshape(1, H * L)            # h-major

    # Stage-1: columns = [hw1_0 (H) | hw2_0 (H) | hb2_0 (E) | hb1_0 (E)]
    w1cat = jnp.concatenate([p["hw1_0"][0], p["hw2_0"][0],
                             p["hb2_0"][0], p["hb1_0"][0]], axis=1)
    b1cat = jnp.concatenate([p["hw1_0"][1], p["hw2_0"][1],
                             p["hb2_0"][1], p["hb1_0"][1]]).reshape(1, -1)

    # Stage-2 block-diagonal: rows match the stage-1 column layout above.
    # INVARIANT (relied on by the kernel's blanket ReLU): the hb1_0 rows
    # [2H+E : 2H+2E) MUST stay exactly zero — hyper_b1's output bypasses
    # stage 2 un-ReLU'd and is sliced from z before the ReLU in the kernel.
    Z = 2 * H + 2 * E
    N2 = A * E + E + 1
    N2P = _round_up(N2, 128)
    w2cat = jnp.zeros((Z, N2P), f32)
    w2cat = w2cat.at[0:H, 0:A * E].set(p["hw1_1"][0])
    w2cat = w2cat.at[H:2 * H, A * E:A * E + E].set(p["hw2_1"][0])
    w2cat = w2cat.at[2 * H:2 * H + E, A * E + E:N2].set(p["hb2_1"][0])
    b2cat = jnp.zeros((1, N2P), f32)
    b2cat = b2cat.at[0, 0:A * E].set(p["hw1_1"][1])
    b2cat = b2cat.at[0, A * E:A * E + E].set(p["hw2_1"][1])
    b2cat = b2cat.at[0, A * E + E:N2].set(p["hb2_1"][1])

    return {"wc": Wc_pad.astype(bf16), "bc": bc.astype(f32),
            "w1": w1cat.astype(bf16), "b1": b1cat.astype(f32),
            "w2": w2cat.astype(bf16), "b2": b2cat.astype(f32)}


# ---------------------------------------------------------------------------
# Pure-JAX reference (module-structured, with the same bf16-at-MXU-edges
# rounding the kernel applies) for an in-script correctness check.
# ---------------------------------------------------------------------------
def reference_forward(p, qvals, states, *, n_agents, obs_dim, hypernet_embed,
                      embed_dim, abs_w=True):
    A, H, E = n_agents, hypernet_embed, embed_dim
    b, t, _ = qvals.shape
    _bf = lambda a: a.astype(jnp.bfloat16).astype(jnp.float32)
    _lin = lambda xx, wb: _bf(xx) @ _bf(wb[0]) + wb[1]

    q = qvals.reshape(-1, 1, A).astype(jnp.float32)
    x = _bf(states.reshape(-1, A, obs_dim).astype(jnp.float32))   # (B, C, L)
    xpad = jnp.pad(x, ((0, 0), (0, 0), (1, 1)))
    L = obs_dim
    taps = jnp.stack([xpad[:, :, k:k + L] for k in range(3)], -1)  # (B,C,L,3)
    conv = jnp.einsum("bclk,hck->bhl", taps, _bf(p["conv_w"]))
    conv = conv + p["conv_b"][None, :, None]
    s = jnp.maximum(conv.reshape(b, -1), 0.0)                      # (b, H*L)

    w1 = _lin(jnp.maximum(_lin(s, p["hw1_0"]), 0.0), p["hw1_1"]).reshape(-1, A, E)
    b1 = _lin(s, p["hb1_0"]).reshape(-1, 1, E)
    w2 = _lin(jnp.maximum(_lin(s, p["hw2_0"]), 0.0), p["hw2_1"]).reshape(-1, E, 1)
    b2 = _lin(jnp.maximum(_lin(s, p["hb2_0"]), 0.0), p["hb2_1"]).reshape(-1, 1, 1)
    if abs_w:
        w1, w2 = jnp.abs(w1), jnp.abs(w2)
    hidden = q @ w1 + b1
    hidden = jnp.where(hidden > 0, hidden, jnp.exp(jnp.minimum(hidden, 0.0)) - 1.0)
    y = hidden @ w2 + b2
    return y.reshape(b, t, -1)


if __name__ == "__main__":
    import numpy as np

    # args: n_agents=8, state_shape=(8,8) -> obs_dim=8, hypernet_embed=32,
    #       mixing_embed_dim=32.  t must be 1 (module constraint).
    n_agents, obs_dim, hypernet_embed, embed_dim = 8, 8, 32, 32
    b, t = 256, 1

    key = jax.random.PRNGKey(0)
    kp, kq, ks = jax.random.split(key, 3)
    params = init_params(kp, n_agents, obs_dim, hypernet_embed, embed_dim)
    packed = pack_params(params, n_agents=n_agents, obs_dim=obs_dim,
                         hypernet_embed=hypernet_embed, embed_dim=embed_dim)

    qvals = jax.random.normal(kq, (b, t, n_agents), jnp.float32)
    states = jax.random.normal(ks, (b, t, n_agents * obs_dim), jnp.float32)

    fwd = jax.jit(functools.partial(
        conv_mixer_forward, n_agents=n_agents, obs_dim=obs_dim,
        hypernet_embed=hypernet_embed, embed_dim=embed_dim,
        abs_w=True, block_b_cap=2048))
    y = jax.block_until_ready(fwd(packed, qvals, states))
    assert y.shape == (b, t, 1)

    y_ref = reference_forward(params, qvals, states, n_agents=n_agents,
                              obs_dim=obs_dim, hypernet_embed=hypernet_embed,
                              embed_dim=embed_dim, abs_w=True)
    np.testing.assert_allclose(np.asarray(y), np.asarray(y_ref),
                               rtol=2e-2, atol=2e-2)
    assert np.all(np.isfinite(np.asarray(y)))
    print("KERNEL_OK")
</pallas_src>

<mosaic_0001>
module attributes {stable_mosaic.version = 11 : i64} {
  func.func @fused_convmixer_kernel(%arg0: i32, %arg1: memref<256x128xf32, #tpu.memory_space<vmem>>, %arg2: memref<128x256xbf16, #tpu.memory_space<vmem>>, %arg3: memref<1x256xf32, #tpu.memory_space<vmem>>, %arg4: memref<256x128xbf16, #tpu.memory_space<vmem>>, %arg5: memref<1x128xf32, #tpu.memory_space<vmem>>, %arg6: memref<128x384xbf16, #tpu.memory_space<vmem>>, %arg7: memref<1x384xf32, #tpu.memory_space<vmem>>, %arg8: memref<256x8xf32, #tpu.memory_space<vmem>>) attributes {dimension_semantics = [#tpu.dimension_semantics<arbitrary>], iteration_bounds = array<i64: 1>, scalar_prefetch = 0 : i64, scratch_operands = 0 : i64, tpu.core_type = #tpu.core_type<tc>, window_params = [{transform_indices = @transform_0, window_bounds = array<i64: 256, 128>}, {pipeline_mode = #tpu.pipeline_mode<synchronous>, transform_indices = @transform_1, window_bounds = array<i64: 128, 256>}, {pipeline_mode = #tpu.pipeline_mode<synchronous>, transform_indices = @transform_2, window_bounds = array<i64: 1, 256>}, {pipeline_mode = #tpu.pipeline_mode<synchronous>, transform_indices = @transform_3, window_bounds = array<i64: 256, 128>}, {pipeline_mode = #tpu.pipeline_mode<synchronous>, transform_indices = @transform_4, window_bounds = array<i64: 1, 128>}, {pipeline_mode = #tpu.pipeline_mode<synchronous>, transform_indices = @transform_5, window_bounds = array<i64: 128, 384>}, {pipeline_mode = #tpu.pipeline_mode<synchronous>, transform_indices = @transform_6, window_bounds = array<i64: 1, 384>}, {transform_indices = @transform_7, window_bounds = array<i64: 256, 8>}]} {
    %c0 = arith.constant 0 : index
    %c0_0 = arith.constant 0 : index
    %0 = vector.load %arg1[%c0, %c0_0] : memref<256x128xf32, #tpu.memory_space<vmem>>, vector<256x128xf32>
    %1 = arith.truncf %0 : vector<256x128xf32> to vector<256x128xbf16>
    %c0_1 = arith.constant 0 : index
    %c0_2 = arith.constant 0 : index
    %2 = vector.load %arg2[%c0_1, %c0_2] : memref<128x256xbf16, #tpu.memory_space<vmem>>, vector<128x256xbf16>
    %cst = arith.constant dense<0.000000e+00> : vector<256x256xf32>
    %3 = tpu.matmul %1, %2, %cst {dimension_numbers = #tpu.dot_dimension_numbers<[1], [0], [0], [1], [0, 0, 1, 1], [], []>} : vector<256x128xbf16>, vector<128x256xbf16>, vector<256x256xf32> -> vector<256x256xf32>
    %c0_3 = arith.constant 0 : index
    %c0_4 = arith.constant 0 : index
    %4 = vector.load %arg3[%c0_3, %c0_4] : memref<1x256xf32, #tpu.memory_space<vmem>>, vector<1x256xf32>
    %5 = vector.broadcast %4 : vector<1x256xf32> to vector<256x256xf32>
    %6 = arith.addf %3, %5 : vector<256x256xf32>
    %cst_5 = arith.constant 0.000000e+00 : f32
    %7 = vector.broadcast %cst_5 : f32 to vector<256x256xf32>
    %8 = arith.maximumf %6, %7 : vector<256x256xf32>
    %9 = arith.truncf %8 : vector<256x256xf32> to vector<256x256xbf16>
    %c0_6 = arith.constant 0 : index
    %c0_7 = arith.constant 0 : index
    %10 = vector.load %arg4[%c0_6, %c0_7] : memref<256x128xbf16, #tpu.memory_space<vmem>>, vector<256x128xbf16>
    %cst_8 = arith.constant dense<0.000000e+00> : vector<256x128xf32>
    %11 = tpu.matmul %9, %10, %cst_8 {dimension_numbers = #tpu.dot_dimension_numbers<[1], [0], [0], [1], [0, 0, 1, 1], [], []>} : vector<256x256xbf16>, vector<256x128xbf16>, vector<256x128xf32> -> vector<256x128xf32>
    %c0_9 = arith.constant 0 : index
    %c0_10 = arith.constant 0 : index
    %12 = vector.load %arg5[%c0_9, %c0_10] : memref<1x128xf32, #tpu.memory_space<vmem>>, vector<1x128xf32>
    %13 = vector.broadcast %12 : vector<1x128xf32> to vector<256x128xf32>
    %14 = arith.addf %11, %13 : vector<256x128xf32>
    %15 = vector.extract_strided_slice %14 {offsets = [0, 96], sizes = [256, 32], strides = [1, 1]} : vector<256x128xf32> to vector<256x32xf32>
    %cst_11 = arith.constant 0.000000e+00 : f32
    %16 = vector.broadcast %cst_11 : f32 to vector<256x128xf32>
    %17 = arith.maximumf %14, %16 : vector<256x128xf32>
    %18 = arith.truncf %17 : vector<256x128xf32> to vector<256x128xbf16>
    %c0_12 = arith.constant 0 : index
    %c0_13 = arith.constant 0 : index
    %19 = vector.load %arg6[%c0_12, %c0_13] : memref<128x384xbf16, #tpu.memory_space<vmem>>, vector<128x384xbf16>
    %cst_14 = arith.constant dense<0.000000e+00> : vector<256x384xf32>
    %20 = tpu.matmul %18, %19, %cst_14 {dimension_numbers = #tpu.dot_dimension_numbers<[1], [0], [0], [1], [0, 0, 1, 1], [], []>} : vector<256x128xbf16>, vector<128x384xbf16>, vector<256x384xf32> -> vector<256x384xf32>
    %c0_15 = arith.constant 0 : index
    %c0_16 = arith.constant 0 : index
    %21 = vector.load %arg7[%c0_15, %c0_16] : memref<1x384xf32, #tpu.memory_space<vmem>>, vector<1x384xf32>
    %22 = vector.broadcast %21 : vector<1x384xf32> to vector<256x384xf32>
    %23 = arith.addf %20, %22 : vector<256x384xf32>
    %24 = vector.extract_strided_slice %23 {offsets = [0, 0], sizes = [256, 256], strides = [1, 1]} : vector<256x384xf32> to vector<256x256xf32>
    %25 = vector.extract_strided_slice %23 {offsets = [0, 256], sizes = [256, 32], strides = [1, 1]} : vector<256x384xf32> to vector<256x32xf32>
    %26 = vector.extract_strided_slice %23 {offsets = [0, 288], sizes = [256, 1], strides = [1, 1]} : vector<256x384xf32> to vector<256x1xf32>
    %27 = math.absf %24 : vector<256x256xf32>
    %28 = math.absf %25 : vector<256x32xf32>
    %29 = vector.extract_strided_slice %0 {offsets = [0, 64], sizes = [256, 1], strides = [1, 1]} : vector<256x128xf32> to vector<256x1xf32>
    %30 = vector.extract_strided_slice %27 {offsets = [0, 0], sizes = [256, 32], strides = [1, 1]} : vector<256x256xf32> to vector<256x32xf32>
    %31 = vector.broadcast %29 : vector<256x1xf32> to vector<256x32xf32>
    %32 = arith.mulf %31, %30 : vector<256x32xf32>
    %33 = arith.addf %15, %32 : vector<256x32xf32>
    %34 = vector.extract_strided_slice %0 {offsets = [0, 65], sizes = [256, 1], strides = [1, 1]} : vector<256x128xf32> to vector<256x1xf32>
    %35 = vector.extract_strided_slice %27 {offsets = [0, 32], sizes = [256, 32], strides = [1, 1]} : vector<256x256xf32> to vector<256x32xf32>
    %36 = vector.broadcast %34 : vector<256x1xf32> to vector<256x32xf32>
    %37 = arith.mulf %36, %35 : vector<256x32xf32>
    %38 = arith.addf %33, %37 : vector<256x32xf32>
    %39 = vector.extract_strided_slice %0 {offsets = [0, 66], sizes = [256, 1], strides = [1, 1]} : vector<256x128xf32> to vector<256x1xf32>
    %40 = vector.extract_strided_slice %27 {offsets = [0, 64], sizes = [256, 32], strides = [1, 1]} : vector<256x256xf32> to vector<256x32xf32>
    %41 = vector.broadcast %39 : vector<256x1xf32> to vector<256x32xf32>
    %42 = arith.mulf %41, %40 : vector<256x32xf32>
    %43 = arith.addf %38, %42 : vector<256x32xf32>
    %44 = vector.extract_strided_slice %0 {offsets = [0, 67], sizes = [256, 1], strides = [1, 1]} : vector<256x128xf32> to vector<256x1xf32>
    %45 = vector.extract_strided_slice %27 {offsets = [0, 96], sizes = [256, 32], strides = [1, 1]} : vector<256x256xf32> to vector<256x32xf32>
    %46 = vector.broadcast %44 : vector<256x1xf32> to vector<256x32xf32>
    %47 = arith.mulf %46, %45 : vector<256x32xf32>
    %48 = arith.addf %43, %47 : vector<256x32xf32>
    %49 = vector.extract_strided_slice %0 {offsets = [0, 68], sizes = [256, 1], strides = [1, 1]} : vector<256x128xf32> to vector<256x1xf32>
    %50 = vector.extract_strided_slice %27 {offsets = [0, 128], sizes = [256, 32], strides = [1, 1]} : vector<256x256xf32> to vector<256x32xf32>
    %51 = vector.broadcast %49 : vector<256x1xf32> to vector<256x32xf32>
    %52 = arith.mulf %51, %50 : vector<256x32xf32>
    %53 = arith.addf %48, %52 : vector<256x32xf32>
    %54 = vector.extract_strided_slice %0 {offsets = [0, 69], sizes = [256, 1], strides = [1, 1]} : vector<256x128xf32> to vector<256x1xf32>
    %55 = vector.extract_strided_slice %27 {offsets = [0, 160], sizes = [256, 32], strides = [1, 1]} : vector<256x256xf32> to vector<256x32xf32>
    %56 = vector.broadcast %54 : vector<256x1xf32> to vector<256x32xf32>
    %57 = arith.mulf %56, %55 : vector<256x32xf32>
    %58 = arith.addf %53, %57 : vector<256x32xf32>
    %59 = vector.extract_strided_slice %0 {offsets = [0, 70], sizes = [256, 1], strides = [1, 1]} : vector<256x128xf32> to vector<256x1xf32>
    %60 = vector.extract_strided_slice %27 {offsets = [0, 192], sizes = [256, 32], strides = [1, 1]} : vector<256x256xf32> to vector<256x32xf32>
    %61 = vector.broadcast %59 : vector<256x1xf32> to vector<256x32xf32>
    %62 = arith.mulf %61, %60 : vector<256x32xf32>
    %63 = arith.addf %58, %62 : vector<256x32xf32>
    %64 = vector.extract_strided_slice %0 {offsets = [0, 71], sizes = [256, 1], strides = [1, 1]} : vector<256x128xf32> to vector<256x1xf32>
    %65 = vector.extract_strided_slice %27 {offsets = [0, 224], sizes = [256, 32], strides = [1, 1]} : vector<256x256xf32> to vector<256x32xf32>
    %66 = vector.broadcast %64 : vector<256x1xf32> to vector<256x32xf32>
    %67 = arith.mulf %66, %65 : vector<256x32xf32>
    %68 = arith.addf %63, %67 : vector<256x32xf32>
    %cst_17 = arith.constant 0.000000e+00 : f32
    %69 = vector.broadcast %cst_17 : f32 to vector<256x32xf32>
    %70 = arith.cmpf ogt, %68, %69 : vector<256x32xf32>
    %cst_18 = arith.constant 0.000000e+00 : f32
    %71 = vector.broadcast %cst_18 : f32 to vector<256x32xf32>
    %72 = arith.minimumf %68, %71 : vector<256x32xf32>
    %73 = math.exp %72 : vector<256x32xf32>
    %cst_19 = arith.constant 1.000000e+00 : f32
    %74 = vector.broadcast %cst_19 : f32 to vector<256x32xf32>
    %75 = arith.subf %73, %74 : vector<256x32xf32>
    %76 = arith.select %70, %68, %75 : vector<256x32xi1>, vector<256x32xf32>
    %77 = arith.mulf %76, %28 : vector<256x32xf32>
    %cst_20 = arith.constant dense<0.000000e+00> : vector<256xf32>
    %78 = vector.multi_reduction <add>, %77, %cst_20 [1] : vector<256x32xf32> to vector<256xf32>
    %79 = vector.shape_cast %78 : vector<256xf32> to vector<256x1xf32>
    %80 = arith.addf %79, %26 : vector<256x1xf32>
    %81 = vector.shape_cast %80 : vector<256x1xf32> to vector<256x1xf32>
    %82 = vector.broadcast %81 : vector<256x1xf32> to vector<256x8xf32>
    %c0_21 = arith.constant 0 : index
    %c0_22 = arith.constant 0 : index
    %83 = vector.load %arg8[%c0_21, %c0_22] : memref<256x8xf32, #tpu.memory_space<vmem>>, vector<256x8xf32>
    tpu.vector_store %arg8[%c0_21, %c0_22], %82 {strides = array<i32>} : memref<256x8xf32, #tpu.memory_space<vmem>>, vector<256x8xf32>,
    return
  }
  func.func @transform_0(%arg0: i32) -> (i32, i32) {
    %c0_i32 = arith.constant 0 : i32
    %c0_i32_0 = arith.constant 0 : i32
    return %arg0, %c0_i32 : i32, i32
  }
  func.func @transform_1(%arg0: i32) -> (i32, i32) {
    %c0_i32 = arith.constant 0 : i32
    %c0_i32_0 = arith.constant 0 : i32
    %c0_i32_1 = arith.constant 0 : i32
    return %c0_i32, %c0_i32_0 : i32, i32
  }
  func.func @transform_2(%arg0: i32) -> (i32, i32) {
    %c0_i32 = arith.constant 0 : i32
    %c0_i32_0 = arith.constant 0 : i32
    %c0_i32_1 = arith.constant 0 : i32
    return %c0_i32, %c0_i32_0 : i32, i32
  }
  func.func @transform_3(%arg0: i32) -> (i32, i32) {
    %c0_i32 = arith.constant 0 : i32
    %c0_i32_0 = arith.constant 0 : i32
    %c0_i32_1 = arith.constant 0 : i32
    return %c0_i32, %c0_i32_0 : i32, i32
  }
  func.func @transform_4(%arg0: i32) -> (i32, i32) {
    %c0_i32 = arith.constant 0 : i32
    %c0_i32_0 = arith.constant 0 : i32
    %c0_i32_1 = arith.constant 0 : i32
    return %c0_i32, %c0_i32_0 : i32, i32
  }
  func.func @transform_5(%arg0: i32) -> (i32, i32) {
    %c0_i32 = arith.constant 0 : i32
    %c0_i32_0 = arith.constant 0 : i32
    %c0_i32_1 = arith.constant 0 : i32
    return %c0_i32, %c0_i32_0 : i32, i32
  }
  func.func @transform_6(%arg0: i32) -> (i32, i32) {
    %c0_i32 = arith.constant 0 : i32
    %c0_i32_0 = arith.constant 0 : i32
    %c0_i32_1 = arith.constant 0 : i32
    return %c0_i32, %c0_i32_0 : i32, i32
  }
  func.func @transform_7(%arg0: i32) -> (i32, i32) {
    %c0_i32 = arith.constant 0 : i32
    %c0_i32_0 = arith.constant 0 : i32
    return %arg0, %c0_i32 : i32, i32
  }
}

</mosaic_0001>

<bundles_post_ra>
// kernel: conv_mixer_forward.1
= control target key start
LH: loop header
LB: loop body
LE: loop exit
PB: predicated region body
PF: predicated region fallthrough
CT: control target
= control target key end

     0   :  { %v9330_v1 = vmov 0   ;;  %v5107_v2 = vmov 64   ;;  %s5114_s20 = smov 64   ;;  %s5115_s21 = smov 96   ;;  %s9322_s1 = inlined_call_operand.vmem [shape: bf16[128,256], index: 1, kind: input, shape index: {}]   ;;  %s9323_s0 = inlined_call_operand.vmem [shape: f32[256,128], index: 0, kind: input, shape index: {}]   ;;  %s9324_s3 = inlined_call_operand.vmem [shape: bf16[256,128], index: 3, kind: input, shape index: {}]   ;;  %s9325_s2 = inlined_call_operand.vmem [shape: f32[1,256], index: 2, kind: input, shape index: {}]   ;;  %s9326_s5 = inlined_call_operand.vmem [shape: bf16[128,384], index: 5, kind: input, shape index: {}]   ;;  %s9327_s4 = inlined_call_operand.vmem [shape: f32[1,128], index: 4, kind: input, shape index: {}]   ;;  %s9328_s6 = inlined_call_operand.vmem [shape: f32[1,384], index: 6, kind: input, shape index: {}]   ;;  %s9329_s7 = inlined_call_operand.vmem [shape: f32[256,8], index: 7, kind: output, shape index: {}]  }
   0x1   :  { %v4905_v0 = vld [vmem:[%s9322_s1 + $0x4] ss:$8 sps:$4 sm:$0xff]   ;;  %215 = vmatprep.mubr.bf16.mxu0 %v9330_v1  ;;  %4888 = vset.pattern.permute.xlu1 %v5107_v2  ;;  %v4907_v3 = vld [vmem:[%s9322_s1] ss:$8 sps:$4 sm:$0xff]   ;;  %v4908_v4 = vld [vmem:[%s9322_s1 + $0x14] ss:$8 sps:$4 sm:$0xff]  }
   0x2   :  { %335 = vmatprep.mubr.bf16.mxu1 %v9330_v1  ;;  %4887 = vset.pattern.permute.xlu0 %v5107_v2  ;;  %v4910_v5 = vld [vmem:[%s9322_s1 + $0x10] ss:$8 sps:$4 sm:$0xff]   ;;  %v4911_v6 = vld [vmem:[%s9322_s1 + $0x24] ss:$8 sps:$4 sm:$0xff]   ;;  %v4913_v7 = vld [vmem:[%s9322_s1 + $0x20] ss:$8 sps:$4 sm:$0xff]  }
   0x3   :  { %183 = vmatprep.subr.bf16.mxu0 %v4905_v0  ;;  %4858 = vmatprep.subr.bf16.mxu1 %v4905_v0  ;;  %v4914_v8 = vld [vmem:[%s9322_s1 + $0x34] ss:$8 sps:$4 sm:$0xff]   ;;  %v4916_v9 = vld [vmem:[%s9322_s1 + $0x30] ss:$8 sps:$4 sm:$0xff]   ;;  %v4917_v10 = vld [vmem:[%s9322_s1 + $0x44] ss:$8 sps:$4 sm:$0xff]  }
   0x4   :  { %184 = vmatpush1.bf16.msra.mxu0 %v4907_v3  ;;  %4866 = vmatpush1.bf16.msra.mxu1 %v4907_v3  ;;  %v5191_v11 = vld [vmem:[%s9323_s0] sm:$0xff]  ;;  %v5196_v12 = vld [vmem:[%s9323_s0 + $0x10] sm:$0xff]  ;;  %v5209_v15 = vld [vmem:[%s9323_s0 + $0x8] sm:$0xff]  ;;  %s5116_s22 = smov 32  }
   0x5   :  { %185 = vmatprep.subr.bf16.mxu0 %v4908_v4  ;;  %4859 = vmatprep.subr.bf16.mxu1 %v4908_v4  ;;  %v4919_v13 = vld [vmem:[%s9322_s1 + $0x40] ss:$8 sps:$4 sm:$0xff]   ;;  %v4920_v14 = vld [vmem:[%s9322_s1 + $0x54] ss:$8 sps:$4 sm:$0xff]   ;;  %v4922_v17 = vld [vmem:[%s9322_s1 + $0x50] ss:$8 sps:$4 sm:$0xff]   ;;  %v59_v31 = vpack.c.bf16 %v5209_v15, %v5191_v11 }
   0x6   :  { %1455 = vperm.xlu1 %4888, %v5196_v12   ;;  %1445 = vperm.xlu0 %4887, %v5191_v11   ;;  %v5214_v16 = vld [vmem:[%s9323_s0 + $0x18] sm:$0xff]  ;;  %v4923_v18 = vld [vmem:[%s9322_s1 + $0x64] ss:$8 sps:$4 sm:$0xff]   ;;  %v4925_v21 = vld [vmem:[%s9322_s1 + $0x60] ss:$8 sps:$4 sm:$0xff]  }
   0x7   :  { %v5227_v19 = vld [vmem:[%s9323_s0 + $0x20] sm:$0xff]  ;;  %v5232_v20 = vld [vmem:[%s9323_s0 + $0x28] sm:$0xff]  ;;  %v4926_v22 = vld [vmem:[%s9322_s1 + $0x74] ss:$8 sps:$4 sm:$0xff]   ;;  %v60_v42 = vpack.c.bf16 %v5214_v16, %v5196_v12 }
   0x8   :  { %186 = vmatpush1.bf16.msra.mxu0 %v4910_v5  ;;  %4867 = vmatpush1.bf16.msra.mxu1 %v4910_v5  ;;  %v5245_v23 = vld [vmem:[%s9323_s0 + $0x30] sm:$0xff]  ;;  %v5250_v24 = vld [vmem:[%s9323_s0 + $0x38] sm:$0xff]  ;;  %v5260_v26 = vld [vmem:[%s9323_s0 + $0x40] sm:$0xff]  ;;  %v61_v53 = vpack.c.bf16 %v5232_v20, %v5227_v19 }
   0x9   :  { %187 = vmatprep.subr.bf16.mxu0 %v4911_v6  ;;  %4860 = vmatprep.subr.bf16.mxu1 %v4911_v6  ;;  %v4928_v25 = vld [vmem:[%s9322_s1 + $0x70] ss:$8 sps:$4 sm:$0xff]   ;;  %v5265_v27 = vld [vmem:[%s9323_s0 + $0x48] sm:$0xff]  ;;  %v5270_v28 = vld [vmem:[%s9323_s0 + $0xc0] sm:$0xff]  ;;  %v62_v0 = vpack.c.bf16 %v5250_v24, %v5245_v23 }
   0xa   :  { %1460 = vperm.xlu1 %4888, %v5214_v16   ;;  %1450 = vperm.xlu0 %4887, %v5209_v15   ;;  %v5275_v29 = vld [vmem:[%s9323_s0 + $0xc8] sm:$0xff]  ;;  %v4929_v30 = vld [vmem:[%s9324_s3 + $0x40] sm:$0xff]   ;;  %v5287_v32 = vld [vmem:[%s9323_s0 + $0x50] sm:$0xff] }
   0xb   :  { %v71_v33 = vpack.c.bf16 %v5275_v29, %v5270_v28  ;;  %v5294_v34 = vld [vmem:[%s9323_s0 + $0x58] sm:$0xff]  ;;  %v4930_v35 = vld [vmem:[%s9324_s3] sm:$0xff]   ;;  %v5303_v36 = vld [vmem:[%s9323_s0 + $0xd0] sm:$0xff] }
   0xc   :  { %188 = vmatpush1.bf16.msra.mxu0 %v4913_v7  ;;  %4868 = vmatpush1.bf16.msra.mxu1 %v4913_v7  ;;  %v5308_v37 = vld [vmem:[%s9323_s0 + $0xd8] sm:$0xff]  ;;  %v4931_v38 = vld [vmem:[%s9324_s3 + $0x48] sm:$0xff]   ;;  %v5317_v39 = vld [vmem:[%s9323_s0 + $0x60] sm:$0xff]  ;;  %v63_v7 = vpack.c.bf16 %v5265_v27, %v5260_v26 }
   0xd   :  { %189 = vmatprep.subr.bf16.mxu0 %v4914_v8  ;;  %4861 = vmatprep.subr.bf16.mxu1 %v4914_v8  ;;  %v5324_v40 = vld [vmem:[%s9323_s0 + $0x68] sm:$0xff]  ;;  %v72_v43 = vpack.c.bf16 %v5308_v37, %v5303_v36  ;;  %v5338_v44 = vld [vmem:[%s9323_s0 + $0x70] sm:$0xff]  ;;  %v5343_v45 = vld [vmem:[%s9323_s0 + $0x78] sm:$0xff]  ;;  %v64_v8 = vpack.c.bf16 %v5294_v34, %v5287_v32 }
   0xe   :  { %1470 = vperm.xlu1 %4888, %v5232_v20   ;;  %1465 = vperm.xlu0 %4887, %v5227_v19   ;;  %v4932_v41 = vld [vmem:[%s9324_s3 + $0x8] sm:$0xff]   ;;  %v4933_v46 = vld [vmem:[%s9324_s3 + $0x50] sm:$0xff]   ;;  %v5358_v48 = vld [vmem:[%s9323_s0 + $0xe0] sm:$0xff] }
   0xf   :  { %v4934_v47 = vld [vmem:[%s9324_s3 + $0x10] sm:$0xff]   ;;  %v5363_v49 = vld [vmem:[%s9323_s0 + $0xe8] sm:$0xff]  ;;  %v4935_v50 = vld [vmem:[%s9324_s3 + $0x58] sm:$0xff]  }
  0x10   :  { %190 = vmatpush1.bf16.msra.mxu0 %v4916_v9  ;;  %4869 = vmatpush1.bf16.msra.mxu1 %v4916_v9  ;;  %v5371_v51 = vld [vmem:[%s9323_s0 + $0x80] sm:$0xff]  ;;  %v5376_v52 = vld [vmem:[%s9323_s0 + $0x88] sm:$0xff]  ;;  %v73_v54 = vpack.c.bf16 %v5363_v49, %v5358_v48  ;;  %v5387_v55 = vld [vmem:[%s9323_s0 + $0x90] sm:$0xff]  ;;  %v5108_v9 = vmov 65  }
  0x11   :  { %191 = vmatprep.subr.bf16.mxu0 %v4917_v10  ;;  %4862 = vmatprep.subr.bf16.mxu1 %v4917_v10  ;;  %v5392_v56 = vld [vmem:[%s9323_s0 + $0x98] sm:$0xff]  ;;  %v4937_v58 = vld [vmem:[%s9324_s3 + $0x60] sm:$0xff]   ;;  %v5407_v59 = vld [vmem:[%s9323_s0 + $0xf0] sm:$0xff]  ;;  %v65_v10 = vpack.c.bf16 %v5324_v40, %v5317_v39 }
  0x12   :  { %1480 = vperm.xlu1 %4888, %v5250_v24   ;;  %1475 = vperm.xlu0 %4887, %v5245_v23   ;;  %v4936_v57 = vld [vmem:[%s9324_s3 + $0x18] sm:$0xff]   ;;  %v5417_v61 = vld [vmem:[%s9323_s0 + $0xa0] sm:$0xff]  ;;  %v5422_v62 = vld [vmem:[%s9323_s0 + $0xa8] sm:$0xff] }
  0x13   :  { %v5412_v60 = vld [vmem:[%s9323_s0 + $0xf8] sm:$0xff]  ;;  %v4938_v63 = vld [vmem:[%s9324_s3 + $0x20] sm:$0xff]   ;;  %v4939_v3 = vld [vmem:[%s9324_s3 + $0x68] sm:$0xff]  }
  0x14   :  { %192 = vmatpush1.bf16.msra.mxu0 %v4919_v13  ;;  %4870 = vmatpush1.bf16.msra.mxu1 %v4919_v13  ;;  %v74_v2 = vpack.c.bf16 %v5412_v60, %v5407_v59  ;;  %v5439_v4 = vld [vmem:[%s9323_s0 + $0xb0] sm:$0xff]  ;;  %v5444_v5 = vld [vmem:[%s9323_s0 + $0xb8] sm:$0xff]  ;;  %v4940_v6 = vld [vmem:[%s9324_s3 + $0x28] sm:$0xff]   ;;  %v66_v13 = vpack.c.bf16 %v5343_v45, %v5338_v44 }
  0x15   :  { %193 = vmatprep.subr.bf16.mxu0 %v4920_v14  ;;  %4863 = vmatprep.subr.bf16.mxu1 %v4920_v14  ;;  %v67_v14 = vpack.c.bf16 %v5376_v52, %v5371_v51 }
  0x16   :  { %1490 = vperm.xlu1 %4888, %v5265_v27   ;;  %1485 = vperm.xlu0 %4887, %v5260_v26  }
  0x18   :  { %194 = vmatpush1.bf16.msra.mxu0 %v4922_v17  ;;  %4871 = vmatpush1.bf16.msra.mxu1 %v4922_v17  ;;  %v68_v17 = vpack.c.bf16 %v5392_v56, %v5387_v55 }
  0x19   :  { %195 = vmatprep.subr.bf16.mxu0 %v4923_v18  ;;  %4864 = vmatprep.subr.bf16.mxu1 %v4923_v18  ;;  %v69_v18 = vpack.c.bf16 %v5422_v62, %v5417_v61 }
  0x1a   :  { %1500 = vperm.xlu1 %4888, %v5294_v34   ;;  %1495 = vperm.xlu0 %4887, %v5287_v32  }
  0x1c   :  { %196 = vmatpush1.bf16.msra.mxu0 %v4925_v21  ;;  %4872 = vmatpush1.bf16.msra.mxu1 %v4925_v21  ;;  %v70_v21 = vpack.c.bf16 %v5444_v5, %v5439_v4 }
  0x1d   :  { %197 = vmatprep.subr.bf16.mxu0 %v4926_v22  ;;  %4865 = vmatprep.subr.bf16.mxu1 %v4926_v22  ;;  %v4941_v22 = vld [vmem:[%s9324_s3 + $0x70] sm:$0xff]  }
  0x1e   :  { %1510 = vperm.xlu1 %4888, %v5324_v40   ;;  %1505 = vperm.xlu0 %4887, %v5317_v39  }
  0x20   :  { %198 = vmatpush1.bf16.msra.mxu0 %v4928_v25  ;;  %4873 = vmatpush1.bf16.msra.mxu1 %v4928_v25  ;;  %v4942_v25 = vld [vmem:[%s9324_s3 + $0x30] sm:$0xff]  }
  0x21   :  { %4674 = vmatprep.subr.bf16.mxu1 %v4929_v30  ;;  %v4943_v30 = vld [vmem:[%s9324_s3 + $0x78] sm:$0xff]  }
  0x22   :  { %1520 = vperm.xlu1 %4888, %v5343_v45   ;;  %1515 = vperm.xlu0 %4887, %v5338_v44  }
  0x23   :  { %216 = vmatmul.mubr.bf16.vlgmr.msra.gmra.mrb[0].mxu0 %v59_v31  ;;  %336 = vmatmul.mubr.bf16.vlgmr.msra.gmra.mrb[0].mxu1 %v71_v33  ;;  %v4944_v31 = vld [vmem:[%s9324_s3 + $0x38] sm:$0xff]  }
  0x24   :  { %225 = vmatprep.mubr.bf16.mxu0 %v9330_v1  ;;  %345 = vmatprep.mubr.bf16.mxu1 %v9330_v1 }
  0x25   :  { %4675 = vmatpush3.bf16.msra.mxu1 %v4930_v35  ;;  %v5109_v35 = vmov 66  }
  0x26   :  { %4676 = vmatprep.subr.bf16.mxu1 %v4931_v38  ;;  %1530 = vperm.xlu1 %4888, %v5376_v52  }
  0x27   :  { %1525 = vperm.xlu0 %4887, %v5371_v51  }
  0x29   :  { %4677 = vmatpush3.bf16.msra.mxu1 %v4932_v41 }
  0x2a   :  { %4678 = vmatprep.subr.bf16.mxu1 %v4933_v46  ;;  %1540 = vperm.xlu1 %4888, %v5392_v56  }
  0x2b   :  { %226 = vmatmul.mubr.bf16.gmra.mrb[4].mxu0 %v60_v42  ;;  %346 = vmatmul.mubr.bf16.gmra.mrb[4].mxu1 %v72_v43 }
  0x2c   :  { %235 = vmatprep.mubr.bf16.mxu0 %v9330_v1  ;;  %355 = vmatprep.mubr.bf16.mxu1 %v9330_v1 }
  0x2d   :  { %4679 = vmatpush3.bf16.msra.mxu1 %v4934_v47  ;;  %1535 = vperm.xlu0 %4887, %v5387_v55  }
  0x2e   :  { %4680 = vmatprep.subr.bf16.mxu1 %v4935_v50  ;;  %1550 = vperm.xlu1 %4888, %v5422_v62  }
  0x31   :  { %4681 = vmatpush3.bf16.msra.mxu1 %v4936_v57  ;;  %1545 = vperm.xlu0 %4887, %v5417_v61  }
  0x32   :  { %4682 = vmatprep.subr.bf16.mxu1 %v4937_v58  ;;  %1560 = vperm.xlu1 %4888, %v5444_v5  }
  0x33   :  { %236 = vmatmul.mubr.bf16.gmra.mrb[8].mxu0 %v61_v53  ;;  %356 = vmatmul.mubr.bf16.gmra.mrb[8].mxu1 %v73_v54 }
  0x34   :  { %245 = vmatprep.mubr.bf16.mxu0 %v9330_v1  ;;  %365 = vmatprep.mubr.bf16.mxu1 %v9330_v1 }
  0x35   :  { %4683 = vmatpush3.bf16.msra.mxu1 %v4938_v63  ;;  %1555 = vperm.xlu0 %4887, %v5439_v4  }
  0x36   :  { %4684 = vmatprep.subr.bf16.mxu1 %v4939_v3  ;;  %1570 = vperm.xlu1 %4888, %v5275_v29  }
  0x39   :  { %4685 = vmatpush3.bf16.msra.mxu1 %v4940_v6  ;;  %1565 = vperm.xlu0 %4887, %v5270_v28  }
  0x3a   :  { %1580 = vperm.xlu1 %4888, %v5308_v37   ;;  %4686 = vmatprep.subr.bf16.mxu1 %v4941_v22 }
  0x3b   :  { %246 = vmatmul.mubr.bf16.gmra.mrb[12].mxu0 %v62_v0  ;;  %366 = vmatmul.mubr.bf16.gmra.mrb[12].mxu1 %v74_v2 }
  0x3c   :  { %255 = vmatprep.mubr.bf16.mxu0 %v9330_v1 }
  0x3d   :  { %1575 = vperm.xlu0 %4887, %v5303_v36   ;;  %4687 = vmatpush3.bf16.msra.mxu1 %v4942_v25 }
  0x3e   :  { %1590 = vperm.xlu1 %4888, %v5363_v49   ;;  %4688 = vmatprep.subr.bf16.mxu1 %v4943_v30 }
  0x41   :  { %1585 = vperm.xlu0 %4887, %v5358_v48   ;;  %4689 = vmatpush3.bf16.msra.mxu1 %v4944_v31 }
  0x42   :  { %1600 = vperm.xlu1 %4888, %v5412_v60  }
  0x43   :  { %256 = vmatmul.mubr.bf16.gmra.mrb[16].mxu0 %v63_v7 }
  0x44   :  { %265 = vmatprep.mubr.bf16.mxu0 %v9330_v1 }
  0x45   :  { %1595 = vperm.xlu0 %4887, %v5407_v59  }
  0x46   :  { %4890 = vset.pattern.permute.xlu1 %v5108_v9 }
  0x47   :  { %1800 = vperm.xlu1 %4890, %v5209_v15  }
  0x49   :  { %4889 = vset.pattern.permute.xlu0 %v5108_v9 }
  0x4a   :  { %1796 = vperm.xlu0 %4889, %v5191_v11  }
  0x4b   :  { %266 = vmatmul.mubr.bf16.gmra.mrb[20].mxu0 %v64_v8  ;;  %1804 = vperm.xlu1 %4890, %v5196_v12  }
  0x4c   :  { %275 = vmatprep.mubr.bf16.mxu0 %v9330_v1 }
  0x4e   :  { %1808 = vperm.xlu0 %4889, %v5214_v16  }
  0x4f   :  { %1812 = vperm.xlu1 %4890, %v5227_v19  }
  0x52   :  { %1816 = vperm.xlu0 %4889, %v5232_v20  }
  0x53   :  { %276 = vmatmul.mubr.bf16.gmra.mrb[24].mxu0 %v65_v10  ;;  %1820 = vperm.xlu1 %4890, %v5245_v23  }
  0x54   :  { %285 = vmatprep.mubr.bf16.mxu0 %v9330_v1 }
  0x56   :  { %1824 = vperm.xlu0 %4889, %v5250_v24  }
  0x57   :  { %1828 = vperm.xlu1 %4890, %v5260_v26  }
  0x5a   :  { %1832 = vperm.xlu0 %4889, %v5265_v27  }
  0x5b   :  { %286 = vmatmul.mubr.bf16.gmra.mrb[28].mxu0 %v66_v13  ;;  %1836 = vperm.xlu1 %4890, %v5287_v32  }
  0x5c   :  { %295 = vmatprep.mubr.bf16.mxu0 %v9330_v1 }
  0x5e   :  { %1840 = vperm.xlu0 %4889, %v5294_v34  }
  0x5f   :  { %1844 = vperm.xlu1 %4890, %v5317_v39  }
  0x62   :  { %1848 = vperm.xlu0 %4889, %v5324_v40  }
  0x63   :  { %296 = vmatmul.mubr.bf16.gmra.mrb[32].mxu0 %v67_v14  ;;  %1852 = vperm.xlu1 %4890, %v5338_v44  }
  0x64   :  { %305 = vmatprep.mubr.bf16.mxu0 %v9330_v1 }
  0x66   :  { %1856 = vperm.xlu0 %4889, %v5343_v45  }
  0x67   :  { %1860 = vperm.xlu1 %4890, %v5371_v51  }
  0x6a   :  { %1864 = vperm.xlu0 %4889, %v5376_v52  }
  0x6b   :  { %306 = vmatmul.mubr.bf16.gmra.mrb[36].mxu0 %v68_v17  ;;  %1868 = vperm.xlu1 %4890, %v5387_v55  }
  0x6c   :  { %315 = vmatprep.mubr.bf16.mxu0 %v9330_v1 }
  0x6e   :  { %1872 = vperm.xlu0 %4889, %v5392_v56  }
  0x6f   :  { %1876 = vperm.xlu1 %4890, %v5417_v61  }
  0x72   :  { %1880 = vperm.xlu0 %4889, %v5422_v62  }
  0x73   :  { %316 = vmatmul.mubr.bf16.gmra.mrb[40].mxu0 %v69_v18  ;;  %1884 = vperm.xlu1 %4890, %v5439_v4  }
  0x74   :  { %325 = vmatprep.mubr.bf16.mxu0 %v9330_v1 }
  0x76   :  { %1888 = vperm.xlu0 %4889, %v5444_v5  }
  0x77   :  { %1892 = vperm.xlu1 %4890, %v5270_v28  }
  0x7a   :  { %1896 = vperm.xlu0 %4889, %v5275_v29  }
  0x7b   :  { %326 = vmatmul.mubr.bf16.gmra.mrb[44].mxu0 %v70_v21  ;;  %1900 = vperm.xlu1 %4890, %v5303_v36  }
  0x7c   :  { %1025 = vmatprep.mubr.bf16.mxu0 %v9330_v1 }
  0x7e   :  { %1904 = vperm.xlu0 %4889, %v5308_v37  }
  0x7f   :  { %1908 = vperm.xlu1 %4890, %v5358_v48  }
  0x82   :  { %1912 = vperm.xlu0 %4889, %v5363_v49  }
  0x83   :  { %1916 = vperm.xlu1 %4890, %v5407_v59  }
  0x85   :  { %v5528_v33 = vpop.permute.xlu1 %1455  ;;  %v5533_v41 = vpop.permute.xlu0 %1445 }
  0x86   :  { %1920 = vperm.xlu0 %4889, %v5412_v60  }
  0x87   :  { %4891 = vset.pattern.permute.xlu1 %v5109_v35 }
  0x88   :  { %2116 = vperm.xlu1 %4891, %v5191_v11  }
  0x89   :  { %v5531_v38 = vpop.permute.xlu1 %1460  ;;  %v5539_v43 = vpop.permute.xlu0 %1450 }
  0x8a   :  { %4892 = vset.pattern.permute.xlu0 %v5109_v35  ;;  %9446 = vst [vmem:[#allocation2_spill] sm:$0xff] %v5531_v38 }
  0x8b   :  { %2120 = vperm.xlu0 %4892, %v5209_v15  }
  0x8c   :  { %2124 = vperm.xlu1 %4891, %v5196_v12  }
  0x8d   :  { %v5537_v42 = vpop.permute.xlu1 %1470  ;;  %v5545_v47 = vpop.permute.xlu0 %1465 }
  0x8e   :  { %9447 = vst [vmem:[#allocation3_spill] sm:$0xff] %v5537_v42  ;;  %9449 = vst [vmem:[#allocation5_spill] sm:$0xff] %v5545_v47  ;;  %v6036_v42 = vld [vmem:[%s9323_s0 + $0xa8] sm:$0xff] }
  0x8f   :  { %2132 = vperm.xlu0 %4892, %v5227_v19  }
  0x90   :  { %2128 = vperm.xlu1 %4891, %v5214_v16  }
  0x91   :  { %v5543_v46 = vpop.permute.xlu1 %1480  ;;  %v5551_v53 = vpop.permute.xlu0 %1475 }
  0x92   :  { %9448 = vst [vmem:[#allocation4_spill] sm:$0xff] %v5543_v46  ;;  %9451 = vst [vmem:[#allocation7_spill] sm:$0xff] %v5551_v53  ;;  %v6000_v46 = vld [vmem:[%s9323_s0 + $0x88] sm:$0xff] }
  0x93   :  { %2140 = vperm.xlu0 %4892, %v5245_v23  }
  0x94   :  { %2136 = vperm.xlu1 %4891, %v5232_v20  }
  0x95   :  { %v5549_v50 = vpop.permute.xlu1 %1490  ;;  %v5557_v57 = vpop.permute.xlu0 %1485 }
  0x96   :  { %9450 = vst [vmem:[#allocation6_spill] sm:$0xff] %v5549_v50  ;;  %9453 = vst [vmem:[#allocation9_spill] sm:$0xff] %v5557_v57  ;;  %v5968_v57 = vld [vmem:[%s9323_s0 + $0x68] sm:$0xff] }
  0x97   :  { %2148 = vperm.xlu0 %4892, %v5260_v26  }
  0x98   :  { %2144 = vperm.xlu1 %4891, %v5250_v24  }
  0x99   :  { %v5555_v54 = vpop.permute.xlu1 %1500  ;;  %v5563_v63 = vpop.permute.xlu0 %1495 }
  0x9a   :  { %9452 = vst [vmem:[#allocation8_spill] sm:$0xff] %v5555_v54  ;;  %9455 = vst [vmem:[#allocation11_spill] sm:$0xff] %v5563_v63 }
  0x9b   :  { %2156 = vperm.xlu0 %4892, %v5287_v32  }
  0x9c   :  { %2152 = vperm.xlu1 %4891, %v5265_v27  }
  0x9d   :  { %v5561_v58 = vpop.permute.xlu1 %1510  ;;  %v5569_v2 = vpop.permute.xlu0 %1505 }
  0x9e   :  { %9454 = vst [vmem:[#allocation10_spill] sm:$0xff] %v5561_v58  ;;  %9457 = vst [vmem:[#allocation13_spill] sm:$0xff] %v5569_v2 }
  0x9f   :  { %2164 = vperm.xlu0 %4892, %v5317_v39  }
  0xa0   :  { %2160 = vperm.xlu1 %4891, %v5294_v34  }
  0xa1   :  { %v5567_v0 = vpop.permute.xlu1 %1520  ;;  %v5575_v6 = vpop.permute.xlu0 %1515 }
  0xa2   :  { %9456 = vst [vmem:[#allocation12_spill] sm:$0xff] %v5567_v0  ;;  %9459 = vst [vmem:[#allocation15_spill] sm:$0xff] %v5575_v6 }
  0xa3   :  { %2172 = vperm.xlu0 %4892, %v5338_v44  }
  0xa4   :  { %2168 = vperm.xlu1 %4891, %v5324_v40  }
  0xa5   :  { %v5573_v3 = vpop.permute.xlu1 %1530 }
  0xa6   :  { %9458 = vst [vmem:[#allocation14_spill] sm:$0xff] %v5573_v3  ;;  %v5581_v8 = vpop.permute.xlu0 %1525 }
  0xa7   :  { %2180 = vperm.xlu0 %4892, %v5371_v51   ;;  %9461 = vst [vmem:[#allocation17_spill] sm:$0xff] %v5581_v8 }
  0xa8   :  { %2176 = vperm.xlu1 %4891, %v5343_v45  }
  0xa9   :  { %v5579_v7 = vpop.permute.xlu1 %1540 }
  0xaa   :  { %9460 = vst [vmem:[#allocation16_spill] sm:$0xff] %v5579_v7 }
  0xab   :  { %2188 = vperm.xlu0 %4892, %v5387_v55  }
  0xac   :  { %2184 = vperm.xlu1 %4891, %v5376_v52   ;;  %v5587_v10 = vpop.permute.xlu0 %1535 }
  0xad   :  { %v5585_v9 = vpop.permute.xlu1 %1550  ;;  %9463 = vst [vmem:[#allocation19_spill] sm:$0xff] %v5587_v10 }
  0xae   :  { %9462 = vst [vmem:[#allocation18_spill] sm:$0xff] %v5585_v9 }
  0xaf   :  { %2196 = vperm.xlu0 %4892, %v5417_v61  }
  0xb0   :  { %2192 = vperm.xlu1 %4891, %v5392_v56   ;;  %v5593_v14 = vpop.permute.xlu0 %1545 }
  0xb1   :  { %v5591_v13 = vpop.permute.xlu1 %1560  ;;  %9465 = vst [vmem:[#allocation21_spill] sm:$0xff] %v5593_v14 }
  0xb2   :  { %9464 = vst [vmem:[#allocation20_spill] sm:$0xff] %v5591_v13 }
  0xb3   :  { %2204 = vperm.xlu0 %4892, %v5439_v4  }
  0xb4   :  { %2200 = vperm.xlu1 %4891, %v5422_v62   ;;  %v5599_v18 = vpop.permute.xlu0 %1555 }
  0xb5   :  { %v5597_v17 = vpop.permute.xlu1 %1570  ;;  %9467 = vst [vmem:[#allocation23_spill] sm:$0xff] %v5599_v18 }
  0xb6   :  { %9466 = vst [vmem:[#allocation22_spill] sm:$0xff] %v5597_v17 }
  0xb7   :  { %2212 = vperm.xlu0 %4892, %v5270_v28  }
  0xb8   :  { %2208 = vperm.xlu1 %4891, %v5444_v5   ;;  %v5605_v22 = vpop.permute.xlu0 %1565 }
  0xb9   :  { %v5603_v21 = vpop.permute.xlu1 %1580  ;;  %9469 = vst [vmem:[#allocation25_spill] sm:$0xff] %v5605_v22 }
  0xba   :  { %9468 = vst [vmem:[#allocation24_spill] sm:$0xff] %v5603_v21  ;;  %v5110_v21 = vmov 67  }
  0xbb   :  { %2220 = vperm.xlu0 %4892, %v5303_v36  }
  0xbc   :  { %2216 = vperm.xlu1 %4891, %v5275_v29   ;;  %v5611_v30 = vpop.permute.xlu0 %1575 }
  0xbd   :  { %v5609_v25 = vpop.permute.xlu1 %1590  ;;  %9471 = vst [vmem:[#allocation27_spill] sm:$0xff] %v5611_v30 }
  0xbe   :  { %9470 = vst [vmem:[#allocation26_spill] sm:$0xff] %v5609_v25 }
  0xbf   :  { %2228 = vperm.xlu0 %4892, %v5358_v48  }
  0xc0   :  { %2224 = vperm.xlu1 %4891, %v5308_v37   ;;  %v5617_v35 = vpop.permute.xlu0 %1585 }
  0xc1   :  { %v5615_v31 = vpop.permute.xlu1 %1600  ;;  %9473 = vst [vmem:[#allocation29_spill] sm:$0xff] %v5617_v35 }
  0xc2   :  { %9472 = vst [vmem:[#allocation28_spill] sm:$0xff] %v5615_v31 }
  0xc3   :  { %2236 = vperm.xlu0 %4892, %v5407_v59  }
  0xc4   :  { %2232 = vperm.xlu1 %4891, %v5363_v49   ;;  %v5621_v1 = vpop.permute.xlu0 %1595 }
  0xc5   :  { %9474 = vst [vmem:[#allocation30_spill] sm:$0xff] %v5621_v1 }
  0xc6   :  { %v5623_v17 = vpop.permute.xlu1 %1800 }
  0xc7   :  { %4893 = vset.pattern.permute.xlu0 %v5110_v21 }
  0xc8   :  { %2436 = vperm.xlu0 %4893, %v5191_v11   ;;  %2240 = vperm.xlu1 %4891, %v5412_v60  }
  0xc9   :  { %v5629_v30 = vpop.permute.xlu0 %1796 }
  0xca   :  { %v5627_v25 = vpop.permute.xlu1 %1804 }
  0xcc   :  { %2448 = vperm.xlu0 %4893, %v5214_v16   ;;  %4894 = vset.pattern.permute.xlu1 %v5110_v21 }
  0xcd   :  { %2440 = vperm.xlu1 %4894, %v5209_v15   ;;  %v5635_v1 = vpop.permute.xlu0 %1808 }
  0xce   :  { %v5633_v31 = vpop.permute.xlu1 %1812  ;;  %9476 = vst [vmem:[#allocation32_spill] sm:$0xff] %v5635_v1  ;;  %v5112_v1 = vmov 69  }
  0xcf   :  { %9475 = vst [vmem:[#allocation31_spill] sm:$0xff] %v5633_v31  ;;  %v6068_v31 = vld [vmem:[%s9323_s0 + $0xc8] sm:$0xff] }
  0xd0   :  { %2456 = vperm.xlu0 %4893, %v5232_v20  }
  0xd1   :  { %2444 = vperm.xlu1 %4894, %v5196_v12   ;;  %v5641_v35 = vpop.permute.xlu0 %1816 }
  0xd2   :  { %v5639_v11 = vpop.permute.xlu1 %1820  ;;  %9478 = vst [vmem:[#allocation34_spill] sm:$0xff] %v5641_v35 }
  0xd3   :  { %9477 = vst [vmem:[#allocation33_spill] sm:$0xff] %v5639_v11  ;;  %v6023_v11 = vld [vmem:[%s9323_s0 + $0xd0] sm:$0xff] }
  0xd4   :  { %2464 = vperm.xlu0 %4893, %v5250_v24  }
  0xd5   :  { %2452 = vperm.xlu1 %4894, %v5227_v19   ;;  %v5647_v21 = vpop.permute.xlu0 %1824  ;;  %v93_v19 = vlaneseq }
  0xd6   :  { %v5645_v16 = vpop.permute.xlu1 %1828  ;;  %9480 = vst [vmem:[#allocation36_spill] sm:$0xff] %v5647_v21  ;;  %v5984_v21 = vld [vmem:[%s9323_s0 + $0x78] sm:$0xff] }
  0xd7   :  { %9479 = vst [vmem:[#allocation35_spill] sm:$0xff] %v5645_v16  ;;  %v5668_v22 = vshrl.u32 %v93_v19, 7 }
  0xd8   :  { %2472 = vperm.xlu0 %4893, %v5265_v27  }
  0xd9   :  { %2460 = vperm.xlu1 %4894, %v5245_v23   ;;  %v5653_v20 = vpop.permute.xlu0 %1832  ;;  %9487 = vst [vmem:[#allocation43_spill] sm:$0xff] %v5668_v22  ;;  %v9333_v13 = vsub.s32 1, %v5668_v22 }
  0xda   :  { %v5651_v15 = vpop.permute.xlu1 %1836  ;;  %9482 = vst [vmem:[#allocation38_spill] sm:$0xff] %v5653_v20 }
  0xdb   :  { %9481 = vst [vmem:[#allocation37_spill] sm:$0xff] %v5651_v15  ;;  %v5957_v15 = vld [vmem:[%s9323_s0 + $0x90] sm:$0xff] }
  0xdc   :  { %2480 = vperm.xlu0 %4893, %v5294_v34  }
  0xdd   :  { %2468 = vperm.xlu1 %4894, %v5260_v26   ;;  %v5659_v24 = vpop.permute.xlu0 %1840  ;;  %v9332_v26 = vsub.s32 0, %v5668_v22 }
  0xde   :  { %v5657_v12 = vpop.permute.xlu1 %1844  ;;  %9484 = vst [vmem:[#allocation40_spill] sm:$0xff] %v5659_v24  ;;  %v5936_v24 = vld [vmem:[%s9323_s0 + $0x48] sm:$0xff] }
  0xdf   :  { %9483 = vst [vmem:[#allocation39_spill] sm:$0xff] %v5657_v12 }
  0xe0   :  { %2488 = vperm.xlu0 %4893, %v5324_v40  }
  0xe1   :  { %2476 = vperm.xlu1 %4894, %v5287_v32   ;;  %v5665_v23 = vpop.permute.xlu0 %1848  ;;  %v91_v32 = vld [vmem:[%s9325_s2] sm:$0x3] }
  0xe2   :  { %v5663_v27 = vpop.permute.xlu1 %1852  ;;  %9486 = vst [vmem:[#allocation42_spill] sm:$0xff] %v5665_v23  ;;  %v5923_v23 = vld [vmem:[%s9323_s0 + $0x70] sm:$0xff] }
  0xe3   :  { %9485 = vst [vmem:[#allocation41_spill] sm:$0xff] %v5663_v27 }
  0xe4   :  { %2496 = vperm.xlu0 %4893, %v5343_v45   ;;  %v5689_v45 = vrot.slane %v91_v32, %v9333_v13 }
  0xe5   :  { %2484 = vperm.xlu1 %4894, %v5317_v39   ;;  %v5675_v40 = vpop.permute.xlu0 %1856  ;;  %v5685_v39 = vrot.slane %v91_v32, %v9332_v26 }
  0xe6   :  { %v5673_v34 = vpop.permute.xlu1 %1860  ;;  %9489 = vst [vmem:[#allocation45_spill] sm:$0xff] %v5675_v40 }
  0xe7   :  { %9488 = vst [vmem:[#allocation44_spill] sm:$0xff] %v5673_v34 }
  0xe8   :  { %2504 = vperm.xlu0 %4893, %v5376_v52  }
  0xe9   :  { %2492 = vperm.xlu1 %4894, %v5338_v44   ;;  %v5694_v19 = vpop.permute.xlu0 %1864 }
  0xea   :  { %v5691_v52 = vpop.permute.xlu1 %1868  ;;  %9491 = vst [vmem:[#allocation47_spill] sm:$0xff] %v5694_v19 }
  0xeb   :  { %9490 = vst [vmem:[#allocation46_spill] sm:$0xff] %v5691_v52 }
  0xec   :  { %2512 = vperm.xlu0 %4893, %v5392_v56  }
  0xed   :  { %2500 = vperm.xlu1 %4894, %v5371_v51  }
  0xf0   :  { %2520 = vperm.xlu0 %4893, %v5422_v62  }
  0xf1   :  { %2508 = vperm.xlu1 %4894, %v5387_v55  }
  0xf4   :  { %2528 = vperm.xlu0 %4893, %v5444_v5   ;;  %v5718_v5 = vpop.permute.xlu0 %1872 }
  0xf5   :  { %2516 = vperm.xlu1 %4894, %v5417_v61   ;;  %9493 = vst [vmem:[#allocation49_spill] sm:$0xff] %v5718_v5 }
  0xf6   :  { %v217_v18 = vpop.f32.mrb[0].mxu0  ;;  %v337_v9 = vpop.f32.mrb[0].mxu1 }
  0xf7   :  { %v218_v44 = vadd.f32 %v217_v18, %v5685_v39  ;;  %v219_v56 = vpop.f32.mrb[1].mxu0  ;;  %v338_v26 = vadd.f32 %v337_v9, %v5685_v39  ;;  %v339_v14 = vpop.f32.mrb[1].mxu1 }
  0xf8   :  { %v220_v7 = vadd.f32 %v219_v56, %v5689_v45  ;;  %v221_v32 = vpop.f32.mrb[2].mxu0  ;;  %v340_v13 = vadd.f32 %v339_v14, %v5689_v45  ;;  %v341_v10 = vpop.f32.mrb[2].mxu1  ;;  %v4945_v14 = vld [vmem:[%s9326_s5] ss:$12 sps:$4 sm:$0xff]   ;;  %2536 = vperm.xlu0 %4893, %v5275_v29  }
  0xf9   :  { %v222_v51 = vadd.f32 %v221_v32, %v5685_v39  ;;  %v223_v52 = vpop.f32.mrb[3].mxu0  ;;  %v424_v19 = vmax.f32 %v338_v26, 0.0  ;;  %v342_v3 = vadd.f32 %v341_v10, %v5685_v39  ;;  %v343_v8 = vpop.f32.mrb[3].mxu1  ;;  %v376_v56 = vmax.f32 %v218_v44, 0.0  ;;  %v4947_v10 = vld [vmem:[%s9326_s5 + $0x4] ss:$12 sps:$4 sm:$0xff]   ;;  %2524 = vperm.xlu1 %4894, %v5439_v4  }
  0xfa   :  { %v224_v62 = vadd.f32 %v223_v52, %v5689_v45  ;;  %v425_v18 = vmax.f32 %v340_v13, 0.0  ;;  %v344_v9 = vadd.f32 %v343_v8, %v5689_v45  ;;  %v377_v26 = vmax.f32 %v220_v7, 0.0  ;;  %v5713_v52 = vpop.permute.xlu1 %1876  ;;  %993 = vmatprep.subr.bf16.mxu0 %v4947_v10  ;;  %v4956_v4 = vld [vmem:[%s9326_s5 + $0x4c] ss:$12 sps:$4 sm:$0xff]  }
  0xfb   :  { %v378_v32 = vmax.f32 %v222_v51, 0.0  ;;  %v426_v34 = vmax.f32 %v342_v3, 0.0  ;;  %9492 = vst [vmem:[#allocation48_spill] sm:$0xff] %v5713_v52  ;;  %v4950_v3 = vld [vmem:[%s9326_s5 + $0x1c] ss:$12 sps:$4 sm:$0xff]   ;;  %994 = vmatpush1.bf16.msra.mxu0 %v4945_v14 }
  0xfc   :  { %v379_v55 = vmax.f32 %v224_v62, 0.0  ;;  %v427_v40 = vmax.f32 %v344_v9, 0.0  ;;  %995 = vmatprep.subr.bf16.mxu0 %v4950_v3  ;;  %2544 = vperm.xlu0 %4893, %v5308_v37  }
  0xfd   :  { %v440_v13 = vpack.c.bf16 %v378_v32, %v376_v56  ;;  %v5715_v8 = vpack.c.bf16 %v426_v34, %v424_v19  ;;  %v4948_v34 = vld [vmem:[%s9326_s5 + $0x18] ss:$12 sps:$4 sm:$0xff]   ;;  %2532 = vperm.xlu1 %4894, %v5270_v28  }
  0xfe   :  { %v441_v44 = vpack.c.bf16 %v379_v55, %v377_v26  ;;  %v227_v51 = vpop.f32.mrb[4].mxu0  ;;  %v5723_v0 = vpack.c.bf16 %v427_v40, %v425_v18  ;;  %v347_v7 = vpop.f32.mrb[4].mxu1  ;;  %v4953_v40 = vld [vmem:[%s9326_s5 + $0x34] ss:$12 sps:$4 sm:$0xff]  }
  0xff   :  { %v228_v61 = vadd.f32 %v227_v51, %v5685_v39  ;;  %v229_v19 = vpop.f32.mrb[5].mxu0  ;;  %v348_v62 = vadd.f32 %v347_v7, %v5685_v39  ;;  %v349_v9 = vpop.f32.mrb[5].mxu1  ;;  %996 = vmatpush1.bf16.msra.mxu0 %v4948_v34 }
 0x100   :  { %v230_v18 = vadd.f32 %v229_v19, %v5689_v45  ;;  %v231_v14 = vpop.f32.mrb[6].mxu0  ;;  %639 = vmatprep.mubr.bf16.mxu1 %v441_v44  ;;  %v350_v29 = vadd.f32 %v349_v9, %v5689_v45  ;;  %v351_v56 = vpop.f32.mrb[6].mxu1  ;;  %997 = vmatprep.subr.bf16.mxu0 %v4953_v40  ;;  %v4959_v40 = vld [vmem:[%s9326_s5 + $0x64] ss:$12 sps:$4 sm:$0xff]  }
 0x101   :  { %v380_v32 = vmax.f32 %v228_v61, 0.0  ;;  %v232_v10 = vadd.f32 %v231_v14, %v5685_v39  ;;  %v233_v26 = vpop.f32.mrb[7].mxu0  ;;  %640 = vmatmul.mubr.bf16.vlgmr.msra.gmra.mrb[16].mxu1 %v440_v13  ;;  %v428_v55 = vmax.f32 %v348_v62, 0.0  ;;  %v352_v51 = vadd.f32 %v351_v56, %v5685_v39  ;;  %v353_v3 = vpop.f32.mrb[7].mxu1  ;;  %v4951_v13 = vld [vmem:[%s9326_s5 + $0x30] ss:$12 sps:$4 sm:$0xff]   ;;  %2552 = vperm.xlu0 %4893, %v5363_v49  }
 0x102   :  { %v381_v7 = vmax.f32 %v230_v18, 0.0  ;;  %v234_v52 = vadd.f32 %v233_v26, %v5689_v45  ;;  %v429_v19 = vmax.f32 %v350_v29, 0.0  ;;  %v354_v44 = vadd.f32 %v353_v3, %v5689_v45  ;;  %v5741_v5 = vpop.permute.xlu1 %1884  ;;  %v4954_v14 = vld [vmem:[%s9326_s5 + $0x48] ss:$12 sps:$4 sm:$0xff]   ;;  %v5756_v34 = vpop.permute.xlu0 %1880  ;;  %2540 = vperm.xlu1 %4894, %v5303_v36  }
 0x103   :  { %9494 = vst [vmem:[#allocation50_spill] sm:$0xff] %v5741_v5  ;;  %v382_v61 = vmax.f32 %v232_v10, 0.0  ;;  %v430_v62 = vmax.f32 %v352_v51, 0.0  ;;  %9495 = vst [vmem:[#allocation51_spill] sm:$0xff] %v5756_v34  ;;  %998 = vmatpush1.bf16.msra.mxu0 %v4951_v13  ;;  %v4957_v13 = vld [vmem:[%s9326_s5 + $0x60] ss:$12 sps:$4 sm:$0xff]  }
 0x104   :  { %v383_v9 = vmax.f32 %v234_v52, 0.0  ;;  %v431_v18 = vmax.f32 %v354_v44, 0.0  ;;  %v4966_v52 = vld [vmem:[%s9326_s5 + $0x8] ss:$12 sps:$4 sm:$0xff]   ;;  %999 = vmatprep.subr.bf16.mxu0 %v4956_v4  ;;  %v4967_v44 = vld [vmem:[%s9326_s5 + $0x20] ss:$12 sps:$4 sm:$0xff]  }
 0x105   :  { %v442_v29 = vpack.c.bf16 %v382_v61, %v380_v32  ;;  %v5753_v37 = vpack.c.bf16 %v430_v62, %v428_v55  ;;  %4810 = vmatprep.subr.bf16.mxu1 %v4966_v52  ;;  %2560 = vperm.xlu0 %4893, %v5412_v60  }
 0x106   :  { %v443_v56 = vpack.c.bf16 %v383_v9, %v381_v7  ;;  %v237_v10 = vpop.f32.mrb[8].mxu0  ;;  %v5764_v26 = vpack.c.bf16 %v431_v18, %v429_v19  ;;  %v357_v51 = vpop.f32.mrb[8].mxu1  ;;  %4811 = vmatpush3.bf16.msra.mxu1 %v4966_v52  ;;  %2548 = vperm.xlu1 %4894, %v5358_v48  }
 0x107   :  { %v238_v28 = vadd.f32 %v237_v10, %v5685_v39  ;;  %v239_v32 = vpop.f32.mrb[9].mxu0  ;;  %v358_v55 = vadd.f32 %v357_v51, %v5685_v39  ;;  %v359_v3 = vpop.f32.mrb[9].mxu1  ;;  %1000 = vmatpush1.bf16.msra.mxu0 %v4954_v14  ;;  %4812 = vmatprep.subr.bf16.mxu1 %v4967_v44  ;;  %v4965_v14 = vld [vmem:[%s9326_s5 + $0x94] ss:$12 sps:$4 sm:$0xff]  }
 0x108   :  { %v240_v7 = vadd.f32 %v239_v32, %v5689_v45  ;;  %v241_v19 = vpop.f32.mrb[10].mxu0  ;;  %647 = vmatprep.mubr.bf16.mxu1 %v443_v56  ;;  %v360_v61 = vadd.f32 %v359_v3, %v5689_v45  ;;  %v5774_v49 = vpop.permute.xlu1 %1892  ;;  %v4962_v56 = vld [vmem:[%s9326_s5 + $0x7c] ss:$12 sps:$4 sm:$0xff]   ;;  %1001 = vmatprep.subr.bf16.mxu0 %v4959_v40 }
 0x109   :  { %9496 = vst [vmem:[#allocation52_spill] sm:$0xff] %v5774_v49  ;;  %v384_v62 = vmax.f32 %v238_v28, 0.0  ;;  %v242_v4 = vadd.f32 %v241_v19, %v5685_v39  ;;  %v243_v9 = vpop.f32.mrb[11].mxu0  ;;  %648 = vmatmul.mubr.bf16.gmra.mrb[20].mxu1 %v442_v29  ;;  %v361_v18 = vpop.f32.mrb[10].mxu1  ;;  %v432_v32 = vmax.f32 %v358_v55, 0.0 }
 0x10a   :  { %v385_v10 = vmax.f32 %v240_v7, 0.0  ;;  %v244_v51 = vadd.f32 %v243_v9, %v5689_v45  ;;  %v362_v3 = vadd.f32 %v361_v18, %v5685_v39  ;;  %v363_v49 = vpop.f32.mrb[11].mxu1  ;;  %v433_v28 = vmax.f32 %v360_v61, 0.0  ;;  %v5790_v7 = vpop.permute.xlu0 %1888  ;;  %v4960_v55 = vld [vmem:[%s9326_s5 + $0x78] ss:$12 sps:$4 sm:$0xff]   ;;  %4813 = vmatpush3.bf16.msra.mxu1 %v4967_v44  ;;  %2556 = vperm.xlu1 %4894, %v5407_v59  }
 0x10b   :  { %v386_v52 = vmax.f32 %v242_v4, 0.0  ;;  %v364_v29 = vadd.f32 %v363_v49, %v5689_v45  ;;  %9498 = vst [vmem:[#allocation54_spill] sm:$0xff] %v5790_v7  ;;  %v5111_v18 = vmov 68   ;;  %1002 = vmatpush1.bf16.msra.mxu0 %v4957_v13  ;;  %v5828_v59 = vld [vmem:[%s9323_s0 + $0x20] sm:$0xff] }
 0x10c   :  { %v387_v36 = vmax.f32 %v244_v51, 0.0  ;;  %v434_v19 = vmax.f32 %v362_v3, 0.0  ;;  %v5788_v5 = vpop.permute.xlu1 %1900  ;;  %4896 = vset.pattern.permute.xlu0 %v5111_v18  ;;  %1003 = vmatprep.subr.bf16.mxu0 %v4962_v56 }
 0x10d   :  { %9497 = vst [vmem:[#allocation53_spill] sm:$0xff] %v5788_v5  ;;  %v444_v9 = vpack.c.bf16 %v386_v52, %v384_v62  ;;  %v435_v60 = vmax.f32 %v364_v29, 0.0  ;;  %v5808_v52 = vld [vmem:[%s9323_s0 + $0x8] sm:$0xff] }
 0x10e   :  { %v445_v40 = vpack.c.bf16 %v387_v36, %v385_v10  ;;  %v247_v61 = vpop.f32.mrb[12].mxu0  ;;  %v5799_v49 = vpack.c.bf16 %v434_v19, %v432_v32  ;;  %v367_v4 = vpop.f32.mrb[12].mxu1  ;;  %2632 = vperm.xlu0 %4896, %v5808_v52   ;;  %4895 = vset.pattern.permute.xlu1 %v5111_v18 }
 0x10f   :  { %v248_v51 = vadd.f32 %v247_v61, %v5685_v39  ;;  %v249_v3 = vpop.f32.mrb[13].mxu0  ;;  %v5802_v44 = vpack.c.bf16 %v435_v60, %v433_v28  ;;  %v368_v62 = vadd.f32 %v367_v4, %v5685_v39  ;;  %v369_v48 = vpop.f32.mrb[13].mxu1  ;;  %1004 = vmatpush1.bf16.msra.mxu0 %v4960_v55  ;;  %v4970_v55 = vld [vmem:[%s9326_s5 + $0xac] ss:$12 sps:$4 sm:$0xff]  }
 0x110   :  { %v250_v10 = vadd.f32 %v249_v3, %v5689_v45  ;;  %v251_v32 = vpop.f32.mrb[14].mxu0  ;;  %655 = vmatprep.mubr.bf16.mxu1 %v445_v40  ;;  %v370_v13 = vadd.f32 %v369_v48, %v5689_v45  ;;  %v5813_v29 = vpop.permute.xlu1 %1908  ;;  %1005 = vmatprep.subr.bf16.mxu0 %v4965_v14 }
 0x111   :  { %9499 = vst [vmem:[#allocation55_spill] sm:$0xff] %v5813_v29  ;;  %v388_v28 = vmax.f32 %v248_v51, 0.0  ;;  %v252_v36 = vadd.f32 %v251_v32, %v5685_v39  ;;  %v253_v19 = vpop.f32.mrb[15].mxu0  ;;  %656 = vmatmul.mubr.bf16.gmra.mrb[24].mxu1 %v444_v9  ;;  %v371_v60 = vpop.f32.mrb[14].mxu1  ;;  %v436_v56 = vmax.f32 %v368_v62, 0.0 }
 0x112   :  { %v389_v61 = vmax.f32 %v250_v10, 0.0  ;;  %v254_v4 = vadd.f32 %v253_v19, %v5689_v45  ;;  %v372_v3 = vadd.f32 %v371_v60, %v5685_v39  ;;  %v373_v5 = vpop.f32.mrb[15].mxu1  ;;  %v5819_v40 = vpop.permute.xlu0 %1896  ;;  %v4963_v51 = vld [vmem:[%s9326_s5 + $0x90] ss:$12 sps:$4 sm:$0xff]   ;;  %v437_v32 = vmax.f32 %v370_v13, 0.0  ;;  %2644 = vperm.xlu0 %4896, %v5828_v59  }
 0x113   :  { %9500 = vst [vmem:[#allocation56_spill] sm:$0xff] %v5819_v40  ;;  %v390_v48 = vmax.f32 %v252_v36, 0.0  ;;  %v374_v9 = vadd.f32 %v373_v5, %v5689_v45  ;;  %v5841_v40 = vld [vmem:[%s9323_s0] sm:$0xff]  ;;  %1006 = vmatpush1.bf16.msra.mxu0 %v4963_v51 }
 0x114   :  { %v391_v62 = vmax.f32 %v254_v4, 0.0  ;;  %v438_v10 = vmax.f32 %v372_v3, 0.0  ;;  %v5834_v19 = vpop.permute.xlu1 %1916  ;;  %2628 = vperm.xlu1 %4895, %v5841_v40   ;;  %1007 = vmatprep.subr.bf16.mxu0 %v4970_v55 }
 0x115   :  { %9501 = vst [vmem:[#allocation57_spill] sm:$0xff] %v5834_v19  ;;  %v446_v36 = vpack.c.bf16 %v390_v48, %v388_v28  ;;  %v439_v13 = vmax.f32 %v374_v9, 0.0  ;;  %v4968_v28 = vld [vmem:[%s9326_s5 + $0xa8] ss:$12 sps:$4 sm:$0xff]   ;;  %v5882_v19 = vld [vmem:[%s9323_s0 + $0x18] sm:$0xff] }
 0x116   :  { %v447_v5 = vpack.c.bf16 %v391_v62, %v389_v61  ;;  %v257_v60 = vpop.f32.mrb[16].mxu0  ;;  %v5836_v29 = vpack.c.bf16 %v438_v10, %v436_v56  ;;  %v5844_v14 = vpop.permute.xlu0 %1904  ;;  %v5855_v56 = vld [vmem:[%s9323_s0 + $0x30] sm:$0xff] }
 0x117   :  { %9502 = vst [vmem:[#allocation58_spill] sm:$0xff] %v5844_v14  ;;  %v258_v18 = vadd.f32 %v257_v60, %v5685_v39  ;;  %v259_v61 = vpop.f32.mrb[17].mxu0  ;;  %v5850_v4 = vpack.c.bf16 %v439_v13, %v437_v32  ;;  %2652 = vperm.xlu0 %4896, %v5855_v56   ;;  %v5866_v60 = vld [vmem:[%s9323_s0 + $0x10] sm:$0xff]  ;;  %1008 = vmatpush1.bf16.msra.mxu0 %v4968_v28 }
 0x118   :  { %v260_v3 = vadd.f32 %v259_v61, %v5689_v45  ;;  %v261_v51 = vpop.f32.mrb[18].mxu0  ;;  %663 = vmatprep.mubr.bf16.mxu1 %v447_v5  ;;  %v5859_v48 = vpop.permute.xlu1 %2116  ;;  %2636 = vperm.xlu1 %4895, %v5866_v60  }
 0x119   :  { %v392_v9 = vmax.f32 %v258_v18, 0.0  ;;  %v262_v62 = vadd.f32 %v261_v51, %v5685_v39  ;;  %v263_v10 = vpop.f32.mrb[19].mxu0  ;;  %664 = vmatmul.mubr.bf16.gmra.mrb[28].mxu1 %v446_v36  ;;  %v5874_v18 = vld [vmem:[%s9323_s0 + $0x40] sm:$0xff] }
 0x11a   :  { %v393_v32 = vmax.f32 %v260_v3, 0.0  ;;  %v264_v13 = vadd.f32 %v263_v10, %v5689_v45  ;;  %v5869_v55 = vpop.permute.xlu0 %1912 }
 0x11b   :  { %9503 = vst [vmem:[#allocation59_spill] sm:$0xff] %v5869_v55  ;;  %v394_v5 = vmax.f32 %v262_v62, 0.0  ;;  %2660 = vperm.xlu0 %4896, %v5874_v18  }
 0x11c   :  { %v395_v36 = vmax.f32 %v264_v13, 0.0  ;;  %v5877_v10 = vpop.permute.xlu1 %2124  ;;  %2640 = vperm.xlu1 %4895, %v5882_v19  }
 0x11d   :  { %v448_v61 = vpack.c.bf16 %v394_v5, %v392_v9  ;;  %9504 = vst [vmem:[#allocation60_spill] sm:$0xff] %v5877_v10  ;;  %v5891_v9 = vld [vmem:[%s9323_s0 + $0x50] sm:$0xff] }
 0x11e   :  { %v449_v3 = vpack.c.bf16 %v395_v36, %v393_v32  ;;  %v267_v51 = vpop.f32.mrb[20].mxu0  ;;  %v5886_v55 = vpop.permute.xlu0 %1920 }
 0x11f   :  { %v268_v28 = vadd.f32 %v267_v51, %v5685_v39  ;;  %v269_v62 = vpop.f32.mrb[21].mxu0  ;;  %9505 = vst [vmem:[#allocation61_spill] sm:$0xff] %v5886_v55  ;;  %2668 = vperm.xlu0 %4896, %v5891_v9   ;;  %v5900_v55 = vld [vmem:[%s9323_s0 + $0x28] sm:$0xff] }
 0x120   :  { %v270_v32 = vadd.f32 %v269_v62, %v5689_v45  ;;  %v271_v13 = vpop.f32.mrb[22].mxu0  ;;  %671 = vmatprep.mubr.bf16.mxu1 %v449_v3  ;;  %2648 = vperm.xlu1 %4895, %v5900_v55   ;;  %v5908_v3 = vld [vmem:[%s9323_s0 + $0x60] sm:$0xff] }
 0x121   :  { %v396_v5 = vmax.f32 %v268_v28, 0.0  ;;  %v272_v36 = vadd.f32 %v271_v13, %v5685_v39  ;;  %v273_v14 = vpop.f32.mrb[23].mxu0  ;;  %672 = vmatmul.mubr.bf16.gmra.mrb[32].mxu1 %v448_v61  ;;  %v5911_v28 = vpop.permute.xlu1 %2128  ;;  %v5916_v13 = vld [vmem:[%s9323_s0 + $0x38] sm:$0xff] }
 0x122   :  { %v397_v51 = vmax.f32 %v270_v32, 0.0  ;;  %v274_v7 = vadd.f32 %v273_v14, %v5689_v45  ;;  %v5903_v6 = vpop.permute.xlu0 %2120  ;;  %9506 = vst [vmem:[#allocation62_spill] sm:$0xff] %v5911_v28 }
 0x123   :  { %v398_v34 = vmax.f32 %v272_v36, 0.0  ;;  %2676 = vperm.xlu0 %4896, %v5908_v3  }
 0x124   :  { %v399_v61 = vmax.f32 %v274_v7, 0.0  ;;  %2656 = vperm.xlu1 %4895, %v5916_v13  }
 0x125   :  { %v450_v14 = vpack.c.bf16 %v398_v34, %v396_v5  ;;  %v5931_v12 = vpop.permute.xlu1 %2136 }
 0x126   :  { %v451_v62 = vpack.c.bf16 %v399_v61, %v397_v51  ;;  %v277_v32 = vpop.f32.mrb[24].mxu0  ;;  %v5928_v58 = vpop.permute.xlu0 %2132  ;;  %9508 = vst [vmem:[#allocation64_spill] sm:$0xff] %v5931_v12 }
 0x127   :  { %v278_v36 = vadd.f32 %v277_v32, %v5685_v39  ;;  %v279_v27 = vpop.f32.mrb[25].mxu0  ;;  %2684 = vperm.xlu0 %4896, %v5923_v23   ;;  %9507 = vst [vmem:[#allocation63_spill] sm:$0xff] %v5928_v58  ;;  %v6057_v58 = vld [vmem:[%s9323_s0 + $0xf0] sm:$0xff] }
 0x128   :  { %v280_v34 = vadd.f32 %v279_v27, %v5689_v45  ;;  %v281_v7 = vpop.f32.mrb[26].mxu0  ;;  %679 = vmatprep.mubr.bf16.mxu1 %v451_v62  ;;  %2664 = vperm.xlu1 %4895, %v5936_v24   ;;  %v5942_v62 = vld [vmem:[%s9323_s0 + $0x80] sm:$0xff] }
 0x129   :  { %v400_v5 = vmax.f32 %v278_v36, 0.0  ;;  %v282_v51 = vadd.f32 %v281_v7, %v5685_v39  ;;  %v283_v61 = vpop.f32.mrb[27].mxu0  ;;  %680 = vmatmul.mubr.bf16.gmra.mrb[36].mxu1 %v450_v14 }
 0x12a   :  { %v401_v32 = vmax.f32 %v280_v34, 0.0  ;;  %v284_v2 = vadd.f32 %v283_v61, %v5689_v45  ;;  %v5948_v61 = vld [vmem:[%s9323_s0 + $0x58] sm:$0xff]  ;;  %v5952_v63 = vpop.permute.xlu0 %2140 }
 0x12b   :  { %v402_v27 = vmax.f32 %v282_v51, 0.0  ;;  %2692 = vperm.xlu0 %4896, %v5942_v62   ;;  %9509 = vst [vmem:[#allocation65_spill] sm:$0xff] %v5952_v63 }
 0x12c   :  { %v403_v14 = vmax.f32 %v284_v2, 0.0  ;;  %2672 = vperm.xlu1 %4895, %v5948_v61  }
 0x12d   :  { %v452_v36 = vpack.c.bf16 %v402_v27, %v400_v5 }
 0x12e   :  { %v453_v34 = vpack.c.bf16 %v403_v14, %v401_v32  ;;  %v287_v7 = vpop.f32.mrb[28].mxu0  ;;  %v5961_v32 = vpop.permute.xlu1 %2144 }
 0x12f   :  { %v288_v51 = vadd.f32 %v287_v7, %v5685_v39  ;;  %v289_v54 = vpop.f32.mrb[29].mxu0  ;;  %2700 = vperm.xlu0 %4896, %v5957_v15   ;;  %9510 = vst [vmem:[#allocation66_spill] sm:$0xff] %v5961_v32 }
 0x130   :  { %v290_v2 = vadd.f32 %v289_v54, %v5689_v45  ;;  %v291_v5 = vpop.f32.mrb[30].mxu0  ;;  %687 = vmatprep.mubr.bf16.mxu1 %v453_v34  ;;  %2680 = vperm.xlu1 %4895, %v5968_v57   ;;  %v5974_v34 = vld [vmem:[%s9323_s0 + $0xa0] sm:$0xff] }
 0x131   :  { %v404_v27 = vmax.f32 %v288_v51, 0.0  ;;  %v292_v14 = vadd.f32 %v291_v5, %v5685_v39  ;;  %v293_v7 = vpop.f32.mrb[31].mxu0  ;;  %688 = vmatmul.mubr.bf16.gmra.mrb[40].mxu1 %v452_v36 }
 0x132   :  { %v405_v20 = vmax.f32 %v290_v2, 0.0  ;;  %v294_v50 = vadd.f32 %v293_v7, %v5689_v45  ;;  %v5977_v2 = vpop.permute.xlu0 %2148  ;;  %v5979_v16 = vpop.permute.xlu1 %2152 }
 0x133   :  { %v406_v54 = vmax.f32 %v292_v14, 0.0  ;;  %2708 = vperm.xlu0 %4896, %v5974_v34   ;;  %9511 = vst [vmem:[#allocation67_spill] sm:$0xff] %v5977_v2  ;;  %9512 = vst [vmem:[#allocation68_spill] sm:$0xff] %v5979_v16 }
 0x134   :  { %v407_v51 = vmax.f32 %v294_v50, 0.0  ;;  %2688 = vperm.xlu1 %4895, %v5984_v21   ;;  %v5991_v50 = vld [vmem:[%s9323_s0 + $0xb0] sm:$0xff] }
 0x135   :  { %v454_v36 = vpack.c.bf16 %v406_v54, %v404_v27 }
 0x136   :  { %v455_v5 = vpack.c.bf16 %v407_v51, %v405_v20  ;;  %v297_v7 = vpop.f32.mrb[32].mxu0  ;;  %v6003_v53 = vpop.permute.xlu0 %2156 }
 0x137   :  { %v298_v14 = vadd.f32 %v297_v7, %v5685_v39  ;;  %v299_v32 = vpop.f32.mrb[33].mxu0  ;;  %2716 = vperm.xlu0 %4896, %v5991_v50   ;;  %9513 = vst [vmem:[#allocation69_spill] sm:$0xff] %v6003_v53 }
 0x138   :  { %v300_v20 = vadd.f32 %v299_v32, %v5689_v45  ;;  %v301_v27 = vpop.f32.mrb[34].mxu0  ;;  %695 = vmatprep.mubr.bf16.mxu1 %v455_v5  ;;  %2696 = vperm.xlu1 %4895, %v6000_v46   ;;  %v6008_v32 = vld [vmem:[%s9323_s0 + $0xc0] sm:$0xff]  ;;  %v6011_v5 = vpop.permute.xlu1 %2160 }
 0x139   :  { %v408_v54 = vmax.f32 %v298_v14, 0.0  ;;  %v302_v51 = vadd.f32 %v301_v27, %v5685_v39  ;;  %v303_v16 = vpop.f32.mrb[35].mxu0  ;;  %696 = vmatmul.mubr.bf16.gmra.mrb[44].mxu1 %v454_v36  ;;  %9514 = vst [vmem:[#allocation70_spill] sm:$0xff] %v6011_v5  ;;  %v6016_v27 = vld [vmem:[%s9323_s0 + $0x98] sm:$0xff] }
 0x13a   :  { %v409_v2 = vmax.f32 %v300_v20, 0.0  ;;  %v304_v7 = vadd.f32 %v303_v16, %v5689_v45  ;;  %v6028_v5 = vpop.permute.xlu0 %2164 }
 0x13b   :  { %v410_v63 = vmax.f32 %v302_v51, 0.0  ;;  %2724 = vperm.xlu0 %4896, %v6008_v32   ;;  %9515 = vst [vmem:[#allocation71_spill] sm:$0xff] %v6028_v5 }
 0x13c   :  { %v411_v36 = vmax.f32 %v304_v7, 0.0  ;;  %2704 = vperm.xlu1 %4895, %v6016_v27   ;;  %v6031_v12 = vpop.permute.xlu1 %2168 }
 0x13d   :  { %v456_v16 = vpack.c.bf16 %v410_v63, %v408_v54  ;;  %9516 = vst [vmem:[#allocation72_spill] sm:$0xff] %v6031_v12 }
 0x13e   :  { %v457_v14 = vpack.c.bf16 %v411_v36, %v409_v2  ;;  %v307_v20 = vpop.f32.mrb[36].mxu0  ;;  %v6052_v5 = vpop.permute.xlu0 %2172 }
 0x13f   :  { %v308_v51 = vadd.f32 %v307_v20, %v5685_v39  ;;  %v309_v53 = vpop.f32.mrb[37].mxu0  ;;  %2732 = vperm.xlu0 %4896, %v6023_v11   ;;  %9517 = vst [vmem:[#allocation73_spill] sm:$0xff] %v6052_v5 }
 0x140   :  { %v310_v63 = vadd.f32 %v309_v53, %v5689_v45  ;;  %v311_v2 = vpop.f32.mrb[38].mxu0  ;;  %703 = vmatprep.mubr.bf16.mxu1 %v457_v14  ;;  %2712 = vperm.xlu1 %4895, %v6036_v42   ;;  %v6042_v14 = vld [vmem:[%s9323_s0 + $0xe0] sm:$0xff] }
 0x141   :  { %v412_v54 = vmax.f32 %v308_v51, 0.0  ;;  %v312_v7 = vadd.f32 %v311_v2, %v5685_v39  ;;  %v313_v36 = vpop.f32.mrb[39].mxu0  ;;  %704 = vmatmul.mubr.bf16.gmra.mrb[48].mxu1 %v456_v16 }
 0x142   :  { %v413_v20 = vmax.f32 %v310_v63, 0.0  ;;  %v314_v35 = vadd.f32 %v313_v36, %v5689_v45  ;;  %v6048_v36 = vld [vmem:[%s9323_s0 + $0xb8] sm:$0xff] }
 0x143   :  { %v414_v53 = vmax.f32 %v312_v7, 0.0  ;;  %2740 = vperm.xlu0 %4896, %v6042_v14  }
 0x144   :  { %v415_v16 = vmax.f32 %v314_v35, 0.0  ;;  %2720 = vperm.xlu1 %4895, %v6048_v36  }
 0x145   :  { %v458_v51 = vpack.c.bf16 %v414_v53, %v412_v54 }
 0x146   :  { %v459_v63 = vpack.c.bf16 %v415_v16, %v413_v20  ;;  %v317_v2 = vpop.f32.mrb[40].mxu0  ;;  %v6061_v20 = vpop.permute.xlu1 %2176 }
 0x147   :  { %v318_v7 = vadd.f32 %v317_v2, %v5685_v39  ;;  %v319_v12 = vpop.f32.mrb[41].mxu0  ;;  %2748 = vperm.xlu0 %4896, %v6057_v58   ;;  %9518 = vst [vmem:[#allocation74_spill] sm:$0xff] %v6061_v20 }
 0x148   :  { %v320_v35 = vadd.f32 %v319_v12, %v5689_v45  ;;  %v321_v54 = vpop.f32.mrb[42].mxu0  ;;  %711 = vmatprep.mubr.bf16.mxu1 %v459_v63  ;;  %2728 = vperm.xlu1 %4895, %v6068_v31  }
 0x149   :  { %v416_v53 = vmax.f32 %v318_v7, 0.0  ;;  %v322_v16 = vadd.f32 %v321_v54, %v5685_v39  ;;  %v323_v2 = vpop.f32.mrb[43].mxu0  ;;  %712 = vmatmul.mubr.bf16.gmra.mrb[52].mxu1 %v458_v51  ;;  %v6072_v54 = vpop.permute.xlu0 %2180 }
 0x14a   :  { %v417_v47 = vmax.f32 %v320_v35, 0.0  ;;  %v324_v5 = vadd.f32 %v323_v2, %v5689_v45  ;;  %9519 = vst [vmem:[#allocation75_spill] sm:$0xff] %v6072_v54  ;;  %v6074_v20 = vpop.permute.xlu1 %2184  ;;  %v6079_v2 = vld [vmem:[%s9323_s0 + $0xd8] sm:$0xff]  ;;  %v6090_v54 = vld [vmem:[%s9323_s0 + $0xe8] sm:$0xff] }
 0x14b   :  { %v418_v12 = vmax.f32 %v322_v16, 0.0  ;;  %4897 = vset.pattern.permute.xlu0 %v5112_v1  ;;  %9520 = vst [vmem:[#allocation76_spill] sm:$0xff] %v6074_v20 }
 0x14c   :  { %v419_v63 = vmax.f32 %v324_v5, 0.0  ;;  %2948 = vperm.xlu0 %4897, %v5841_v40   ;;  %2736 = vperm.xlu1 %4895, %v6079_v2  }
 0x14d   :  { %v460_v7 = vpack.c.bf16 %v418_v12, %v416_v53 }
 0x14e   :  { %v461_v51 = vpack.c.bf16 %v419_v63, %v417_v47  ;;  %v327_v35 = vpop.f32.mrb[44].mxu0  ;;  %v6095_v10 = vpop.permute.xlu1 %2192 }
 0x14f   :  { %v328_v16 = vadd.f32 %v327_v35, %v5685_v39  ;;  %v329_v28 = vpop.f32.mrb[45].mxu0  ;;  %v6093_v35 = vpop.permute.xlu0 %2188  ;;  %9522 = vst [vmem:[#allocation78_spill] sm:$0xff] %v6095_v10 }
 0x150   :  { %v330_v5 = vadd.f32 %v329_v28, %v5689_v45  ;;  %v331_v38 = vpop.f32.mrb[46].mxu0  ;;  %719 = vmatprep.mubr.bf16.mxu1 %v461_v51  ;;  %2960 = vperm.xlu0 %4897, %v5882_v19   ;;  %9521 = vst [vmem:[#allocation77_spill] sm:$0xff] %v6093_v35 }
 0x151   :  { %v420_v47 = vmax.f32 %v328_v16, 0.0  ;;  %v332_v53 = vadd.f32 %v331_v38, %v5685_v39  ;;  %v333_v12 = vpop.f32.mrb[47].mxu0  ;;  %720 = vmatmul.mubr.bf16.gmra.mrb[56].mxu1 %v460_v7  ;;  %2744 = vperm.xlu1 %4895, %v6090_v54   ;;  %v4971_v38 = vld [vmem:[%s9326_s5 + $0x38] ss:$12 sps:$4 sm:$0xff]  }
 0x152   :  { %v421_v63 = vmax.f32 %v330_v5, 0.0  ;;  %v334_v20 = vadd.f32 %v333_v12, %v5689_v45  ;;  %v6104_v7 = vld [vmem:[%s9323_s0 + $0xf8] sm:$0xff]  ;;  %4814 = vmatprep.subr.bf16.mxu1 %v4971_v38  ;;  %v6114_v5 = vpop.permute.xlu1 %2200 }
 0x153   :  { %v422_v28 = vmax.f32 %v332_v53, 0.0  ;;  %4815 = vmatpush3.bf16.msra.mxu1 %v4971_v38  ;;  %v6111_v16 = vpop.permute.xlu0 %2196  ;;  %9524 = vst [vmem:[#allocation80_spill] sm:$0xff] %v6114_v5 }
 0x154   :  { %v423_v51 = vmax.f32 %v334_v20, 0.0  ;;  %2968 = vperm.xlu0 %4897, %v5900_v55   ;;  %v4972_v20 = vld [vmem:[%s9326_s5 + $0x50] ss:$12 sps:$4 sm:$0xff]   ;;  %9523 = vst [vmem:[#allocation79_spill] sm:$0xff] %v6111_v16 }
 0x155   :  { %v462_v39 = vpack.c.bf16 %v422_v28, %v420_v47  ;;  %2752 = vperm.xlu1 %4895, %v6104_v7   ;;  %4816 = vmatprep.subr.bf16.mxu1 %v4972_v20  ;;  %v4973_v47 = vld [vmem:[%s9326_s5 + $0x68] ss:$12 sps:$4 sm:$0xff]  }
 0x156   :  { %v463_v45 = vpack.c.bf16 %v423_v51, %v421_v63  ;;  %v6124_v12 = vpop.permute.xlu1 %2208 }
 0x157   :  { %4817 = vmatpush3.bf16.msra.mxu1 %v4972_v20  ;;  %v6121_v53 = vpop.permute.xlu0 %2204  ;;  %9526 = vst [vmem:[#allocation82_spill] sm:$0xff] %v6124_v12 }
 0x158   :  { %727 = vmatprep.mubr.bf16.mxu1 %v463_v45  ;;  %2976 = vperm.xlu0 %4897, %v5916_v13   ;;  %9525 = vst [vmem:[#allocation81_spill] sm:$0xff] %v6121_v53 }
 0x159   :  { %728 = vmatmul.mubr.bf16.gmra.mrb[60].mxu1 %v462_v39  ;;  %4898 = vset.pattern.permute.xlu1 %v5112_v1  ;;  %v4974_v1 = vld [vmem:[%s9326_s5 + $0x80] ss:$12 sps:$4 sm:$0xff]  }
 0x15a   :  { %735 = vmatprep.mubr.bf16.mxu1 %v5723_v0  ;;  %2952 = vperm.xlu1 %4898, %v5808_v52   ;;  %v4975_v0 = vld [vmem:[%s9326_s5 + $0x98] ss:$12 sps:$4 sm:$0xff]   ;;  %v6139_v28 = vpop.permute.xlu1 %2216 }
 0x15b   :  { %4818 = vmatprep.subr.bf16.mxu1 %v4973_v47  ;;  %v6137_v63 = vpop.permute.xlu0 %2212  ;;  %9528 = vst [vmem:[#allocation84_spill] sm:$0xff] %v6139_v28 }
 0x15c   :  { %2984 = vperm.xlu0 %4897, %v5936_v24   ;;  %4819 = vmatpush3.bf16.msra.mxu1 %v4973_v47  ;;  %9527 = vst [vmem:[#allocation83_spill] sm:$0xff] %v6137_v63 }
 0x15d   :  { %4820 = vmatprep.subr.bf16.mxu1 %v4974_v1 }
 0x15e   :  { %2956 = vperm.xlu1 %4898, %v5866_v60   ;;  %v6151_v51 = vpop.permute.xlu1 %2224 }
 0x15f   :  { %9530 = vst [vmem:[#allocation86_spill] sm:$0xff] %v6151_v51 }
 0x160   :  { %2992 = vperm.xlu0 %4897, %v5948_v61   ;;  %4821 = vmatpush3.bf16.msra.mxu1 %v4974_v1  ;;  %v5113_v1 = vmov 70  }
 0x161   :  { %736 = vmatmul.mubr.bf16.gmra.mrb[64].mxu1 %v5715_v8  ;;  %4822 = vmatprep.subr.bf16.mxu1 %v4975_v0  ;;  %v4976_v8 = vld [vmem:[%s9326_s5 + $0xb0] ss:$12 sps:$4 sm:$0xff]  }
 0x162   :  { %743 = vmatprep.mubr.bf16.mxu1 %v5764_v26  ;;  %2964 = vperm.xlu1 %4898, %v5828_v59   ;;  %v6148_v26 = vpop.permute.xlu0 %2220 }
 0x163   :  { %9529 = vst [vmem:[#allocation85_spill] sm:$0xff] %v6148_v26 }
 0x164   :  { %3000 = vperm.xlu0 %4897, %v5968_v57   ;;  %4823 = vmatpush3.bf16.msra.mxu1 %v4975_v0 }
 0x165   :  { %4824 = vmatprep.subr.bf16.mxu1 %v4976_v8 }
 0x166   :  { %2972 = vperm.xlu1 %4898, %v5855_v56   ;;  %v6157_v38 = vpop.permute.xlu0 %2228 }
 0x167   :  { %9531 = vst [vmem:[#allocation87_spill] sm:$0xff] %v6157_v38 }
 0x168   :  { %3008 = vperm.xlu0 %4897, %v5984_v21   ;;  %4825 = vmatpush3.bf16.msra.mxu1 %v4976_v8 }
 0x169   :  { %744 = vmatmul.mubr.bf16.gmra.mrb[68].mxu1 %v5753_v37  ;;  %v6160_v37 = vpop.permute.xlu1 %2232 }
 0x16a   :  { %751 = vmatprep.mubr.bf16.mxu1 %v5802_v44  ;;  %2980 = vperm.xlu1 %4898, %v5874_v18   ;;  %9532 = vst [vmem:[#allocation88_spill] sm:$0xff] %v6160_v37  ;;  %v6164_v44 = vpop.permute.xlu0 %2236 }
 0x16b   :  { %9533 = vst [vmem:[#allocation89_spill] sm:$0xff] %v6164_v44 }
 0x16c   :  { %3016 = vperm.xlu0 %4897, %v6000_v46  }
 0x16d   :  { %v6167_v39 = vpop.permute.xlu1 %2240 }
 0x16e   :  { %2988 = vperm.xlu1 %4898, %v5891_v9   ;;  %9534 = vst [vmem:[#allocation90_spill] sm:$0xff] %v6167_v39 }
 0x170   :  { %3024 = vperm.xlu0 %4897, %v6016_v27  }
 0x171   :  { %752 = vmatmul.mubr.bf16.gmra.mrb[72].mxu1 %v5799_v49  ;;  %v6172_v49 = vpop.permute.xlu1 %2440 }
 0x172   :  { %759 = vmatprep.mubr.bf16.mxu1 %v5850_v4  ;;  %2996 = vperm.xlu1 %4898, %v5908_v3   ;;  %9535 = vst [vmem:[#allocation91_spill] sm:$0xff] %v6172_v49  ;;  %v6175_v4 = vpop.permute.xlu0 %2436 }
 0x173   :  { %9536 = vst [vmem:[#allocation92_spill] sm:$0xff] %v6175_v4 }
 0x174   :  { %3032 = vperm.xlu0 %4897, %v6036_v42  }
 0x175   :  { %v6179_v45 = vpop.permute.xlu1 %2444 }
 0x176   :  { %3004 = vperm.xlu1 %4898, %v5923_v23   ;;  %9537 = vst [vmem:[#allocation93_spill] sm:$0xff] %v6179_v45  ;;  %v6181_v20 = vpop.permute.xlu0 %2448 }
 0x177   :  { %9538 = vst [vmem:[#allocation94_spill] sm:$0xff] %v6181_v20 }
 0x178   :  { %3040 = vperm.xlu0 %4897, %v6048_v36  }
 0x179   :  { %760 = vmatmul.mubr.bf16.gmra.mrb[76].mxu1 %v5836_v29  ;;  %v6186_v29 = vpop.permute.xlu1 %2452 }
 0x17a   :  { %3012 = vperm.xlu1 %4898, %v5942_v62   ;;  %9539 = vst [vmem:[#allocation95_spill] sm:$0xff] %v6186_v29  ;;  %v6189_v47 = vpop.permute.xlu0 %2456 }
 0x17b   :  { %9540 = vst [vmem:[#allocation96_spill] sm:$0xff] %v6189_v47 }
 0x17c   :  { %3048 = vperm.xlu0 %4897, %v6068_v31  }
 0x17d   :  { %v6193_v0 = vpop.permute.xlu1 %2460 }
 0x17e   :  { %3020 = vperm.xlu1 %4898, %v5957_v15   ;;  %9541 = vst [vmem:[#allocation97_spill] sm:$0xff] %v6193_v0  ;;  %v6195_v8 = vpop.permute.xlu0 %2464 }
 0x17f   :  { %9542 = vst [vmem:[#allocation98_spill] sm:$0xff] %v6195_v8 }
 0x180   :  { %3056 = vperm.xlu0 %4897, %v6079_v2  }
 0x181   :  { %v6200_v29 = vpop.permute.xlu1 %2468 }
 0x182   :  { %3028 = vperm.xlu1 %4898, %v5974_v34   ;;  %9543 = vst [vmem:[#allocation99_spill] sm:$0xff] %v6200_v29  ;;  %v6202_v20 = vpop.permute.xlu0 %2472 }
 0x183   :  { %9544 = vst [vmem:[#allocation100_spill] sm:$0xff] %v6202_v20 }
 0x184   :  { %3064 = vperm.xlu0 %4897, %v6090_v54  }
 0x186   :  { %3036 = vperm.xlu1 %4898, %v5991_v50   ;;  %v6209_v0 = vpop.permute.xlu0 %2480 }
 0x187   :  { %9546 = vst [vmem:[#allocation102_spill] sm:$0xff] %v6209_v0 }
 0x188   :  { %3072 = vperm.xlu0 %4897, %v6104_v7  }
 0x18a   :  { %3044 = vperm.xlu1 %4898, %v6008_v32   ;;  %v6216_v20 = vpop.permute.xlu0 %2488 }
 0x18b   :  { %9548 = vst [vmem:[#allocation104_spill] sm:$0xff] %v6216_v20 }
 0x18c   :  { %4900 = vset.pattern.permute.xlu0 %v5113_v1 }
 0x18d   :  { %3272 = vperm.xlu0 %4900, %v5808_v52   ;;  %v6207_v52 = vpop.permute.xlu1 %2476 }
 0x18e   :  { %3052 = vperm.xlu1 %4898, %v6023_v11   ;;  %9545 = vst [vmem:[#allocation101_spill] sm:$0xff] %v6207_v52 }
 0x191   :  { %3284 = vperm.xlu0 %4900, %v5828_v59   ;;  %v6213_v59 = vpop.permute.xlu1 %2484 }
 0x192   :  { %3060 = vperm.xlu1 %4898, %v6042_v14   ;;  %9547 = vst [vmem:[#allocation103_spill] sm:$0xff] %v6213_v59 }
 0x195   :  { %3292 = vperm.xlu0 %4900, %v5855_v56   ;;  %v6221_v56 = vpop.permute.xlu1 %2492 }
 0x196   :  { %3068 = vperm.xlu1 %4898, %v6057_v58   ;;  %9549 = vst [vmem:[#allocation105_spill] sm:$0xff] %v6221_v56 }
 0x199   :  { %3300 = vperm.xlu0 %4900, %v5874_v18   ;;  %v6223_v18 = vpop.permute.xlu0 %2496 }
 0x19a   :  { %4899 = vset.pattern.permute.xlu1 %v5113_v1  ;;  %9550 = vst [vmem:[#allocation106_spill] sm:$0xff] %v6223_v18 }
 0x19b   :  { %3268 = vperm.xlu1 %4899, %v5841_v40   ;;  %v6227_v40 = vpop.permute.xlu1 %2500 }
 0x19c   :  { %9551 = vst [vmem:[#allocation107_spill] sm:$0xff] %v6227_v40 }
 0x19d   :  { %3308 = vperm.xlu0 %4900, %v5891_v9  }
 0x19f   :  { %3276 = vperm.xlu1 %4899, %v5866_v60   ;;  %v6230_v60 = vpop.permute.xlu0 %2504 }
 0x1a0   :  { %9552 = vst [vmem:[#allocation108_spill] sm:$0xff] %v6230_v60 }
 0x1a1   :  { %3316 = vperm.xlu0 %4900, %v5908_v3  }
 0x1a3   :  { %3280 = vperm.xlu1 %4899, %v5882_v19   ;;  %v6237_v19 = vpop.permute.xlu0 %2512 }
 0x1a4   :  { %9554 = vst [vmem:[#allocation110_spill] sm:$0xff] %v6237_v19 }
 0x1a5   :  { %3324 = vperm.xlu0 %4900, %v5923_v23   ;;  %v6235_v23 = vpop.permute.xlu1 %2508 }
 0x1a6   :  { %9553 = vst [vmem:[#allocation109_spill] sm:$0xff] %v6235_v23 }
 0x1a7   :  { %3288 = vperm.xlu1 %4899, %v5900_v55   ;;  %v6244_v9 = vpop.permute.xlu0 %2520 }
 0x1a8   :  { %9556 = vst [vmem:[#allocation112_spill] sm:$0xff] %v6244_v9 }
 0x1a9   :  { %3332 = vperm.xlu0 %4900, %v5942_v62   ;;  %v6241_v55 = vpop.permute.xlu1 %2516 }
 0x1aa   :  { %9555 = vst [vmem:[#allocation111_spill] sm:$0xff] %v6241_v55 }
 0x1ab   :  { %3296 = vperm.xlu1 %4899, %v5916_v13   ;;  %v6272_v13 = vld [vmem:[%s9327_s4] ss:$0 sm:$0xff] }
 0x1ad   :  { %3340 = vperm.xlu0 %4900, %v5957_v15   ;;  %v6249_v15 = vpop.permute.xlu1 %2524 }
 0x1ae   :  { %9557 = vst [vmem:[#allocation113_spill] sm:$0xff] %v6249_v15 }
 0x1af   :  { %3304 = vperm.xlu1 %4899, %v5936_v24   ;;  %v6251_v24 = vpop.permute.xlu0 %2528 }
 0x1b0   :  { %9558 = vst [vmem:[#allocation114_spill] sm:$0xff] %v6251_v24 }
 0x1b1   :  { %3348 = vperm.xlu0 %4900, %v5974_v34   ;;  %v6255_v3 = vpop.permute.xlu1 %2532 }
 0x1b2   :  { %9559 = vst [vmem:[#allocation115_spill] sm:$0xff] %v6255_v3 }
 0x1b3   :  { %3312 = vperm.xlu1 %4899, %v5948_v61  }
 0x1b5   :  { %3356 = vperm.xlu0 %4900, %v5991_v50  }
 0x1b7   :  { %3320 = vperm.xlu1 %4899, %v5968_v57   ;;  %v6258_v57 = vpop.permute.xlu0 %2536 }
 0x1b8   :  { %9560 = vst [vmem:[#allocation116_spill] sm:$0xff] %v6258_v57 }
 0x1b9   :  { %3364 = vperm.xlu0 %4900, %v6008_v32  }
 0x1bb   :  { %3328 = vperm.xlu1 %4899, %v5984_v21   ;;  %v6262_v21 = vpop.permute.xlu1 %2540 }
 0x1bc   :  { %9561 = vst [vmem:[#allocation117_spill] sm:$0xff] %v6262_v21 }
 0x1bd   :  { %3372 = vperm.xlu0 %4900, %v6023_v11  }
 0x1bf   :  { %3336 = vperm.xlu1 %4899, %v6000_v46   ;;  %v6265_v11 = vpop.permute.xlu1 %2548 }
 0x1c0   :  { %9562 = vst [vmem:[#allocation118_spill] sm:$0xff] %v6265_v11 }
 0x1c1   :  { %3380 = vperm.xlu0 %4900, %v6042_v14  }
 0x1c3   :  { %3344 = vperm.xlu1 %4899, %v6016_v27  }
 0x1c5   :  { %3388 = vperm.xlu0 %4900, %v6057_v58  }
 0x1c7   :  { %3352 = vperm.xlu1 %4899, %v6036_v42   ;;  %v6274_v42 = vpop.permute.xlu1 %2556 }
 0x1c8   :  { %9563 = vst [vmem:[#allocation119_spill] sm:$0xff] %v6274_v42 }
 0x1cb   :  { %3360 = vperm.xlu1 %4899, %v6048_v36  }
 0x1cf   :  { %3368 = vperm.xlu1 %4899, %v6068_v31  }
 0x1d3   :  { %3376 = vperm.xlu1 %4899, %v6079_v2   ;;  %v6285_v2 = vpop.permute.xlu1 %2628 }
 0x1d4   :  { %v4690_v46 = vpop.f32.mrb[16].mxu1 }
 0x1d5   :  { %v4691_v62 = vpop.f32.mrb[17].mxu1 }
 0x1d6   :  { %v4692_v58 = vadd.f32 %v4691_v62, %v4690_v46  ;;  %v4693_v61 = vpop.f32.mrb[18].mxu1 }
 0x1d7   :  { %v4694_v34 = vpop.f32.mrb[19].mxu1  ;;  %3384 = vperm.xlu1 %4899, %v6090_v54  }
 0x1d8   :  { %v6277_v50 = vadd.f32 %v4692_v58, %v6272_v13  ;;  %v4695_v32 = vadd.f32 %v4694_v34, %v4693_v61  ;;  %v9567_v34 = vmov 0  }
 0x1da   :  { %9564 = vst [vmem:[#allocation120_spill] sm:$0xff] %v6277_v50  ;;  %v6281_v31 = vadd.f32 %v4695_v32, %v6272_v13  ;;  %v768_v27 = vmax.f32 %v6277_v50, 0.0 }
 0x1db   :  { %3392 = vperm.xlu1 %4899, %v6104_v7  }
 0x1dc   :  { %9565 = vst [vmem:[#allocation121_spill] sm:$0xff] %v6281_v31  ;;  %v769_v14 = vmax.f32 %v6281_v31, 0.0  ;;  %v4696_v36 = vpop.f32.mrb[20].mxu1 }
 0x1dd   :  { %v4697_v1 = vpop.f32.mrb[21].mxu1 }
 0x1de   :  { %v800_v46 = vpack.c.bf16 %v769_v14, %v768_v27  ;;  %v4698_v62 = vadd.f32 %v4697_v1, %v4696_v36  ;;  %v4699_v58 = vpop.f32.mrb[22].mxu1 }
 0x1df   :  { %v4700_v42 = vpop.f32.mrb[23].mxu1 }
 0x1e0   :  { %v6289_v61 = vadd.f32 %v4698_v62, %v6272_v13  ;;  %v4701_v54 = vadd.f32 %v4700_v42, %v4699_v58  ;;  %1026 = vmatmul.mubr.bf16.vlgmr.msra.gmra.mrb[48].mxu0 %v800_v46  ;;  %4826 = vmatprep.mubr.bf16.mxu1 %v800_v46 }
 0x1e1   :  { %1035 = vmatprep.mubr.bf16.mxu0 %v9567_v34 }
 0x1e2   :  { %9566 = vst [vmem:[#allocation122_spill] sm:$0xff] %v6289_v61  ;;  %v770_v32 = vmax.f32 %v6289_v61, 0.0  ;;  %v6294_v11 = vadd.f32 %v4701_v54, %v6272_v13 }
 0x1e4   :  { %9568 = vst [vmem:[#allocation123_spill] sm:$0xff] %v6294_v11  ;;  %v771_v7 = vmax.f32 %v6294_v11, 0.0  ;;  %v4702_v21 = vpop.f32.mrb[24].mxu1 }
 0x1e5   :  { %v4703_v27 = vpop.f32.mrb[25].mxu1 }
 0x1e6   :  { %v4704_v14 = vadd.f32 %v4703_v27, %v4702_v21  ;;  %v4705_v36 = vpop.f32.mrb[26].mxu1  ;;  %v801_v1 = vpack.c.bf16 %v771_v7, %v770_v32 }
 0x1e7   :  { %v4706_v57 = vpop.f32.mrb[27].mxu1 }
 0x1e8   :  { %v6298_v62 = vadd.f32 %v4704_v14, %v6272_v13  ;;  %v4707_v42 = vadd.f32 %v4706_v57, %v4705_v36  ;;  %1036 = vmatmul.mubr.bf16.gmra.mrb[52].mxu0 %v801_v1  ;;  %4827 = vmatmul.mubr.bf16.vlgmr.msra.gmra.mrb[80].mxu1 %v801_v1  ;;  %v6309_v36 = vpop.permute.xlu1 %2636  ;;  %v6312_v1 = vpop.permute.xlu0 %2544 }
 0x1e9   :  { %1045 = vmatprep.mubr.bf16.mxu0 %v9567_v34  ;;  %9572 = vst [vmem:[#allocation127_spill] sm:$0xff] %v6312_v1 }
 0x1ea   :  { %9569 = vst [vmem:[#allocation124_spill] sm:$0xff] %v6298_v62  ;;  %v772_v46 = vmax.f32 %v6298_v62, 0.0  ;;  %v6303_v58 = vadd.f32 %v4707_v42, %v6272_v13 }
 0x1ec   :  { %9570 = vst [vmem:[#allocation125_spill] sm:$0xff] %v6303_v58  ;;  %v773_v54 = vmax.f32 %v6303_v58, 0.0  ;;  %v4708_v3 = vpop.f32.mrb[28].mxu1 }
 0x1ed   :  { %v4709_v21 = vpop.f32.mrb[29].mxu1 }
 0x1ee   :  { %v4710_v27 = vadd.f32 %v4709_v21, %v4708_v3  ;;  %v4711_v32 = vpop.f32.mrb[30].mxu1  ;;  %v802_v7 = vpack.c.bf16 %v773_v54, %v772_v46 }
 0x1ef   :  { %v4712_v24 = vpop.f32.mrb[31].mxu1 }
 0x1f0   :  { %v6307_v14 = vadd.f32 %v4710_v27, %v6272_v13  ;;  %v4713_v57 = vadd.f32 %v4712_v24, %v4711_v32  ;;  %1046 = vmatmul.mubr.bf16.gmra.mrb[56].mxu0 %v802_v7  ;;  %4830 = vmatprep.mubr.bf16.mxu1 %v802_v7  ;;  %v6319_v32 = vpop.permute.xlu1 %2640  ;;  %v6321_v7 = vpop.permute.xlu0 %2552 }
 0x1f1   :  { %1055 = vmatprep.mubr.bf16.mxu0 %v9567_v34  ;;  %9574 = vst [vmem:[#allocation129_spill] sm:$0xff] %v6321_v7 }
 0x1f2   :  { %9571 = vst [vmem:[#allocation126_spill] sm:$0xff] %v6307_v14  ;;  %v774_v42 = vmax.f32 %v6307_v14, 0.0  ;;  %v6316_v15 = vadd.f32 %v4713_v57, %v6272_v13 }
 0x1f4   :  { %9573 = vst [vmem:[#allocation128_spill] sm:$0xff] %v6316_v15  ;;  %v775_v3 = vmax.f32 %v6316_v15, 0.0  ;;  %v4714_v46 = vpop.f32.mrb[32].mxu1  ;;  %v6334_v7 = vpop.permute.xlu0 %2560 }
 0x1f5   :  { %v4715_v54 = vpop.f32.mrb[33].mxu1  ;;  %9577 = vst [vmem:[#allocation132_spill] sm:$0xff] %v6334_v7 }
 0x1f6   :  { %v4716_v21 = vadd.f32 %v4715_v54, %v4714_v46  ;;  %v4717_v27 = vpop.f32.mrb[34].mxu1  ;;  %v803_v24 = vpack.c.bf16 %v775_v3, %v774_v42  ;;  %v6332_v46 = vpop.permute.xlu1 %2648 }
 0x1f7   :  { %v4718_v9 = vpop.f32.mrb[35].mxu1 }
 0x1f8   :  { %v6324_v55 = vadd.f32 %v4716_v21, %v6272_v13  ;;  %v4719_v1 = vadd.f32 %v4718_v9, %v4717_v27  ;;  %1056 = vmatmul.mubr.bf16.gmra.mrb[60].mxu0 %v803_v24  ;;  %4831 = vmatmul.mubr.bf16.gmra.mrb[84].mxu1 %v803_v24 }
 0x1f9   :  { %1065 = vmatprep.mubr.bf16.mxu0 %v9567_v34 }
 0x1fa   :  { %9575 = vst [vmem:[#allocation130_spill] sm:$0xff] %v6324_v55  ;;  %v776_v57 = vmax.f32 %v6324_v55, 0.0  ;;  %v6329_v15 = vadd.f32 %v4719_v1, %v6272_v13  ;;  %v6340_v1 = vpop.permute.xlu0 %2632  ;;  %v6346_v7 = vpop.permute.xlu1 %2656 }
 0x1fc   :  { %9576 = vst [vmem:[#allocation131_spill] sm:$0xff] %v6329_v15  ;;  %v777_v42 = vmax.f32 %v6329_v15, 0.0  ;;  %v4720_v3 = vpop.f32.mrb[36].mxu1 }
 0x1fd   :  { %v4721_v54 = vpop.f32.mrb[37].mxu1 }
 0x1fe   :  { %v4722_v21 = vadd.f32 %v4721_v54, %v4720_v3  ;;  %v4723_v58 = vpop.f32.mrb[38].mxu1  ;;  %v804_v9 = vpack.c.bf16 %v777_v42, %v776_v57 }
 0x1ff   :  { %v4724_v27 = vpop.f32.mrb[39].mxu1 }
 0x200   :  { %v6337_v24 = vadd.f32 %v4722_v21, %v6272_v13  ;;  %v4725_v19 = vadd.f32 %v4724_v27, %v4723_v58  ;;  %1066 = vmatmul.mubr.bf16.gmra.mrb[64].mxu0 %v804_v9  ;;  %4834 = vmatprep.mubr.bf16.mxu1 %v804_v9  ;;  %v6349_v9 = vpop.permute.xlu0 %2644 }
 0x201   :  { %1075 = vmatprep.mubr.bf16.mxu0 %v9567_v34 }
 0x202   :  { %9578 = vst [vmem:[#allocation133_spill] sm:$0xff] %v6337_v24  ;;  %v778_v15 = vmax.f32 %v6337_v24, 0.0  ;;  %v6344_v55 = vadd.f32 %v4725_v19, %v6272_v13  ;;  %v6354_v24 = vpop.permute.xlu1 %2664 }
 0x204   :  { %9579 = vst [vmem:[#allocation134_spill] sm:$0xff] %v6344_v55  ;;  %v779_v57 = vmax.f32 %v6344_v55, 0.0  ;;  %v4726_v42 = vpop.f32.mrb[40].mxu1 }
 0x205   :  { %v4727_v3 = vpop.f32.mrb[41].mxu1 }
 0x206   :  { %v4728_v54 = vadd.f32 %v4727_v3, %v4726_v42  ;;  %v4729_v21 = vpop.f32.mrb[42].mxu1  ;;  %v805_v58 = vpack.c.bf16 %v779_v57, %v778_v15  ;;  %v6362_v3 = vpop.permute.xlu0 %2652 }
 0x207   :  { %v4730_v27 = vpop.f32.mrb[43].mxu1 }
 0x208   :  { %v6352_v23 = vadd.f32 %v4728_v54, %v6272_v13  ;;  %v4731_v14 = vadd.f32 %v4730_v27, %v4729_v21  ;;  %1076 = vmatmul.mubr.bf16.gmra.mrb[68].mxu0 %v805_v58  ;;  %4835 = vmatmul.mubr.bf16.gmra.mrb[88].mxu1 %v805_v58  ;;  %v6364_v27 = vpop.permute.xlu1 %2672 }
 0x209   :  { %1085 = vmatprep.mubr.bf16.mxu0 %v9567_v34 }
 0x20a   :  { %9580 = vst [vmem:[#allocation135_spill] sm:$0xff] %v6352_v23  ;;  %v780_v19 = vmax.f32 %v6352_v23, 0.0  ;;  %v6359_v55 = vadd.f32 %v4731_v14, %v6272_v13  ;;  %v6374_v23 = vpop.permute.xlu0 %2660 }
 0x20c   :  { %9581 = vst [vmem:[#allocation136_spill] sm:$0xff] %v6359_v55  ;;  %v781_v15 = vmax.f32 %v6359_v55, 0.0  ;;  %v4732_v57 = vpop.f32.mrb[44].mxu1 }
 0x20d   :  { %v4733_v42 = vpop.f32.mrb[45].mxu1 }
 0x20e   :  { %v4734_v54 = vadd.f32 %v4733_v42, %v4732_v57  ;;  %v4735_v60 = vpop.f32.mrb[46].mxu1  ;;  %v806_v21 = vpack.c.bf16 %v781_v15, %v780_v19  ;;  %v6377_v57 = vpop.permute.xlu1 %2680 }
 0x20f   :  { %v4736_v40 = vpop.f32.mrb[47].mxu1 }
 0x210   :  { %v6367_v58 = vadd.f32 %v4734_v54, %v6272_v13  ;;  %v4737_v18 = vadd.f32 %v4736_v40, %v4735_v60  ;;  %1086 = vmatmul.mubr.bf16.gmra.mrb[72].mxu0 %v806_v21  ;;  %4838 = vmatprep.mubr.bf16.mxu1 %v806_v21 }
 0x211   :  { %1095 = vmatprep.mubr.bf16.mxu0 %v9567_v34 }
 0x212   :  { %9582 = vst [vmem:[#allocation137_spill] sm:$0xff] %v6367_v58  ;;  %v782_v14 = vmax.f32 %v6367_v58, 0.0  ;;  %v6372_v55 = vadd.f32 %v4737_v18, %v6272_v13  ;;  %v6383_v18 = vpop.permute.xlu0 %2668  ;;  %v6389_v11 = vpop.permute.xlu1 %2688 }
 0x213   :  { %9586 = vst [vmem:[#allocation141_spill] sm:$0xff] %v6389_v11 }
 0x214   :  { %9583 = vst [vmem:[#allocation138_spill] sm:$0xff] %v6372_v55  ;;  %v783_v19 = vmax.f32 %v6372_v55, 0.0  ;;  %v4738_v15 = vpop.f32.mrb[48].mxu1 }
 0x215   :  { %v4739_v42 = vpop.f32.mrb[49].mxu1 }
 0x216   :  { %v4740_v54 = vadd.f32 %v4739_v42, %v4738_v15  ;;  %v4741_v56 = vpop.f32.mrb[50].mxu1  ;;  %v807_v40 = vpack.c.bf16 %v783_v19, %v782_v14 }
 0x217   :  { %v4742_v60 = vpop.f32.mrb[51].mxu1 }
 0x218   :  { %v6380_v21 = vadd.f32 %v4740_v54, %v6272_v13  ;;  %v4743_v20 = vadd.f32 %v4742_v60, %v4741_v56  ;;  %1096 = vmatmul.mubr.bf16.gmra.mrb[76].mxu0 %v807_v40  ;;  %4839 = vmatmul.mubr.bf16.gmra.mrb[92].mxu1 %v807_v40  ;;  %v6392_v40 = vpop.permute.xlu0 %2676 }
 0x219   :  { %1105 = vmatprep.mubr.bf16.mxu0 %v9567_v34 }
 0x21a   :  { %9584 = vst [vmem:[#allocation139_spill] sm:$0xff] %v6380_v21  ;;  %v784_v55 = vmax.f32 %v6380_v21, 0.0  ;;  %v6387_v58 = vadd.f32 %v4743_v20, %v6272_v13  ;;  %v6397_v21 = vpop.permute.xlu1 %2696 }
 0x21b   :  { %9588 = vst [vmem:[#allocation143_spill] sm:$0xff] %v6397_v21 }
 0x21c   :  { %9585 = vst [vmem:[#allocation140_spill] sm:$0xff] %v6387_v58  ;;  %v785_v14 = vmax.f32 %v6387_v58, 0.0  ;;  %v4744_v19 = vpop.f32.mrb[52].mxu1 }
 0x21d   :  { %v4745_v15 = vpop.f32.mrb[53].mxu1 }
 0x21e   :  { %v4746_v42 = vadd.f32 %v4745_v15, %v4744_v19  ;;  %v4747_v54 = vpop.f32.mrb[54].mxu1  ;;  %v808_v56 = vpack.c.bf16 %v785_v14, %v784_v55  ;;  %v6405_v15 = vpop.permute.xlu0 %2684 }
 0x21f   :  { %v4748_v60 = vpop.f32.mrb[55].mxu1  ;;  %9590 = vst [vmem:[#allocation145_spill] sm:$0xff] %v6405_v15 }
 0x220   :  { %v6395_v62 = vadd.f32 %v4746_v42, %v6272_v13  ;;  %v4749_v31 = vadd.f32 %v4748_v60, %v4747_v54  ;;  %1106 = vmatmul.mubr.bf16.gmra.mrb[80].mxu0 %v808_v56  ;;  %4842 = vmatprep.mubr.bf16.mxu1 %v808_v56  ;;  %v6407_v42 = vpop.permute.xlu1 %2704 }
 0x221   :  { %1115 = vmatprep.mubr.bf16.mxu0 %v9567_v34  ;;  %9591 = vst [vmem:[#allocation146_spill] sm:$0xff] %v6407_v42 }
 0x222   :  { %9587 = vst [vmem:[#allocation142_spill] sm:$0xff] %v6395_v62  ;;  %v786_v20 = vmax.f32 %v6395_v62, 0.0  ;;  %v6402_v58 = vadd.f32 %v4749_v31, %v6272_v13  ;;  %v6417_v62 = vpop.permute.xlu0 %2692 }
 0x223   :  { %9594 = vst [vmem:[#allocation149_spill] sm:$0xff] %v6417_v62 }
 0x224   :  { %9589 = vst [vmem:[#allocation144_spill] sm:$0xff] %v6402_v58  ;;  %v787_v55 = vmax.f32 %v6402_v58, 0.0  ;;  %v4750_v14 = vpop.f32.mrb[56].mxu1 }
 0x225   :  { %v4751_v19 = vpop.f32.mrb[57].mxu1 }
 0x226   :  { %v4752_v54 = vadd.f32 %v4751_v19, %v4750_v14  ;;  %v4753_v60 = vpop.f32.mrb[58].mxu1  ;;  %v809_v59 = vpack.c.bf16 %v787_v55, %v786_v20  ;;  %v6420_v19 = vpop.permute.xlu1 %2712 }
 0x227   :  { %v4754_v61 = vpop.f32.mrb[59].mxu1  ;;  %9595 = vst [vmem:[#allocation150_spill] sm:$0xff] %v6420_v19 }
 0x228   :  { %v6410_v56 = vadd.f32 %v4752_v54, %v6272_v13  ;;  %v4755_v0 = vadd.f32 %v4754_v61, %v4753_v60  ;;  %1116 = vmatmul.mubr.bf16.gmra.mrb[84].mxu0 %v809_v59  ;;  %4843 = vmatmul.mubr.bf16.gmra.mrb[96].mxu1 %v809_v59 }
 0x229   :  { %1125 = vmatprep.mubr.bf16.mxu0 %v9567_v34 }
 0x22a   :  { %9592 = vst [vmem:[#allocation147_spill] sm:$0xff] %v6410_v56  ;;  %v788_v31 = vmax.f32 %v6410_v56, 0.0  ;;  %v6415_v58 = vadd.f32 %v4755_v0, %v6272_v13  ;;  %v6425_v0 = vpop.permute.xlu0 %2700  ;;  %v6428_v56 = vpop.permute.xlu1 %2720 }
 0x22b   :  { %9597 = vst [vmem:[#allocation152_spill] sm:$0xff] %v6425_v0  ;;  %9598 = vst [vmem:[#allocation153_spill] sm:$0xff] %v6428_v56 }
 0x22c   :  { %9593 = vst [vmem:[#allocation148_spill] sm:$0xff] %v6415_v58  ;;  %v789_v14 = vmax.f32 %v6415_v58, 0.0  ;;  %v4756_v20 = vpop.f32.mrb[60].mxu1 }
 0x22d   :  { %v4757_v55 = vpop.f32.mrb[61].mxu1 }
 0x22e   :  { %v4758_v54 = vadd.f32 %v4757_v55, %v4756_v20  ;;  %v4759_v52 = vpop.f32.mrb[62].mxu1  ;;  %v810_v61 = vpack.c.bf16 %v789_v14, %v788_v31  ;;  %v6437_v50 = vpop.permute.xlu1 %2728 }
 0x22f   :  { %v4760_v60 = vpop.f32.mrb[63].mxu1  ;;  %9601 = vst [vmem:[#allocation156_spill] sm:$0xff] %v6437_v50 }
 0x230   :  { %v6423_v59 = vadd.f32 %v4758_v54, %v6272_v13  ;;  %v4761_v29 = vadd.f32 %v4760_v60, %v4759_v52  ;;  %1126 = vmatmul.mubr.bf16.gmra.mrb[88].mxu0 %v810_v61  ;;  %4846 = vmatprep.mubr.bf16.mxu1 %v810_v61  ;;  %v6435_v60 = vpop.permute.xlu0 %2708 }
 0x231   :  { %1135 = vmatprep.mubr.bf16.mxu0 %v9567_v34  ;;  %9600 = vst [vmem:[#allocation155_spill] sm:$0xff] %v6435_v60 }
 0x232   :  { %9596 = vst [vmem:[#allocation151_spill] sm:$0xff] %v6423_v59  ;;  %v790_v58 = vmax.f32 %v6423_v59, 0.0  ;;  %v6432_v8 = vadd.f32 %v4761_v29, %v6272_v13  ;;  %v6450_v59 = vpop.permute.xlu1 %2736 }
 0x233   :  { %9605 = vst [vmem:[#allocation160_spill] sm:$0xff] %v6450_v59 }
 0x234   :  { %9599 = vst [vmem:[#allocation154_spill] sm:$0xff] %v6432_v8  ;;  %v791_v31 = vmax.f32 %v6432_v8, 0.0  ;;  %v4762_v14 = vpop.f32.mrb[64].mxu1 }
 0x235   :  { %v4763_v20 = vpop.f32.mrb[65].mxu1 }
 0x236   :  { %v4764_v55 = vadd.f32 %v4763_v20, %v4762_v14  ;;  %v4765_v54 = vpop.f32.mrb[66].mxu1  ;;  %v811_v52 = vpack.c.bf16 %v791_v31, %v790_v58  ;;  %v6448_v14 = vpop.permute.xlu0 %2716 }
 0x237   :  { %v4766_v61 = vpop.f32.mrb[67].mxu1  ;;  %9604 = vst [vmem:[#allocation159_spill] sm:$0xff] %v6448_v14  ;;  %v6462_v39 = vpop.permute.xlu1 %2744 }
 0x238   :  { %v6440_v47 = vadd.f32 %v4764_v55, %v6272_v13  ;;  %v4767_v45 = vadd.f32 %v4766_v61, %v4765_v54  ;;  %1136 = vmatmul.mubr.bf16.gmra.mrb[92].mxu0 %v811_v52  ;;  %4847 = vmatmul.mubr.bf16.gmra.mrb[100].mxu1 %v811_v52  ;;  %9609 = vst [vmem:[#allocation164_spill] sm:$0xff] %v6462_v39 }
 0x239   :  { %1145 = vmatprep.mubr.bf16.mxu0 %v9567_v34 }
 0x23a   :  { %9602 = vst [vmem:[#allocation157_spill] sm:$0xff] %v6440_v47  ;;  %v792_v29 = vmax.f32 %v6440_v47, 0.0  ;;  %v6445_v8 = vadd.f32 %v4767_v45, %v6272_v13  ;;  %v6460_v47 = vpop.permute.xlu0 %2724 }
 0x23b   :  { %9608 = vst [vmem:[#allocation163_spill] sm:$0xff] %v6460_v47 }
 0x23c   :  { %9603 = vst [vmem:[#allocation158_spill] sm:$0xff] %v6445_v8  ;;  %v793_v58 = vmax.f32 %v6445_v8, 0.0  ;;  %v4768_v31 = vpop.f32.mrb[68].mxu1 }
 0x23d   :  { %v4769_v20 = vpop.f32.mrb[69].mxu1 }
 0x23e   :  { %v4770_v55 = vadd.f32 %v4769_v20, %v4768_v31  ;;  %v4771_v49 = vpop.f32.mrb[70].mxu1  ;;  %v812_v54 = vpack.c.bf16 %v793_v58, %v792_v29 }
 0x23f   :  { %v4772_v61 = vpop.f32.mrb[71].mxu1 }
 0x240   :  { %v6453_v52 = vadd.f32 %v4770_v55, %v6272_v13  ;;  %v4773_v4 = vadd.f32 %v4772_v61, %v4771_v49  ;;  %1146 = vmatmul.mubr.bf16.gmra.mrb[96].mxu0 %v812_v54  ;;  %4850 = vmatprep.mubr.bf16.mxu1 %v812_v54 }
 0x241   :  { %1155 = vmatprep.mubr.bf16.mxu0 %v9567_v34 }
 0x242   :  { %9606 = vst [vmem:[#allocation161_spill] sm:$0xff] %v6453_v52  ;;  %v794_v45 = vmax.f32 %v6453_v52, 0.0  ;;  %v6458_v8 = vadd.f32 %v4773_v4, %v6272_v13  ;;  %v6469_v4 = vpop.permute.xlu1 %2752  ;;  %v6471_v52 = vpop.permute.xlu0 %2732 }
 0x243   :  { %9611 = vst [vmem:[#allocation166_spill] sm:$0xff] %v6469_v4  ;;  %9612 = vst [vmem:[#allocation167_spill] sm:$0xff] %v6471_v52 }
 0x244   :  { %9607 = vst [vmem:[#allocation162_spill] sm:$0xff] %v6458_v8  ;;  %v795_v29 = vmax.f32 %v6458_v8, 0.0  ;;  %v4774_v58 = vpop.f32.mrb[72].mxu1 }
 0x245   :  { %v4775_v31 = vpop.f32.mrb[73].mxu1 }
 0x246   :  { %v4776_v20 = vadd.f32 %v4775_v31, %v4774_v58  ;;  %v4777_v55 = vpop.f32.mrb[74].mxu1  ;;  %v813_v49 = vpack.c.bf16 %v795_v29, %v794_v45  ;;  %v6478_v31 = vpop.permute.xlu1 %2952 }
 0x247   :  { %v4778_v61 = vpop.f32.mrb[75].mxu1  ;;  %v6480_v37 = vpop.permute.xlu0 %2740 }
 0x248   :  { %v6466_v54 = vadd.f32 %v4776_v20, %v6272_v13  ;;  %v4779_v44 = vadd.f32 %v4778_v61, %v4777_v55  ;;  %1156 = vmatmul.mubr.bf16.gmra.mrb[100].mxu0 %v813_v49  ;;  %4851 = vmatmul.mubr.bf16.gmra.mrb[104].mxu1 %v813_v49  ;;  %9614 = vst [vmem:[#allocation169_spill] sm:$0xff] %v6480_v37 }
 0x249   :  { %1165 = vmatprep.mubr.bf16.mxu0 %v9567_v34 }
 0x24a   :  { %9610 = vst [vmem:[#allocation165_spill] sm:$0xff] %v6466_v54  ;;  %v796_v8 = vmax.f32 %v6466_v54, 0.0  ;;  %v6475_v39 = vadd.f32 %v4779_v44, %v6272_v13  ;;  %v6490_v54 = vpop.permute.xlu1 %2956 }
 0x24c   :  { %9613 = vst [vmem:[#allocation168_spill] sm:$0xff] %v6475_v39  ;;  %v797_v45 = vmax.f32 %v6475_v39, 0.0  ;;  %v4780_v29 = vpop.f32.mrb[76].mxu1 }
 0x24d   :  { %v4781_v58 = vpop.f32.mrb[77].mxu1 }
 0x24e   :  { %v4782_v20 = vadd.f32 %v4781_v58, %v4780_v29  ;;  %v4783_v55 = vpop.f32.mrb[78].mxu1  ;;  %v814_v49 = vpack.c.bf16 %v797_v45, %v796_v8  ;;  %v6493_v45 = vpop.permute.xlu0 %2748 }
 0x24f   :  { %v4784_v61 = vpop.f32.mrb[79].mxu1  ;;  %9617 = vst [vmem:[#allocation172_spill] sm:$0xff] %v6493_v45  ;;  %v6495_v58 = vpop.permute.xlu1 %2964 }
 0x250   :  { %v6483_v4 = vadd.f32 %v4782_v20, %v6272_v13  ;;  %v4785_v38 = vadd.f32 %v4784_v61, %v4783_v55  ;;  %1166 = vmatmul.mubr.bf16.gmra.mrb[104].mxu0 %v814_v49  ;;  %4854 = vmatprep.mubr.bf16.mxu1 %v814_v49 }
 0x251   :  { %1175 = vmatprep.mubr.bf16.mxu0 %v9567_v34 }
 0x252   :  { %9615 = vst [vmem:[#allocation170_spill] sm:$0xff] %v6483_v4  ;;  %v798_v44 = vmax.f32 %v6483_v4, 0.0  ;;  %v6488_v39 = vadd.f32 %v4785_v38, %v6272_v13  ;;  %v2949_v20 = vpop.permute.xlu0 %2948 }
 0x253   :  { %v6497_v55 = vpop.permute.xlu1 %2972 }
 0x254   :  { %9616 = vst [vmem:[#allocation171_spill] sm:$0xff] %v6488_v39  ;;  %v799_v8 = vmax.f32 %v6488_v39, 0.0 }
 0x256   :  { %v815_v29 = vpack.c.bf16 %v799_v8, %v798_v44  ;;  %v6499_v34 = vpop.permute.xlu0 %2960 }
 0x257   :  { %v6501_v49 = vpop.permute.xlu1 %2980 }
 0x258   :  { %1176 = vmatmul.mubr.bf16.gmra.mrb[108].mxu0 %v815_v29  ;;  %4855 = vmatmul.mubr.bf16.gmra.mrb[108].mxu1 %v815_v29 }
 0x25a   :  { %v6503_v38 = vpop.permute.xlu0 %2968 }
 0x25b   :  { %v6505_v13 = vpop.permute.xlu1 %2988 }
 0x25e   :  { %v6507_v61 = vpop.permute.xlu0 %2976 }
 0x25f   :  { %v6509_v39 = vpop.permute.xlu1 %2996 }
 0x262   :  { %v6511_v44 = vpop.permute.xlu0 %2984 }
 0x263   :  { %v6513_v8 = vpop.permute.xlu1 %3004 }
 0x266   :  { %v6515_v29 = vpop.permute.xlu0 %2992 }
 0x267   :  { %v6517_v4 = vpop.permute.xlu1 %3012 }
 0x268   :  { %9618 = vst [vmem:[#allocation173_spill] sm:$0xff] %v6517_v4 }
 0x26a   :  { %v6519_v45 = vpop.permute.xlu0 %3000 }
 0x26b   :  { %v6521_v37 = vpop.permute.xlu1 %3020 }
 0x26c   :  { %9619 = vst [vmem:[#allocation174_spill] sm:$0xff] %v6521_v37 }
 0x26e   :  { %v6523_v59 = vpop.permute.xlu0 %3008 }
 0x26f   :  { %9620 = vst [vmem:[#allocation175_spill] sm:$0xff] %v6523_v59  ;;  %v6525_v51 = vpop.permute.xlu1 %3028 }
 0x270   :  { %9621 = vst [vmem:[#allocation176_spill] sm:$0xff] %v6525_v51 }
 0x272   :  { %v6527_v52 = vpop.permute.xlu0 %3016 }
 0x273   :  { %9622 = vst [vmem:[#allocation177_spill] sm:$0xff] %v6527_v52  ;;  %v6529_v26 = vpop.permute.xlu1 %3036 }
 0x274   :  { %9623 = vst [vmem:[#allocation178_spill] sm:$0xff] %v6529_v26  ;;  %v848_v26 = vld [vmem:[%s9328_s6] sm:$0x7] }
 0x276   :  { %v6531_v50 = vpop.permute.xlu0 %3024 }
 0x277   :  { %9624 = vst [vmem:[#allocation179_spill] sm:$0xff] %v6531_v50  ;;  %v6533_v28 = vpop.permute.xlu1 %3044 }
 0x278   :  { %9625 = vst [vmem:[#allocation180_spill] sm:$0xff] %v6533_v28 }
 0x27a   :  { %v6535_v47 = vpop.permute.xlu0 %3032 }
 0x27b   :  { %9626 = vst [vmem:[#allocation181_spill] sm:$0xff] %v6535_v47  ;;  %v6537_v63 = vpop.permute.xlu1 %3052  ;;  %v9634_v47 = vsub.s32 0, %v5668_v22 }
 0x27c   :  { %9627 = vst [vmem:[#allocation182_spill] sm:$0xff] %v6537_v63 }
 0x27d   :  { %v6556_v63 = vrot.slane %v848_v26, %v9634_v47 }
 0x27e   :  { %v6539_v56 = vpop.permute.xlu0 %3040 }
 0x27f   :  { %9628 = vst [vmem:[#allocation183_spill] sm:$0xff] %v6539_v56  ;;  %v6541_v12 = vpop.permute.xlu1 %3060  ;;  %v9635_v56 = vsub.s32 1, %v5668_v22 }
 0x280   :  { %9629 = vst [vmem:[#allocation184_spill] sm:$0xff] %v6541_v12 }
 0x281   :  { %v6560_v12 = vrot.slane %v848_v26, %v9635_v56 }
 0x282   :  { %v6543_v14 = vpop.permute.xlu0 %3048 }
 0x283   :  { %9630 = vst [vmem:[#allocation185_spill] sm:$0xff] %v6543_v14  ;;  %v6545_v53 = vpop.permute.xlu1 %3068 }
 0x284   :  { %9631 = vst [vmem:[#allocation186_spill] sm:$0xff] %v6545_v53 }
 0x286   :  { %v6547_v19 = vpop.permute.xlu0 %3056 }
 0x287   :  { %9632 = vst [vmem:[#allocation187_spill] sm:$0xff] %v6547_v19  ;;  %v3269_v5 = vpop.permute.xlu1 %3268 }
 0x28a   :  { %v6552_v28 = vpop.permute.xlu0 %3064 }
 0x28b   :  { %9633 = vst [vmem:[#allocation188_spill] sm:$0xff] %v6552_v28  ;;  %v6562_v60 = vpop.permute.xlu1 %3276 }
 0x28e   :  { %v6566_v50 = vpop.permute.xlu0 %3072 }
 0x28f   :  { %9636 = vst [vmem:[#allocation189_spill] sm:$0xff] %v6566_v50 }
 0x292   :  { %v3273_v10 = vpop.permute.xlu0 %3272 }
 0x2b3   :  { %v1027_v14 = vpop.f32.mrb[48].mxu0 }
 0x2b4   :  { %v1028_v53 = vadd.f32 %v1027_v14, %v6556_v63  ;;  %v1029_v19 = vpop.f32.mrb[49].mxu0  ;;  %v6577_v14 = vpop.permute.xlu1 %3280 }
 0x2b5   :  { %v1030_v16 = vadd.f32 %v1029_v19, %v6560_v12  ;;  %v1031_v51 = vpop.f32.mrb[50].mxu0 }
 0x2b6   :  { %v6568_v28 = vand.u32 2147483647, %v1028_v53  ;;  %v1033_v42 = vpop.f32.mrb[51].mxu0  ;;  %v1032_v22 = vadd.f32 %v1031_v51, %v6556_v63 }
 0x2b7   :  { %v6570_v47 = vand.u32 2147483647, %v1030_v16 }
 0x2b8   :  { %9637 = vst [vmem:[#allocation190_spill] sm:$0xff] %v6568_v28  ;;  %v1923_v26 = vmul.f32 %v5629_v30, %v6568_v28  ;;  %v1603_v56 = vmul.f32 %v5533_v41, %v6568_v28  ;;  %v6583_v19 = vand.u32 2147483647, %v1032_v22  ;;  %v2243_v41 = vmul.f32 %v5859_v48, %v6568_v28  ;;  %v6603_v28 = vpop.permute.xlu0 %3284 }
 0x2b9   :  { %9638 = vst [vmem:[#allocation191_spill] sm:$0xff] %v6570_v47  ;;  %v3075_v30 = vmul.f32 %v2949_v20, %v6570_v47  ;;  %v1034_v22 = vadd.f32 %v1033_v42, %v6560_v12  ;;  %v2755_v48 = vmul.f32 %v6285_v2, %v6570_v47  ;;  %v3395_v42 = vmul.f32 %v3269_v5, %v6570_v47 }
 0x2ba   :  { %1987 = vrot.lane.b32.xlu1 %v1923_v26, %s5114_s20  ;;  %1667 = vrot.lane.b32.xlu0 %v1603_v56, %s5115_s21  ;;  %9640 = vst [vmem:[#allocation193_spill] sm:$0xff] %v6583_v19  ;;  %v1604_v20 = vmul.f32 %v5539_v43, %v6583_v19  ;;  %v2244_v43 = vmul.f32 %v5903_v6, %v6583_v19 }
 0x2bb   :  { %v1037_v53 = vpop.f32.mrb[52].mxu0  ;;  %v6581_v16 = vpop.f32.mrb[80].mxu1 }
 0x2bc   :  { %9639 = vst [vmem:[#allocation192_spill] sm:$0xff] %v6581_v16  ;;  %v1039_v51 = vpop.f32.mrb[53].mxu0  ;;  %v6588_v50 = vpop.f32.mrb[81].mxu1 }
 0x2bd   :  { %9641 = vst [vmem:[#allocation194_spill] sm:$0xff] %v6588_v50  ;;  %v1041_v0 = vpop.f32.mrb[54].mxu0  ;;  %v6590_v35 = vpop.f32.mrb[82].mxu1 }
 0x2be   :  { %9642 = vst [vmem:[#allocation195_spill] sm:$0xff] %v6590_v35  ;;  %v1043_v26 = vpop.f32.mrb[55].mxu0  ;;  %3139 = vrot.lane.b32.xlu1 %v3075_v30, %s5114_s20  ;;  %2307 = vrot.lane.b32.xlu0 %v2243_v41, %s5116_s22  ;;  %v6594_v56 = vpop.f32.mrb[83].mxu1  ;;  %v6609_v41 = vand.u32 2147483647, %v1034_v22 }
 0x2bf   :  { %9643 = vst [vmem:[#allocation196_spill] sm:$0xff] %v6594_v56  ;;  %v6607_v35 = vpop.permute.xlu1 %3288  ;;  %v1924_v56 = vmul.f32 %v5623_v17, %v6583_v19  ;;  %v6629_v6 = vpop.permute.xlu0 %3292 }
 0x2c0   :  { %9644 = vst [vmem:[#allocation197_spill] sm:$0xff] %v6609_v41  ;;  %v2756_v22 = vmul.f32 %v6340_v1, %v6609_v41  ;;  %v3396_v17 = vmul.f32 %v3273_v10, %v6609_v41  ;;  %v3076_v47 = vmul.f32 %v6478_v31, %v6609_v41  ;;  %v1042_v10 = vadd.f32 %v1041_v0, %v6556_v63  ;;  %v9652_v0 = vld [vmem:[#allocation60_spill] sm:$0xff] }
 0x2c2   :  { %1669 = vrot.lane.b32.xlu1 %v1604_v20, %s5115_s21  ;;  %2819 = vrot.lane.b32.xlu0 %v2755_v48, %s5115_s21  ;;  %v1038_v48 = vadd.f32 %v1037_v53, %v6556_v63  ;;  %v1040_v53 = vadd.f32 %v1039_v51, %v6560_v12 }
 0x2c3   :  { %v6605_v30 = vpop.f32.mrb[56].mxu0  ;;  %v6627_v50 = vpop.permute.xlu1 %3296 }
 0x2c4   :  { %v6611_v16 = vpop.f32.mrb[57].mxu0 }
 0x2c5   :  { %v6616_v2 = vpop.f32.mrb[58].mxu0 }
 0x2c6   :  { %v6618_v20 = vpop.f32.mrb[59].mxu0  ;;  %2309 = vrot.lane.b32.xlu1 %v2244_v43, %s5116_s22  ;;  %3459 = vrot.lane.b32.xlu0 %v3395_v42, %s5116_s22  ;;  %v6637_v42 = vand.u32 2147483647, %v1038_v48  ;;  %v6657_v48 = vand.u32 2147483647, %v1040_v53 }
 0x2c7   :  { %v6672_v53 = vand.u32 2147483647, %v1042_v10  ;;  %v9653_v10 = vld [vmem:[#allocation2_spill] sm:$0xff] }
 0x2c8   :  { %9646 = vst [vmem:[#allocation199_spill] sm:$0xff] %v6637_v42  ;;  %9650 = vst [vmem:[#allocation203_spill] sm:$0xff] %v6657_v48  ;;  %v1925_v31 = vmul.f32 %v5627_v25, %v6637_v42  ;;  %v1605_v41 = vmul.f32 %v5528_v33, %v6637_v42  ;;  %v3077_v25 = vmul.f32 %v6490_v54, %v6657_v48 }
 0x2c9   :  { %9651 = vst [vmem:[#allocation204_spill] sm:$0xff] %v6672_v53  ;;  %v2245_v33 = vmul.f32 %v9652_v0, %v6637_v42  ;;  %v2757_v52 = vmul.f32 %v6309_v36, %v6657_v48  ;;  %v3397_v36 = vmul.f32 %v6562_v60, %v6657_v48  ;;  %v9660_v48 = vld [vmem:[#allocation32_spill] sm:$0xff] }
 0x2ca   :  { %2821 = vrot.lane.b32.xlu1 %v2756_v22, %s5115_s21  ;;  %1989 = vrot.lane.b32.xlu0 %v1924_v56, %s5114_s20 }
 0x2cb   :  { %v6633_v5 = vpop.f32.mrb[60].mxu0  ;;  %v6635_v43 = vpop.f32.mrb[84].mxu1 }
 0x2cc   :  { %9645 = vst [vmem:[#allocation198_spill] sm:$0xff] %v6635_v43  ;;  %v6640_v1 = vpop.f32.mrb[61].mxu0  ;;  %v6645_v19 = vpop.f32.mrb[85].mxu1 }
 0x2cd   :  { %9647 = vst [vmem:[#allocation200_spill] sm:$0xff] %v6645_v19  ;;  %v6647_v22 = vpop.f32.mrb[62].mxu0  ;;  %v6649_v56 = vpop.f32.mrb[86].mxu1  ;;  %v1606_v19 = vmul.f32 %v9653_v10, %v6672_v53  ;;  %v9656_v10 = vld [vmem:[#allocation62_spill] sm:$0xff] }
 0x2ce   :  { %9648 = vst [vmem:[#allocation201_spill] sm:$0xff] %v6649_v56  ;;  %v6651_v37 = vpop.f32.mrb[63].mxu0  ;;  %3461 = vrot.lane.b32.xlu1 %v3396_v17, %s5116_s22  ;;  %3141 = vrot.lane.b32.xlu0 %v3076_v47, %s5114_s20  ;;  %v6655_v51 = vpop.f32.mrb[87].mxu1  ;;  %v2246_v42 = vmul.f32 %v9656_v10, %v6672_v53  ;;  %v1048_v10 = vadd.f32 %v6605_v30, %v6556_v63 }
 0x2cf   :  { %9649 = vst [vmem:[#allocation202_spill] sm:$0xff] %v6655_v51  ;;  %v6666_v56 = vpop.permute.xlu0 %3300  ;;  %v6670_v47 = vpop.permute.xlu1 %3304  ;;  %v1050_v30 = vadd.f32 %v6611_v16, %v6560_v12  ;;  %v1052_v16 = vadd.f32 %v6616_v2, %v6556_v63 }
 0x2d2   :  { %1991 = vrot.lane.b32.xlu1 %v1925_v31, %s5114_s20  ;;  %1671 = vrot.lane.b32.xlu0 %v1605_v41, %s5115_s21  ;;  %v1044_v41 = vadd.f32 %v1043_v26, %v6560_v12 }
 0x2d3   :  { %v6668_v17 = vpop.f32.mrb[64].mxu0  ;;  %v6691_v54 = vpop.permute.xlu1 %3312 }
 0x2d4   :  { %v6674_v43 = vpop.f32.mrb[65].mxu0  ;;  %v6693_v21 = vpop.permute.xlu0 %3308 }
 0x2d5   :  { %v6680_v51 = vpop.f32.mrb[66].mxu0 }
 0x2d6   :  { %v6682_v31 = vpop.f32.mrb[67].mxu0  ;;  %3143 = vrot.lane.b32.xlu1 %v3077_v25, %s5114_s20  ;;  %2311 = vrot.lane.b32.xlu0 %v2245_v33, %s5116_s22  ;;  %v6701_v33 = vand.u32 2147483647, %v1044_v41 }
 0x2d8   :  { %9655 = vst [vmem:[#allocation2_spill] sm:$0xff] %v6701_v33  ;;  %v2758_v60 = vmul.f32 %v6319_v32, %v6701_v33  ;;  %v3398_v32 = vmul.f32 %v6577_v14, %v6701_v33  ;;  %v9664_v14 = vld [vmem:[#allocation5_spill] sm:$0xff] }
 0x2da   :  { %1673 = vrot.lane.b32.xlu1 %v1606_v19, %s5115_s21  ;;  %2823 = vrot.lane.b32.xlu0 %v2757_v52, %s5115_s21 }
 0x2db   :  { %v6697_v0 = vpop.f32.mrb[68].mxu0  ;;  %v6699_v25 = vpop.f32.mrb[88].mxu1 }
 0x2dc   :  { %9654 = vst [vmem:[#allocation60_spill] sm:$0xff] %v6699_v25  ;;  %v6703_v26 = vpop.f32.mrb[69].mxu0  ;;  %v6709_v62 = vpop.f32.mrb[89].mxu1  ;;  %v1926_v25 = vmul.f32 %v9660_v48, %v6672_v53  ;;  %v3078_v48 = vmul.f32 %v6499_v34, %v6701_v33  ;;  %v9663_v53 = vld [vmem:[#allocation31_spill] sm:$0xff] }
 0x2dd   :  { %9657 = vst [vmem:[#allocation62_spill] sm:$0xff] %v6709_v62  ;;  %v6711_v4 = vpop.f32.mrb[70].mxu0  ;;  %v6713_v19 = vpop.f32.mrb[90].mxu1 }
 0x2de   :  { %9658 = vst [vmem:[#allocation205_spill] sm:$0xff] %v6713_v19  ;;  %v6715_v52 = vpop.f32.mrb[71].mxu0  ;;  %2313 = vrot.lane.b32.xlu1 %v2246_v42, %s5116_s22  ;;  %3463 = vrot.lane.b32.xlu0 %v3397_v36, %s5116_s22  ;;  %v6719_v41 = vpop.f32.mrb[91].mxu1 }
 0x2df   :  { %9659 = vst [vmem:[#allocation206_spill] sm:$0xff] %v6719_v41  ;;  %v6729_v19 = vpop.permute.xlu0 %3316  ;;  %v6733_v36 = vpop.permute.xlu1 %3320  ;;  %v6735_v41 = vand.u32 2147483647, %v1048_v10  ;;  %v6751_v10 = vand.u32 2147483647, %v1050_v30 }
 0x2e1   :  { %9661 = vst [vmem:[#allocation32_spill] sm:$0xff] %v6735_v41  ;;  %9662 = vst [vmem:[#allocation207_spill] sm:$0xff] %v6751_v10  ;;  %v1927_v59 = vmul.f32 %v9663_v53, %v6735_v41  ;;  %v1607_v11 = vmul.f32 %v9664_v14, %v6735_v41  ;;  %v3079_v53 = vmul.f32 %v6495_v58, %v6751_v10  ;;  %v9669_v14 = vld [vmem:[#allocation63_spill] sm:$0xff] }
 0x2e2   :  { %2825 = vrot.lane.b32.xlu1 %v2758_v60, %s5115_s21  ;;  %1993 = vrot.lane.b32.xlu0 %v1926_v25, %s5114_s20  ;;  %v1054_v58 = vadd.f32 %v6618_v20, %v6560_v12  ;;  %v9678_v20 = vld [vmem:[#allocation64_spill] sm:$0xff] }
 0x2e3   :  { %v6731_v42 = vpop.f32.mrb[72].mxu0  ;;  %v6759_v34 = vpop.permute.xlu1 %3328 }
 0x2e4   :  { %v6739_v62 = vpop.f32.mrb[73].mxu0  ;;  %9665 = vst [vmem:[#allocation31_spill] sm:$0xff] %v6759_v34  ;;  %v6761_v33 = vpop.permute.xlu0 %3324  ;;  %v2247_v34 = vmul.f32 %v9669_v14, %v6735_v41  ;;  %v2759_v41 = vmul.f32 %v6349_v9, %v6751_v10  ;;  %v3399_v9 = vmul.f32 %v6603_v28, %v6751_v10 }
 0x2e5   :  { %v6745_v25 = vpop.f32.mrb[74].mxu0  ;;  %9666 = vst [vmem:[#allocation5_spill] sm:$0xff] %v6761_v33 }
 0x2e6   :  { %v6747_v60 = vpop.f32.mrb[75].mxu0  ;;  %3465 = vrot.lane.b32.xlu1 %v3398_v32, %s5116_s22  ;;  %3145 = vrot.lane.b32.xlu0 %v3078_v48, %s5114_s20  ;;  %v6769_v48 = vand.u32 2147483647, %v1052_v16 }
 0x2e8   :  { %9668 = vst [vmem:[#allocation209_spill] sm:$0xff] %v6769_v48 }
 0x2ea   :  { %1995 = vrot.lane.b32.xlu1 %v1927_v59, %s5114_s20  ;;  %1675 = vrot.lane.b32.xlu0 %v1607_v11, %s5115_s21 }
 0x2eb   :  { %v6765_v32 = vpop.f32.mrb[76].mxu0  ;;  %v6767_v30 = vpop.f32.mrb[92].mxu1 }
 0x2ec   :  { %9667 = vst [vmem:[#allocation208_spill] sm:$0xff] %v6767_v30  ;;  %v6771_v2 = vpop.f32.mrb[77].mxu0  ;;  %v6777_v15 = vpop.f32.mrb[93].mxu1  ;;  %v9674_v30 = vld [vmem:[#allocation3_spill] sm:$0xff] }
 0x2ed   :  { %9670 = vst [vmem:[#allocation63_spill] sm:$0xff] %v6777_v15  ;;  %v6779_v33 = vpop.f32.mrb[78].mxu0  ;;  %v6781_v59 = vpop.f32.mrb[94].mxu1  ;;  %v1608_v14 = vmul.f32 %v9674_v30, %v6769_v48  ;;  %v2248_v30 = vmul.f32 %v9678_v20, %v6769_v48 }
 0x2ee   :  { %9671 = vst [vmem:[#allocation210_spill] sm:$0xff] %v6781_v59  ;;  %v6783_v11 = vpop.f32.mrb[79].mxu0  ;;  %3147 = vrot.lane.b32.xlu1 %v3079_v53, %s5114_s20  ;;  %2315 = vrot.lane.b32.xlu0 %v2247_v34, %s5116_s22  ;;  %v6787_v16 = vpop.f32.mrb[95].mxu1 }
 0x2ef   :  { %9672 = vst [vmem:[#allocation211_spill] sm:$0xff] %v6783_v11  ;;  %9673 = vst [vmem:[#allocation212_spill] sm:$0xff] %v6787_v16  ;;  %v6797_v59 = vpop.permute.xlu0 %3332  ;;  %v6801_v34 = vpop.permute.xlu1 %3336  ;;  %v6803_v16 = vand.u32 2147483647, %v1054_v58 }
 0x2f0   :  { %9675 = vst [vmem:[#allocation3_spill] sm:$0xff] %v6797_v59  ;;  %9676 = vst [vmem:[#allocation213_spill] sm:$0xff] %v6801_v34  ;;  %v9679_v34 = vld [vmem:[#allocation34_spill] sm:$0xff] }
 0x2f1   :  { %9677 = vst [vmem:[#allocation214_spill] sm:$0xff] %v6803_v16  ;;  %v2760_v58 = vmul.f32 %v6332_v46, %v6803_v16  ;;  %v1928_v20 = vmul.f32 %v9679_v34, %v6769_v48  ;;  %v1060_v46 = vadd.f32 %v6640_v1, %v6560_v12  ;;  %v3400_v34 = vmul.f32 %v6607_v35, %v6803_v16 }
 0x2f2   :  { %1677 = vrot.lane.b32.xlu1 %v1608_v14, %s5115_s21  ;;  %2827 = vrot.lane.b32.xlu0 %v2759_v41, %s5115_s21  ;;  %v1058_v41 = vadd.f32 %v6633_v5, %v6556_v63  ;;  %v3080_v48 = vmul.f32 %v6503_v38, %v6803_v16  ;;  %v1062_v35 = vadd.f32 %v6647_v22, %v6556_v63  ;;  %v9689_v38 = vld [vmem:[#allocation33_spill] sm:$0xff] }
 0x2f3   :  { %v6799_v53 = vpop.f32.mrb[80].mxu0  ;;  %v6823_v59 = vpop.permute.xlu1 %3344 }
 0x2f4   :  { %v6805_v15 = vpop.f32.mrb[81].mxu0  ;;  %9680 = vst [vmem:[#allocation64_spill] sm:$0xff] %v6823_v59  ;;  %v6825_v28 = vpop.permute.xlu0 %3340  ;;  %v6833_v10 = vand.u32 2147483647, %v1058_v41  ;;  %v6855_v41 = vand.u32 2147483647, %v1060_v46 }
 0x2f5   :  { %v6811_v11 = vpop.f32.mrb[82].mxu0  ;;  %9681 = vst [vmem:[#allocation34_spill] sm:$0xff] %v6825_v28  ;;  %v6871_v46 = vand.u32 2147483647, %v1062_v35  ;;  %v9696_v35 = vld [vmem:[#allocation4_spill] sm:$0xff] }
 0x2f6   :  { %v6813_v14 = vpop.f32.mrb[83].mxu0  ;;  %2317 = vrot.lane.b32.xlu1 %v2248_v30, %s5116_s22  ;;  %3467 = vrot.lane.b32.xlu0 %v3399_v9, %s5116_s22  ;;  %9683 = vst [vmem:[#allocation216_spill] sm:$0xff] %v6833_v10  ;;  %9688 = vst [vmem:[#allocation221_spill] sm:$0xff] %v6855_v41  ;;  %v1929_v16 = vmul.f32 %v9689_v38, %v6833_v10  ;;  %v3081_v22 = vmul.f32 %v6497_v55, %v6855_v41  ;;  %v9694_v38 = vld [vmem:[#allocation65_spill] sm:$0xff] }
 0x2f7   :  { %9693 = vst [vmem:[#allocation222_spill] sm:$0xff] %v6871_v46  ;;  %v2761_v55 = vmul.f32 %v6362_v3, %v6855_v41  ;;  %v3401_v3 = vmul.f32 %v6629_v6, %v6855_v41  ;;  %v9705_v41 = vld [vmem:[#allocation36_spill] sm:$0xff] }
 0x2fa   :  { %2829 = vrot.lane.b32.xlu1 %v2760_v58, %s5115_s21  ;;  %1997 = vrot.lane.b32.xlu0 %v1928_v20, %s5114_s20 }
 0x2fb   :  { %v6829_v30 = vpop.f32.mrb[84].mxu0  ;;  %v6831_v9 = vpop.f32.mrb[96].mxu1 }
 0x2fc   :  { %9682 = vst [vmem:[#allocation215_spill] sm:$0xff] %v6831_v9  ;;  %v6837_v5 = vpop.f32.mrb[85].mxu0  ;;  %v6843_v58 = vpop.f32.mrb[97].mxu1 }
 0x2fd   :  { %9684 = vst [vmem:[#allocation217_spill] sm:$0xff] %v6843_v58  ;;  %v6845_v20 = vpop.f32.mrb[86].mxu0  ;;  %v6847_v59 = vpop.f32.mrb[98].mxu1  ;;  %v9690_v58 = vld [vmem:[#allocation7_spill] sm:$0xff] }
 0x2fe   :  { %9685 = vst [vmem:[#allocation218_spill] sm:$0xff] %v6847_v59  ;;  %v6849_v9 = vpop.f32.mrb[87].mxu0  ;;  %3469 = vrot.lane.b32.xlu1 %v3400_v34, %s5116_s22  ;;  %3149 = vrot.lane.b32.xlu0 %v3080_v48, %s5114_s20  ;;  %v6853_v1 = vpop.f32.mrb[99].mxu1  ;;  %v1609_v28 = vmul.f32 %v9690_v58, %v6833_v10  ;;  %v2249_v58 = vmul.f32 %v9694_v38, %v6833_v10 }
 0x2ff   :  { %9686 = vst [vmem:[#allocation219_spill] sm:$0xff] %v6849_v9  ;;  %9687 = vst [vmem:[#allocation220_spill] sm:$0xff] %v6853_v1  ;;  %v6865_v34 = vpop.permute.xlu0 %3348  ;;  %v6869_v59 = vpop.permute.xlu1 %3352 }
 0x300   :  { %9691 = vst [vmem:[#allocation33_spill] sm:$0xff] %v6865_v34  ;;  %9692 = vst [vmem:[#allocation7_spill] sm:$0xff] %v6869_v59  ;;  %v1610_v59 = vmul.f32 %v9696_v35, %v6871_v46  ;;  %v9701_v35 = vld [vmem:[#allocation66_spill] sm:$0xff] }
 0x302   :  { %1999 = vrot.lane.b32.xlu1 %v1929_v16, %s5114_s20  ;;  %1679 = vrot.lane.b32.xlu0 %v1609_v28, %s5115_s21  ;;  %v1064_v28 = vadd.f32 %v6651_v37, %v6560_v12 }
 0x303   :  { %v6867_v48 = vpop.f32.mrb[88].mxu0  ;;  %v6891_v34 = vpop.permute.xlu1 %3360 }
 0x304   :  { %v6873_v1 = vpop.f32.mrb[89].mxu0  ;;  %9697 = vst [vmem:[#allocation4_spill] sm:$0xff] %v6891_v34  ;;  %v6893_v38 = vpop.permute.xlu0 %3356  ;;  %v6901_v10 = vand.u32 2147483647, %v1064_v28 }
 0x305   :  { %v6879_v9 = vpop.f32.mrb[90].mxu0  ;;  %9698 = vst [vmem:[#allocation223_spill] sm:$0xff] %v6893_v38 }
 0x306   :  { %v6881_v16 = vpop.f32.mrb[91].mxu0  ;;  %3151 = vrot.lane.b32.xlu1 %v3081_v22, %s5114_s20  ;;  %2319 = vrot.lane.b32.xlu0 %v2249_v58, %s5116_s22  ;;  %9700 = vst [vmem:[#allocation225_spill] sm:$0xff] %v6901_v10  ;;  %v2762_v6 = vmul.f32 %v6346_v7, %v6901_v10  ;;  %v3402_v7 = vmul.f32 %v6627_v50, %v6901_v10  ;;  %v9712_v50 = vld [vmem:[#allocation9_spill] sm:$0xff] }
 0x307   :  { %9695 = vst [vmem:[#allocation65_spill] sm:$0xff] %v6881_v16  ;;  %v2250_v16 = vmul.f32 %v9701_v35, %v6871_v46  ;;  %v1068_v35 = vadd.f32 %v6668_v17, %v6556_v63  ;;  %v1070_v17 = vadd.f32 %v6674_v43, %v6560_v12  ;;  %v1072_v43 = vadd.f32 %v6680_v51, %v6556_v63 }
 0x30a   :  { %1681 = vrot.lane.b32.xlu1 %v1610_v59, %s5115_s21  ;;  %2831 = vrot.lane.b32.xlu0 %v2761_v55, %s5115_s21 }
 0x30b   :  { %v6897_v22 = vpop.f32.mrb[92].mxu0  ;;  %v6899_v58 = vpop.f32.mrb[100].mxu1 }
 0x30c   :  { %9699 = vst [vmem:[#allocation224_spill] sm:$0xff] %v6899_v58  ;;  %v6903_v37 = vpop.f32.mrb[93].mxu0  ;;  %v6909_v34 = vpop.f32.mrb[101].mxu1  ;;  %v1930_v58 = vmul.f32 %v9705_v41, %v6871_v46  ;;  %v3082_v41 = vmul.f32 %v6507_v61, %v6901_v10  ;;  %v9711_v46 = vld [vmem:[#allocation35_spill] sm:$0xff] }
 0x30d   :  { %9702 = vst [vmem:[#allocation66_spill] sm:$0xff] %v6909_v34  ;;  %v6911_v38 = vpop.f32.mrb[94].mxu0  ;;  %v6913_v59 = vpop.f32.mrb[102].mxu1 }
 0x30e   :  { %9703 = vst [vmem:[#allocation226_spill] sm:$0xff] %v6913_v59  ;;  %v6915_v55 = vpop.f32.mrb[95].mxu0  ;;  %2321 = vrot.lane.b32.xlu1 %v2250_v16, %s5116_s22  ;;  %3471 = vrot.lane.b32.xlu0 %v3401_v3, %s5116_s22  ;;  %v6919_v28 = vpop.f32.mrb[103].mxu1 }
 0x30f   :  { %9704 = vst [vmem:[#allocation227_spill] sm:$0xff] %v6919_v28  ;;  %v6929_v59 = vpop.permute.xlu0 %3364  ;;  %v6933_v3 = vpop.permute.xlu1 %3368  ;;  %v6935_v28 = vand.u32 2147483647, %v1068_v35  ;;  %v6951_v35 = vand.u32 2147483647, %v1070_v17 }
 0x310   :  { %9706 = vst [vmem:[#allocation36_spill] sm:$0xff] %v6929_v59  ;;  %9707 = vst [vmem:[#allocation228_spill] sm:$0xff] %v6933_v3 }
 0x311   :  { %9708 = vst [vmem:[#allocation229_spill] sm:$0xff] %v6935_v28  ;;  %9710 = vst [vmem:[#allocation231_spill] sm:$0xff] %v6951_v35  ;;  %v1931_v59 = vmul.f32 %v9711_v46, %v6935_v28  ;;  %v1611_v3 = vmul.f32 %v9712_v50, %v6935_v28  ;;  %v3083_v46 = vmul.f32 %v6501_v49, %v6951_v35  ;;  %v9717_v50 = vld [vmem:[#allocation67_spill] sm:$0xff] }
 0x312   :  { %2833 = vrot.lane.b32.xlu1 %v2762_v6, %s5115_s21  ;;  %2001 = vrot.lane.b32.xlu0 %v1930_v58, %s5114_s20  ;;  %v1074_v49 = vadd.f32 %v6682_v31, %v6560_v12  ;;  %v9726_v31 = vld [vmem:[#allocation68_spill] sm:$0xff] }
 0x313   :  { %v6931_v16 = vpop.f32.mrb[96].mxu0  ;;  %v6959_v61 = vpop.permute.xlu1 %3376 }
 0x314   :  { %v6939_v34 = vpop.f32.mrb[97].mxu0  ;;  %9713 = vst [vmem:[#allocation35_spill] sm:$0xff] %v6959_v61  ;;  %v6961_v10 = vpop.permute.xlu0 %3372  ;;  %v2251_v61 = vmul.f32 %v9717_v50, %v6935_v28 }
 0x315   :  { %v6945_v58 = vpop.f32.mrb[98].mxu0  ;;  %9714 = vst [vmem:[#allocation9_spill] sm:$0xff] %v6961_v10 }
 0x316   :  { %v6947_v6 = vpop.f32.mrb[99].mxu0  ;;  %3473 = vrot.lane.b32.xlu1 %v3402_v7, %s5116_s22  ;;  %3153 = vrot.lane.b32.xlu0 %v3082_v41, %s5114_s20  ;;  %v6969_v41 = vand.u32 2147483647, %v1072_v43 }
 0x317   :  { %9709 = vst [vmem:[#allocation230_spill] sm:$0xff] %v6947_v6  ;;  %v6995_v28 = vpop.permute.xlu1 %3384 }
 0x318   :  { %9716 = vst [vmem:[#allocation233_spill] sm:$0xff] %v6969_v41 }
 0x31a   :  { %2003 = vrot.lane.b32.xlu1 %v1931_v59, %s5114_s20  ;;  %1683 = vrot.lane.b32.xlu0 %v1611_v3, %s5115_s21 }
 0x31b   :  { %v6965_v7 = vpop.f32.mrb[100].mxu0  ;;  %v6967_v17 = vpop.f32.mrb[104].mxu1 }
 0x31c   :  { %9715 = vst [vmem:[#allocation232_spill] sm:$0xff] %v6967_v17  ;;  %v6971_v51 = vpop.f32.mrb[101].mxu0  ;;  %v6977_v6 = vpop.f32.mrb[105].mxu1  ;;  %v9722_v17 = vld [vmem:[#allocation6_spill] sm:$0xff] }
 0x31d   :  { %9718 = vst [vmem:[#allocation67_spill] sm:$0xff] %v6977_v6  ;;  %v6979_v10 = vpop.f32.mrb[102].mxu0  ;;  %v6981_v59 = vpop.f32.mrb[106].mxu1  ;;  %v1612_v50 = vmul.f32 %v9722_v17, %v6969_v41  ;;  %v2763_v6 = vmul.f32 %v6374_v23, %v6951_v35  ;;  %9723 = vst [vmem:[#allocation6_spill] sm:$0xff] %v6995_v28  ;;  %v2252_v17 = vmul.f32 %v9726_v31, %v6969_v41  ;;  %v9728_v31 = vld [vmem:[#allocation38_spill] sm:$0xff] }
 0x31e   :  { %9719 = vst [vmem:[#allocation234_spill] sm:$0xff] %v6981_v59  ;;  %v6983_v3 = vpop.f32.mrb[103].mxu0  ;;  %3155 = vrot.lane.b32.xlu1 %v3083_v46, %s5114_s20  ;;  %2323 = vrot.lane.b32.xlu0 %v2251_v61, %s5116_s22  ;;  %v6987_v43 = vpop.f32.mrb[107].mxu1  ;;  %v7003_v59 = vand.u32 2147483647, %v1074_v49  ;;  %v3403_v23 = vmul.f32 %v6666_v56, %v6951_v35  ;;  %v1078_v49 = vadd.f32 %v6697_v0, %v6556_v63 }
 0x31f   :  { %9720 = vst [vmem:[#allocation235_spill] sm:$0xff] %v6983_v3  ;;  %9721 = vst [vmem:[#allocation236_spill] sm:$0xff] %v6987_v43  ;;  %v6999_v46 = vpop.permute.xlu0 %3380  ;;  %v1080_v0 = vadd.f32 %v6703_v26, %v6560_v12 }
 0x320   :  { %9724 = vst [vmem:[#allocation237_spill] sm:$0xff] %v6999_v46  ;;  %9725 = vst [vmem:[#allocation238_spill] sm:$0xff] %v7003_v59  ;;  %v1932_v46 = vmul.f32 %v9728_v31, %v6969_v41  ;;  %v7033_v35 = vand.u32 2147483647, %v1078_v49  ;;  %v3404_v31 = vmul.f32 %v6670_v47, %v7003_v59  ;;  %v1082_v47 = vadd.f32 %v6711_v4, %v6556_v63 }
 0x322   :  { %1685 = vrot.lane.b32.xlu1 %v1612_v50, %s5115_s21  ;;  %2835 = vrot.lane.b32.xlu0 %v2763_v6, %s5115_s21  ;;  %v7017_v6 = vpop.permute.xlu1 %3392  ;;  %v2764_v50 = vmul.f32 %v6354_v24, %v7003_v59 }
 0x323   :  { %v7001_v61 = vpop.f32.mrb[104].mxu0  ;;  %9727 = vst [vmem:[#allocation68_spill] sm:$0xff] %v7017_v6  ;;  %v7025_v56 = vpop.permute.xlu0 %3388 }
 0x324   :  { %v7005_v43 = vpop.f32.mrb[105].mxu0  ;;  %9729 = vst [vmem:[#allocation38_spill] sm:$0xff] %v7025_v56  ;;  %v9739_v56 = vld [vmem:[#allocation11_spill] sm:$0xff] }
 0x325   :  { %v7011_v3 = vpop.f32.mrb[106].mxu0 }
 0x326   :  { %v7013_v28 = vpop.f32.mrb[107].mxu0  ;;  %2325 = vrot.lane.b32.xlu1 %v2252_v17, %s5116_s22  ;;  %3475 = vrot.lane.b32.xlu0 %v3403_v23, %s5116_s22 }
 0x32a   :  { %2837 = vrot.lane.b32.xlu1 %v2764_v50, %s5115_s21  ;;  %2005 = vrot.lane.b32.xlu0 %v1932_v46, %s5114_s20  ;;  %v3084_v50 = vmul.f32 %v6511_v44, %v7003_v59  ;;  %v9738_v59 = vld [vmem:[#allocation37_spill] sm:$0xff] }
 0x32b   :  { %v7029_v17 = vpop.f32.mrb[108].mxu0  ;;  %v7031_v23 = vpop.f32.mrb[108].mxu1 }
 0x32c   :  { %9730 = vst [vmem:[#allocation239_spill] sm:$0xff] %v7031_v23  ;;  %v7037_v6 = vpop.f32.mrb[109].mxu0  ;;  %v7039_v24 = vpop.permute.xlu1 %1987 }
 0x32d   :  { %9731 = vst [vmem:[#allocation240_spill] sm:$0xff] %v7039_v24  ;;  %v7045_v46 = vpop.permute.xlu0 %1667  ;;  %v7047_v41 = vpop.f32.mrb[110].mxu0  ;;  %v7057_v24 = vand.u32 2147483647, %v1080_v0  ;;  %v7073_v0 = vand.u32 2147483647, %v1082_v47 }
 0x32e   :  { %9732 = vst [vmem:[#allocation241_spill] sm:$0xff] %v7045_v46  ;;  %v7049_v23 = vpop.f32.mrb[111].mxu0  ;;  %3477 = vrot.lane.b32.xlu1 %v3404_v31, %s5116_s22  ;;  %3157 = vrot.lane.b32.xlu0 %v3084_v50, %s5114_s20  ;;  %v7053_v26 = vpop.f32.mrb[109].mxu1  ;;  %v1933_v46 = vmul.f32 %v9738_v59, %v7033_v35  ;;  %v9741_v59 = vld [vmem:[#allocation69_spill] sm:$0xff] }
 0x32f   :  { %9733 = vst [vmem:[#allocation242_spill] sm:$0xff] %v7049_v23  ;;  %9734 = vst [vmem:[#allocation243_spill] sm:$0xff] %v7053_v26  ;;  %v7055_v49 = vpop.f32.mrb[110].mxu1  ;;  %v1613_v23 = vmul.f32 %v9739_v56, %v7033_v35  ;;  %v3085_v4 = vmul.f32 %v6505_v13, %v7057_v24  ;;  %v1084_v56 = vadd.f32 %v6715_v52, %v6560_v12  ;;  %v9747_v52 = vld [vmem:[#allocation70_spill] sm:$0xff] }
 0x330   :  { %9735 = vst [vmem:[#allocation244_spill] sm:$0xff] %v7055_v49  ;;  %9736 = vst [vmem:[#allocation245_spill] sm:$0xff] %v7057_v24  ;;  %v7061_v44 = vpop.permute.xlu1 %3139  ;;  %v7067_v31 = vpop.f32.mrb[111].mxu1  ;;  %v2765_v13 = vmul.f32 %v6383_v18, %v7057_v24  ;;  %v1088_v18 = vadd.f32 %v6731_v42, %v6556_v63 }
 0x331   :  { %9737 = vst [vmem:[#allocation246_spill] sm:$0xff] %v7061_v44  ;;  %9740 = vst [vmem:[#allocation37_spill] sm:$0xff] %v7067_v31  ;;  %v7069_v50 = vpop.permute.xlu0 %2307  ;;  %v2253_v44 = vmul.f32 %v9741_v59, %v7033_v35  ;;  %v2254_v59 = vmul.f32 %v9747_v52, %v7073_v0 }
 0x332   :  { %2007 = vrot.lane.b32.xlu1 %v1933_v46, %s5114_s20  ;;  %1687 = vrot.lane.b32.xlu0 %v1613_v23, %s5115_s21  ;;  %v9743_v46 = vld [vmem:[#allocation8_spill] sm:$0xff] }
 0x333   :  { %v1614_v47 = vmul.f32 %v9743_v46, %v7073_v0 }
 0x334   :  { %v7075_v49 = vpop.permute.xlu1 %1669 }
 0x335   :  { %v7081_v26 = vpop.permute.xlu0 %2819 }
 0x336   :  { %9742 = vst [vmem:[#allocation11_spill] sm:$0xff] %v7081_v26  ;;  %3159 = vrot.lane.b32.xlu1 %v3085_v4, %s5114_s20  ;;  %2327 = vrot.lane.b32.xlu0 %v2253_v44, %s5116_s22  ;;  %v7097_v4 = vand.u32 2147483647, %v1084_v56  ;;  %v3405_v26 = vmul.f32 %v6693_v21, %v7057_v24  ;;  %v7121_v21 = vand.u32 2147483647, %v1088_v18  ;;  %v1092_v18 = vadd.f32 %v6745_v25, %v6556_v63 }
 0x338   :  { %v7087_v23 = vpop.permute.xlu1 %2309  ;;  %9745 = vst [vmem:[#allocation8_spill] sm:$0xff] %v7097_v4  ;;  %v2766_v56 = vmul.f32 %v6364_v27, %v7097_v4  ;;  %v3086_v27 = vmul.f32 %v6515_v29, %v7097_v4 }
 0x339   :  { %v7093_v31 = vpop.permute.xlu0 %3459 }
 0x33a   :  { %9744 = vst [vmem:[#allocation69_spill] sm:$0xff] %v7093_v31  ;;  %1689 = vrot.lane.b32.xlu1 %v1614_v47, %s5115_s21  ;;  %2839 = vrot.lane.b32.xlu0 %v2765_v13, %s5115_s21  ;;  %v9749_v13 = vld [vmem:[#allocation40_spill] sm:$0xff] }
 0x33b   :  { %v1934_v52 = vmul.f32 %v9749_v13, %v7073_v0 }
 0x33c   :  { %v7099_v44 = vpop.permute.xlu1 %2821 }
 0x33d   :  { %9746 = vst [vmem:[#allocation247_spill] sm:$0xff] %v7099_v44  ;;  %v7105_v46 = vpop.permute.xlu0 %1989 }
 0x33e   :  { %2329 = vrot.lane.b32.xlu1 %v2254_v59, %s5116_s22  ;;  %3479 = vrot.lane.b32.xlu0 %v3405_v26, %s5116_s22  ;;  %v1090_v26 = vadd.f32 %v6739_v62, %v6560_v12  ;;  %v3406_v59 = vmul.f32 %v6691_v54, %v7097_v4  ;;  %v9754_v54 = vld [vmem:[#allocation13_spill] sm:$0xff] }
 0x340   :  { %v7111_v47 = vpop.permute.xlu1 %3461 }
 0x341   :  { %9748 = vst [vmem:[#allocation70_spill] sm:$0xff] %v7111_v47  ;;  %v7117_v31 = vpop.permute.xlu0 %3141  ;;  %v1615_v47 = vmul.f32 %v9754_v54, %v7121_v21 }
 0x342   :  { %9750 = vst [vmem:[#allocation40_spill] sm:$0xff] %v7117_v31  ;;  %2841 = vrot.lane.b32.xlu1 %v2766_v56, %s5115_s21  ;;  %2009 = vrot.lane.b32.xlu0 %v1934_v52, %s5114_s20  ;;  %v7135_v56 = vand.u32 2147483647, %v1090_v26  ;;  %v9753_v52 = vld [vmem:[#allocation39_spill] sm:$0xff] }
 0x343   :  { %v1935_v24 = vmul.f32 %v9753_v52, %v7121_v21 }
 0x344   :  { %v7125_v42 = vpop.permute.xlu1 %1991  ;;  %9751 = vst [vmem:[#allocation248_spill] sm:$0xff] %v7135_v56  ;;  %v3087_v25 = vmul.f32 %v6509_v39, %v7135_v56  ;;  %v2767_v39 = vmul.f32 %v6392_v40, %v7135_v56  ;;  %v3407_v31 = vmul.f32 %v6729_v19, %v7135_v56  ;;  %v1098_v40 = vadd.f32 %v6765_v32, %v6556_v63 }
 0x345   :  { %v7131_v13 = vpop.permute.xlu0 %1671 }
 0x346   :  { %3481 = vrot.lane.b32.xlu1 %v3406_v59, %s5116_s22  ;;  %3161 = vrot.lane.b32.xlu0 %v3086_v27, %s5114_s20  ;;  %v7149_v59 = vand.u32 2147483647, %v1092_v18  ;;  %v9755_v27 = vld [vmem:[#allocation71_spill] sm:$0xff]  ;;  %v9757_v18 = vld [vmem:[#allocation10_spill] sm:$0xff]  ;;  %v7197_v19 = vand.u32 2147483647, %v1098_v40  ;;  %v1102_v40 = vadd.f32 %v6779_v33, %v6556_v63 }
 0x347   :  { %v2255_v4 = vmul.f32 %v9755_v27, %v7121_v21 }
 0x348   :  { %v7139_v62 = vpop.permute.xlu1 %3143  ;;  %v1616_v54 = vmul.f32 %v9757_v18, %v7149_v59 }
 0x349   :  { %9752 = vst [vmem:[#allocation249_spill] sm:$0xff] %v7139_v62  ;;  %v7145_v29 = vpop.permute.xlu0 %2311 }
 0x34a   :  { %2011 = vrot.lane.b32.xlu1 %v1935_v24, %s5114_s20  ;;  %1691 = vrot.lane.b32.xlu0 %v1615_v47, %s5115_s21  ;;  %v1094_v24 = vadd.f32 %v6747_v60, %v6560_v12  ;;  %v9761_v60 = vld [vmem:[#allocation72_spill] sm:$0xff] }
 0x34b   :  { %v2256_v27 = vmul.f32 %v9761_v60, %v7149_v59 }
 0x34c   :  { %v7151_v26 = vpop.permute.xlu1 %1673 }
 0x34d   :  { %v7157_v52 = vpop.permute.xlu0 %2823 }
 0x34e   :  { %9756 = vst [vmem:[#allocation39_spill] sm:$0xff] %v7157_v52  ;;  %3163 = vrot.lane.b32.xlu1 %v3087_v25, %s5114_s20  ;;  %2331 = vrot.lane.b32.xlu0 %v2255_v4, %s5116_s22  ;;  %v7173_v25 = vand.u32 2147483647, %v1094_v24 }
 0x350   :  { %v7163_v47 = vpop.permute.xlu1 %2313  ;;  %9759 = vst [vmem:[#allocation71_spill] sm:$0xff] %v7173_v25  ;;  %v2768_v24 = vmul.f32 %v6377_v57, %v7173_v25  ;;  %v3088_v57 = vmul.f32 %v6519_v45, %v7173_v25 }
 0x351   :  { %v7169_v62 = vpop.permute.xlu0 %3463 }
 0x352   :  { %9758 = vst [vmem:[#allocation13_spill] sm:$0xff] %v7169_v62  ;;  %1693 = vrot.lane.b32.xlu1 %v1616_v54, %s5115_s21  ;;  %2843 = vrot.lane.b32.xlu0 %v2767_v39, %s5115_s21  ;;  %v9763_v39 = vld [vmem:[#allocation42_spill] sm:$0xff] }
 0x353   :  { %v1936_v60 = vmul.f32 %v9763_v39, %v7149_v59 }
 0x354   :  { %v7175_v4 = vpop.permute.xlu1 %2825 }
 0x355   :  { %9760 = vst [vmem:[#allocation10_spill] sm:$0xff] %v7175_v4  ;;  %v7181_v18 = vpop.permute.xlu0 %1993 }
 0x356   :  { %2333 = vrot.lane.b32.xlu1 %v2256_v27, %s5116_s22  ;;  %3483 = vrot.lane.b32.xlu0 %v3407_v31, %s5116_s22  ;;  %v1100_v31 = vadd.f32 %v6771_v2, %v6560_v12  ;;  %v3408_v27 = vmul.f32 %v6733_v36, %v7173_v25  ;;  %v9768_v36 = vld [vmem:[#allocation15_spill] sm:$0xff] }
 0x358   :  { %v7187_v54 = vpop.permute.xlu1 %3465 }
 0x359   :  { %9762 = vst [vmem:[#allocation72_spill] sm:$0xff] %v7187_v54  ;;  %v7193_v62 = vpop.permute.xlu0 %3145  ;;  %v1617_v54 = vmul.f32 %v9768_v36, %v7197_v19 }
 0x35a   :  { %9764 = vst [vmem:[#allocation42_spill] sm:$0xff] %v7193_v62  ;;  %2845 = vrot.lane.b32.xlu1 %v2768_v24, %s5115_s21  ;;  %2013 = vrot.lane.b32.xlu0 %v1936_v60, %s5114_s20  ;;  %v7211_v24 = vand.u32 2147483647, %v1100_v31  ;;  %v9767_v60 = vld [vmem:[#allocation41_spill] sm:$0xff] }
 0x35b   :  { %v1937_v56 = vmul.f32 %v9767_v60, %v7197_v19  ;;  %v9773_v62 = vld [vmem:[#allocation145_spill] sm:$0xff] }
 0x35c   :  { %v7201_v32 = vpop.permute.xlu1 %1995  ;;  %9765 = vst [vmem:[#allocation250_spill] sm:$0xff] %v7211_v24  ;;  %v3089_v33 = vmul.f32 %v6513_v8, %v7211_v24  ;;  %v2769_v8 = vmul.f32 %v9773_v62, %v7211_v24  ;;  %v1108_v62 = vadd.f32 %v6799_v53, %v6556_v63 }
 0x35d   :  { %v7207_v39 = vpop.permute.xlu0 %1675 }
 0x35e   :  { %3485 = vrot.lane.b32.xlu1 %v3408_v27, %s5116_s22  ;;  %3165 = vrot.lane.b32.xlu0 %v3088_v57, %s5114_s20  ;;  %v7225_v27 = vand.u32 2147483647, %v1102_v40  ;;  %v9769_v57 = vld [vmem:[#allocation73_spill] sm:$0xff]  ;;  %v9772_v40 = vld [vmem:[#allocation12_spill] sm:$0xff] }
 0x35f   :  { %v2257_v25 = vmul.f32 %v9769_v57, %v7197_v19  ;;  %v9777_v57 = vld [vmem:[#allocation74_spill] sm:$0xff] }
 0x360   :  { %v7215_v2 = vpop.permute.xlu1 %3147 }
 0x361   :  { %9766 = vst [vmem:[#allocation251_spill] sm:$0xff] %v7215_v2  ;;  %v7221_v45 = vpop.permute.xlu0 %2315  ;;  %v1618_v2 = vmul.f32 %v9772_v40, %v7225_v27 }
 0x362   :  { %2015 = vrot.lane.b32.xlu1 %v1937_v56, %s5114_s20  ;;  %1695 = vrot.lane.b32.xlu0 %v1617_v54, %s5115_s21  ;;  %v9771_v56 = vld [vmem:[#allocation211_spill] sm:$0xff] }
 0x363   :  { %v1104_v36 = vadd.f32 %v9771_v56, %v6560_v12  ;;  %v2258_v56 = vmul.f32 %v9777_v57, %v7225_v27 }
 0x364   :  { %v7227_v31 = vpop.permute.xlu1 %1677 }
 0x365   :  { %v7233_v60 = vpop.permute.xlu0 %2827 }
 0x366   :  { %9770 = vst [vmem:[#allocation41_spill] sm:$0xff] %v7233_v60  ;;  %3167 = vrot.lane.b32.xlu1 %v3089_v33, %s5114_s20  ;;  %2335 = vrot.lane.b32.xlu0 %v2257_v25, %s5116_s22  ;;  %v7249_v33 = vand.u32 2147483647, %v1104_v36  ;;  %v9778_v60 = vld [vmem:[#allocation5_spill] sm:$0xff] }
 0x367   :  { %v3409_v52 = vmul.f32 %v9778_v60, %v7211_v24  ;;  %v9780_v36 = vld [vmem:[#allocation141_spill] sm:$0xff]  ;;  %v7273_v60 = vand.u32 2147483647, %v1108_v62  ;;  %v1112_v62 = vadd.f32 %v6811_v11, %v6556_v63 }
 0x368   :  { %v7239_v54 = vpop.permute.xlu1 %2317  ;;  %9775 = vst [vmem:[#allocation73_spill] sm:$0xff] %v7249_v33  ;;  %v9791_v11 = vld [vmem:[#allocation173_spill] sm:$0xff] }
 0x369   :  { %v7245_v4 = vpop.permute.xlu0 %3467 }
 0x36a   :  { %9774 = vst [vmem:[#allocation15_spill] sm:$0xff] %v7245_v4  ;;  %1697 = vrot.lane.b32.xlu1 %v1618_v2, %s5115_s21  ;;  %2847 = vrot.lane.b32.xlu0 %v2769_v8, %s5115_s21  ;;  %v2770_v8 = vmul.f32 %v9780_v36, %v7249_v33  ;;  %v9781_v4 = vld [vmem:[#allocation45_spill] sm:$0xff]  ;;  %v9784_v36 = vld [vmem:[#allocation175_spill] sm:$0xff] }
 0x36b   :  { %v1938_v57 = vmul.f32 %v9781_v4, %v7225_v27 }
 0x36c   :  { %v7251_v25 = vpop.permute.xlu1 %2829 }
 0x36d   :  { %9776 = vst [vmem:[#allocation211_spill] sm:$0xff] %v7251_v25  ;;  %v7257_v40 = vpop.permute.xlu0 %1997 }
 0x36e   :  { %2337 = vrot.lane.b32.xlu1 %v2258_v56, %s5116_s22  ;;  %3487 = vrot.lane.b32.xlu0 %v3409_v52, %s5116_s22  ;;  %v1110_v52 = vadd.f32 %v6805_v15, %v6560_v12  ;;  %v9783_v56 = vld [vmem:[#allocation31_spill] sm:$0xff] }
 0x36f   :  { %v3410_v24 = vmul.f32 %v9783_v56, %v7249_v33  ;;  %v9788_v56 = vld [vmem:[#allocation17_spill] sm:$0xff] }
 0x370   :  { %v7263_v2 = vpop.permute.xlu1 %3469  ;;  %v1619_v44 = vmul.f32 %v9788_v56, %v7273_v60 }
 0x371   :  { %9779 = vst [vmem:[#allocation12_spill] sm:$0xff] %v7263_v2  ;;  %v7269_v25 = vpop.permute.xlu0 %3149  ;;  %v3090_v2 = vmul.f32 %v9784_v36, %v7249_v33  ;;  %v9792_v33 = vld [vmem:[#allocation75_spill] sm:$0xff] }
 0x372   :  { %9782 = vst [vmem:[#allocation145_spill] sm:$0xff] %v7269_v25  ;;  %2849 = vrot.lane.b32.xlu1 %v2770_v8, %s5115_s21  ;;  %2017 = vrot.lane.b32.xlu0 %v1938_v57, %s5114_s20  ;;  %v7287_v8 = vand.u32 2147483647, %v1110_v52  ;;  %v9787_v57 = vld [vmem:[#allocation44_spill] sm:$0xff] }
 0x373   :  { %v1939_v25 = vmul.f32 %v9787_v57, %v7273_v60 }
 0x374   :  { %v7277_v53 = vpop.permute.xlu1 %1999  ;;  %9785 = vst [vmem:[#allocation74_spill] sm:$0xff] %v7287_v8  ;;  %v3091_v52 = vmul.f32 %v9791_v11, %v7287_v8 }
 0x375   :  { %v7283_v4 = vpop.permute.xlu0 %1679 }
 0x376   :  { %3489 = vrot.lane.b32.xlu1 %v3410_v24, %s5116_s22  ;;  %3169 = vrot.lane.b32.xlu0 %v3090_v2, %s5114_s20  ;;  %v7301_v24 = vand.u32 2147483647, %v1112_v62  ;;  %v9795_v62 = vld [vmem:[#allocation14_spill] sm:$0xff] }
 0x378   :  { %v7291_v15 = vpop.permute.xlu1 %3151  ;;  %v1620_v56 = vmul.f32 %v9795_v62, %v7301_v24 }
 0x379   :  { %9786 = vst [vmem:[#allocation5_spill] sm:$0xff] %v7291_v15  ;;  %v7297_v36 = vpop.permute.xlu0 %2319  ;;  %v2259_v15 = vmul.f32 %v9792_v33, %v7273_v60 }
 0x37a   :  { %9789 = vst [vmem:[#allocation141_spill] sm:$0xff] %v7297_v36  ;;  %2019 = vrot.lane.b32.xlu1 %v1939_v25, %s5114_s20  ;;  %1699 = vrot.lane.b32.xlu0 %v1619_v44, %s5115_s21  ;;  %v1114_v25 = vadd.f32 %v6813_v14, %v6560_v12  ;;  %v9800_v14 = vld [vmem:[#allocation76_spill] sm:$0xff] }
 0x37c   :  { %v7303_v2 = vpop.permute.xlu1 %1681  ;;  %v7325_v33 = vand.u32 2147483647, %v1114_v25  ;;  %v9804_v25 = vld [vmem:[#allocation143_spill] sm:$0xff] }
 0x37d   :  { %9790 = vst [vmem:[#allocation45_spill] sm:$0xff] %v7303_v2  ;;  %v7309_v57 = vpop.permute.xlu0 %2831  ;;  %v9796_v2 = vld [vmem:[#allocation149_spill] sm:$0xff] }
 0x37e   :  { %9793 = vst [vmem:[#allocation31_spill] sm:$0xff] %v7309_v57  ;;  %3171 = vrot.lane.b32.xlu1 %v3091_v52, %s5114_s20  ;;  %2339 = vrot.lane.b32.xlu0 %v2259_v15, %s5116_s22  ;;  %v2771_v11 = vmul.f32 %v9796_v2, %v7287_v8  ;;  %9798 = vst [vmem:[#allocation17_spill] sm:$0xff] %v7325_v33  ;;  %v2260_v52 = vmul.f32 %v9800_v14, %v7301_v24 }
 0x37f   :  { %v1118_v2 = vadd.f32 %v6829_v30, %v6556_v63 }
 0x380   :  { %v7315_v44 = vpop.permute.xlu1 %2321 }
 0x381   :  { %9794 = vst [vmem:[#allocation175_spill] sm:$0xff] %v7315_v44  ;;  %v7321_v36 = vpop.permute.xlu0 %3471  ;;  %v9801_v44 = vld [vmem:[#allocation3_spill] sm:$0xff] }
 0x382   :  { %9797 = vst [vmem:[#allocation44_spill] sm:$0xff] %v7321_v36  ;;  %1701 = vrot.lane.b32.xlu1 %v1620_v56, %s5115_s21  ;;  %2851 = vrot.lane.b32.xlu0 %v2771_v11, %s5115_s21  ;;  %v3411_v57 = vmul.f32 %v9801_v44, %v7287_v8  ;;  %v2772_v11 = vmul.f32 %v9804_v25, %v7325_v33  ;;  %v9805_v36 = vld [vmem:[#allocation47_spill] sm:$0xff]  ;;  %v7349_v44 = vand.u32 2147483647, %v1118_v2  ;;  %v9809_v25 = vld [vmem:[#allocation177_spill] sm:$0xff] }
 0x383   :  { %v1940_v14 = vmul.f32 %v9805_v36, %v7301_v24  ;;  %v1122_v2 = vadd.f32 %v6845_v20, %v6556_v63  ;;  %v9816_v20 = vld [vmem:[#allocation174_spill] sm:$0xff] }
 0x384   :  { %v7327_v15 = vpop.permute.xlu1 %2833 }
 0x385   :  { %9799 = vst [vmem:[#allocation173_spill] sm:$0xff] %v7327_v15  ;;  %v7333_v62 = vpop.permute.xlu0 %2001 }
 0x386   :  { %9802 = vst [vmem:[#allocation75_spill] sm:$0xff] %v7333_v62  ;;  %2341 = vrot.lane.b32.xlu1 %v2260_v52, %s5116_s22  ;;  %3491 = vrot.lane.b32.xlu0 %v3411_v57, %s5116_s22  ;;  %v1120_v57 = vadd.f32 %v6837_v5, %v6560_v12  ;;  %v9808_v52 = vld [vmem:[#allocation213_spill] sm:$0xff]  ;;  %v9822_v62 = vld [vmem:[#allocation152_spill] sm:$0xff] }
 0x387   :  { %v3412_v8 = vmul.f32 %v9808_v52, %v7325_v33  ;;  %v9813_v52 = vld [vmem:[#allocation19_spill] sm:$0xff] }
 0x388   :  { %v7339_v56 = vpop.permute.xlu1 %3473 }
 0x389   :  { %9803 = vst [vmem:[#allocation14_spill] sm:$0xff] %v7339_v56  ;;  %v7345_v15 = vpop.permute.xlu0 %3153  ;;  %v3092_v56 = vmul.f32 %v9809_v25, %v7325_v33  ;;  %v9817_v33 = vld [vmem:[#allocation77_spill] sm:$0xff] }
 0x38a   :  { %9806 = vst [vmem:[#allocation149_spill] sm:$0xff] %v7345_v15  ;;  %2853 = vrot.lane.b32.xlu1 %v2772_v11, %s5115_s21  ;;  %2021 = vrot.lane.b32.xlu0 %v1940_v14, %s5114_s20  ;;  %v7363_v11 = vand.u32 2147483647, %v1120_v57  ;;  %v9812_v14 = vld [vmem:[#allocation46_spill] sm:$0xff] }
 0x38b   :  { %v1941_v15 = vmul.f32 %v9812_v14, %v7349_v44 }
 0x38c   :  { %v7353_v30 = vpop.permute.xlu1 %2003  ;;  %9810 = vst [vmem:[#allocation3_spill] sm:$0xff] %v7363_v11  ;;  %v3093_v57 = vmul.f32 %v9816_v20, %v7363_v11  ;;  %v2773_v20 = vmul.f32 %v9822_v62, %v7363_v11  ;;  %v1128_v62 = vadd.f32 %v6867_v48, %v6556_v63 }
 0x38d   :  { %9807 = vst [vmem:[#allocation76_spill] sm:$0xff] %v7353_v30  ;;  %v7359_v36 = vpop.permute.xlu0 %1683  ;;  %v1621_v30 = vmul.f32 %v9813_v52, %v7349_v44 }
 0x38e   :  { %3493 = vrot.lane.b32.xlu1 %v3412_v8, %s5116_s22  ;;  %3173 = vrot.lane.b32.xlu0 %v3092_v56, %s5114_s20  ;;  %v7377_v8 = vand.u32 2147483647, %v1122_v2  ;;  %v9821_v2 = vld [vmem:[#allocation16_spill] sm:$0xff] }
 0x390   :  { %v7367_v5 = vpop.permute.xlu1 %3155 }
 0x391   :  { %9811 = vst [vmem:[#allocation143_spill] sm:$0xff] %v7367_v5  ;;  %v7373_v25 = vpop.permute.xlu0 %2323  ;;  %v2261_v5 = vmul.f32 %v9817_v33, %v7349_v44 }
 0x392   :  { %9814 = vst [vmem:[#allocation47_spill] sm:$0xff] %v7373_v25  ;;  %2023 = vrot.lane.b32.xlu1 %v1941_v15, %s5114_s20  ;;  %1703 = vrot.lane.b32.xlu0 %v1621_v30, %s5115_s21  ;;  %v9819_v15 = vld [vmem:[#allocation219_spill] sm:$0xff]  ;;  %v1622_v25 = vmul.f32 %v9821_v2, %v7377_v8 }
 0x393   :  { %v1124_v52 = vadd.f32 %v9819_v15, %v6560_v12 }
 0x394   :  { %v7379_v56 = vpop.permute.xlu1 %1685 }
 0x395   :  { %9815 = vst [vmem:[#allocation213_spill] sm:$0xff] %v7379_v56  ;;  %v7385_v14 = vpop.permute.xlu0 %2835  ;;  %v7401_v33 = vand.u32 2147483647, %v1124_v52  ;;  %v9830_v52 = vld [vmem:[#allocation146_spill] sm:$0xff] }
 0x396   :  { %9818 = vst [vmem:[#allocation177_spill] sm:$0xff] %v7385_v14  ;;  %3175 = vrot.lane.b32.xlu1 %v3093_v57, %s5114_s20  ;;  %2343 = vrot.lane.b32.xlu0 %v2261_v5, %s5116_s22  ;;  %v9826_v57 = vld [vmem:[#allocation78_spill] sm:$0xff] }
 0x397   :  { %9824 = vst [vmem:[#allocation174_spill] sm:$0xff] %v7401_v33  ;;  %v2262_v15 = vmul.f32 %v9826_v57, %v7377_v8  ;;  %v9827_v14 = vld [vmem:[#allocation34_spill] sm:$0xff] }
 0x398   :  { %v7391_v30 = vpop.permute.xlu1 %2325 }
 0x399   :  { %9820 = vst [vmem:[#allocation46_spill] sm:$0xff] %v7391_v30  ;;  %v7397_v56 = vpop.permute.xlu0 %3475  ;;  %v3413_v30 = vmul.f32 %v9827_v14, %v7363_v11  ;;  %v7425_v14 = vand.u32 2147483647, %v1128_v62  ;;  %v1132_v62 = vadd.f32 %v6879_v9, %v6556_v63  ;;  %v9843_v9 = vld [vmem:[#allocation176_spill] sm:$0xff] }
 0x39a   :  { %9823 = vst [vmem:[#allocation19_spill] sm:$0xff] %v7397_v56  ;;  %1705 = vrot.lane.b32.xlu1 %v1622_v25, %s5115_s21  ;;  %2855 = vrot.lane.b32.xlu0 %v2773_v20, %s5115_s21  ;;  %v2774_v20 = vmul.f32 %v9830_v52, %v7401_v33  ;;  %v9831_v56 = vld [vmem:[#allocation49_spill] sm:$0xff]  ;;  %v9835_v52 = vld [vmem:[#allocation179_spill] sm:$0xff] }
 0x39b   :  { %v1942_v57 = vmul.f32 %v9831_v56, %v7377_v8 }
 0x39c   :  { %v7403_v5 = vpop.permute.xlu1 %2837 }
 0x39d   :  { %9825 = vst [vmem:[#allocation77_spill] sm:$0xff] %v7403_v5  ;;  %v7409_v2 = vpop.permute.xlu0 %2005 }
 0x39e   :  { %9828 = vst [vmem:[#allocation219_spill] sm:$0xff] %v7409_v2  ;;  %2345 = vrot.lane.b32.xlu1 %v2262_v15, %s5116_s22  ;;  %3495 = vrot.lane.b32.xlu0 %v3413_v30, %s5116_s22  ;;  %v1130_v30 = vadd.f32 %v6873_v1, %v6560_v12  ;;  %v9834_v15 = vld [vmem:[#allocation64_spill] sm:$0xff] }
 0x39f   :  { %v3414_v11 = vmul.f32 %v9834_v15, %v7401_v33  ;;  %v9840_v15 = vld [vmem:[#allocation21_spill] sm:$0xff]  ;;  %v10122_v2 = vld [vmem:[#allocation100_spill] sm:$0xff] }
 0x3a0   :  { %v7415_v25 = vpop.permute.xlu1 %3477 }
 0x3a1   :  { %9829 = vst [vmem:[#allocation16_spill] sm:$0xff] %v7415_v25  ;;  %v7421_v5 = vpop.permute.xlu0 %3157  ;;  %v3094_v25 = vmul.f32 %v9835_v52, %v7401_v33  ;;  %v9844_v33 = vld [vmem:[#allocation79_spill] sm:$0xff] }
 0x3a2   :  { %9832 = vst [vmem:[#allocation152_spill] sm:$0xff] %v7421_v5  ;;  %2857 = vrot.lane.b32.xlu1 %v2774_v20, %s5115_s21  ;;  %2025 = vrot.lane.b32.xlu0 %v1942_v57, %s5114_s20  ;;  %v7439_v20 = vand.u32 2147483647, %v1130_v30  ;;  %v9839_v57 = vld [vmem:[#allocation48_spill] sm:$0xff] }
 0x3a3   :  { %v1943_v5 = vmul.f32 %v9839_v57, %v7425_v14 }
 0x3a4   :  { %v7429_v48 = vpop.permute.xlu1 %2007  ;;  %9837 = vst [vmem:[#allocation146_spill] sm:$0xff] %v7439_v20  ;;  %v3095_v30 = vmul.f32 %v9843_v9, %v7439_v20 }
 0x3a5   :  { %9833 = vst [vmem:[#allocation78_spill] sm:$0xff] %v7429_v48  ;;  %v7435_v56 = vpop.permute.xlu0 %1687  ;;  %v1623_v48 = vmul.f32 %v9840_v15, %v7425_v14 }
 0x3a6   :  { %9836 = vst [vmem:[#allocation34_spill] sm:$0xff] %v7435_v56  ;;  %3497 = vrot.lane.b32.xlu1 %v3414_v11, %s5116_s22  ;;  %3177 = vrot.lane.b32.xlu0 %v3094_v25, %s5114_s20  ;;  %v7453_v11 = vand.u32 2147483647, %v1132_v62  ;;  %v9848_v62 = vld [vmem:[#allocation18_spill] sm:$0xff] }
 0x3a8   :  { %v7443_v1 = vpop.permute.xlu1 %3159 }
 0x3a9   :  { %9838 = vst [vmem:[#allocation49_spill] sm:$0xff] %v7443_v1  ;;  %v7449_v52 = vpop.permute.xlu0 %2327  ;;  %v2263_v1 = vmul.f32 %v9844_v33, %v7425_v14 }
 0x3aa   :  { %9841 = vst [vmem:[#allocation64_spill] sm:$0xff] %v7449_v52  ;;  %2027 = vrot.lane.b32.xlu1 %v1943_v5, %s5114_s20  ;;  %1707 = vrot.lane.b32.xlu0 %v1623_v48, %s5115_s21  ;;  %v9846_v5 = vld [vmem:[#allocation65_spill] sm:$0xff]  ;;  %v1624_v52 = vmul.f32 %v9848_v62, %v7453_v11 }
 0x3ab   :  { %v1134_v15 = vadd.f32 %v9846_v5, %v6560_v12 }
 0x3ac   :  { %v7455_v25 = vpop.permute.xlu1 %1689 }
 0x3ad   :  { %9842 = vst [vmem:[#allocation179_spill] sm:$0xff] %v7455_v25  ;;  %v7461_v57 = vpop.permute.xlu0 %2839  ;;  %v9849_v25 = vld [vmem:[#allocation155_spill] sm:$0xff]  ;;  %v7477_v33 = vand.u32 2147483647, %v1134_v15  ;;  %v9857_v15 = vld [vmem:[#allocation150_spill] sm:$0xff] }
 0x3ae   :  { %9845 = vst [vmem:[#allocation48_spill] sm:$0xff] %v7461_v57  ;;  %3179 = vrot.lane.b32.xlu1 %v3095_v30, %s5114_s20  ;;  %2347 = vrot.lane.b32.xlu0 %v2263_v1, %s5116_s22  ;;  %v2775_v9 = vmul.f32 %v9849_v25, %v7439_v20  ;;  %v9853_v30 = vld [vmem:[#allocation80_spill] sm:$0xff]  ;;  %v9854_v57 = vld [vmem:[#allocation33_spill] sm:$0xff] }
 0x3af   :  { %9851 = vst [vmem:[#allocation79_spill] sm:$0xff] %v7477_v33  ;;  %v2264_v5 = vmul.f32 %v9853_v30, %v7453_v11 }
 0x3b0   :  { %v7467_v48 = vpop.permute.xlu1 %2329 }
 0x3b1   :  { %9847 = vst [vmem:[#allocation21_spill] sm:$0xff] %v7467_v48  ;;  %v7473_v56 = vpop.permute.xlu0 %3479  ;;  %v3415_v48 = vmul.f32 %v9854_v57, %v7439_v20  ;;  %v5117_v57 = vmov 71  }
 0x3b2   :  { %9850 = vst [vmem:[#allocation176_spill] sm:$0xff] %v7473_v56  ;;  %1709 = vrot.lane.b32.xlu1 %v1624_v52, %s5115_s21  ;;  %2859 = vrot.lane.b32.xlu0 %v2775_v9, %s5115_s21  ;;  %v1138_v52 = vadd.f32 %v6897_v22, %v6556_v63  ;;  %v2776_v9 = vmul.f32 %v9857_v15, %v7477_v33  ;;  %v9858_v56 = vld [vmem:[#allocation51_spill] sm:$0xff] }
 0x3b3   :  { %v1944_v30 = vmul.f32 %v9858_v56, %v7453_v11  ;;  %4902 = vset.pattern.permute.xlu1 %v5117_v57  ;;  %4901 = vset.pattern.permute.xlu0 %v5117_v57  ;;  %v1140_v22 = vadd.f32 %v6903_v37, %v6560_v12  ;;  %v9861_v15 = vld [vmem:[#allocation7_spill] sm:$0xff]  ;;  %v9862_v56 = vld [vmem:[#allocation181_spill] sm:$0xff] }
 0x3b4   :  { %v7479_v1 = vpop.permute.xlu1 %2841  ;;  %v3416_v20 = vmul.f32 %v9861_v15, %v7477_v33  ;;  %v9867_v15 = vld [vmem:[#allocation23_spill] sm:$0xff] }
 0x3b5   :  { %9852 = vst [vmem:[#allocation65_spill] sm:$0xff] %v7479_v1  ;;  %v7485_v62 = vpop.permute.xlu0 %2009 }
 0x3b6   :  { %9855 = vst [vmem:[#allocation18_spill] sm:$0xff] %v7485_v62  ;;  %2349 = vrot.lane.b32.xlu1 %v2264_v5, %s5116_s22  ;;  %3499 = vrot.lane.b32.xlu0 %v3415_v48, %s5116_s22  ;;  %v7501_v48 = vand.u32 2147483647, %v1138_v52  ;;  %v1142_v52 = vadd.f32 %v6911_v38, %v6556_v63  ;;  %v9870_v38 = vld [vmem:[#allocation178_spill] sm:$0xff]  ;;  %v9898_v62 = vld [vmem:[#allocation163_spill] sm:$0xff] }
 0x3b8   :  { %v7491_v25 = vpop.permute.xlu1 %3481 }
 0x3b9   :  { %9856 = vst [vmem:[#allocation155_spill] sm:$0xff] %v7491_v25  ;;  %v7497_v1 = vpop.permute.xlu0 %3161  ;;  %v3096_v25 = vmul.f32 %v9862_v56, %v7477_v33  ;;  %v9871_v33 = vld [vmem:[#allocation81_spill] sm:$0xff] }
 0x3ba   :  { %9859 = vst [vmem:[#allocation80_spill] sm:$0xff] %v7497_v1  ;;  %2861 = vrot.lane.b32.xlu1 %v2776_v9, %s5115_s21  ;;  %2029 = vrot.lane.b32.xlu0 %v1944_v30, %s5114_s20  ;;  %v7515_v9 = vand.u32 2147483647, %v1140_v22  ;;  %v9866_v30 = vld [vmem:[#allocation50_spill] sm:$0xff] }
 0x3bb   :  { %v1945_v57 = vmul.f32 %v9866_v30, %v7501_v48 }
 0x3bc   :  { %v7505_v5 = vpop.permute.xlu1 %2011  ;;  %9864 = vst [vmem:[#allocation51_spill] sm:$0xff] %v7515_v9  ;;  %v3097_v22 = vmul.f32 %v9870_v38, %v7515_v9 }
 0x3bd   :  { %9860 = vst [vmem:[#allocation33_spill] sm:$0xff] %v7505_v5  ;;  %v7511_v1 = vpop.permute.xlu0 %1691  ;;  %v1625_v5 = vmul.f32 %v9867_v15, %v7501_v48 }
 0x3be   :  { %9863 = vst [vmem:[#allocation150_spill] sm:$0xff] %v7511_v1  ;;  %3501 = vrot.lane.b32.xlu1 %v3416_v20, %s5116_s22  ;;  %3181 = vrot.lane.b32.xlu0 %v3096_v25, %s5114_s20  ;;  %v7529_v20 = vand.u32 2147483647, %v1142_v52  ;;  %v9874_v52 = vld [vmem:[#allocation20_spill] sm:$0xff] }
 0x3c0   :  { %v7519_v37 = vpop.permute.xlu1 %3163  ;;  %v1626_v15 = vmul.f32 %v9874_v52, %v7529_v20  ;;  %v9880_v52 = vld [vmem:[#allocation54_spill] sm:$0xff] }
 0x3c1   :  { %9865 = vst [vmem:[#allocation7_spill] sm:$0xff] %v7519_v37  ;;  %v7525_v56 = vpop.permute.xlu0 %2331  ;;  %v2265_v37 = vmul.f32 %v9871_v33, %v7501_v48 }
 0x3c2   :  { %9868 = vst [vmem:[#allocation181_spill] sm:$0xff] %v7525_v56  ;;  %2031 = vrot.lane.b32.xlu1 %v1945_v57, %s5114_s20  ;;  %1711 = vrot.lane.b32.xlu0 %v1625_v5, %s5115_s21  ;;  %v1144_v57 = vadd.f32 %v6915_v55, %v6560_v12  ;;  %v9875_v56 = vld [vmem:[#allocation159_spill] sm:$0xff] }
 0x3c3   :  { %v2777_v38 = vmul.f32 %v9875_v56, %v7515_v9 }
 0x3c4   :  { %v7531_v25 = vpop.permute.xlu1 %1693  ;;  %v7553_v33 = vand.u32 2147483647, %v1144_v57  ;;  %v1150_v57 = vadd.f32 %v6939_v34, %v6560_v12 }
 0x3c5   :  { %9869 = vst [vmem:[#allocation50_spill] sm:$0xff] %v7531_v25  ;;  %v7537_v30 = vpop.permute.xlu0 %2843 }
 0x3c6   :  { %9872 = vst [vmem:[#allocation23_spill] sm:$0xff] %v7537_v30  ;;  %3183 = vrot.lane.b32.xlu1 %v3097_v22, %s5114_s20  ;;  %2351 = vrot.lane.b32.xlu0 %v2265_v37, %s5116_s22  ;;  %9877 = vst [vmem:[#allocation20_spill] sm:$0xff] %v7553_v33  ;;  %v1148_v37 = vadd.f32 %v6931_v16, %v6556_v63  ;;  %v9879_v22 = vld [vmem:[#allocation82_spill] sm:$0xff] }
 0x3c7   :  { %v2266_v30 = vmul.f32 %v9879_v22, %v7529_v20  ;;  %v9884_v22 = vld [vmem:[#allocation183_spill] sm:$0xff] }
 0x3c8   :  { %v7543_v5 = vpop.permute.xlu1 %2333 }
 0x3c9   :  { %9873 = vst [vmem:[#allocation178_spill] sm:$0xff] %v7543_v5  ;;  %v7549_v25 = vpop.permute.xlu0 %3483  ;;  %v1946_v5 = vmul.f32 %v9880_v52, %v7529_v20 }
 0x3ca   :  { %9876 = vst [vmem:[#allocation81_spill] sm:$0xff] %v7549_v25  ;;  %1713 = vrot.lane.b32.xlu1 %v1626_v15, %s5115_s21  ;;  %2863 = vrot.lane.b32.xlu0 %v2777_v38, %s5115_s21  ;;  %v7567_v15 = vand.u32 2147483647, %v1148_v37  ;;  %v9883_v38 = vld [vmem:[#allocation153_spill] sm:$0xff]  ;;  %v9888_v37 = vld [vmem:[#allocation52_spill] sm:$0xff] }
 0x3cb   :  { %v2778_v25 = vmul.f32 %v9883_v38, %v7553_v33  ;;  %v9889_v38 = vld [vmem:[#allocation25_spill] sm:$0xff] }
 0x3cc   :  { %v7557_v55 = vpop.permute.xlu1 %2845 }
 0x3cd   :  { %9878 = vst [vmem:[#allocation159_spill] sm:$0xff] %v7557_v55  ;;  %v7563_v56 = vpop.permute.xlu0 %2013  ;;  %v3098_v55 = vmul.f32 %v9884_v22, %v7553_v33 }
 0x3ce   :  { %9881 = vst [vmem:[#allocation82_spill] sm:$0xff] %v7563_v56  ;;  %2353 = vrot.lane.b32.xlu1 %v2266_v30, %s5116_s22  ;;  %2033 = vrot.lane.b32.xlu0 %v1946_v5, %s5114_s20  ;;  %v7581_v30 = vand.u32 2147483647, %v1150_v57  ;;  %v1152_v5 = vadd.f32 %v6945_v58, %v6556_v63  ;;  %v1627_v56 = vmul.f32 %v9889_v38, %v7567_v15  ;;  %v9892_v58 = vld [vmem:[#allocation180_spill] sm:$0xff] }
 0x3d0   :  { %v7571_v16 = vpop.permute.xlu1 %3485  ;;  %9886 = vst [vmem:[#allocation183_spill] sm:$0xff] %v7581_v30  ;;  %v3099_v57 = vmul.f32 %v9892_v58, %v7581_v30  ;;  %v2779_v58 = vmul.f32 %v9898_v62, %v7581_v30 }
 0x3d1   :  { %9882 = vst [vmem:[#allocation54_spill] sm:$0xff] %v7571_v16  ;;  %v7577_v52 = vpop.permute.xlu0 %3165  ;;  %v1947_v16 = vmul.f32 %v9888_v37, %v7567_v15 }
 0x3d2   :  { %9885 = vst [vmem:[#allocation153_spill] sm:$0xff] %v7577_v52  ;;  %2865 = vrot.lane.b32.xlu1 %v2778_v25, %s5115_s21  ;;  %3185 = vrot.lane.b32.xlu0 %v3098_v55, %s5114_s20  ;;  %v7595_v25 = vand.u32 2147483647, %v1152_v5  ;;  %v9893_v52 = vld [vmem:[#allocation83_spill] sm:$0xff]  ;;  %v9897_v5 = vld [vmem:[#allocation22_spill] sm:$0xff] }
 0x3d4   :  { %v7585_v34 = vpop.permute.xlu1 %2015 }
 0x3d5   :  { %9887 = vst [vmem:[#allocation252_spill] sm:$0xff] %v7585_v34  ;;  %v7591_v22 = vpop.permute.xlu0 %1695  ;;  %v2267_v34 = vmul.f32 %v9893_v52, %v7567_v15 }
 0x3d6   :  { %9890 = vst [vmem:[#allocation52_spill] sm:$0xff] %v7591_v22  ;;  %2035 = vrot.lane.b32.xlu1 %v1947_v16, %s5114_s20  ;;  %1715 = vrot.lane.b32.xlu0 %v1627_v56, %s5115_s21  ;;  %v9895_v16 = vld [vmem:[#allocation230_spill] sm:$0xff] }
 0x3d7   :  { %v1154_v38 = vadd.f32 %v9895_v16, %v6560_v12  ;;  %v9902_v16 = vld [vmem:[#allocation84_spill] sm:$0xff] }
 0x3d8   :  { %v7597_v55 = vpop.permute.xlu1 %3167 }
 0x3d9   :  { %9891 = vst [vmem:[#allocation25_spill] sm:$0xff] %v7597_v55  ;;  %v7603_v37 = vpop.permute.xlu0 %2335  ;;  %v1628_v55 = vmul.f32 %v9897_v5, %v7595_v25  ;;  %v7619_v52 = vand.u32 2147483647, %v1154_v38  ;;  %v9903_v5 = vld [vmem:[#allocation56_spill] sm:$0xff]  ;;  %v1160_v38 = vadd.f32 %v6971_v51, %v6560_v12 }
 0x3da   :  { %9894 = vst [vmem:[#allocation180_spill] sm:$0xff] %v7603_v37  ;;  %3187 = vrot.lane.b32.xlu1 %v3099_v57, %s5114_s20  ;;  %2355 = vrot.lane.b32.xlu0 %v2267_v34, %s5116_s22  ;;  %v1158_v34 = vadd.f32 %v6965_v7, %v6556_v63  ;;  %v2268_v37 = vmul.f32 %v9902_v16, %v7595_v25  ;;  %v9907_v16 = vld [vmem:[#allocation185_spill] sm:$0xff] }
 0x3db   :  { %9900 = vst [vmem:[#allocation22_spill] sm:$0xff] %v7619_v52 }
 0x3dc   :  { %v7609_v56 = vpop.permute.xlu1 %1697 }
 0x3dd   :  { %9896 = vst [vmem:[#allocation83_spill] sm:$0xff] %v7609_v56  ;;  %v7615_v22 = vpop.permute.xlu0 %2847  ;;  %v1948_v56 = vmul.f32 %v9903_v5, %v7595_v25 }
 0x3de   :  { %9899 = vst [vmem:[#allocation230_spill] sm:$0xff] %v7615_v22  ;;  %1717 = vrot.lane.b32.xlu1 %v1628_v55, %s5115_s21  ;;  %2867 = vrot.lane.b32.xlu0 %v2779_v58, %s5115_s21  ;;  %v7633_v55 = vand.u32 2147483647, %v1158_v34  ;;  %v9906_v58 = vld [vmem:[#allocation156_spill] sm:$0xff]  ;;  %v9911_v34 = vld [vmem:[#allocation53_spill] sm:$0xff] }
 0x3df   :  { %v2780_v22 = vmul.f32 %v9906_v58, %v7619_v52  ;;  %v9912_v58 = vld [vmem:[#allocation27_spill] sm:$0xff] }
 0x3e0   :  { %v7623_v57 = vpop.permute.xlu1 %2337 }
 0x3e1   :  { %9901 = vst [vmem:[#allocation163_spill] sm:$0xff] %v7623_v57  ;;  %v7629_v62 = vpop.permute.xlu0 %3487  ;;  %v3100_v57 = vmul.f32 %v9907_v16, %v7619_v52 }
 0x3e2   :  { %9904 = vst [vmem:[#allocation84_spill] sm:$0xff] %v7629_v62  ;;  %2357 = vrot.lane.b32.xlu1 %v2268_v37, %s5116_s22  ;;  %2037 = vrot.lane.b32.xlu0 %v1948_v56, %s5114_s20  ;;  %v7647_v37 = vand.u32 2147483647, %v1160_v38  ;;  %v1162_v56 = vadd.f32 %v6979_v10, %v6556_v63  ;;  %v1949_v62 = vmul.f32 %v9911_v34, %v7633_v55  ;;  %v9916_v10 = vld [vmem:[#allocation182_spill] sm:$0xff] }
 0x3e4   :  { %v7637_v7 = vpop.permute.xlu1 %2849  ;;  %9909 = vst [vmem:[#allocation185_spill] sm:$0xff] %v7647_v37  ;;  %v3101_v38 = vmul.f32 %v9916_v10, %v7647_v37 }
 0x3e5   :  { %9905 = vst [vmem:[#allocation56_spill] sm:$0xff] %v7637_v7  ;;  %v7643_v5 = vpop.permute.xlu0 %2017  ;;  %v1629_v7 = vmul.f32 %v9912_v58, %v7633_v55 }
 0x3e6   :  { %9908 = vst [vmem:[#allocation156_spill] sm:$0xff] %v7643_v5  ;;  %2869 = vrot.lane.b32.xlu1 %v2780_v22, %s5115_s21  ;;  %3189 = vrot.lane.b32.xlu0 %v3100_v57, %s5114_s20  ;;  %v7661_v22 = vand.u32 2147483647, %v1162_v56  ;;  %v9921_v56 = vld [vmem:[#allocation24_spill] sm:$0xff] }
 0x3e8   :  { %v7651_v51 = vpop.permute.xlu1 %3489  ;;  %9914 = vst [vmem:[#allocation27_spill] sm:$0xff] %v7661_v22 }
 0x3e9   :  { %9910 = vst [vmem:[#allocation253_spill] sm:$0xff] %v7651_v51  ;;  %v7657_v16 = vpop.permute.xlu0 %3169  ;;  %v9917_v51 = vld [vmem:[#allocation85_spill] sm:$0xff] }
 0x3ea   :  { %9913 = vst [vmem:[#allocation53_spill] sm:$0xff] %v7657_v16  ;;  %2039 = vrot.lane.b32.xlu1 %v1949_v62, %s5114_s20  ;;  %1719 = vrot.lane.b32.xlu0 %v1629_v7, %s5115_s21  ;;  %v2269_v5 = vmul.f32 %v9917_v51, %v7633_v55  ;;  %v9919_v62 = vld [vmem:[#allocation235_spill] sm:$0xff]  ;;  %v1630_v16 = vmul.f32 %v9921_v56, %v7661_v22  ;;  %v9927_v56 = vld [vmem:[#allocation58_spill] sm:$0xff] }
 0x3eb   :  { %v1164_v58 = vadd.f32 %v9919_v62, %v6560_v12  ;;  %v9926_v62 = vld [vmem:[#allocation86_spill] sm:$0xff] }
 0x3ec   :  { %v7663_v57 = vpop.permute.xlu1 %2019 }
 0x3ed   :  { %9915 = vst [vmem:[#allocation254_spill] sm:$0xff] %v7663_v57  ;;  %v7669_v34 = vpop.permute.xlu0 %1699  ;;  %v9922_v57 = vld [vmem:[#allocation167_spill] sm:$0xff]  ;;  %v7685_v51 = vand.u32 2147483647, %v1164_v58  ;;  %v1170_v58 = vadd.f32 %v7005_v43, %v6560_v12 }
 0x3ee   :  { %9918 = vst [vmem:[#allocation182_spill] sm:$0xff] %v7669_v34  ;;  %3191 = vrot.lane.b32.xlu1 %v3101_v38, %s5114_s20  ;;  %2359 = vrot.lane.b32.xlu0 %v2269_v5, %s5116_s22  ;;  %v2781_v10 = vmul.f32 %v9922_v57, %v7647_v37  ;;  %v1168_v5 = vadd.f32 %v7001_v61, %v6556_v63 }
 0x3ef   :  { %9924 = vst [vmem:[#allocation24_spill] sm:$0xff] %v7685_v51  ;;  %v1950_v34 = vmul.f32 %v9927_v56, %v7661_v22 }
 0x3f0   :  { %v7675_v7 = vpop.permute.xlu1 %3171 }
 0x3f1   :  { %9920 = vst [vmem:[#allocation85_spill] sm:$0xff] %v7675_v7  ;;  %v7681_v1 = vpop.permute.xlu0 %2339  ;;  %v2270_v7 = vmul.f32 %v9926_v62, %v7661_v22  ;;  %v9932_v62 = vld [vmem:[#allocation187_spill] sm:$0xff] }
 0x3f2   :  { %9923 = vst [vmem:[#allocation235_spill] sm:$0xff] %v7681_v1  ;;  %1721 = vrot.lane.b32.xlu1 %v1630_v16, %s5115_s21  ;;  %2871 = vrot.lane.b32.xlu0 %v2781_v10, %s5115_s21  ;;  %v7699_v16 = vand.u32 2147483647, %v1168_v5  ;;  %v9931_v10 = vld [vmem:[#allocation160_spill] sm:$0xff]  ;;  %v9936_v5 = vld [vmem:[#allocation55_spill] sm:$0xff] }
 0x3f3   :  { %v2782_v1 = vmul.f32 %v9931_v10, %v7685_v51  ;;  %v9937_v10 = vld [vmem:[#allocation29_spill] sm:$0xff] }
 0x3f4   :  { %v7689_v38 = vpop.permute.xlu1 %1701  ;;  %9929 = vst [vmem:[#allocation58_spill] sm:$0xff] %v7699_v16 }
 0x3f5   :  { %9925 = vst [vmem:[#allocation167_spill] sm:$0xff] %v7689_v38  ;;  %v7695_v57 = vpop.permute.xlu0 %2851  ;;  %v3102_v38 = vmul.f32 %v9932_v62, %v7685_v51 }
 0x3f6   :  { %9928 = vst [vmem:[#allocation86_spill] sm:$0xff] %v7695_v57  ;;  %2361 = vrot.lane.b32.xlu1 %v2270_v7, %s5116_s22  ;;  %2041 = vrot.lane.b32.xlu0 %v1950_v34, %s5114_s20  ;;  %v7713_v34 = vand.u32 2147483647, %v1170_v58  ;;  %v1172_v7 = vadd.f32 %v7011_v3, %v6556_v63  ;;  %v1951_v57 = vmul.f32 %v9936_v5, %v7699_v16  ;;  %v9941_v3 = vld [vmem:[#allocation184_spill] sm:$0xff] }
 0x3f8   :  { %v7703_v61 = vpop.permute.xlu1 %2341  ;;  %9934 = vst [vmem:[#allocation187_spill] sm:$0xff] %v7713_v34  ;;  %v3103_v58 = vmul.f32 %v9941_v3, %v7713_v34 }
 0x3f9   :  { %9930 = vst [vmem:[#allocation255_spill] sm:$0xff] %v7703_v61  ;;  %v7709_v56 = vpop.permute.xlu0 %3491  ;;  %v1631_v61 = vmul.f32 %v9937_v10, %v7699_v16 }
 0x3fa   :  { %9933 = vst [vmem:[#allocation160_spill] sm:$0xff] %v7709_v56  ;;  %2873 = vrot.lane.b32.xlu1 %v2782_v1, %s5115_s21  ;;  %3193 = vrot.lane.b32.xlu0 %v3102_v38, %s5114_s20  ;;  %v7727_v1 = vand.u32 2147483647, %v1172_v7  ;;  %v9942_v56 = vld [vmem:[#allocation87_spill] sm:$0xff]  ;;  %v9945_v7 = vld [vmem:[#allocation26_spill] sm:$0xff] }
 0x3fc   :  { %v7717_v43 = vpop.permute.xlu1 %2853  ;;  %9939 = vst [vmem:[#allocation29_spill] sm:$0xff] %v7727_v1  ;;  %v1632_v10 = vmul.f32 %v9945_v7, %v7727_v1  ;;  %v9951_v7 = vld [vmem:[#allocation59_spill] sm:$0xff] }
 0x3fd   :  { %9935 = vst [vmem:[#allocation256_spill] sm:$0xff] %v7717_v43  ;;  %v7723_v62 = vpop.permute.xlu0 %2021  ;;  %v2271_v43 = vmul.f32 %v9942_v56, %v7699_v16 }
 0x3fe   :  { %9938 = vst [vmem:[#allocation55_spill] sm:$0xff] %v7723_v62  ;;  %2043 = vrot.lane.b32.xlu1 %v1951_v57, %s5114_s20  ;;  %1723 = vrot.lane.b32.xlu0 %v1631_v61, %s5115_s21  ;;  %v1174_v57 = vadd.f32 %v7013_v28, %v6560_v12 }
 0x400   :  { %v7729_v38 = vpop.permute.xlu1 %3493  ;;  %v7751_v56 = vand.u32 2147483647, %v1174_v57  ;;  %v1180_v57 = vadd.f32 %v7037_v6, %v6560_v12 }
 0x401   :  { %9940 = vst [vmem:[#allocation257_spill] sm:$0xff] %v7729_v38  ;;  %v7735_v5 = vpop.permute.xlu0 %3173  ;;  %v9946_v38 = vld [vmem:[#allocation169_spill] sm:$0xff] }
 0x402   :  { %9943 = vst [vmem:[#allocation184_spill] sm:$0xff] %v7735_v5  ;;  %3195 = vrot.lane.b32.xlu1 %v3103_v58, %s5114_s20  ;;  %2363 = vrot.lane.b32.xlu0 %v2271_v43, %s5116_s22  ;;  %v2783_v3 = vmul.f32 %v9946_v38, %v7713_v34  ;;  %9948 = vst [vmem:[#allocation169_spill] sm:$0xff] %v7751_v56  ;;  %v1178_v43 = vadd.f32 %v7029_v17, %v6556_v63  ;;  %v9950_v58 = vld [vmem:[#allocation88_spill] sm:$0xff] }
 0x403   :  { %v2272_v5 = vmul.f32 %v9950_v58, %v7727_v1  ;;  %v9956_v58 = vld [vmem:[#allocation188_spill] sm:$0xff] }
 0x404   :  { %v7741_v61 = vpop.permute.xlu1 %2023 }
 0x405   :  { %9944 = vst [vmem:[#allocation87_spill] sm:$0xff] %v7741_v61  ;;  %v7747_v62 = vpop.permute.xlu0 %1703  ;;  %v1952_v61 = vmul.f32 %v9951_v7, %v7727_v1  ;;  %v10118_v1 = vld [vmem:[#allocation98_spill] sm:$0xff] }
 0x406   :  { %9947 = vst [vmem:[#allocation26_spill] sm:$0xff] %v7747_v62  ;;  %1725 = vrot.lane.b32.xlu1 %v1632_v10, %s5115_s21  ;;  %2875 = vrot.lane.b32.xlu0 %v2783_v3, %s5115_s21  ;;  %v7765_v10 = vand.u32 2147483647, %v1178_v43  ;;  %v9955_v3 = vld [vmem:[#allocation164_spill] sm:$0xff]  ;;  %v3104_v62 = vmul.f32 %v9956_v58, %v7751_v56  ;;  %v9960_v43 = vld [vmem:[#allocation57_spill] sm:$0xff] }
 0x408   :  { %v7755_v28 = vpop.permute.xlu1 %3175  ;;  %9953 = vst [vmem:[#allocation59_spill] sm:$0xff] %v7765_v10 }
 0x409   :  { %9949 = vst [vmem:[#allocation258_spill] sm:$0xff] %v7755_v28  ;;  %v7761_v38 = vpop.permute.xlu0 %2343  ;;  %v2784_v28 = vmul.f32 %v9955_v3, %v7751_v56  ;;  %v9961_v3 = vld [vmem:[#allocation30_spill] sm:$0xff] }
 0x40a   :  { %9952 = vst [vmem:[#allocation88_spill] sm:$0xff] %v7761_v38  ;;  %2365 = vrot.lane.b32.xlu1 %v2272_v5, %s5116_s22  ;;  %2045 = vrot.lane.b32.xlu0 %v1952_v61, %s5114_s20  ;;  %v7779_v5 = vand.u32 2147483647, %v1180_v57  ;;  %v1182_v61 = vadd.f32 %v7047_v41, %v6556_v63  ;;  %v1953_v38 = vmul.f32 %v9960_v43, %v7765_v10  ;;  %v9965_v63 = vld [vmem:[#allocation186_spill] sm:$0xff]  ;;  %v9966_v57 = vld [vmem:[#allocation89_spill] sm:$0xff] }
 0x40c   :  { %v7769_v17 = vpop.permute.xlu1 %1705  ;;  %9958 = vst [vmem:[#allocation188_spill] sm:$0xff] %v7779_v5  ;;  %v3105_v41 = vmul.f32 %v9965_v63, %v7779_v5 }
 0x40d   :  { %9954 = vst [vmem:[#allocation259_spill] sm:$0xff] %v7769_v17  ;;  %v7775_v7 = vpop.permute.xlu0 %2855  ;;  %v1633_v17 = vmul.f32 %v9961_v3, %v7765_v10 }
 0x40e   :  { %9957 = vst [vmem:[#allocation164_spill] sm:$0xff] %v7775_v7  ;;  %2877 = vrot.lane.b32.xlu1 %v2784_v28, %s5115_s21  ;;  %3197 = vrot.lane.b32.xlu0 %v3104_v62, %s5114_s20  ;;  %v7793_v62 = vand.u32 2147483647, %v1182_v61  ;;  %v2273_v7 = vmul.f32 %v9966_v57, %v7765_v10  ;;  %v9970_v61 = vld [vmem:[#allocation28_spill] sm:$0xff] }
 0x410   :  { %v7783_v6 = vpop.permute.xlu1 %2345  ;;  %9963 = vst [vmem:[#allocation30_spill] sm:$0xff] %v7793_v62 }
 0x411   :  { %9959 = vst [vmem:[#allocation260_spill] sm:$0xff] %v7783_v6  ;;  %v7789_v58 = vpop.permute.xlu0 %3495 }
 0x412   :  { %9962 = vst [vmem:[#allocation57_spill] sm:$0xff] %v7789_v58  ;;  %2047 = vrot.lane.b32.xlu1 %v1953_v38, %s5114_s20  ;;  %1727 = vrot.lane.b32.xlu0 %v1633_v17, %s5115_s21  ;;  %v9968_v38 = vld [vmem:[#allocation242_spill] sm:$0xff]  ;;  %v1634_v58 = vmul.f32 %v9970_v61, %v7793_v62 }
 0x413   :  { %v1184_v3 = vadd.f32 %v9968_v38, %v6560_v12  ;;  %v9975_v12 = vld [vmem:[#allocation90_spill] sm:$0xff]  ;;  %v9976_v38 = vld [vmem:[#allocation61_spill] sm:$0xff] }
 0x414   :  { %v7795_v28 = vpop.permute.xlu1 %2857  ;;  %v2274_v57 = vmul.f32 %v9975_v12, %v7793_v62 }
 0x415   :  { %9964 = vst [vmem:[#allocation261_spill] sm:$0xff] %v7795_v28  ;;  %v7801_v43 = vpop.permute.xlu0 %2025  ;;  %v9971_v28 = vld [vmem:[#allocation172_spill] sm:$0xff] }
 0x416   :  { %9967 = vst [vmem:[#allocation186_spill] sm:$0xff] %v7801_v43  ;;  %3199 = vrot.lane.b32.xlu1 %v3105_v41, %s5114_s20  ;;  %2367 = vrot.lane.b32.xlu0 %v2273_v7, %s5116_s22  ;;  %v2785_v63 = vmul.f32 %v9971_v28, %v7779_v5  ;;  %v7817_v41 = vand.u32 2147483647, %v1184_v3 }
 0x418   :  { %v7807_v17 = vpop.permute.xlu1 %3497  ;;  %9973 = vst [vmem:[#allocation28_spill] sm:$0xff] %v7817_v41 }
 0x419   :  { %9969 = vst [vmem:[#allocation89_spill] sm:$0xff] %v7807_v17  ;;  %v7813_v6 = vpop.permute.xlu0 %3177  ;;  %v1954_v17 = vmul.f32 %v9976_v38, %v7793_v62  ;;  %v10116_v62 = vld [vmem:[#allocation97_spill] sm:$0xff] }
 0x41a   :  { %9972 = vst [vmem:[#allocation242_spill] sm:$0xff] %v7813_v6  ;;  %1729 = vrot.lane.b32.xlu1 %v1634_v58, %s5115_s21  ;;  %2879 = vrot.lane.b32.xlu0 %v2785_v63, %s5115_s21  ;;  %v9979_v58 = vld [vmem:[#allocation166_spill] sm:$0xff]  ;;  %v9980_v63 = vld [vmem:[#allocation189_spill] sm:$0xff] }
 0x41b   :  { %v2786_v3 = vmul.f32 %v9979_v58, %v7817_v41  ;;  %v3106_v6 = vmul.f32 %v9980_v63, %v7817_v41 }
 0x41c   :  { %v7819_v7 = vpop.permute.xlu1 %2027 }
 0x41d   :  { %9974 = vst [vmem:[#allocation172_spill] sm:$0xff] %v7819_v7  ;;  %v7825_v61 = vpop.permute.xlu0 %1707 }
 0x41e   :  { %9977 = vst [vmem:[#allocation90_spill] sm:$0xff] %v7825_v61  ;;  %2369 = vrot.lane.b32.xlu1 %v2274_v57, %s5116_s22  ;;  %2049 = vrot.lane.b32.xlu0 %v1954_v17, %s5114_s20  ;;  %v9983_v57 = vld [vmem:[#allocation4_spill] sm:$0xff]  ;;  %v9984_v17 = vld [vmem:[#allocation223_spill] sm:$0xff] }
 0x41f   :  { %v3418_v38 = vmul.f32 %v9983_v57, %v7553_v33  ;;  %v10115_v61 = vld [vmem:[#allocation216_spill] sm:$0xff] }
 0x420   :  { %v7829_v28 = vpop.permute.xlu1 %3179  ;;  %v8257_v10 = vmul.f32 %v10116_v62, %v10115_v61 }
 0x421   :  { %9978 = vst [vmem:[#allocation61_spill] sm:$0xff] %v7829_v28  ;;  %v7835_v7 = vpop.permute.xlu0 %2347  ;;  %v3417_v28 = vmul.f32 %v9984_v17, %v7515_v9 }
 0x422   :  { %9981 = vst [vmem:[#allocation166_spill] sm:$0xff] %v7835_v7  ;;  %2881 = vrot.lane.b32.xlu1 %v2786_v3, %s5115_s21  ;;  %3201 = vrot.lane.b32.xlu0 %v3106_v6, %s5114_s20  ;;  %v9987_v3 = vld [vmem:[#allocation228_spill] sm:$0xff] }
 0x423   :  { %v3420_v63 = vmul.f32 %v9987_v3, %v7619_v52  ;;  %v9988_v6 = vld [vmem:[#allocation36_spill] sm:$0xff] }
 0x424   :  { %v7839_v12 = vpop.permute.xlu1 %1709  ;;  %v3419_v7 = vmul.f32 %v9988_v6, %v7581_v30 }
 0x425   :  { %9982 = vst [vmem:[#allocation189_spill] sm:$0xff] %v7839_v12  ;;  %v7845_v43 = vpop.permute.xlu0 %2859 }
 0x426   :  { %9985 = vst [vmem:[#allocation4_spill] sm:$0xff] %v7845_v43  ;;  %3505 = vrot.lane.b32.xlu1 %v3418_v38, %s5116_s22  ;;  %3503 = vrot.lane.b32.xlu0 %v3417_v28, %s5116_s22  ;;  %v9991_v38 = vld [vmem:[#allocation35_spill] sm:$0xff]  ;;  %v9992_v28 = vld [vmem:[#allocation9_spill] sm:$0xff] }
 0x427   :  { %v3422_v17 = vmul.f32 %v9991_v38, %v7685_v51  ;;  %v3421_v33 = vmul.f32 %v9992_v28, %v7647_v37 }
 0x428   :  { %v7849_v58 = vpop.permute.xlu1 %2349 }
 0x429   :  { %9986 = vst [vmem:[#allocation223_spill] sm:$0xff] %v7849_v58  ;;  %v7855_v12 = vpop.permute.xlu0 %3499 }
 0x42a   :  { %9989 = vst [vmem:[#allocation228_spill] sm:$0xff] %v7855_v12  ;;  %3509 = vrot.lane.b32.xlu1 %v3420_v63, %s5116_s22  ;;  %3507 = vrot.lane.b32.xlu0 %v3419_v7, %s5116_s22  ;;  %v9995_v63 = vld [vmem:[#allocation6_spill] sm:$0xff]  ;;  %v9996_v7 = vld [vmem:[#allocation237_spill] sm:$0xff] }
 0x42b   :  { %v3424_v6 = vmul.f32 %v9995_v63, %v7751_v56  ;;  %v3423_v52 = vmul.f32 %v9996_v7, %v7713_v34  ;;  %v5080_v34 = vld [vmem:[%s9323_s0 + $0x38] sm:$0xff] }
 0x42c   :  { %v7859_v57 = vpop.permute.xlu1 %2861 }
 0x42d   :  { %9990 = vst [vmem:[#allocation36_spill] sm:$0xff] %v7859_v57  ;;  %v7865_v9 = vpop.permute.xlu0 %2029 }
 0x42e   :  { %9993 = vst [vmem:[#allocation35_spill] sm:$0xff] %v7865_v9  ;;  %3513 = vrot.lane.b32.xlu1 %v3422_v17, %s5116_s22  ;;  %3511 = vrot.lane.b32.xlu0 %v3421_v33, %s5116_s22  ;;  %v9999_v17 = vld [vmem:[#allocation68_spill] sm:$0xff]  ;;  %v10000_v33 = vld [vmem:[#allocation38_spill] sm:$0xff]  ;;  %v10114_v9 = vld [vmem:[#allocation241_spill] sm:$0xff] }
 0x42f   :  { %v3426_v28 = vmul.f32 %v9999_v17, %v7817_v41  ;;  %v3425_v51 = vmul.f32 %v10000_v33, %v7779_v5  ;;  %v5078_v5 = vld [vmem:[%s9323_s0 + $0x28] sm:$0xff] }
 0x430   :  { %v7869_v3 = vpop.permute.xlu1 %3501 }
 0x431   :  { %9994 = vst [vmem:[#allocation9_spill] sm:$0xff] %v7869_v3  ;;  %v7875_v30 = vpop.permute.xlu0 %3181  ;;  %v5084_v3 = vld [vmem:[%s9323_s0 + $0x58] sm:$0xff] }
 0x432   :  { %9997 = vst [vmem:[#allocation6_spill] sm:$0xff] %v7875_v30  ;;  %3517 = vrot.lane.b32.xlu1 %v3424_v6, %s5116_s22  ;;  %3515 = vrot.lane.b32.xlu0 %v3423_v52, %s5116_s22  ;;  %v5073_v52 = vld [vmem:[%s9323_s0 + $0x8] sm:$0xff]  ;;  %v5074_v6 = vld [vmem:[%s9323_s0] sm:$0xff] }
 0x434   :  { %v7879_v38 = vpop.permute.xlu1 %2031 }
 0x435   :  { %9998 = vst [vmem:[#allocation237_spill] sm:$0xff] %v7879_v38  ;;  %v7885_v37 = vpop.permute.xlu0 %1711 }
 0x436   :  { %10001 = vst [vmem:[#allocation68_spill] sm:$0xff] %v7885_v37  ;;  %3521 = vrot.lane.b32.xlu1 %v3426_v28, %s5116_s22  ;;  %3519 = vrot.lane.b32.xlu0 %v3425_v51, %s5116_s22  ;;  %v5075_v51 = vld [vmem:[%s9323_s0 + $0x10] sm:$0xff]  ;;  %v5076_v28 = vld [vmem:[%s9323_s0 + $0x18] sm:$0xff] }
 0x437   :  { %v10112_v37 = vld [vmem:[#allocation96_spill] sm:$0xff] }
 0x438   :  { %v7889_v63 = vpop.permute.xlu1 %3183 }
 0x439   :  { %10002 = vst [vmem:[#allocation38_spill] sm:$0xff] %v7889_v63  ;;  %v7891_v7 = vpop.permute.xlu0 %2351 }
 0x43a   :  { %10003 = vst [vmem:[#allocation262_spill] sm:$0xff] %v7891_v7  ;;  %3592 = vperm.xlu1 %4902, %v5073_v52   ;;  %3588 = vperm.xlu0 %4901, %v5074_v6   ;;  %v5077_v6 = vld [vmem:[%s9323_s0 + $0x20] sm:$0xff] }
 0x43c   :  { %v7899_v17 = vpop.permute.xlu1 %1713 }
 0x43d   :  { %10004 = vst [vmem:[#allocation263_spill] sm:$0xff] %v7899_v17  ;;  %v7901_v33 = vpop.permute.xlu0 %2863 }
 0x43e   :  { %10005 = vst [vmem:[#allocation264_spill] sm:$0xff] %v7901_v33  ;;  %3596 = vperm.xlu1 %4902, %v5075_v51   ;;  %3600 = vperm.xlu0 %4901, %v5076_v28   ;;  %v5079_v28 = vld [vmem:[%s9323_s0 + $0x30] sm:$0xff] }
 0x440   :  { %v7909_v52 = vpop.permute.xlu1 %2353 }
 0x441   :  { %10006 = vst [vmem:[#allocation265_spill] sm:$0xff] %v7909_v52  ;;  %v7911_v41 = vpop.permute.xlu0 %2033 }
 0x442   :  { %10007 = vst [vmem:[#allocation266_spill] sm:$0xff] %v7911_v41  ;;  %3604 = vperm.xlu1 %4902, %v5077_v6   ;;  %3608 = vperm.xlu0 %4901, %v5078_v5   ;;  %v5081_v5 = vld [vmem:[%s9323_s0 + $0x40] sm:$0xff] }
 0x444   :  { %v7919_v51 = vpop.permute.xlu1 %2865 }
 0x445   :  { %10008 = vst [vmem:[#allocation267_spill] sm:$0xff] %v7919_v51  ;;  %v7921_v56 = vpop.permute.xlu0 %3185 }
 0x446   :  { %10009 = vst [vmem:[#allocation268_spill] sm:$0xff] %v7921_v56  ;;  %3612 = vperm.xlu1 %4902, %v5079_v28   ;;  %3616 = vperm.xlu0 %4901, %v5080_v34   ;;  %v5082_v56 = vld [vmem:[%s9323_s0 + $0x48] sm:$0xff]  ;;  %v5083_v34 = vld [vmem:[%s9323_s0 + $0x50] sm:$0xff] }
 0x448   :  { %v7929_v6 = vpop.permute.xlu1 %2035 }
 0x449   :  { %10010 = vst [vmem:[#allocation269_spill] sm:$0xff] %v7929_v6  ;;  %v7931_v63 = vpop.permute.xlu0 %1715 }
 0x44a   :  { %10011 = vst [vmem:[#allocation270_spill] sm:$0xff] %v7931_v63  ;;  %3620 = vperm.xlu1 %4902, %v5081_v5   ;;  %3624 = vperm.xlu0 %4901, %v5082_v56   ;;  %v5085_v56 = vld [vmem:[%s9323_s0 + $0x60] sm:$0xff]  ;;  %v10103_v63 = vld [vmem:[#allocation204_spill] sm:$0xff] }
 0x44c   :  { %v7939_v28 = vpop.permute.xlu1 %3187 }
 0x44d   :  { %10012 = vst [vmem:[#allocation271_spill] sm:$0xff] %v7939_v28  ;;  %v7941_v51 = vpop.permute.xlu0 %2355  ;;  %v5086_v28 = vld [vmem:[%s9323_s0 + $0x68] sm:$0xff] }
 0x44e   :  { %10013 = vst [vmem:[#allocation272_spill] sm:$0xff] %v7941_v51  ;;  %3628 = vperm.xlu1 %4902, %v5083_v34   ;;  %3632 = vperm.xlu0 %4901, %v5084_v3   ;;  %v5087_v3 = vld [vmem:[%s9323_s0 + $0x70] sm:$0xff] }
 0x450   :  { %v7949_v5 = vpop.permute.xlu1 %1717 }
 0x451   :  { %10014 = vst [vmem:[#allocation273_spill] sm:$0xff] %v7949_v5  ;;  %v7951_v33 = vpop.permute.xlu0 %2867 }
 0x452   :  { %10015 = vst [vmem:[#allocation274_spill] sm:$0xff] %v7951_v33  ;;  %3636 = vperm.xlu1 %4902, %v5085_v56   ;;  %3640 = vperm.xlu0 %4901, %v5086_v28   ;;  %v5088_v33 = vld [vmem:[%s9323_s0 + $0x78] sm:$0xff]  ;;  %v5089_v28 = vld [vmem:[%s9323_s0 + $0x80] sm:$0xff] }
 0x454   :  { %v7959_v34 = vpop.permute.xlu1 %2357 }
 0x455   :  { %10016 = vst [vmem:[#allocation275_spill] sm:$0xff] %v7959_v34  ;;  %v7961_v12 = vpop.permute.xlu0 %2037  ;;  %v5090_v34 = vld [vmem:[%s9323_s0 + $0x88] sm:$0xff] }
 0x456   :  { %10017 = vst [vmem:[#allocation276_spill] sm:$0xff] %v7961_v12  ;;  %3644 = vperm.xlu1 %4902, %v5087_v3   ;;  %3648 = vperm.xlu0 %4901, %v5088_v33   ;;  %v5091_v33 = vld [vmem:[%s9323_s0 + $0x90] sm:$0xff] }
 0x458   :  { %v7969_v56 = vpop.permute.xlu1 %2869 }
 0x459   :  { %10018 = vst [vmem:[#allocation277_spill] sm:$0xff] %v7969_v56  ;;  %v7971_v30 = vpop.permute.xlu0 %3189 }
 0x45a   :  { %10019 = vst [vmem:[#allocation278_spill] sm:$0xff] %v7971_v30  ;;  %3652 = vperm.xlu1 %4902, %v5089_v28   ;;  %3656 = vperm.xlu0 %4901, %v5090_v34   ;;  %v5092_v30 = vld [vmem:[%s9323_s0 + $0x98] sm:$0xff]  ;;  %v5093_v34 = vld [vmem:[%s9323_s0 + $0xa0] sm:$0xff] }
 0x45c   :  { %v7979_v3 = vpop.permute.xlu1 %2039 }
 0x45d   :  { %10020 = vst [vmem:[#allocation279_spill] sm:$0xff] %v7979_v3  ;;  %v7981_v51 = vpop.permute.xlu0 %1719  ;;  %v5094_v3 = vld [vmem:[%s9323_s0 + $0xa8] sm:$0xff] }
 0x45e   :  { %10021 = vst [vmem:[#allocation280_spill] sm:$0xff] %v7981_v51  ;;  %3660 = vperm.xlu1 %4902, %v5091_v33   ;;  %3664 = vperm.xlu0 %4901, %v5092_v30   ;;  %v5095_v30 = vld [vmem:[%s9323_s0 + $0xb0] sm:$0xff] }
 0x460   :  { %v7989_v28 = vpop.permute.xlu1 %3191 }
 0x461   :  { %10022 = vst [vmem:[#allocation281_spill] sm:$0xff] %v7989_v28  ;;  %v7991_v56 = vpop.permute.xlu0 %2359  ;;  %v5096_v28 = vld [vmem:[%s9323_s0 + $0xb8] sm:$0xff] }
 0x462   :  { %10023 = vst [vmem:[#allocation282_spill] sm:$0xff] %v7991_v56  ;;  %3668 = vperm.xlu1 %4902, %v5093_v34   ;;  %3672 = vperm.xlu0 %4901, %v5094_v3   ;;  %v5097_v3 = vld [vmem:[%s9323_s0 + $0xc0] sm:$0xff] }
 0x464   :  { %v7999_v33 = vpop.permute.xlu1 %1721 }
 0x465   :  { %10024 = vst [vmem:[#allocation283_spill] sm:$0xff] %v7999_v33  ;;  %v8001_v12 = vpop.permute.xlu0 %2871 }
 0x466   :  { %10025 = vst [vmem:[#allocation284_spill] sm:$0xff] %v8001_v12  ;;  %3676 = vperm.xlu1 %4902, %v5095_v30   ;;  %3680 = vperm.xlu0 %4901, %v5096_v28   ;;  %v5098_v12 = vld [vmem:[%s9323_s0 + $0xc8] sm:$0xff]  ;;  %v5099_v28 = vld [vmem:[%s9323_s0 + $0xd0] sm:$0xff] }
 0x467   :  { %v10028_v30 = vld [vmem:[#allocation43_spill] sm:$0xff] }
 0x468   :  { %v8009_v34 = vpop.permute.xlu1 %2361  ;;  %v860_v33 = vsub.s32 2, %v10028_v30 }
 0x469   :  { %10026 = vst [vmem:[#allocation285_spill] sm:$0xff] %v8009_v34  ;;  %v8011_v56 = vpop.permute.xlu0 %2041 }
 0x46a   :  { %10027 = vst [vmem:[#allocation286_spill] sm:$0xff] %v8011_v56  ;;  %3684 = vperm.xlu1 %4902, %v5097_v3   ;;  %3688 = vperm.xlu0 %4901, %v5098_v12   ;;  %v5100_v3 = vld [vmem:[%s9323_s0 + $0xd8] sm:$0xff]  ;;  %v5101_v12 = vld [vmem:[%s9328_s6] sm:$0x7] }
 0x46b   :  { %v8033_v34 = vrot.slane %v5101_v12, %v860_v33  ;;  %v10035_v33 = vld [vmem:[#allocation196_spill] sm:$0xff] }
 0x46c   :  { %v8020_v52 = vpop.permute.xlu1 %2873 }
 0x46d   :  { %10029 = vst [vmem:[#allocation43_spill] sm:$0xff] %v8020_v52  ;;  %v8022_v51 = vpop.permute.xlu0 %3193  ;;  %v8051_v12 = vadd.f32 %v10035_v33, %v8033_v34 }
 0x46e   :  { %10030 = vst [vmem:[#allocation287_spill] sm:$0xff] %v8022_v51  ;;  %3692 = vperm.xlu1 %4902, %v5099_v28   ;;  %3696 = vperm.xlu0 %4901, %v5100_v3   ;;  %v5102_v51 = vld [vmem:[%s9323_s0 + $0xe0] sm:$0xff]  ;;  %v5103_v28 = vld [vmem:[%s9323_s0 + $0xe8] sm:$0xff] }
 0x46f   :  { %v10033_v3 = vld [vmem:[#allocation194_spill] sm:$0xff]  ;;  %10036 = vst [vmem:[#allocation196_spill] sm:$0xff] %v8051_v12 }
 0x470   :  { %v8035_v30 = vpop.permute.xlu1 %2043  ;;  %v8047_v56 = vadd.f32 %v10033_v3, %v8033_v34  ;;  %v10039_v3 = vld [vmem:[#allocation192_spill] sm:$0xff] }
 0x471   :  { %10031 = vst [vmem:[#allocation288_spill] sm:$0xff] %v8035_v30  ;;  %v8037_v52 = vpop.permute.xlu0 %1723  ;;  %v8065_v57 = vadd.f32 %v10039_v3, %v8033_v34 }
 0x472   :  { %10032 = vst [vmem:[#allocation289_spill] sm:$0xff] %v8037_v52  ;;  %3700 = vperm.xlu1 %4902, %v5102_v51   ;;  %3704 = vperm.xlu0 %4901, %v5103_v28   ;;  %10034 = vst [vmem:[#allocation194_spill] sm:$0xff] %v8047_v56  ;;  %v5104_v51 = vld [vmem:[%s9323_s0 + $0xf0] sm:$0xff]  ;;  %v5105_v28 = vld [vmem:[%s9323_s0 + $0xf8] sm:$0xff]  ;;  %v1411_v33 = vand.u32 2147483647, %v8047_v56 }
 0x473   :  { %10040 = vst [vmem:[#allocation192_spill] sm:$0xff] %v8065_v57  ;;  %v10045_v56 = vld [vmem:[#allocation200_spill] sm:$0xff] }
 0x474   :  { %v8053_v30 = vpop.permute.xlu1 %3195  ;;  %v8083_v7 = vadd.f32 %v10045_v56, %v8033_v34  ;;  %v10053_v56 = vld [vmem:[#allocation201_spill] sm:$0xff] }
 0x475   :  { %10037 = vst [vmem:[#allocation290_spill] sm:$0xff] %v8053_v30  ;;  %v8055_v52 = vpop.permute.xlu0 %2363  ;;  %v10041_v30 = vld [vmem:[#allocation195_spill] sm:$0xff] }
 0x476   :  { %10038 = vst [vmem:[#allocation291_spill] sm:$0xff] %v8055_v52  ;;  %3708 = vperm.xlu1 %4902, %v5104_v51   ;;  %3712 = vperm.xlu0 %4901, %v5105_v28   ;;  %v8070_v5 = vadd.f32 %v10041_v30, %v8033_v34  ;;  %v1412_v52 = vand.u32 2147483647, %v8051_v12  ;;  %v1413_v28 = vand.u32 2147483647, %v8065_v57  ;;  %10046 = vst [vmem:[#allocation200_spill] sm:$0xff] %v8083_v7 }
 0x477   :  { %v10047_v30 = vld [vmem:[#allocation202_spill] sm:$0xff]  ;;  %v8102_v57 = vadd.f32 %v10053_v56, %v8033_v34 }
 0x478   :  { %10042 = vst [vmem:[#allocation195_spill] sm:$0xff] %v8070_v5  ;;  %v8073_v6 = vpop.permute.xlu1 %1725  ;;  %v1414_v3 = vand.u32 2147483647, %v8070_v5  ;;  %v8087_v43 = vadd.f32 %v10047_v30, %v8033_v34  ;;  %v1415_v5 = vand.u32 2147483647, %v8083_v7  ;;  %v10059_v56 = vld [vmem:[#allocation206_spill] sm:$0xff] }
 0x479   :  { %10043 = vst [vmem:[#allocation292_spill] sm:$0xff] %v8073_v6  ;;  %v8075_v51 = vpop.permute.xlu0 %2875  ;;  %10054 = vst [vmem:[#allocation201_spill] sm:$0xff] %v8102_v57 }
 0x47a   :  { %10044 = vst [vmem:[#allocation293_spill] sm:$0xff] %v8075_v51  ;;  %4003 = vrot.lane.b32.xlu1 %v1411_v33, %s5115_s21  ;;  %4005 = vrot.lane.b32.xlu0 %v1412_v52, %s5115_s21  ;;  %10048 = vst [vmem:[#allocation202_spill] sm:$0xff] %v8087_v43  ;;  %v10051_v52 = vld [vmem:[#allocation198_spill] sm:$0xff]  ;;  %v1416_v30 = vand.u32 2147483647, %v8087_v43 }
 0x47b   :  { %v8097_v33 = vadd.f32 %v10051_v52, %v8033_v34  ;;  %v10057_v52 = vld [vmem:[#allocation62_spill] sm:$0xff] }
 0x47c   :  { %v8089_v12 = vpop.permute.xlu1 %2365  ;;  %v8115_v7 = vadd.f32 %v10057_v52, %v8033_v34  ;;  %v10065_v52 = vld [vmem:[#allocation205_spill] sm:$0xff] }
 0x47d   :  { %10049 = vst [vmem:[#allocation294_spill] sm:$0xff] %v8089_v12  ;;  %v8091_v6 = vpop.permute.xlu0 %2045  ;;  %10052 = vst [vmem:[#allocation198_spill] sm:$0xff] %v8097_v33 }
 0x47e   :  { %10050 = vst [vmem:[#allocation295_spill] sm:$0xff] %v8091_v6  ;;  %4007 = vrot.lane.b32.xlu1 %v1413_v28, %s5115_s21  ;;  %4009 = vrot.lane.b32.xlu0 %v1414_v3, %s5115_s21  ;;  %v1417_v28 = vand.u32 2147483647, %v8097_v33  ;;  %v1418_v3 = vand.u32 2147483647, %v8102_v57  ;;  %10058 = vst [vmem:[#allocation62_spill] sm:$0xff] %v8115_v7  ;;  %v8119_v6 = vadd.f32 %v10059_v56, %v8033_v34 }
 0x47f   :  { %v1419_v57 = vand.u32 2147483647, %v8115_v7  ;;  %v8134_v33 = vadd.f32 %v10065_v52, %v8033_v34  ;;  %v10071_v52 = vld [vmem:[#allocation212_spill] sm:$0xff] }
 0x480   :  { %v8105_v51 = vpop.permute.xlu1 %2877  ;;  %10060 = vst [vmem:[#allocation206_spill] sm:$0xff] %v8119_v6  ;;  %v1420_v56 = vand.u32 2147483647, %v8119_v6 }
 0x481   :  { %10055 = vst [vmem:[#allocation296_spill] sm:$0xff] %v8105_v51  ;;  %v8107_v12 = vpop.permute.xlu0 %3197  ;;  %10066 = vst [vmem:[#allocation205_spill] sm:$0xff] %v8134_v33 }
 0x482   :  { %10056 = vst [vmem:[#allocation297_spill] sm:$0xff] %v8107_v12  ;;  %4011 = vrot.lane.b32.xlu1 %v1415_v5, %s5115_s21  ;;  %4013 = vrot.lane.b32.xlu0 %v1416_v30, %s5115_s21  ;;  %v10063_v5 = vld [vmem:[#allocation60_spill] sm:$0xff] }
 0x483   :  { %v8129_v30 = vadd.f32 %v10063_v5, %v8033_v34  ;;  %v10069_v5 = vld [vmem:[#allocation63_spill] sm:$0xff] }
 0x484   :  { %v8121_v43 = vpop.permute.xlu1 %2047  ;;  %v8147_v7 = vadd.f32 %v10069_v5, %v8033_v34  ;;  %v10077_v5 = vld [vmem:[#allocation210_spill] sm:$0xff] }
 0x485   :  { %10061 = vst [vmem:[#allocation298_spill] sm:$0xff] %v8121_v43  ;;  %v8123_v51 = vpop.permute.xlu0 %1727  ;;  %10064 = vst [vmem:[#allocation60_spill] sm:$0xff] %v8129_v30 }
 0x486   :  { %10062 = vst [vmem:[#allocation299_spill] sm:$0xff] %v8123_v51  ;;  %4015 = vrot.lane.b32.xlu1 %v1417_v28, %s5115_s21  ;;  %4017 = vrot.lane.b32.xlu0 %v1418_v3, %s5115_s21  ;;  %v1421_v28 = vand.u32 2147483647, %v8129_v30  ;;  %v1422_v3 = vand.u32 2147483647, %v8134_v33  ;;  %10070 = vst [vmem:[#allocation63_spill] sm:$0xff] %v8147_v7  ;;  %v8151_v51 = vadd.f32 %v10071_v52, %v8033_v34 }
 0x487   :  { %v1423_v30 = vand.u32 2147483647, %v8147_v7  ;;  %v8166_v33 = vadd.f32 %v10077_v5, %v8033_v34  ;;  %v10083_v5 = vld [vmem:[#allocation220_spill] sm:$0xff] }
 0x488   :  { %v8137_v12 = vpop.permute.xlu1 %3199  ;;  %10072 = vst [vmem:[#allocation212_spill] sm:$0xff] %v8151_v51  ;;  %v1424_v52 = vand.u32 2147483647, %v8151_v51 }
 0x489   :  { %10067 = vst [vmem:[#allocation300_spill] sm:$0xff] %v8137_v12  ;;  %v8139_v43 = vpop.permute.xlu0 %2367  ;;  %10078 = vst [vmem:[#allocation210_spill] sm:$0xff] %v8166_v33 }
 0x48a   :  { %10068 = vst [vmem:[#allocation301_spill] sm:$0xff] %v8139_v43  ;;  %4019 = vrot.lane.b32.xlu1 %v1419_v57, %s5115_s21  ;;  %4021 = vrot.lane.b32.xlu0 %v1420_v56, %s5115_s21  ;;  %v10075_v57 = vld [vmem:[#allocation208_spill] sm:$0xff] }
 0x48b   :  { %v8161_v56 = vadd.f32 %v10075_v57, %v8033_v34  ;;  %v10081_v57 = vld [vmem:[#allocation217_spill] sm:$0xff] }
 0x48c   :  { %v8153_v6 = vpop.permute.xlu1 %1729  ;;  %v8179_v7 = vadd.f32 %v10081_v57, %v8033_v34  ;;  %v10089_v57 = vld [vmem:[#allocation218_spill] sm:$0xff] }
 0x48d   :  { %10073 = vst [vmem:[#allocation302_spill] sm:$0xff] %v8153_v6  ;;  %v8155_v12 = vpop.permute.xlu0 %2879  ;;  %10076 = vst [vmem:[#allocation208_spill] sm:$0xff] %v8161_v56 }
 0x48e   :  { %10074 = vst [vmem:[#allocation303_spill] sm:$0xff] %v8155_v12  ;;  %4023 = vrot.lane.b32.xlu1 %v1421_v28, %s5115_s21  ;;  %4025 = vrot.lane.b32.xlu0 %v1422_v3, %s5115_s21  ;;  %v1425_v28 = vand.u32 2147483647, %v8161_v56  ;;  %v1426_v3 = vand.u32 2147483647, %v8166_v33  ;;  %10082 = vst [vmem:[#allocation217_spill] sm:$0xff] %v8179_v7  ;;  %v8183_v12 = vadd.f32 %v10083_v5, %v8033_v34 }
 0x48f   :  { %v1427_v33 = vand.u32 2147483647, %v8179_v7  ;;  %v10093_v7 = vld [vmem:[#allocation227_spill] sm:$0xff] }
 0x490   :  { %v8169_v43 = vpop.permute.xlu1 %2369  ;;  %10084 = vst [vmem:[#allocation220_spill] sm:$0xff] %v8183_v12  ;;  %v1428_v5 = vand.u32 2147483647, %v8183_v12  ;;  %v10097_v12 = vld [vmem:[#allocation190_spill] sm:$0xff] }
 0x491   :  { %10079 = vst [vmem:[#allocation304_spill] sm:$0xff] %v8169_v43  ;;  %v8171_v6 = vpop.permute.xlu0 %2049  ;;  %v8198_v43 = vadd.f32 %v10089_v57, %v8033_v34 }
 0x492   :  { %10080 = vst [vmem:[#allocation305_spill] sm:$0xff] %v8171_v6  ;;  %4027 = vrot.lane.b32.xlu1 %v1423_v30, %s5115_s21  ;;  %4029 = vrot.lane.b32.xlu0 %v1424_v52, %s5115_s21  ;;  %v10087_v52 = vld [vmem:[#allocation215_spill] sm:$0xff] }
 0x493   :  { %v8193_v56 = vadd.f32 %v10087_v52, %v8033_v34  ;;  %10090 = vst [vmem:[#allocation218_spill] sm:$0xff] %v8198_v43 }
 0x494   :  { %v8187_v51 = vpop.permute.xlu1 %2881 }
 0x495   :  { %10085 = vst [vmem:[#allocation306_spill] sm:$0xff] %v8187_v51  ;;  %v8189_v30 = vpop.permute.xlu0 %3201  ;;  %10088 = vst [vmem:[#allocation215_spill] sm:$0xff] %v8193_v56  ;;  %v8211_v51 = vadd.f32 %v10093_v7, %v8033_v34 }
 0x496   :  { %4031 = vrot.lane.b32.xlu1 %v1425_v28, %s5115_s21  ;;  %4033 = vrot.lane.b32.xlu0 %v1426_v3, %s5115_s21  ;;  %10086 = vst [vmem:[#allocation307_spill] sm:$0xff] %v8189_v30  ;;  %v1429_v28 = vand.u32 2147483647, %v8193_v56  ;;  %v1430_v3 = vand.u32 2147483647, %v8198_v43  ;;  %v10091_v30 = vld [vmem:[#allocation66_spill] sm:$0xff] }
 0x497   :  { %v8207_v52 = vadd.f32 %v10091_v30, %v8033_v34  ;;  %10094 = vst [vmem:[#allocation227_spill] sm:$0xff] %v8211_v51  ;;  %v10100_v56 = vld [vmem:[#allocation91_spill] sm:$0xff]  ;;  %v10102_v43 = vld [vmem:[#allocation93_spill] sm:$0xff] }
 0x498   :  { %v8213_v57 = vpop.permute.xlu1 %3505  ;;  %v10101_v30 = vld [vmem:[#allocation199_spill] sm:$0xff] }
 0x499   :  { %10092 = vst [vmem:[#allocation66_spill] sm:$0xff] %v8207_v52  ;;  %10095 = vst [vmem:[#allocation308_spill] sm:$0xff] %v8213_v57  ;;  %v8215_v6 = vpop.permute.xlu0 %3503  ;;  %v8229_v7 = vmul.f32 %v10102_v43, %v10101_v30  ;;  %v10104_v57 = vld [vmem:[#allocation94_spill] sm:$0xff]  ;;  %v1432_v43 = vand.u32 2147483647, %v8211_v51  ;;  %v10111_v30 = vld [vmem:[#allocation209_spill] sm:$0xff] }
 0x49a   :  { %4035 = vrot.lane.b32.xlu1 %v1427_v33, %s5115_s21  ;;  %4037 = vrot.lane.b32.xlu0 %v1428_v5, %s5115_s21  ;;  %10096 = vst [vmem:[#allocation309_spill] sm:$0xff] %v8215_v6  ;;  %v10098_v33 = vld [vmem:[#allocation92_spill] sm:$0xff]  ;;  %v10099_v5 = vld [vmem:[#allocation193_spill] sm:$0xff]  ;;  %v8233_v38 = vmul.f32 %v10104_v57, %v10103_v63  ;;  %v8251_v63 = vmul.f32 %v10112_v37, %v10111_v30 }
 0x49b   :  { %v8219_v41 = vmul.f32 %v10098_v33, %v10097_v12  ;;  %v8223_v17 = vmul.f32 %v10100_v56, %v10099_v5  ;;  %v10105_v6 = vld [vmem:[#allocation224_spill] sm:$0xff]  ;;  %v10107_v33 = vld [vmem:[#allocation226_spill] sm:$0xff]  ;;  %v10121_v51 = vld [vmem:[#allocation233_spill] sm:$0xff] }
 0x49c   :  { %v8237_v12 = vadd.f32 %v10105_v6, %v8033_v34  ;;  %v8241_v56 = vadd.f32 %v10107_v33, %v8033_v34  ;;  %v10109_v5 = vld [vmem:[#allocation32_spill] sm:$0xff]  ;;  %v10117_v33 = vld [vmem:[#allocation222_spill] sm:$0xff]  ;;  %v8269_v22 = vmul.f32 %v10122_v2, %v10121_v51  ;;  %v10123_v37 = vld [vmem:[#allocation101_spill] sm:$0xff] }
 0x49d   :  { %v10113_v57 = vld [vmem:[#allocation120_spill] sm:$0xff]  ;;  %v8261_v16 = vmul.f32 %v10118_v1, %v10117_v33  ;;  %v8273_v30 = vmul.f32 %v10123_v37, %v7033_v35  ;;  %v10125_v1 = vld [vmem:[#allocation122_spill] sm:$0xff]  ;;  %v10126_v51 = vld [vmem:[#allocation103_spill] sm:$0xff]  ;;  %v8289_v35 = vpop.permute.xlu1 %3509 }
 0x49e   :  { %4039 = vrot.lane.b32.xlu1 %v1429_v28, %s5115_s21  ;;  %4041 = vrot.lane.b32.xlu0 %v1430_v3, %s5115_s21  ;;  %10106 = vst [vmem:[#allocation190_spill] sm:$0xff] %v8237_v12  ;;  %10108 = vst [vmem:[#allocation92_spill] sm:$0xff] %v8241_v56  ;;  %v10110_v28 = vld [vmem:[#allocation95_spill] sm:$0xff]  ;;  %v1431_v3 = vand.u32 2147483647, %v8207_v52  ;;  %v1763_v6 = vadd.f32 %v10114_v9, %v10113_v57  ;;  %v10124_v9 = vld [vmem:[#allocation102_spill] sm:$0xff]  ;;  %v1765_v61 = vadd.f32 %v7131_v13, %v10125_v1 }
 0x49f   :  { %v8245_v58 = vmul.f32 %v10110_v28, %v10109_v5  ;;  %v10119_v5 = vld [vmem:[#allocation229_spill] sm:$0xff]  ;;  %v10120_v28 = vld [vmem:[#allocation99_spill] sm:$0xff]  ;;  %v8277_v62 = vmul.f32 %v10124_v9, %v7073_v0  ;;  %v1433_v57 = vand.u32 2147483647, %v8237_v12  ;;  %v1434_v2 = vand.u32 2147483647, %v8241_v56 }
 0x4a0   :  { %v8265_v52 = vmul.f32 %v10120_v28, %v10119_v5  ;;  %v8287_v33 = vmul.f32 %v10126_v51, %v7121_v21  ;;  %10127 = vst [vmem:[#allocation193_spill] sm:$0xff] %v8289_v35  ;;  %v8291_v5 = vpop.permute.xlu0 %3507  ;;  %v10129_v0 = vld [vmem:[#allocation121_spill] sm:$0xff]  ;;  %v10130_v28 = vld [vmem:[#allocation124_spill] sm:$0xff]  ;;  %v10131_v13 = vld [vmem:[#allocation67_spill] sm:$0xff] }
 0x4a1   :  { %10128 = vst [vmem:[#allocation91_spill] sm:$0xff] %v8291_v5  ;;  %v8299_v37 = vadd.f32 %v10131_v13, %v8033_v34  ;;  %v10133_v9 = vld [vmem:[#allocation236_spill] sm:$0xff]  ;;  %v10136_v12 = vld [vmem:[#allocation123_spill] sm:$0xff] }
 0x4a2   :  { %4043 = vrot.lane.b32.xlu1 %v1431_v3, %s5115_s21  ;;  %4045 = vrot.lane.b32.xlu0 %v1432_v43, %s5115_s21  ;;  %v1764_v3 = vadd.f32 %v7075_v49, %v10129_v0  ;;  %v1767_v43 = vadd.f32 %v7207_v39, %v10130_v28  ;;  %v8303_v1 = vadd.f32 %v10133_v9, %v8033_v34  ;;  %v10135_v21 = vld [vmem:[#allocation240_spill] sm:$0xff]  ;;  %v10138_v49 = vld [vmem:[#allocation105_spill] sm:$0xff]  ;;  %v10139_v28 = vld [vmem:[#allocation106_spill] sm:$0xff] }
 0x4a3   :  { %10132 = vst [vmem:[#allocation199_spill] sm:$0xff] %v8299_v37  ;;  %v2083_v51 = vadd.f32 %v10135_v21, %v1763_v6  ;;  %v1766_v56 = vadd.f32 %v7151_v26, %v10136_v12  ;;  %v10137_v5 = vld [vmem:[#allocation104_spill] sm:$0xff]  ;;  %v8314_v39 = vmul.f32 %v10138_v49, %v7197_v19  ;;  %v8319_v13 = vmul.f32 %v10139_v28, %v7225_v27  ;;  %v10140_v9 = vld [vmem:[#allocation107_spill] sm:$0xff]  ;;  %v10148_v49 = vld [vmem:[#allocation110_spill] sm:$0xff] }
 0x4a4   :  { %10134 = vst [vmem:[#allocation93_spill] sm:$0xff] %v8303_v1  ;;  %v8310_v35 = vmul.f32 %v10137_v5, %v7149_v59  ;;  %v2084_v0 = vadd.f32 %v7105_v46, %v1764_v3  ;;  %v8323_v6 = vmul.f32 %v10140_v9, %v7273_v60  ;;  %v2085_v59 = vadd.f32 %v7125_v42, %v1765_v61  ;;  %v10141_v19 = vld [vmem:[#allocation232_spill] sm:$0xff]  ;;  %v10143_v46 = vld [vmem:[#allocation234_spill] sm:$0xff]  ;;  %v10147_v61 = vld [vmem:[#allocation109_spill] sm:$0xff]  ;;  %v8357_v28 = vpop.permute.xlu0 %3511 }
 0x4a5   :  { %v2086_v26 = vadd.f32 %v7181_v18, %v1766_v56  ;;  %v8331_v12 = vadd.f32 %v10141_v19, %v8033_v34  ;;  %v8335_v27 = vadd.f32 %v10143_v46, %v8033_v34  ;;  %v2087_v5 = vadd.f32 %v7201_v32, %v1767_v43  ;;  %v10146_v18 = vld [vmem:[#allocation126_spill] sm:$0xff]  ;;  %v8355_v43 = vpop.permute.xlu1 %3513  ;;  %10150 = vst [vmem:[#allocation226_spill] sm:$0xff] %v8357_v28  ;;  %v10151_v9 = vld [vmem:[#allocation125_spill] sm:$0xff] }
 0x4a6   :  { %4047 = vrot.lane.b32.xlu1 %v1433_v57, %s5115_s21  ;;  %4049 = vrot.lane.b32.xlu0 %v1434_v2, %s5115_s21  ;;  %v1435_v60 = vand.u32 2147483647, %v8299_v37  ;;  %v1436_v57 = vand.u32 2147483647, %v8303_v1  ;;  %v10145_v2 = vld [vmem:[#allocation108_spill] sm:$0xff]  ;;  %v2403_v42 = vadd.f32 %v7069_v50, %v2083_v51  ;;  %v1769_v56 = vadd.f32 %v7283_v4, %v10146_v18  ;;  %10149 = vst [vmem:[#allocation224_spill] sm:$0xff] %v8355_v43 }
 0x4a7   :  { %10142 = vst [vmem:[#allocation204_spill] sm:$0xff] %v8331_v12  ;;  %10144 = vst [vmem:[#allocation94_spill] sm:$0xff] %v8335_v27  ;;  %v8342_v3 = vmul.f32 %v10145_v2, %v7301_v24  ;;  %v8349_v21 = vmul.f32 %v10147_v61, %v7349_v44  ;;  %v8353_v32 = vmul.f32 %v10148_v49, %v7377_v8  ;;  %v10152_v51 = vld [vmem:[#allocation111_spill] sm:$0xff]  ;;  %v1437_v19 = vand.u32 2147483647, %v8331_v12  ;;  %v10218_v37 = vld [vmem:[#allocation137_spill] sm:$0xff] }
 0x4a8   :  { %v2404_v24 = vadd.f32 %v7087_v23, %v2084_v0  ;;  %v1768_v50 = vadd.f32 %v7227_v31, %v10151_v9  ;;  %v8364_v4 = vmul.f32 %v10152_v51, %v7425_v14  ;;  %v2405_v44 = vadd.f32 %v7145_v29, %v2085_v59  ;;  %v10153_v0 = vld [vmem:[#allocation243_spill] sm:$0xff]  ;;  %v10157_v59 = vld [vmem:[#allocation112_spill] sm:$0xff]  ;;  %v10168_v51 = vld [vmem:[#allocation141_spill] sm:$0xff] }
 0x4a9   :  { %v2406_v8 = vadd.f32 %v7163_v47, %v2086_v26  ;;  %v1438_v46 = vand.u32 2147483647, %v8335_v27  ;;  %v2407_v23 = vadd.f32 %v7221_v45, %v2087_v5  ;;  %v8376_v14 = vadd.f32 %v10153_v0, %v8033_v34  ;;  %v10158_v45 = vld [vmem:[#allocation113_spill] sm:$0xff]  ;;  %v10160_v61 = vld [vmem:[#allocation115_spill] sm:$0xff]  ;;  %v10241_v43 = vld [vmem:[#allocation144_spill] sm:$0xff] }
 0x4aa   :  { %4051 = vrot.lane.b32.xlu1 %v1435_v60, %s5115_s21  ;;  %4053 = vrot.lane.b32.xlu0 %v1436_v57, %s5115_s21  ;;  %v2088_v31 = vadd.f32 %v7257_v40, %v1768_v50  ;;  %v10155_v60 = vld [vmem:[#allocation37_spill] sm:$0xff]  ;;  %v2595_v29 = vadd.f32 %v8219_v41, %v2403_v42  ;;  %v2089_v47 = vadd.f32 %v7277_v53, %v1769_v56  ;;  %v10159_v57 = vld [vmem:[#allocation114_spill] sm:$0xff]  ;;  %v8413_v42 = vpop.permute.xlu1 %3517  ;;  %v10167_v9 = vld [vmem:[#allocation11_spill] sm:$0xff] }
 0x4ab   :  { %10154 = vst [vmem:[#allocation32_spill] sm:$0xff] %v8376_v14  ;;  %v8380_v2 = vadd.f32 %v10155_v60, %v8033_v34  ;;  %v8386_v26 = vmul.f32 %v10157_v59, %v7453_v11  ;;  %v8390_v5 = vmul.f32 %v10158_v45, %v7501_v48  ;;  %v2596_v40 = vadd.f32 %v8223_v17, %v2404_v24  ;;  %v10161_v48 = vld [vmem:[#allocation239_spill] sm:$0xff]  ;;  %v10163_v17 = vld [vmem:[#allocation244_spill] sm:$0xff] }
 0x4ac   :  { %v8395_v18 = vmul.f32 %v10159_v57, %v7529_v20  ;;  %v8399_v49 = vmul.f32 %v10160_v61, %v7567_v15  ;;  %v2597_v53 = vadd.f32 %v8229_v7, %v2405_v44  ;;  %v2598_v11 = vadd.f32 %v8233_v38, %v2406_v8  ;;  %10165 = vst [vmem:[#allocation120_spill] sm:$0xff] %v8413_v42  ;;  %v8415_v15 = vpop.permute.xlu0 %3515  ;;  %v10169_v8 = vld [vmem:[#allocation130_spill] sm:$0xff]  ;;  %v10171_v0 = vld [vmem:[#allocation247_spill] sm:$0xff]  ;;  %v10178_v57 = vld [vmem:[#allocation45_spill] sm:$0xff] }
 0x4ad   :  { %10156 = vst [vmem:[#allocation95_spill] sm:$0xff] %v8380_v2  ;;  %v8407_v41 = vadd.f32 %v10161_v48, %v8033_v34  ;;  %v8411_v20 = vadd.f32 %v10163_v17, %v8033_v34  ;;  %10166 = vst [vmem:[#allocation241_spill] sm:$0xff] %v8415_v15  ;;  %v2599_v56 = vadd.f32 %v8245_v58, %v2407_v23  ;;  %v1439_v7 = vand.u32 2147483647, %v8376_v14  ;;  %v10172_v58 = vld [vmem:[#allocation117_spill] sm:$0xff]  ;;  %v10173_v23 = vld [vmem:[#allocation27_spill] sm:$0xff] }
 0x4ae   :  { %4055 = vrot.lane.b32.xlu1 %v1437_v19, %s5115_s21  ;;  %4057 = vrot.lane.b32.xlu0 %v1438_v46, %s5115_s21  ;;  %v2408_v24 = vadd.f32 %v7239_v54, %v2088_v31  ;;  %v1440_v38 = vand.u32 2147483647, %v8380_v2  ;;  %v2915_v50 = vadd.f32 %v10167_v9, %v2595_v29  ;;  %v2409_v44 = vadd.f32 %v10168_v51, %v2089_v47  ;;  %v10170_v19 = vld [vmem:[#allocation116_spill] sm:$0xff]  ;;  %v10174_v31 = vld [vmem:[#allocation127_spill] sm:$0xff]  ;;  %v10176_v47 = vld [vmem:[#allocation10_spill] sm:$0xff] }
 0x4af   :  { %10162 = vst [vmem:[#allocation209_spill] sm:$0xff] %v8407_v41  ;;  %10164 = vst [vmem:[#allocation96_spill] sm:$0xff] %v8411_v20  ;;  %v1771_v34 = vadd.f32 %v7359_v36, %v10169_v8  ;;  %v8427_v46 = vmul.f32 %v10170_v19, %v7595_v25  ;;  %v2916_v60 = vadd.f32 %v10171_v0, %v2596_v40  ;;  %v10175_v29 = vld [vmem:[#allocation39_spill] sm:$0xff]  ;;  %v10177_v25 = vld [vmem:[#allocation128_spill] sm:$0xff]  ;;  %v1441_v40 = vand.u32 2147483647, %v8407_v41 }
 0x4b0   :  { %v8432_v54 = vmul.f32 %v10172_v58, %v7633_v55  ;;  %v8436_v59 = vmul.f32 %v10174_v31, %v10173_v23  ;;  %v2917_v36 = vadd.f32 %v10175_v29, %v2597_v53  ;;  %v2918_v45 = vadd.f32 %v10176_v47, %v2598_v11  ;;  %v10179_v48 = vld [vmem:[#allocation41_spill] sm:$0xff]  ;;  %v10180_v51 = vld [vmem:[#allocation131_spill] sm:$0xff]  ;;  %v10182_v19 = vld [vmem:[#allocation246_spill] sm:$0xff]  ;;  %v8454_v31 = vpop.permute.xlu1 %3521  ;;  %v8456_v29 = vpop.permute.xlu0 %3519 }
 0x4b1   :  { %v1770_v61 = vadd.f32 %v10178_v57, %v10177_v25  ;;  %v2919_v55 = vadd.f32 %v10179_v48, %v2599_v56  ;;  %v2600_v17 = vadd.f32 %v8251_v63, %v2408_v24  ;;  %v1442_v9 = vand.u32 2147483647, %v8411_v20  ;;  %v10181_v8 = vld [vmem:[#allocation213_spill] sm:$0xff]  ;;  %v10183_v0 = vld [vmem:[#allocation75_spill] sm:$0xff]  ;;  %v10184_v58 = vld [vmem:[#allocation76_spill] sm:$0xff]  ;;  %10185 = vst [vmem:[#allocation216_spill] sm:$0xff] %v8454_v31 }
 0x4b2   :  { %4059 = vrot.lane.b32.xlu1 %v1439_v7, %s5115_s21  ;;  %4061 = vrot.lane.b32.xlu0 %v1440_v38, %s5115_s21  ;;  %v1772_v7 = vadd.f32 %v10181_v8, %v10180_v51  ;;  %v3235_v38 = vadd.f32 %v10182_v19, %v2915_v50  ;;  %v2601_v53 = vadd.f32 %v8257_v10, %v2409_v44  ;;  %v10187_v56 = vld [vmem:[#allocation40_spill] sm:$0xff]  ;;  %v10188_v63 = vld [vmem:[#allocation219_spill] sm:$0xff]  ;;  %v10189_v25 = vld [vmem:[#allocation58_spill] sm:$0xff] }
 0x4b3   :  { %v2090_v11 = vadd.f32 %v10183_v0, %v1770_v61  ;;  %v2091_v23 = vadd.f32 %v10184_v58, %v1771_v34  ;;  %10186 = vst [vmem:[#allocation97_spill] sm:$0xff] %v8456_v29  ;;  %v3236_v47 = vadd.f32 %v10187_v56, %v2916_v60  ;;  %v10190_v57 = vld [vmem:[#allocation118_spill] sm:$0xff]  ;;  %v10191_v10 = vld [vmem:[#allocation249_spill] sm:$0xff]  ;;  %v10198_v56 = vld [vmem:[#allocation211_spill] sm:$0xff] }
 0x4b4   :  { %v2092_v24 = vadd.f32 %v10188_v63, %v1772_v7  ;;  %v8462_v48 = vmul.f32 %v10190_v57, %v10189_v25  ;;  %v3237_v50 = vadd.f32 %v10191_v10, %v2917_v36  ;;  %v10192_v44 = vld [vmem:[#allocation42_spill] sm:$0xff]  ;;  %v10193_v61 = vld [vmem:[#allocation133_spill] sm:$0xff]  ;;  %v10197_v7 = vld [vmem:[#allocation251_spill] sm:$0xff]  ;;  %v2920_v63 = vadd.f32 %v10198_v56, %v2600_v17 }
 0x4b5   :  { %v3238_v34 = vadd.f32 %v10192_v44, %v2918_v45  ;;  %v10194_v51 = vld [vmem:[#allocation34_spill] sm:$0xff]  ;;  %v10195_v19 = vld [vmem:[#allocation29_spill] sm:$0xff]  ;;  %v3239_v58 = vadd.f32 %v10197_v7, %v2919_v55  ;;  %v10199_v25 = vld [vmem:[#allocation59_spill] sm:$0xff] }
 0x4b6   :  { %4063 = vrot.lane.b32.xlu1 %v1441_v40, %s5115_s21  ;;  %4065 = vrot.lane.b32.xlu0 %v1442_v9, %s5115_s21  ;;  %v1773_v8 = vadd.f32 %v10194_v51, %v10193_v61  ;;  %v10196_v0 = vld [vmem:[#allocation129_spill] sm:$0xff]  ;;  %v10200_v57 = vld [vmem:[#allocation119_spill] sm:$0xff]  ;;  %v10202_v9 = vld [vmem:[#allocation30_spill] sm:$0xff] }
 0x4b7   :  { %v8472_v60 = vmul.f32 %v10196_v0, %v10195_v19  ;;  %v8478_v40 = vmul.f32 %v10200_v57, %v10199_v25  ;;  %v10203_v41 = vld [vmem:[#allocation132_spill] sm:$0xff]  ;;  %v10205_v45 = vld [vmem:[#allocation69_spill] sm:$0xff]  ;;  %v10206_v44 = vld [vmem:[#allocation31_spill] sm:$0xff] }
 0x4b8   :  { %v8482_v36 = vmul.f32 %v10203_v41, %v10202_v9  ;;  %v8485_v10 = vadd.f32 %v10205_v45, %v3235_v38  ;;  %v2921_v61 = vadd.f32 %v10206_v44, %v2601_v53  ;;  %v10207_v51 = vld [vmem:[#allocation175_spill] sm:$0xff]  ;;  %v10209_v7 = vld [vmem:[#allocation70_spill] sm:$0xff]  ;;  %v10215_v53 = vld [vmem:[#allocation13_spill] sm:$0xff] }
 0x4b9   :  { %10201 = vst [vmem:[#allocation222_spill] sm:$0xff] %v8478_v40  ;;  %v2410_v19 = vadd.f32 %v10207_v51, %v2090_v11  ;;  %v10208_v0 = vld [vmem:[#allocation47_spill] sm:$0xff]  ;;  %v8490_v55 = vpop.permute.xlu1 %3592  ;;  %v8492_v17 = vpop.permute.xlu0 %3588  ;;  %v8495_v56 = vadd.f32 %v10209_v7, %v3236_v47  ;;  %v10210_v25 = vld [vmem:[#allocation46_spill] sm:$0xff]  ;;  %v8503_v44 = vadd.f32 %v10215_v53, %v3237_v50  ;;  %v10216_v11 = vld [vmem:[#allocation72_spill] sm:$0xff] }
 0x4ba   :  { %10204 = vst [vmem:[#allocation98_spill] sm:$0xff] %v8482_v36  ;;  %v2411_v14 = vadd.f32 %v10208_v0, %v2091_v23  ;;  %v2412_v57 = vadd.f32 %v10210_v25, %v2092_v24  ;;  %v10211_v41 = vld [vmem:[#allocation134_spill] sm:$0xff]  ;;  %v10212_v9 = vld [vmem:[#allocation179_spill] sm:$0xff]  ;;  %v8506_v23 = vadd.f32 %v10216_v11, %v3238_v34  ;;  %v10219_v2 = vld [vmem:[#allocation52_spill] sm:$0xff] }
 0x4bb   :  { %v1774_v12 = vadd.f32 %v10212_v9, %v10211_v41  ;;  %v10213_v38 = vld [vmem:[#allocation135_spill] sm:$0xff]  ;;  %v10214_v45 = vld [vmem:[#allocation150_spill] sm:$0xff]  ;;  %v1777_v47 = vadd.f32 %v10219_v2, %v10218_v37  ;;  %v10221_v24 = vld [vmem:[#allocation145_spill] sm:$0xff]  ;;  %v2602_v34 = vadd.f32 %v8261_v16, %v2410_v19 }
 0x4bc   :  { %v1775_v20 = vadd.f32 %v10214_v45, %v10213_v38  ;;  %v10217_v51 = vld [vmem:[#allocation78_spill] sm:$0xff]  ;;  %v10220_v7 = vld [vmem:[#allocation15_spill] sm:$0xff]  ;;  %v3240_v25 = vadd.f32 %v10221_v24, %v2920_v63  ;;  %v10225_v50 = vld [vmem:[#allocation5_spill] sm:$0xff]  ;;  %v2603_v11 = vadd.f32 %v8265_v52, %v2411_v14 }
 0x4bd   :  { %v2093_v0 = vadd.f32 %v10217_v51, %v1773_v8  ;;  %v8512_v27 = vadd.f32 %v10220_v7, %v3239_v58  ;;  %v10222_v41 = vld [vmem:[#allocation18_spill] sm:$0xff]  ;;  %v10223_v1 = vld [vmem:[#allocation139_spill] sm:$0xff]  ;;  %v3241_v53 = vadd.f32 %v10225_v50, %v2921_v61  ;;  %v10226_v8 = vld [vmem:[#allocation136_spill] sm:$0xff]  ;;  %v8523_v37 = vpop.permute.xlu1 %3596  ;;  %v8525_v2 = vpop.permute.xlu0 %3600  ;;  %v2604_v58 = vadd.f32 %v8269_v22, %v2412_v57 }
 0x4be   :  { %v2094_v9 = vadd.f32 %v10222_v41, %v1774_v12  ;;  %v10224_v38 = vld [vmem:[#allocation182_spill] sm:$0xff]  ;;  %v10228_v63 = vld [vmem:[#allocation33_spill] sm:$0xff]  ;;  %v10230_v24 = vld [vmem:[#allocation83_spill] sm:$0xff] }
 0x4bf   :  { %v1779_v45 = vadd.f32 %v10224_v38, %v10223_v1  ;;  %v10227_v51 = vld [vmem:[#allocation50_spill] sm:$0xff]  ;;  %v2095_v12 = vadd.f32 %v10228_v63, %v1775_v20  ;;  %v10233_v16 = vld [vmem:[#allocation64_spill] sm:$0xff]  ;;  %v10237_v31 = vld [vmem:[#allocation167_spill] sm:$0xff] }
 0x4c0   :  { %v1776_v29 = vadd.f32 %v10227_v51, %v10226_v8  ;;  %v10229_v7 = vld [vmem:[#allocation138_spill] sm:$0xff]  ;;  %v2413_v19 = vadd.f32 %v10233_v16, %v2093_v0  ;;  %v10235_v50 = vld [vmem:[#allocation252_spill] sm:$0xff]  ;;  %v10238_v42 = vld [vmem:[#allocation21_spill] sm:$0xff] }
 0x4c1   :  { %v1778_v1 = vadd.f32 %v10230_v24, %v10229_v7  ;;  %v10231_v41 = vld [vmem:[#allocation142_spill] sm:$0xff]  ;;  %v2097_v8 = vadd.f32 %v10235_v50, %v1777_v47  ;;  %v10236_v51 = vld [vmem:[#allocation140_spill] sm:$0xff]  ;;  %v2414_v28 = vadd.f32 %v10238_v42, %v2094_v9  ;;  %v10242_v7 = vld [vmem:[#allocation259_spill] sm:$0xff]  ;;  %v8552_v42 = vpop.permute.xlu0 %3608 }
 0x4c2   :  { %v10232_v61 = vld [vmem:[#allocation26_spill] sm:$0xff]  ;;  %v1780_v15 = vadd.f32 %v10237_v31, %v10236_v51  ;;  %v10239_v22 = vld [vmem:[#allocation156_spill] sm:$0xff]  ;;  %v1782_v24 = vadd.f32 %v10242_v7, %v10241_v43  ;;  %v10245_v0 = vld [vmem:[#allocation173_spill] sm:$0xff]  ;;  %v8550_v31 = vpop.permute.xlu1 %3604 }
 0x4c3   :  { %v1781_v38 = vadd.f32 %v10232_v61, %v10231_v41  ;;  %v10234_v52 = vld [vmem:[#allocation82_spill] sm:$0xff]  ;;  %v2098_v57 = vadd.f32 %v10239_v22, %v1778_v1  ;;  %v10243_v36 = vld [vmem:[#allocation12_spill] sm:$0xff]  ;;  %v2922_v61 = vadd.f32 %v10245_v0, %v2602_v34  ;;  %v10247_v47 = vld [vmem:[#allocation147_spill] sm:$0xff]  ;;  %v2606_v40 = vadd.f32 %v8277_v62, %v2414_v28 }
 0x4c4   :  { %v2096_v14 = vadd.f32 %v10234_v52, %v1776_v29  ;;  %v10240_v20 = vld [vmem:[#allocation254_spill] sm:$0xff]  ;;  %v8544_v41 = vadd.f32 %v10243_v36, %v3240_v25  ;;  %v10246_v29 = vld [vmem:[#allocation55_spill] sm:$0xff]  ;;  %v10249_v9 = vld [vmem:[#allocation177_spill] sm:$0xff] }
 0x4c5   :  { %v2099_v63 = vadd.f32 %v10240_v20, %v1779_v45  ;;  %v2100_v16 = vadd.f32 %v10246_v29, %v1780_v15  ;;  %v10248_v52 = vld [vmem:[#allocation90_spill] sm:$0xff]  ;;  %v2923_v1 = vadd.f32 %v10249_v9, %v2603_v11  ;;  %v10250_v45 = vld [vmem:[#allocation181_spill] sm:$0xff]  ;;  %v10251_v22 = vld [vmem:[#allocation87_spill] sm:$0xff]  ;;  %v2605_v15 = vadd.f32 %v8273_v30, %v2413_v19 }
 0x4c6   :  { %10244 = vst [vmem:[#allocation229_spill] sm:$0xff] %v8544_v41  ;;  %v1783_v50 = vadd.f32 %v10248_v52, %v10247_v47  ;;  %v2415_v51 = vadd.f32 %v10250_v45, %v2095_v12  ;;  %v2101_v43 = vadd.f32 %v10251_v22, %v1781_v38  ;;  %v10252_v20 = vld [vmem:[#allocation186_spill] sm:$0xff]  ;;  %v10253_v25 = vld [vmem:[#allocation44_spill] sm:$0xff]  ;;  %v10257_v52 = vld [vmem:[#allocation77_spill] sm:$0xff] }
 0x4c7   :  { %v2102_v36 = vadd.f32 %v10252_v20, %v1782_v24  ;;  %v8559_v7 = vadd.f32 %v10253_v25, %v3241_v53  ;;  %v10255_v34 = vld [vmem:[#allocation178_spill] sm:$0xff]  ;;  %v10256_v29 = vld [vmem:[#allocation180_spill] sm:$0xff]  ;;  %v2924_v41 = vadd.f32 %v10257_v52, %v2604_v58  ;;  %v10258_v11 = vld [vmem:[#allocation163_spill] sm:$0xff] }
 0x4c8   :  { %v2416_v0 = vadd.f32 %v10255_v34, %v2096_v14  ;;  %v2417_v47 = vadd.f32 %v10256_v29, %v2097_v8  ;;  %v2418_v9 = vadd.f32 %v10258_v11, %v2098_v57  ;;  %v10259_v12 = vld [vmem:[#allocation235_spill] sm:$0xff]  ;;  %v10260_v38 = vld [vmem:[#allocation149_spill] sm:$0xff]  ;;  %v10262_v53 = vld [vmem:[#allocation172_spill] sm:$0xff]  ;;  %v8573_v14 = vpop.permute.xlu1 %3612  ;;  %v8575_v8 = vpop.permute.xlu0 %3616  ;;  %v2607_v62 = vadd.f32 %v8287_v33, %v2415_v51 }
 0x4c9   :  { %10254 = vst [vmem:[#allocation99_spill] sm:$0xff] %v8559_v7  ;;  %v2419_v45 = vadd.f32 %v10259_v12, %v2099_v63  ;;  %v3242_v22 = vadd.f32 %v10260_v38, %v2922_v61  ;;  %v10261_v24 = vld [vmem:[#allocation255_spill] sm:$0xff]  ;;  %v2103_v25 = vadd.f32 %v10262_v53, %v1783_v50  ;;  %v10263_v7 = vld [vmem:[#allocation148_spill] sm:$0xff]  ;;  %v10264_v30 = vld [vmem:[#allocation189_spill] sm:$0xff] }
 0x4ca   :  { %v2420_v20 = vadd.f32 %v10261_v24, %v2100_v16  ;;  %v1784_v19 = vadd.f32 %v10264_v30, %v10263_v7  ;;  %v10265_v58 = vld [vmem:[#allocation143_spill] sm:$0xff]  ;;  %v10266_v28 = vld [vmem:[#allocation88_spill] sm:$0xff]  ;;  %v2608_v16 = vadd.f32 %v8310_v35, %v2416_v0  ;;  %v2609_v50 = vadd.f32 %v8314_v39, %v2417_v47  ;;  %v10271_v24 = vld [vmem:[#allocation65_spill] sm:$0xff] }
 0x4cb   :  { %v3243_v34 = vadd.f32 %v10265_v58, %v2923_v1  ;;  %v2421_v57 = vadd.f32 %v10266_v28, %v2101_v43  ;;  %v10267_v63 = vld [vmem:[#allocation260_spill] sm:$0xff]  ;;  %v10269_v11 = vld [vmem:[#allocation35_spill] sm:$0xff]  ;;  %v2926_v53 = vadd.f32 %v10271_v24, %v2606_v40  ;;  %v2610_v1 = vadd.f32 %v8319_v13, %v2418_v9  ;;  %v10272_v51 = vld [vmem:[#allocation14_spill] sm:$0xff] }
 0x4cc   :  { %v2422_v29 = vadd.f32 %v10267_v63, %v2102_v36  ;;  %v10268_v61 = vld [vmem:[#allocation48_spill] sm:$0xff]  ;;  %v2104_v7 = vadd.f32 %v10269_v11, %v1784_v19  ;;  %v2611_v33 = vadd.f32 %v8323_v6, %v2419_v45  ;;  %v8590_v43 = vadd.f32 %v10272_v51, %v3242_v22  ;;  %v10274_v35 = vld [vmem:[#allocation151_spill] sm:$0xff]  ;;  %v8596_v47 = vpop.permute.xlu1 %3620  ;;  %v8598_v19 = vpop.permute.xlu0 %3624  ;;  %v10278_v22 = vld [vmem:[#allocation49_spill] sm:$0xff] }
 0x4cd   :  { %v2925_v52 = vadd.f32 %v10268_v61, %v2605_v15  ;;  %v10270_v12 = vld [vmem:[#allocation152_spill] sm:$0xff]  ;;  %v2612_v36 = vadd.f32 %v8342_v3, %v2420_v20  ;;  %v10273_v15 = vld [vmem:[#allocation166_spill] sm:$0xff]  ;;  %v10277_v13 = vld [vmem:[#allocation23_spill] sm:$0xff]  ;;  %v2613_v6 = vadd.f32 %v8349_v21, %v2421_v57 }
 0x4ce   :  { %v3244_v38 = vadd.f32 %v10270_v12, %v2924_v41  ;;  %v2423_v30 = vadd.f32 %v10273_v15, %v2103_v25  ;;  %v10275_v0 = vld [vmem:[#allocation68_spill] sm:$0xff]  ;;  %v10276_v41 = vld [vmem:[#allocation19_spill] sm:$0xff]  ;;  %v2927_v9 = vadd.f32 %v10277_v13, %v2607_v62  ;;  %v2614_v45 = vadd.f32 %v8353_v32, %v2422_v29  ;;  %v10280_v58 = vld [vmem:[#allocation230_spill] sm:$0xff] }
 0x4cf   :  { %v1785_v39 = vadd.f32 %v10275_v0, %v10274_v35  ;;  %v8601_v40 = vadd.f32 %v10276_v41, %v3243_v34  ;;  %v3245_v3 = vadd.f32 %v10278_v22, %v2925_v52  ;;  %v10279_v20 = vld [vmem:[#allocation159_spill] sm:$0xff]  ;;  %v2929_v28 = vadd.f32 %v10280_v58, %v2609_v50  ;;  %v10282_v11 = vld [vmem:[#allocation16_spill] sm:$0xff]  ;;  %v10285_v62 = vld [vmem:[#allocation86_spill] sm:$0xff] }
 0x4d0   :  { %v2928_v25 = vadd.f32 %v10279_v20, %v2608_v16  ;;  %v10281_v63 = vld [vmem:[#allocation223_spill] sm:$0xff]  ;;  %v8611_v12 = vadd.f32 %v10282_v11, %v3244_v38  ;;  %v10283_v24 = vld [vmem:[#allocation80_spill] sm:$0xff]  ;;  %v2931_v35 = vadd.f32 %v10285_v62, %v2611_v33  ;;  %v2615_v32 = vadd.f32 %v8364_v4, %v2423_v30  ;;  %v10287_v29 = vld [vmem:[#allocation237_spill] sm:$0xff]  ;;  %v8621_v41 = vpop.permute.xlu1 %3628 }
 0x4d1   :  { %v2424_v61 = vadd.f32 %v10281_v63, %v2104_v7  ;;  %v3246_v34 = vadd.f32 %v10283_v24, %v2926_v53  ;;  %v10284_v51 = vld [vmem:[#allocation56_spill] sm:$0xff]  ;;  %v2105_v52 = vadd.f32 %v10287_v29, %v1785_v39  ;;  %v10288_v16 = vld [vmem:[#allocation157_spill] sm:$0xff]  ;;  %v10289_v0 = vld [vmem:[#allocation270_spill] sm:$0xff]  ;;  %v8623_v7 = vpop.permute.xlu0 %3632 }
 0x4d2   :  { %v2930_v15 = vadd.f32 %v10284_v51, %v2610_v1  ;;  %v10286_v21 = vld [vmem:[#allocation256_spill] sm:$0xff]  ;;  %v1787_v50 = vadd.f32 %v10289_v0, %v10288_v16  ;;  %v10290_v38 = vld [vmem:[#allocation7_spill] sm:$0xff]  ;;  %v10292_v1 = vld [vmem:[#allocation261_spill] sm:$0xff] }
 0x4d3   :  { %v2932_v57 = vadd.f32 %v10286_v21, %v2612_v36  ;;  %v3247_v13 = vadd.f32 %v10290_v38, %v2927_v9  ;;  %v10291_v53 = vld [vmem:[#allocation164_spill] sm:$0xff]  ;;  %v2934_v20 = vadd.f32 %v10292_v1, %v2614_v45  ;;  %v10293_v33 = vld [vmem:[#allocation154_spill] sm:$0xff]  ;;  %v10294_v58 = vld [vmem:[#allocation263_spill] sm:$0xff]  ;;  %v2616_v51 = vadd.f32 %v8386_v26, %v2424_v61 }
 0x4d4   :  { %v2933_v22 = vadd.f32 %v10291_v53, %v2613_v6  ;;  %v1786_v36 = vadd.f32 %v10294_v58, %v10293_v33  ;;  %v10295_v63 = vld [vmem:[#allocation176_spill] sm:$0xff]  ;;  %v10296_v30 = vld [vmem:[#allocation153_spill] sm:$0xff]  ;;  %v10298_v62 = vld [vmem:[#allocation155_spill] sm:$0xff] }
 0x4d5   :  { %v8631_v4 = vadd.f32 %v10295_v63, %v3245_v3  ;;  %v3248_v39 = vadd.f32 %v10296_v30, %v2928_v25  ;;  %v10297_v11 = vld [vmem:[#allocation25_spill] sm:$0xff]  ;;  %v8637_v21 = vadd.f32 %v10298_v62, %v3246_v34  ;;  %v10301_v45 = vld [vmem:[#allocation266_spill] sm:$0xff]  ;;  %v10302_v38 = vld [vmem:[#allocation184_spill] sm:$0xff]  ;;  %v8648_v26 = vpop.permute.xlu0 %3640 }
 0x4d6   :  { %v3249_v24 = vadd.f32 %v10297_v11, %v2929_v28  ;;  %v10299_v9 = vld [vmem:[#allocation53_spill] sm:$0xff]  ;;  %v2106_v0 = vadd.f32 %v10301_v45, %v1786_v36  ;;  %v3252_v53 = vadd.f32 %v10302_v38, %v2932_v57  ;;  %v10303_v1 = vld [vmem:[#allocation4_spill] sm:$0xff]  ;;  %v10304_v33 = vld [vmem:[#allocation262_spill] sm:$0xff]  ;;  %v8646_v28 = vpop.permute.xlu1 %3636 }
 0x4d7   :  { %v3250_v29 = vadd.f32 %v10299_v9, %v2930_v15  ;;  %v10300_v6 = vld [vmem:[#allocation85_spill] sm:$0xff]  ;;  %v2935_v3 = vadd.f32 %v10303_v1, %v2615_v32  ;;  %v2425_v58 = vadd.f32 %v10304_v33, %v2105_v52  ;;  %v10307_v15 = vld [vmem:[#allocation258_spill] sm:$0xff]  ;;  %v10312_v52 = vld [vmem:[#allocation84_spill] sm:$0xff] }
 0x4d8   :  { %v3251_v16 = vadd.f32 %v10300_v6, %v2931_v35  ;;  %v10305_v25 = vld [vmem:[#allocation269_spill] sm:$0xff]  ;;  %v3253_v30 = vadd.f32 %v10307_v15, %v2933_v22  ;;  %v10308_v35 = vld [vmem:[#allocation242_spill] sm:$0xff]  ;;  %v8661_v6 = vadd.f32 %v10312_v52, %v3249_v24  ;;  %v10315_v1 = vld [vmem:[#allocation280_spill] sm:$0xff] }
 0x4d9   :  { %v2107_v63 = vadd.f32 %v10305_v25, %v1787_v50  ;;  %v10306_v61 = vld [vmem:[#allocation81_spill] sm:$0xff]  ;;  %v3254_v11 = vadd.f32 %v10308_v35, %v2934_v20  ;;  %v10309_v36 = vld [vmem:[#allocation158_spill] sm:$0xff]  ;;  %v10313_v50 = vld [vmem:[#allocation36_spill] sm:$0xff] }
 0x4da   :  { %v8651_v34 = vadd.f32 %v10306_v61, %v3247_v13  ;;  %v10310_v62 = vld [vmem:[#allocation273_spill] sm:$0xff]  ;;  %v10311_v9 = vld [vmem:[#allocation54_spill] sm:$0xff]  ;;  %v2936_v45 = vadd.f32 %v10313_v50, %v2616_v51  ;;  %v10317_v22 = vld [vmem:[#allocation160_spill] sm:$0xff]  ;;  %v2617_v51 = vadd.f32 %v8390_v5, %v2425_v58 }
 0x4db   :  { %v1788_v57 = vadd.f32 %v10310_v62, %v10309_v36  ;;  %v8658_v32 = vadd.f32 %v10311_v9, %v3248_v39  ;;  %v10314_v38 = vld [vmem:[#allocation161_spill] sm:$0xff]  ;;  %v8670_v61 = vadd.f32 %v10317_v22, %v3251_v16  ;;  %v10320_v35 = vld [vmem:[#allocation276_spill] sm:$0xff]  ;;  %v10333_v58 = vld [vmem:[#allocation279_spill] sm:$0xff] }
 0x4dc   :  { %v1789_v33 = vadd.f32 %v10315_v1, %v10314_v38  ;;  %v10316_v13 = vld [vmem:[#allocation253_spill] sm:$0xff]  ;;  %v10324_v52 = vld [vmem:[#allocation272_spill] sm:$0xff]  ;;  %v8680_v38 = vpop.permute.xlu1 %3644 }
 0x4dd   :  { %v8667_v25 = vadd.f32 %v10316_v13, %v3250_v29  ;;  %10318 = vst [vmem:[#allocation233_spill] sm:$0xff] %v8670_v61  ;;  %v10319_v20 = vld [vmem:[#allocation265_spill] sm:$0xff]  ;;  %v2108_v36 = vadd.f32 %v10320_v35, %v1788_v57  ;;  %v2427_v50 = vadd.f32 %v10324_v52, %v2107_v63  ;;  %v8682_v29 = vpop.permute.xlu0 %3648  ;;  %v10332_v35 = vld [vmem:[#allocation6_spill] sm:$0xff]  ;;  %v10337_v61 = vld [vmem:[#allocation299_spill] sm:$0xff] }
 0x4de   :  { %v2426_v15 = vadd.f32 %v10319_v20, %v2106_v0  ;;  %v10321_v39 = vld [vmem:[#allocation257_spill] sm:$0xff]  ;;  %v3256_v5 = vadd.f32 %v10332_v35, %v2936_v45  ;;  %v2109_v63 = vadd.f32 %v10333_v58, %v1789_v33  ;;  %v10344_v33 = vld [vmem:[#allocation264_spill] sm:$0xff] }
 0x4df   :  { %v8675_v62 = vadd.f32 %v10321_v39, %v3252_v53  ;;  %v10323_v24 = vld [vmem:[#allocation61_spill] sm:$0xff]  ;;  %v10334_v39 = vld [vmem:[#allocation162_spill] sm:$0xff]  ;;  %v2937_v35 = vadd.f32 %v10344_v33, %v2617_v51  ;;  %v2619_v58 = vadd.f32 %v8399_v49, %v2427_v50  ;;  %v10351_v50 = vld [vmem:[#allocation171_spill] sm:$0xff] }
 0x4e0   :  { %v3255_v9 = vadd.f32 %v10323_v24, %v2935_v3  ;;  %v10325_v1 = vld [vmem:[#allocation57_spill] sm:$0xff]  ;;  %v10335_v24 = vld [vmem:[#allocation283_spill] sm:$0xff]  ;;  %v10353_v33 = vld [vmem:[#allocation2_spill] sm:$0xff] }
 0x4e1   :  { %10322 = vst [vmem:[#allocation100_spill] sm:$0xff] %v8675_v62  ;;  %v8685_v16 = vadd.f32 %v10325_v1, %v3253_v30  ;;  %v10327_v13 = vld [vmem:[#allocation89_spill] sm:$0xff]  ;;  %v1790_v52 = vadd.f32 %v10335_v24, %v10334_v39  ;;  %v10336_v62 = vld [vmem:[#allocation170_spill] sm:$0xff]  ;;  %v2618_v1 = vadd.f32 %v8395_v18, %v2426_v15  ;;  %v8714_v18 = vpop.permute.xlu0 %3656  ;;  %v10346_v15 = vld [vmem:[#allocation288_spill] sm:$0xff] }
 0x4e2   :  { %v8688_v0 = vadd.f32 %v10327_v13, %v3254_v11  ;;  %v10329_v57 = vld [vmem:[#allocation165_spill] sm:$0xff]  ;;  %v1793_v30 = vadd.f32 %v10337_v61, %v10336_v62  ;;  %v10338_v11 = vld [vmem:[#allocation275_spill] sm:$0xff]  ;;  %v10345_v39 = vld [vmem:[#allocation286_spill] sm:$0xff]  ;;  %v8712_v61 = vpop.permute.xlu1 %3652 }
 0x4e3   :  { %10326 = vst [vmem:[#allocation101_spill] sm:$0xff] %v8685_v16  ;;  %v10330_v22 = vld [vmem:[#allocation289_spill] sm:$0xff]  ;;  %v2428_v13 = vadd.f32 %v10338_v11, %v2108_v36  ;;  %v10340_v16 = vld [vmem:[#allocation292_spill] sm:$0xff]  ;;  %v2110_v24 = vadd.f32 %v10345_v39, %v1790_v52  ;;  %v10347_v62 = vld [vmem:[#allocation295_spill] sm:$0xff]  ;;  %v3718_v39 = vmul.f32 %v8525_v2, %v10353_v33 }
 0x4e4   :  { %10328 = vst [vmem:[#allocation102_spill] sm:$0xff] %v8688_v0  ;;  %v1791_v53 = vadd.f32 %v10330_v22, %v10329_v57  ;;  %v10331_v20 = vld [vmem:[#allocation197_spill] sm:$0xff]  ;;  %v10339_v0 = vld [vmem:[#allocation168_spill] sm:$0xff]  ;;  %v10341_v22 = vld [vmem:[#allocation191_spill] sm:$0xff] }
 0x4e5   :  { %v3716_v3 = vmul.f32 %v8490_v55, %v10331_v20  ;;  %v1792_v57 = vadd.f32 %v10340_v16, %v10339_v0  ;;  %v3715_v55 = vmul.f32 %v8492_v17, %v10341_v22  ;;  %v10342_v20 = vld [vmem:[#allocation228_spill] sm:$0xff]  ;;  %v10348_v17 = vld [vmem:[#allocation203_spill] sm:$0xff]  ;;  %v10349_v11 = vld [vmem:[#allocation282_spill] sm:$0xff] }
 0x4e6   :  { %v8707_v45 = vadd.f32 %v10342_v20, %v3255_v9  ;;  %v2111_v36 = vadd.f32 %v10346_v15, %v1791_v53  ;;  %v3717_v9 = vmul.f32 %v8523_v37, %v10348_v17  ;;  %v2429_v51 = vadd.f32 %v10349_v11, %v2109_v63  ;;  %v10350_v22 = vld [vmem:[#allocation298_spill] sm:$0xff]  ;;  %v10358_v17 = vld [vmem:[#allocation305_spill] sm:$0xff]  ;;  %v8742_v2 = vpop.permute.xlu1 %3660 }
 0x4e7   :  { %v2112_v16 = vadd.f32 %v10347_v62, %v1792_v57  ;;  %v8719_v0 = vadd.f32 %v3716_v3, %v8495_v56  ;;  %v2113_v49 = vadd.f32 %v10350_v22, %v1793_v30  ;;  %v10352_v52 = vld [vmem:[#allocation302_spill] sm:$0xff]  ;;  %v10355_v57 = vld [vmem:[#allocation267_spill] sm:$0xff]  ;;  %v2620_v56 = vadd.f32 %v8427_v46, %v2428_v13  ;;  %v10357_v62 = vld [vmem:[#allocation285_spill] sm:$0xff] }
 0x4e8   :  { %10343 = vst [vmem:[#allocation122_spill] sm:$0xff] %v8707_v45  ;;  %v1794_v20 = vadd.f32 %v10352_v52, %v10351_v50  ;;  %v10354_v45 = vld [vmem:[#allocation9_spill] sm:$0xff]  ;;  %v2938_v15 = vadd.f32 %v10355_v57, %v2618_v1  ;;  %v8735_v3 = vadd.f32 %v3715_v55, %v8485_v10  ;;  %v10356_v37 = vld [vmem:[#allocation274_spill] sm:$0xff]  ;;  %v2430_v30 = vadd.f32 %v10357_v62, %v2110_v24  ;;  %v10359_v22 = vld [vmem:[#allocation207_spill] sm:$0xff] }
 0x4e9   :  { %v8730_v53 = vadd.f32 %v10354_v45, %v3256_v5  ;;  %v2939_v63 = vadd.f32 %v10356_v37, %v2619_v58  ;;  %v3719_v50 = vmul.f32 %v8550_v31, %v10359_v22  ;;  %v8744_v5 = vpop.permute.xlu0 %3664  ;;  %v10360_v45 = vld [vmem:[#allocation291_spill] sm:$0xff]  ;;  %v10361_v52 = vld [vmem:[#allocation294_spill] sm:$0xff]  ;;  %v3812_v10 = vmin.f32 %v8719_v0, 0.0  ;;  %v10362_v58 = vld [vmem:[#allocation301_spill] sm:$0xff] }
 0x4ea   :  { %v2114_v11 = vadd.f32 %v10358_v17, %v1794_v20  ;;  %v2431_v1 = vadd.f32 %v10360_v45, %v2111_v36  ;;  %v2432_v46 = vadd.f32 %v10361_v52, %v2112_v16  ;;  %v8750_v13 = vadd.f32 %v3717_v9, %v8503_v44  ;;  %v10363_v20 = vld [vmem:[#allocation38_spill] sm:$0xff]  ;;  %v10364_v57 = vld [vmem:[#allocation268_spill] sm:$0xff]  ;;  %v10365_v36 = vld [vmem:[#allocation277_spill] sm:$0xff] }
 0x4eb   :  { %v2621_v55 = vadd.f32 %v8432_v54, %v2429_v51  ;;  %v2433_v24 = vadd.f32 %v10362_v58, %v2113_v49  ;;  %v8755_v33 = vadd.f32 %v10363_v20, %v2937_v35  ;;  %v8758_v31 = vadd.f32 %v3718_v39, %v8506_v23  ;;  %v10366_v17 = vld [vmem:[#allocation214_spill] sm:$0xff]  ;;  %v10367_v54 = vld [vmem:[#allocation304_spill] sm:$0xff]  ;;  %v10368_v49 = vld [vmem:[#allocation271_spill] sm:$0xff]  ;;  %v8771_v23 = vpop.permute.xlu1 %3668 }
 0x4ec   :  { %v3258_v37 = vadd.f32 %v10364_v57, %v2938_v15  ;;  %v2940_v62 = vadd.f32 %v10365_v36, %v2620_v56  ;;  %v3811_v16 = vmin.f32 %v8735_v3, 0.0  ;;  %v3720_v44 = vmul.f32 %v8552_v42, %v10366_v17  ;;  %v10369_v52 = vld [vmem:[#allocation284_spill] sm:$0xff]  ;;  %v10371_v58 = vld [vmem:[#allocation221_spill] sm:$0xff] }
 0x4ed   :  { %v2622_v9 = vadd.f32 %v8436_v59, %v2430_v30  ;;  %v2434_v51 = vadd.f32 %v10367_v54, %v2114_v11  ;;  %v3259_v22 = vadd.f32 %v10368_v49, %v2939_v63  ;;  %v8769_v35 = vadd.f32 %v3719_v50, %v8512_v27  ;;  %v8773_v39 = vpop.permute.xlu0 %3672  ;;  %v10370_v30 = vld [vmem:[#allocation222_spill] sm:$0xff]  ;;  %v10373_v36 = vld [vmem:[#allocation229_spill] sm:$0xff]  ;;  %v10377_v54 = vld [vmem:[#allocation231_spill] sm:$0xff] }
 0x4ee   :  { %v2623_v15 = vadd.f32 %v8462_v48, %v2431_v1  ;;  %v2624_v56 = vadd.f32 %v8472_v60, %v2432_v46  ;;  %v3845_v45 = vmul.f32 1.442695, %v3812_v10  ;;  %v3813_v42 = vmin.f32 %v8750_v13, 0.0  ;;  %v10372_v50 = vld [vmem:[#allocation278_spill] sm:$0xff]  ;;  %v10374_v48 = vld [vmem:[#allocation225_spill] sm:$0xff]  ;;  %v10375_v1 = vld [vmem:[#allocation43_spill] sm:$0xff] }
 0x4ef   :  { %v2941_v59 = vadd.f32 %v10369_v52, %v2621_v55  ;;  %v2625_v11 = vadd.f32 %v10370_v30, %v2433_v24  ;;  %v3814_v63 = vmin.f32 %v8758_v31, 0.0  ;;  %v3721_v27 = vmul.f32 %v8573_v14, %v10371_v58  ;;  %v10376_v10 = vld [vmem:[#allocation98_spill] sm:$0xff]  ;;  %v8794_v52 = vpop.permute.xlu1 %3676 }
 0x4f0   :  { %v3260_v20 = vadd.f32 %v10372_v50, %v2940_v62  ;;  %v3843_v57 = vmul.f32 1.442695, %v3811_v16  ;;  %v8785_v17 = vadd.f32 %v3720_v44, %v10373_v36  ;;  %v3722_v60 = vmul.f32 %v8575_v8, %v10374_v48  ;;  %v10378_v62 = vld [vmem:[#allocation293_spill] sm:$0xff]  ;;  %v10379_v44 = vld [vmem:[#allocation296_spill] sm:$0xff]  ;;  %v10380_v8 = vld [vmem:[#allocation303_spill] sm:$0xff] }
 0x4f1   :  { %v2942_v46 = vadd.f32 %v10375_v1, %v2622_v9  ;;  %v2626_v55 = vadd.f32 %v10376_v10, %v2434_v51  ;;  %v3815_v24 = vmin.f32 %v8769_v35, 0.0  ;;  %v3723_v49 = vmul.f32 %v8596_v47, %v10377_v54  ;;  %v8796_v14 = vpop.permute.xlu0 %3680  ;;  %v10381_v9 = vld [vmem:[#allocation281_spill] sm:$0xff]  ;;  %v10382_v48 = vld [vmem:[#allocation99_spill] sm:$0xff]  ;;  %v10383_v54 = vld [vmem:[#allocation238_spill] sm:$0xff] }
 0x4f2   :  { %v2943_v16 = vadd.f32 %v10378_v62, %v2623_v15  ;;  %v2944_v30 = vadd.f32 %v10379_v44, %v2624_v56  ;;  %4977 = vpow2.f32 %v3845_v45  ;;  %v3847_v58 = vmul.f32 1.442695, %v3813_v42  ;;  %v10384_v56 = vld [vmem:[#allocation287_spill] sm:$0xff]  ;;  %v10385_v42 = vld [vmem:[#allocation306_spill] sm:$0xff] }
 0x4f3   :  { %v2945_v50 = vadd.f32 %v10380_v8, %v2625_v11  ;;  %v3261_v36 = vadd.f32 %v10381_v9, %v2941_v59  ;;  %v3849_v51 = vmul.f32 1.442695, %v3814_v63  ;;  %v8803_v1 = vadd.f32 %v3721_v27, %v10382_v48  ;;  %v8816_v63 = vpop.permute.xlu1 %3684  ;;  %v10387_v8 = vld [vmem:[#allocation290_spill] sm:$0xff]  ;;  %v10389_v9 = vld [vmem:[#allocation308_spill] sm:$0xff] }
 0x4f4   :  { %4979 = vpow2.f32 %v3843_v57  ;;  %v3816_v47 = vmin.f32 %v8785_v17, 0.0  ;;  %v8807_v10 = vadd.f32 %v3722_v60, %v8590_v43  ;;  %v3724_v15 = vmul.f32 %v8598_v19, %v10383_v54  ;;  %v10386_v57 = vld [vmem:[#allocation297_spill] sm:$0xff] }
 0x4f5   :  { %v3262_v45 = vadd.f32 %v10384_v56, %v2942_v46  ;;  %v2946_v62 = vadd.f32 %v10385_v42, %v2626_v55  ;;  %v3851_v11 = vmul.f32 1.442695, %v3815_v24  ;;  %v8814_v59 = vadd.f32 %v3723_v49, %v8601_v40  ;;  %v8818_v27 = vpop.permute.xlu0 %3688  ;;  %v10388_v60 = vld [vmem:[#allocation245_spill] sm:$0xff]  ;;  %v10390_v55 = vld [vmem:[#allocation300_spill] sm:$0xff] }
 0x4f6   :  { %v3264_v44 = vadd.f32 %v10386_v57, %v2944_v30  ;;  %v3263_v43 = vadd.f32 %v10387_v8, %v2943_v16  ;;  %4981 = vpow2.f32 %v3847_v58  ;;  %v3725_v19 = vmul.f32 %v8621_v41, %v10388_v60  ;;  %v10391_v30 = vld [vmem:[#allocation8_spill] sm:$0xff]  ;;  %v10392_v58 = vld [vmem:[#allocation307_spill] sm:$0xff] }
 0x4f7   :  { %v8825_v46 = vadd.f32 %v10389_v9, %v3258_v37  ;;  %v3265_v24 = vadd.f32 %v10390_v55, %v2945_v50  ;;  %4983 = vpow2.f32 %v3849_v51  ;;  %v3817_v40 = vmin.f32 %v8803_v1, 0.0  ;;  %v10393_v37 = vld [vmem:[#allocation248_spill] sm:$0xff]  ;;  %v8839_v51 = vpop.permute.xlu1 %3692  ;;  %v10397_v8 = vld [vmem:[#allocation91_spill] sm:$0xff]  ;;  %v10399_v55 = vld [vmem:[#allocation226_spill] sm:$0xff] }
 0x4f8   :  { %v3853_v49 = vmul.f32 1.442695, %v3816_v47  ;;  %v3818_v48 = vmin.f32 %v8807_v10, 0.0  ;;  %v8831_v54 = vadd.f32 %v3724_v15, %v8611_v12  ;;  %v3726_v16 = vmul.f32 %v8623_v7, %v10391_v30  ;;  %v10394_v47 = vld [vmem:[#allocation309_spill] sm:$0xff] }
 0x4f9   :  { %v3266_v56 = vadd.f32 %v10392_v58, %v2946_v62  ;;  %4985 = vpow2.f32 %v3851_v11  ;;  %v3819_v41 = vmin.f32 %v8814_v59, 0.0  ;;  %v3727_v50 = vmul.f32 %v8646_v28, %v10393_v37  ;;  %v8841_v42 = vpop.permute.xlu0 %3696  ;;  %v10395_v12 = vld [vmem:[#allocation193_spill] sm:$0xff]  ;;  %v10396_v62 = vld [vmem:[#allocation71_spill] sm:$0xff]  ;;  %v10398_v28 = vld [vmem:[#allocation224_spill] sm:$0xff] }
 0x4fa   :  { %v8845_v57 = vadd.f32 %v10394_v47, %v8755_v33  ;;  %v8848_v15 = vadd.f32 %v10395_v12, %v3260_v20  ;;  %v8851_v7 = vadd.f32 %v3725_v19, %v8631_v4  ;;  %v3728_v11 = vmul.f32 %v8648_v26, %v10396_v62  ;;  %v10400_v19 = vld [vmem:[#allocation120_spill] sm:$0xff] }
 0x4fb   :  { %v8856_v60 = vadd.f32 %v10397_v8, %v3259_v22  ;;  %v8859_v9 = vadd.f32 %v10398_v28, %v3262_v45  ;;  %v8862_v30 = vadd.f32 %v10399_v55, %v3261_v36  ;;  %v3855_v33 = vmul.f32 1.442695, %v3817_v40  ;;  %v10401_v22 = vld [vmem:[#allocation241_spill] sm:$0xff]  ;;  %v8877_v36 = vpop.permute.xlu1 %3700 }
 0x4fc   :  { %v4978_v58 = vpop.eup %4977  ;;  %4987 = vpow2.f32 %v3853_v49  ;;  %v3857_v20 = vmul.f32 1.442695, %v3818_v48  ;;  %v3820_v37 = vmin.f32 %v8831_v54, 0.0  ;;  %v8866_v4 = vadd.f32 %v3726_v16, %v8637_v21  ;;  %v10402_v48 = vld [vmem:[#allocation216_spill] sm:$0xff]  ;;  %v10404_v21 = vld [vmem:[#allocation97_spill] sm:$0xff] }
 0x4fd   :  { %v8869_v26 = vadd.f32 %v10400_v19, %v3264_v44  ;;  %v8872_v47 = vadd.f32 %v10401_v22, %v3263_v43  ;;  %v3859_v45 = vmul.f32 1.442695, %v3819_v41  ;;  %v8875_v12 = vadd.f32 %v3727_v50, %v8651_v34  ;;  %v8879_v40 = vpop.permute.xlu0 %3704  ;;  %v10406_v41 = vld [vmem:[#allocation250_spill] sm:$0xff]  ;;  %v10407_v55 = vld [vmem:[#allocation73_spill] sm:$0xff] }
 0x4fe   :  { %v4980_v49 = vpop.eup %4979  ;;  %v8882_v62 = vadd.f32 %v10402_v48, %v3266_v56  ;;  %v8885_v16 = vadd.f32 %v10404_v21, %v3265_v24  ;;  %v3821_v44 = vmin.f32 %v8851_v7, 0.0  ;;  %v8889_v43 = vadd.f32 %v3728_v11, %v8658_v32  ;;  %v10408_v22 = vld [vmem:[#allocation74_spill] sm:$0xff] }
 0x4ff   :  { %4989 = vpow2.f32 %v3855_v33  ;;  %v3729_v34 = vmul.f32 %v8680_v38, %v10406_v41  ;;  %vm3779_vm0 = vcmp.gt.f32.partialorder %v8735_v3, 0.0  ;;  %v4643_v50 = vadd.f32 -1.0, %v4978_v58  ;;  %v8898_v11 = vpop.permute.xlu1 %3708 }
 0x500   :  { %10403 = vst [vmem:[#allocation103_spill] sm:$0xff] %v8882_v62  ;;  %10405 = vst [vmem:[#allocation121_spill] sm:$0xff] %v8885_v16  ;;  %v4982_v8 = vpop.eup %4981  ;;  %4991 = vpow2.f32 %v3857_v20  ;;  %v3861_v28 = vmul.f32 1.442695, %v3820_v37  ;;  %v3822_v56 = vmin.f32 %v8866_v4, 0.0  ;;  %v3730_v24 = vmul.f32 %v8682_v29, %v10407_v55  ;;  %v10410_v62 = vld [vmem:[#allocation233_spill] sm:$0xff] }
 0x501   :  { %v4984_v19 = vpop.eup %4983  ;;  %4993 = vpow2.f32 %v3859_v45  ;;  %v3823_v32 = vmin.f32 %v8875_v12, 0.0  ;;  %v8900_v33 = vpop.permute.xlu0 %3712  ;;  %v4642_v38 = vadd.f32 -1.0, %v4980_v49  ;;  %vm3780_vm1 = vcmp.gt.f32.partialorder %v8719_v0, 0.0 }
 0x502   :  { %v3863_v58 = vmul.f32 1.442695, %v3821_v44  ;;  %v3824_v20 = vmin.f32 %v8889_v43, 0.0  ;;  %vm3781_vm2 = vcmp.gt.f32.partialorder %v8750_v13, 0.0  ;;  %vm3782_vm3 = vcmp.gt.f32.partialorder %v8758_v31, 0.0  ;;  %v10409_v44 = vld [vmem:[#allocation17_spill] sm:$0xff] }
 0x503   :  { %v4986_v37 = vpop.eup %4985  ;;  %v8907_v29 = vadd.f32 %v3729_v34, %v8661_v6  ;;  %v3731_v45 = vmul.f32 %v8712_v61, %v10408_v22  ;;  %v3940_v48 = vsel %vm3780_vm1, %v8719_v0, %v4643_v50  ;;  %vm3783_vm4 = vcmp.gt.f32.partialorder %v8769_v35, 0.0  ;;  %v4004_v6 = vpop.permute.xlu1 %4003 }
 0x504   :  { %4995 = vpow2.f32 %v3861_v28  ;;  %v3865_v49 = vmul.f32 1.442695, %v3822_v56  ;;  %v8914_v21 = vadd.f32 %v3730_v24, %v8667_v25  ;;  %v3732_v41 = vmul.f32 %v8714_v18, %v10409_v44  ;;  %v10411_v44 = vld [vmem:[#allocation3_spill] sm:$0xff] }
 0x505   :  { %vm3784_vm5 = vcmp.gt.f32.partialorder %v8785_v17, 0.0  ;;  %v3867_v55 = vmul.f32 1.442695, %v3823_v32  ;;  %v3939_v61 = vsel %vm3779_vm0, %v8735_v3, %v4642_v38  ;;  %v4006_v34 = vpop.permute.xlu0 %4005  ;;  %v4644_v0 = vadd.f32 -1.0, %v4982_v8  ;;  %v10412_v38 = vld [vmem:[#allocation100_spill] sm:$0xff] }
 0x506   :  { %v4645_v50 = vadd.f32 -1.0, %v4984_v19  ;;  %v4988_v22 = vpop.eup %4987  ;;  %4997 = vpow2.f32 %v3863_v58  ;;  %v3869_v28 = vmul.f32 1.442695, %v3824_v20  ;;  %v4099_v56 = vmul.f32 %v4004_v6, %v3939_v61  ;;  %v10413_v19 = vld [vmem:[#allocation174_spill] sm:$0xff]  ;;  %v10414_v61 = vld [vmem:[#allocation101_spill] sm:$0xff] }
 0x507   :  { %v4646_v25 = vadd.f32 -1.0, %v4986_v37  ;;  %v3825_v24 = vmin.f32 %v8907_v29, 0.0  ;;  %v8924_v18 = vadd.f32 %v3731_v45, %v10410_v62  ;;  %v3733_v32 = vmul.f32 %v8742_v2, %v10411_v44  ;;  %v4008_v2 = vpop.permute.xlu1 %4007  ;;  %v10417_v44 = vld [vmem:[#allocation79_spill] sm:$0xff] }
 0x508   :  { %v4100_v16 = vmul.f32 %v4006_v34, %v3940_v48  ;;  %4999 = vpow2.f32 %v3865_v49  ;;  %v3826_v3 = vmin.f32 %v8914_v21, 0.0  ;;  %v8930_v8 = vadd.f32 %v3732_v41, %v10412_v38  ;;  %4163 = vrot.lane.b32.xlu1 %v4099_v56, %s5116_s22 }
 0x509   :  { %v3734_v58 = vmul.f32 %v8744_v5, %v10413_v19  ;;  %vm3785_vm6 = vcmp.gt.f32.partialorder %v8803_v1, 0.0  ;;  %vm3786_vm7 = vcmp.gt.f32.partialorder %v8807_v10, 0.0  ;;  %v4990_v62 = vpop.eup %4989  ;;  %5001 = vpow2.f32 %v3867_v55  ;;  %v4010_v5 = vpop.permute.xlu0 %4009 }
 0x50a   :  { %4165 = vrot.lane.b32.xlu0 %v4100_v16, %s5116_s22  ;;  %v3941_v20 = vsel %vm3781_vm2, %v8750_v13, %v4644_v0  ;;  %v3942_v37 = vsel %vm3782_vm3, %v8758_v31, %v4645_v50  ;;  %v4647_v45 = vadd.f32 -1.0, %v4988_v22  ;;  %vm3787_vm8 = vcmp.gt.f32.partialorder %v8814_v59, 0.0  ;;  %v4992_v48 = vpop.eup %4991  ;;  %v10415_v31 = vld [vmem:[#allocation146_spill] sm:$0xff] }
 0x50b   :  { %5003 = vpow2.f32 %v3869_v28  ;;  %v4101_v49 = vmul.f32 %v4008_v2, %v3941_v20  ;;  %v4102_v41 = vmul.f32 %v4010_v5, %v3942_v37  ;;  %v3943_v16 = vsel %vm3783_vm4, %v8769_v35, %v4646_v25  ;;  %v4994_v55 = vpop.eup %4993  ;;  %v10416_v28 = vld [vmem:[#allocation102_spill] sm:$0xff]  ;;  %v10418_v35 = vld [vmem:[#allocation51_spill] sm:$0xff]  ;;  %v10419_v2 = vld [vmem:[#allocation20_spill] sm:$0xff] }
 0x50c   :  { %v3871_v6 = vmul.f32 1.442695, %v3825_v24  ;;  %v3827_v13 = vmin.f32 %v8924_v18, 0.0  ;;  %v8950_v34 = vadd.f32 %v3733_v32, %v10414_v61  ;;  %v3735_v0 = vmul.f32 %v8771_v23, %v10415_v31  ;;  %v4012_v24 = vpop.permute.xlu1 %4011 }
 0x50d   :  { %v3873_v50 = vmul.f32 1.442695, %v3826_v3  ;;  %v3828_v22 = vmin.f32 %v8930_v8, 0.0  ;;  %v8956_v56 = vadd.f32 %v3734_v58, %v10416_v28  ;;  %v3736_v38 = vmul.f32 %v8773_v39, %v10417_v44  ;;  %4167 = vrot.lane.b32.xlu1 %v4101_v49, %s5116_s22  ;;  %v4014_v32 = vpop.permute.xlu0 %4013 }
 0x50e   :  { %vm3788_vm9 = vcmp.gt.f32.partialorder %v8831_v54, 0.0  ;;  %v3737_v25 = vmul.f32 %v8794_v52, %v10418_v35  ;;  %4169 = vrot.lane.b32.xlu0 %v4102_v41, %s5116_s22  ;;  %v3944_v23 = vsel %vm3784_vm5, %v8785_v17, %v4647_v45  ;;  %v4648_v3 = vadd.f32 -1.0, %v4990_v62  ;;  %v4996_v58 = vpop.eup %4995  ;;  %v10420_v41 = vld [vmem:[#allocation122_spill] sm:$0xff] }
 0x50f   :  { %v4649_v19 = vadd.f32 -1.0, %v4992_v48  ;;  %v3738_v39 = vmul.f32 %v8796_v14, %v10419_v2  ;;  %v4103_v20 = vmul.f32 %v4012_v24, %v3943_v16  ;;  %v4104_v37 = vmul.f32 %v4014_v32, %v3944_v23  ;;  %v10422_v24 = vld [vmem:[#allocation22_spill] sm:$0xff] }
 0x510   :  { %v4650_v5 = vadd.f32 -1.0, %v4994_v55  ;;  %5005 = vpow2.f32 %v3871_v6  ;;  %v3875_v49 = vmul.f32 1.442695, %v3827_v13  ;;  %v3829_v52 = vmin.f32 %v8950_v34, 0.0  ;;  %v4998_v31 = vpop.eup %4997  ;;  %v4016_v48 = vpop.permute.xlu1 %4015 }
 0x511   :  { %v8972_v61 = vadd.f32 %v3735_v0, %v10420_v41  ;;  %5007 = vpow2.f32 %v3873_v50  ;;  %v3877_v17 = vmul.f32 1.442695, %v3828_v22  ;;  %v3830_v62 = vmin.f32 %v8956_v56, 0.0  ;;  %4171 = vrot.lane.b32.xlu1 %v4103_v20, %s5116_s22  ;;  %v4018_v55 = vpop.permute.xlu0 %4017 }
 0x512   :  { %v8976_v45 = vadd.f32 %v3736_v38, %v8730_v53  ;;  %vm3789_vm10 = vcmp.gt.f32.partialorder %v8851_v7, 0.0  ;;  %vm3790_vm11 = vcmp.gt.f32.partialorder %v8866_v4, 0.0  ;;  %v8982_v14 = vadd.f32 %v3737_v25, %v8845_v57  ;;  %4173 = vrot.lane.b32.xlu0 %v4104_v37, %s5116_s22  ;;  %v5000_v13 = vpop.eup %4999 }
 0x513   :  { %v3945_v16 = vsel %vm3785_vm6, %v8803_v1, %v4648_v3  ;;  %v3946_v53 = vsel %vm3786_vm7, %v8807_v10, %v4649_v19  ;;  %v4651_v6 = vadd.f32 -1.0, %v4996_v58  ;;  %vm3791_vm12 = vcmp.gt.f32.partialorder %v8875_v12, 0.0  ;;  %v5002_v28 = vpop.eup %5001  ;;  %v10421_v10 = vld [vmem:[#allocation183_spill] sm:$0xff] }
 0x514   :  { %v8993_v0 = vadd.f32 %v3738_v39, %v8825_v46  ;;  %v4105_v57 = vmul.f32 %v4016_v48, %v3945_v16  ;;  %v4106_v50 = vmul.f32 %v4018_v55, %v3946_v53  ;;  %v3947_v22 = vsel %vm3787_vm8, %v8814_v59, %v4650_v5  ;;  %v4020_v32 = vpop.permute.xlu1 %4019 }
 0x515   :  { %5009 = vpow2.f32 %v3875_v49  ;;  %v3879_v1 = vmul.f32 1.442695, %v3829_v52  ;;  %v3831_v44 = vmin.f32 %v8972_v61, 0.0  ;;  %v3739_v38 = vmul.f32 %v8816_v63, %v10421_v10  ;;  %v5004_v35 = vpop.eup %5003  ;;  %v4022_v3 = vpop.permute.xlu0 %4021  ;;  %v10423_v49 = vld [vmem:[#allocation185_spill] sm:$0xff] }
 0x516   :  { %5011 = vpow2.f32 %v3877_v17  ;;  %v3881_v25 = vmul.f32 1.442695, %v3830_v62  ;;  %v3832_v46 = vmin.f32 %v8976_v45, 0.0  ;;  %v3740_v23 = vmul.f32 %v8818_v27, %v10422_v24  ;;  %4175 = vrot.lane.b32.xlu1 %v4105_v57, %s5116_s22  ;;  %4177 = vrot.lane.b32.xlu0 %v4106_v50, %s5116_s22 }
 0x517   :  { %vm3792_vm13 = vcmp.gt.f32.partialorder %v8889_v43, 0.0  ;;  %v3833_v59 = vmin.f32 %v8982_v14, 0.0  ;;  %v3948_v63 = vsel %vm3788_vm9, %v8831_v54, %v4651_v6  ;;  %v4652_v19 = vadd.f32 -1.0, %v4998_v31  ;;  %v10424_v31 = vld [vmem:[#allocation24_spill] sm:$0xff] }
 0x518   :  { %v4653_v58 = vadd.f32 -1.0, %v5000_v13  ;;  %v3834_v2 = vmin.f32 %v8993_v0, 0.0  ;;  %v4107_v39 = vmul.f32 %v4020_v32, %v3947_v22  ;;  %v4108_v27 = vmul.f32 %v4022_v3, %v3948_v63  ;;  %v10427_v32 = vld [vmem:[#allocation188_spill] sm:$0xff] }
 0x519   :  { %v4654_v20 = vadd.f32 -1.0, %v5002_v28  ;;  %5013 = vpow2.f32 %v3879_v1  ;;  %v3883_v37 = vmul.f32 1.442695, %v3831_v44  ;;  %v9013_v5 = vadd.f32 %v3739_v38, %v8856_v60  ;;  %v4024_v60 = vpop.permute.xlu1 %4023  ;;  %v4026_v16 = vpop.permute.xlu0 %4025  ;;  %v10426_v44 = vld [vmem:[#allocation169_spill] sm:$0xff] }
 0x51a   :  { %v3741_v52 = vmul.f32 %v8839_v51, %v10423_v49  ;;  %5015 = vpow2.f32 %v3881_v25  ;;  %v3885_v41 = vmul.f32 1.442695, %v3832_v46  ;;  %v9018_v54 = vadd.f32 %v3740_v23, %v8848_v15  ;;  %4179 = vrot.lane.b32.xlu1 %v4107_v39, %s5116_s22  ;;  %v5006_v62 = vpop.eup %5005  ;;  %4181 = vrot.lane.b32.xlu0 %v4108_v27, %s5116_s22 }
 0x51b   :  { %v3742_v17 = vmul.f32 %v8841_v42, %v10424_v31  ;;  %vm3793_vm14 = vcmp.gt.f32.partialorder %v8907_v29, 0.0  ;;  %v3887_v48 = vmul.f32 1.442695, %v3833_v59  ;;  %v3949_v51 = vsel %vm3789_vm10, %v8851_v7, %v4652_v19  ;;  %v5008_v42 = vpop.eup %5007  ;;  %v10425_v7 = vld [vmem:[#allocation187_spill] sm:$0xff] }
 0x51c   :  { %v3950_v15 = vsel %vm3790_vm11, %v8866_v4, %v4653_v58  ;;  %v4655_v53 = vadd.f32 -1.0, %v5004_v35  ;;  %v3889_v55 = vmul.f32 1.442695, %v3834_v2  ;;  %v4109_v6 = vmul.f32 %v4024_v60, %v3949_v51  ;;  %v10428_v58 = vld [vmem:[#allocation28_spill] sm:$0xff] }
 0x51d   :  { %v4110_v13 = vmul.f32 %v4026_v16, %v3950_v15  ;;  %v3951_v57 = vsel %vm3791_vm12, %v8875_v12, %v4654_v20  ;;  %5017 = vpow2.f32 %v3883_v37  ;;  %v3835_v50 = vmin.f32 %v9013_v5, 0.0  ;;  %v4030_v38 = vpop.permute.xlu0 %4029 }
 0x51e   :  { %v9036_v22 = vadd.f32 %v3741_v52, %v8862_v30  ;;  %v3743_v28 = vmul.f32 %v8877_v36, %v10425_v7  ;;  %5019 = vpow2.f32 %v3885_v41  ;;  %v3836_v4 = vmin.f32 %v9018_v54, 0.0  ;;  %4183 = vrot.lane.b32.xlu1 %v4109_v6, %s5116_s22  ;;  %v4028_v30 = vpop.permute.xlu1 %4027 }
 0x51f   :  { %v9042_v1 = vadd.f32 %v3742_v17, %v8859_v9  ;;  %v3744_v10 = vmul.f32 %v8879_v40, %v10426_v44  ;;  %v5010_v12 = vpop.eup %5009  ;;  %5021 = vpow2.f32 %v3887_v48  ;;  %4185 = vrot.lane.b32.xlu0 %v4110_v13, %s5116_s22  ;;  %v3952_v36 = vsel %vm3792_vm13, %v8889_v43, %v4655_v53  ;;  %v10429_v17 = vld [vmem:[#allocation121_spill] sm:$0xff]  ;;  %v10430_v48 = vld [vmem:[#allocation103_spill] sm:$0xff] }
 0x520   :  { %v4656_v35 = vadd.f32 -1.0, %v5006_v62  ;;  %v4657_v25 = vadd.f32 -1.0, %v5008_v42  ;;  %v5012_v46 = vpop.eup %5011  ;;  %5023 = vpow2.f32 %v3889_v55  ;;  %v4111_v9 = vmul.f32 %v4028_v30, %v3951_v57 }
 0x521   :  { %v4112_v24 = vmul.f32 %v4030_v38, %v3952_v36  ;;  %vm3794_vm15 = vcmp.gt.f32.partialorder %v8914_v21, 0.0  ;;  %v3891_v40 = vmul.f32 1.442695, %v3835_v50  ;;  %v3837_v23 = vmin.f32 %v9036_v22, 0.0  ;;  %v4034_v20 = vpop.permute.xlu0 %4033 }
 0x522   :  { %v9054_v59 = vadd.f32 %v3743_v28, %v8872_v47  ;;  %v3745_v63 = vmul.f32 %v8898_v11, %v10427_v32  ;;  %v3893_v3 = vmul.f32 1.442695, %v3836_v4  ;;  %v3838_v43 = vmin.f32 %v9042_v1, 0.0  ;;  %4187 = vrot.lane.b32.xlu1 %v4111_v9, %s5116_s22  ;;  %v4032_v27 = vpop.permute.xlu1 %4031 }
 0x523   :  { %v9060_v19 = vadd.f32 %v3744_v10, %v8869_v26  ;;  %v3746_v2 = vmul.f32 %v8900_v33, %v10428_v58  ;;  %v5014_v39 = vpop.eup %5013  ;;  %4189 = vrot.lane.b32.xlu0 %v4112_v24, %s5116_s22  ;;  %v3953_v47 = vsel %vm3793_vm14, %v8907_v29, %v4656_v35  ;;  %v3954_v11 = vsel %vm3794_vm15, %v8914_v21, %v4657_v25 }
 0x524   :  { %v4658_v37 = vadd.f32 -1.0, %v5010_v12  ;;  %v4659_v49 = vadd.f32 -1.0, %v5012_v46  ;;  %v5016_v26 = vpop.eup %5015  ;;  %v4113_v52 = vmul.f32 %v4032_v27, %v3953_v47  ;;  %v4114_v41 = vmul.f32 %v4034_v20, %v3954_v11 }
 0x525   :  { %vm3795_vm0 = vcmp.gt.f32.partialorder %v8924_v18, 0.0  ;;  %vm3796_vm1 = vcmp.gt.f32.partialorder %v8930_v8, 0.0  ;;  %5025 = vpow2.f32 %v3891_v40  ;;  %v3895_v33 = vmul.f32 1.442695, %v3837_v23  ;;  %v4038_v42 = vpop.permute.xlu0 %4037 }
 0x526   :  { %v3839_v31 = vmin.f32 %v9054_v59, 0.0  ;;  %v9074_v62 = vadd.f32 %v3745_v63, %v10429_v17  ;;  %v3897_v29 = vmul.f32 1.442695, %v3838_v43  ;;  %v3840_v21 = vmin.f32 %v9060_v19, 0.0  ;;  %4191 = vrot.lane.b32.xlu1 %v4113_v52, %s5116_s22  ;;  %v4036_v15 = vpop.permute.xlu1 %4035 }
 0x527   :  { %v9078_v60 = vadd.f32 %v3746_v2, %v10430_v48  ;;  %5027 = vpow2.f32 %v3893_v3  ;;  %v5018_v51 = vpop.eup %5017  ;;  %4193 = vrot.lane.b32.xlu0 %v4114_v41, %s5116_s22  ;;  %v3955_v16 = vsel %vm3795_vm0, %v8924_v18, %v4658_v37  ;;  %v3956_v53 = vsel %vm3796_vm1, %v8930_v8, %v4659_v49 }
 0x528   :  { %v4660_v55 = vadd.f32 -1.0, %v5014_v39  ;;  %v4661_v6 = vadd.f32 -1.0, %v5016_v26  ;;  %v5020_v13 = vpop.eup %5019  ;;  %v4115_v57 = vmul.f32 %v4036_v15, %v3955_v16  ;;  %v4116_v50 = vmul.f32 %v4038_v42, %v3956_v53 }
 0x529   :  { %v5022_v7 = vpop.eup %5021  ;;  %5029 = vpow2.f32 %v3895_v33  ;;  %v3899_v28 = vmul.f32 1.442695, %v3839_v31  ;;  %v3841_v4 = vmin.f32 %v9074_v62, 0.0  ;;  %vm3797_vm2 = vcmp.gt.f32.partialorder %v8950_v34, 0.0  ;;  %v4042_v36 = vpop.permute.xlu0 %4041 }
 0x52a   :  { %v5024_v44 = vpop.eup %5023  ;;  %v3901_v10 = vmul.f32 1.442695, %v3840_v21  ;;  %v3842_v12 = vmin.f32 %v9078_v60, 0.0  ;;  %4195 = vrot.lane.b32.xlu1 %v4115_v57, %s5116_s22  ;;  %vm3798_vm3 = vcmp.gt.f32.partialorder %v8956_v56, 0.0  ;;  %5031 = vpow2.f32 %v3897_v29  ;;  %v4040_v18 = vpop.permute.xlu1 %4039 }
 0x52b   :  { %4197 = vrot.lane.b32.xlu0 %v4116_v50, %s5116_s22  ;;  %v3957_v8 = vsel %vm3797_vm2, %v8950_v34, %v4660_v55  ;;  %v3958_v30 = vsel %vm3798_vm3, %v8956_v56, %v4661_v6  ;;  %v4662_v38 = vadd.f32 -1.0, %v5018_v51  ;;  %v4663_v35 = vadd.f32 -1.0, %v5020_v13 }
 0x52c   :  { %v4117_v25 = vmul.f32 %v4040_v18, %v3957_v8  ;;  %v4118_v46 = vmul.f32 %v4042_v36, %v3958_v30  ;;  %5033 = vpow2.f32 %v3899_v28  ;;  %v3903_v9 = vmul.f32 1.442695, %v3841_v4 }
 0x52d   :  { %v3905_v24 = vmul.f32 1.442695, %v3842_v12  ;;  %vm3799_vm4 = vcmp.gt.f32.partialorder %v8972_v61, 0.0  ;;  %vm3800_vm5 = vcmp.gt.f32.partialorder %v8976_v45, 0.0  ;;  %5035 = vpow2.f32 %v3901_v10  ;;  %v4046_v32 = vpop.permute.xlu0 %4045 }
 0x52e   :  { %4199 = vrot.lane.b32.xlu1 %v4117_v25, %s5116_s22  ;;  %v4044_v34 = vpop.permute.xlu1 %4043  ;;  %v3959_v56 = vsel %vm3799_vm4, %v8972_v61, %v4662_v38  ;;  %v3960_v23 = vsel %vm3800_vm5, %v8976_v45, %v4663_v35  ;;  %v4664_v63 = vadd.f32 -1.0, %v5022_v7  ;;  %v4665_v3 = vadd.f32 -1.0, %v5024_v44 }
 0x52f   :  { %v5026_v40 = vpop.eup %5025  ;;  %4201 = vrot.lane.b32.xlu0 %v4118_v46, %s5116_s22  ;;  %v4119_v58 = vmul.f32 %v4044_v34, %v3959_v56  ;;  %v4120_v2 = vmul.f32 %v4046_v32, %v3960_v23  ;;  %5037 = vpow2.f32 %v3903_v9  ;;  %vm3801_vm6 = vcmp.gt.f32.partialorder %v8982_v14, 0.0 }
 0x530   :  { %vm3802_vm7 = vcmp.gt.f32.partialorder %v8993_v0, 0.0  ;;  %5039 = vpow2.f32 %v3905_v24  ;;  %v3961_v45 = vsel %vm3801_vm6, %v8982_v14, %v4664_v63  ;;  %v4666_v11 = vadd.f32 -1.0, %v5026_v40 }
 0x531   :  { %v5028_v43 = vpop.eup %5027  ;;  %v3962_v27 = vsel %vm3802_vm7, %v8993_v0, %v4665_v3  ;;  %v4050_v47 = vpop.permute.xlu0 %4049  ;;  %vm3803_vm8 = vcmp.gt.f32.partialorder %v9013_v5, 0.0  ;;  %vm3804_vm9 = vcmp.gt.f32.partialorder %v9018_v54, 0.0  ;;  %vm3805_vm10 = vcmp.gt.f32.partialorder %v9036_v22, 0.0 }
 0x532   :  { %4203 = vrot.lane.b32.xlu1 %v4119_v58, %s5116_s22  ;;  %v4048_v61 = vpop.permute.xlu1 %4047  ;;  %v4667_v20 = vadd.f32 -1.0, %v5028_v43  ;;  %v4122_v26 = vmul.f32 %v4050_v47, %v3962_v27  ;;  %v3963_v14 = vsel %vm3803_vm8, %v9013_v5, %v4666_v11  ;;  %vm3806_vm11 = vcmp.gt.f32.partialorder %v9042_v1, 0.0 }
 0x533   :  { %v5030_v39 = vpop.eup %5029  ;;  %4205 = vrot.lane.b32.xlu0 %v4120_v2, %s5116_s22  ;;  %v4121_v49 = vmul.f32 %v4048_v61, %v3961_v45  ;;  %vm3807_vm12 = vcmp.gt.f32.partialorder %v9054_v59, 0.0  ;;  %vm3808_vm13 = vcmp.gt.f32.partialorder %v9060_v19, 0.0  ;;  %vm3809_vm14 = vcmp.gt.f32.partialorder %v9074_v62, 0.0 }
 0x534   :  { %v5032_v37 = vpop.eup %5031  ;;  %v3964_v0 = vsel %vm3804_vm9, %v9018_v54, %v4667_v20  ;;  %v4668_v31 = vadd.f32 -1.0, %v5030_v39  ;;  %vm3810_vm15 = vcmp.gt.f32.partialorder %v9078_v60, 0.0  ;;  %vm4259_vm0 = vcmask 261120  }
 0x535   :  { %v4054_v33 = vpop.permute.xlu0 %4053  ;;  %v4669_v17 = vadd.f32 -1.0, %v5032_v37  ;;  %v5118_v39 = vmov 32   ;;  %vm4548_vm1 = vcmask 64512  }
 0x536   :  { %4207 = vrot.lane.b32.xlu1 %v4121_v49, %s5116_s22  ;;  %v5034_v52 = vpop.eup %5033  ;;  %v4052_v41 = vpop.permute.xlu1 %4051  ;;  %v4124_v48 = vmul.f32 %v4054_v33, %v3964_v0  ;;  %v3965_v5 = vsel %vm3805_vm10, %v9036_v22, %v4668_v31  ;;  %4903 = vset.pattern.permute.xlu0 %v5118_v39 }
 0x537   :  { %4209 = vrot.lane.b32.xlu0 %v4122_v26, %s5116_s22  ;;  %v5036_v29 = vpop.eup %5035  ;;  %v4123_v21 = vmul.f32 %v4052_v41, %v3963_v14  ;;  %v3966_v54 = vsel %vm3806_vm11, %v9042_v1, %v4669_v17  ;;  %v4670_v53 = vadd.f32 -1.0, %v5034_v52  ;;  %4904 = vset.pattern.permute.xlu1 %v5118_v39 }
 0x538   :  { %v4671_v42 = vadd.f32 -1.0, %v5036_v29 }
 0x539   :  { %v5038_v51 = vpop.eup %5037  ;;  %v4058_v16 = vpop.permute.xlu0 %4057  ;;  %v3967_v50 = vsel %vm3807_vm12, %v9054_v59, %v4670_v53 }
 0x53a   :  { %4211 = vrot.lane.b32.xlu1 %v4123_v21, %s5116_s22  ;;  %v4056_v15 = vpop.permute.xlu1 %4055  ;;  %v5040_v55 = vpop.eup %5039  ;;  %v4126_v13 = vmul.f32 %v4058_v16, %v3966_v54  ;;  %v3968_v22 = vsel %vm3808_vm13, %v9060_v19, %v4671_v42  ;;  %v4672_v7 = vadd.f32 -1.0, %v5038_v51 }
 0x53b   :  { %4213 = vrot.lane.b32.xlu0 %v4124_v48, %s5116_s22  ;;  %v4125_v6 = vmul.f32 %v4056_v15, %v3965_v5  ;;  %v4673_v28 = vadd.f32 -1.0, %v5040_v55 }
 0x53c   :  { %v3969_v12 = vsel %vm3809_vm14, %v9074_v62, %v4672_v7 }
 0x53d   :  { %v4062_v1 = vpop.permute.xlu0 %4061  ;;  %v3970_v59 = vsel %vm3810_vm15, %v9078_v60, %v4673_v28 }
 0x53e   :  { %4215 = vrot.lane.b32.xlu1 %v4125_v6, %s5116_s22  ;;  %v4060_v57 = vpop.permute.xlu1 %4059  ;;  %v4128_v44 = vmul.f32 %v4062_v1, %v3968_v22 }
 0x53f   :  { %4217 = vrot.lane.b32.xlu0 %v4126_v13, %s5116_s22  ;;  %v4127_v4 = vmul.f32 %v4060_v57, %v3967_v50 }
 0x541   :  { %v4066_v18 = vpop.permute.xlu0 %4065 }
 0x542   :  { %4219 = vrot.lane.b32.xlu1 %v4127_v4, %s5116_s22  ;;  %v4064_v10 = vpop.permute.xlu1 %4063  ;;  %v4130_v8 = vmul.f32 %v4066_v18, %v3970_v59 }
 0x543   :  { %4221 = vrot.lane.b32.xlu0 %v4128_v44, %s5116_s22  ;;  %v4129_v19 = vmul.f32 %v4064_v10, %v3969_v12 }
 0x546   :  { %4223 = vrot.lane.b32.xlu1 %v4129_v19, %s5116_s22 }
 0x547   :  { %4225 = vrot.lane.b32.xlu0 %v4130_v8, %s5116_s22 }
 0x57a   :  { %v4164_v30 = vpop.permute.xlu1 %4163 }
 0x57b   :  { %v4260_v38 = vsel %vm4259_vm0, %v4164_v30, 0.0 }
 0x57c   :  { %v4166_v36 = vpop.permute.xlu0 %4165  ;;  %4261 = vadd.xlane.f32.xlu1 %v4260_v38  ;;  %v10431_v38 = vld [vmem:[#allocation194_spill] sm:$0xff] }
 0x57d   :  { %v4263_v35 = vsel %vm4259_vm0, %v4166_v36, 0.0 }
 0x57e   :  { %4264 = vadd.xlane.f32.xlu0 %v4263_v35 }
 0x57f   :  { %v4168_v25 = vpop.permute.xlu1 %4167 }
 0x580   :  { %v4170_v62 = vpop.permute.xlu0 %4169  ;;  %v4266_v60 = vsel %vm4259_vm0, %v4168_v25, 0.0 }
 0x581   :  { %v4269_v46 = vsel %vm4259_vm0, %v4170_v62, 0.0  ;;  %v10432_v62 = vld [vmem:[#allocation196_spill] sm:$0xff] }
 0x582   :  { %4267 = vadd.xlane.f32.xlu0 %v4266_v60  ;;  %4270 = vadd.xlane.f32.xlu1 %v4269_v46 }
 0x583   :  { %v4172_v9 = vpop.permute.xlu1 %4171 }
 0x584   :  { %v4272_v24 = vsel %vm4259_vm0, %v4172_v9, 0.0  ;;  %v4174_v40 = vpop.permute.xlu0 %4173 }
 0x585   :  { %v4275_v34 = vsel %vm4259_vm0, %v4174_v40, 0.0 }
 0x586   :  { %4273 = vadd.xlane.f32.xlu0 %v4272_v24  ;;  %4276 = vadd.xlane.f32.xlu1 %v4275_v34  ;;  %v10433_v24 = vld [vmem:[#allocation192_spill] sm:$0xff] }
 0x588   :  { %v4176_v56 = vpop.permute.xlu1 %4175  ;;  %v4178_v32 = vpop.permute.xlu0 %4177 }
 0x589   :  { %v4278_v23 = vsel %vm4259_vm0, %v4176_v56, 0.0  ;;  %v4281_v63 = vsel %vm4259_vm0, %v4178_v32, 0.0 }
 0x58a   :  { %4279 = vadd.xlane.f32.xlu0 %v4278_v23  ;;  %4282 = vadd.xlane.f32.xlu1 %v4281_v63  ;;  %v10434_v23 = vld [vmem:[#allocation195_spill] sm:$0xff] }
 0x58c   :  { %v4180_v3 = vpop.permute.xlu1 %4179  ;;  %v4182_v58 = vpop.permute.xlu0 %4181 }
 0x58d   :  { %v4284_v43 = vsel %vm4259_vm0, %v4180_v3, 0.0  ;;  %v4287_v2 = vsel %vm4259_vm0, %v4182_v58, 0.0 }
 0x58e   :  { %4285 = vadd.xlane.f32.xlu0 %v4284_v43  ;;  %4288 = vadd.xlane.f32.xlu1 %v4287_v2  ;;  %v10435_v43 = vld [vmem:[#allocation200_spill] sm:$0xff] }
 0x590   :  { %v4184_v61 = vpop.permute.xlu1 %4183 }
 0x591   :  { %v4290_v45 = vsel %vm4259_vm0, %v4184_v61, 0.0  ;;  %v4186_v27 = vpop.permute.xlu0 %4185  ;;  %v10436_v61 = vld [vmem:[#allocation202_spill] sm:$0xff] }
 0x592   :  { %v4293_v47 = vsel %vm4259_vm0, %v4186_v27, 0.0  ;;  %4291 = vadd.xlane.f32.xlu0 %v4290_v45  ;;  %v10437_v27 = vld [vmem:[#allocation206_spill] sm:$0xff] }
 0x593   :  { %4294 = vadd.xlane.f32.xlu1 %v4293_v47 }
 0x594   :  { %v4188_v11 = vpop.permute.xlu1 %4187 }
 0x595   :  { %v4296_v20 = vsel %vm4259_vm0, %v4188_v11, 0.0  ;;  %v4190_v37 = vpop.permute.xlu0 %4189 }
 0x596   :  { %v4299_v49 = vsel %vm4259_vm0, %v4190_v37, 0.0  ;;  %4297 = vadd.xlane.f32.xlu0 %v4296_v20  ;;  %v10438_v37 = vld [vmem:[#allocation198_spill] sm:$0xff] }
 0x597   :  { %4300 = vadd.xlane.f32.xlu1 %v4299_v49 }
 0x598   :  { %v4192_v26 = vpop.permute.xlu1 %4191 }
 0x599   :  { %v4302_v52 = vsel %vm4259_vm0, %v4192_v26, 0.0  ;;  %v4194_v41 = vpop.permute.xlu0 %4193  ;;  %v10439_v26 = vld [vmem:[#allocation205_spill] sm:$0xff] }
 0x59a   :  { %v4305_v14 = vsel %vm4259_vm0, %v4194_v41, 0.0  ;;  %4303 = vadd.xlane.f32.xlu0 %v4302_v52 }
 0x59b   :  { %4306 = vadd.xlane.f32.xlu1 %v4305_v14 }
 0x59c   :  { %v4196_v0 = vpop.permute.xlu1 %4195 }
 0x59d   :  { %v4308_v33 = vsel %vm4259_vm0, %v4196_v0, 0.0  ;;  %v4198_v31 = vpop.permute.xlu0 %4197  ;;  %v10440_v0 = vld [vmem:[#allocation201_spill] sm:$0xff] }
 0x59e   :  { %v4311_v17 = vsel %vm4259_vm0, %v4198_v31, 0.0  ;;  %4309 = vadd.xlane.f32.xlu0 %v4308_v33  ;;  %v10441_v31 = vld [vmem:[#allocation212_spill] sm:$0xff] }
 0x59f   :  { %4312 = vadd.xlane.f32.xlu1 %v4311_v17 }
 0x5a0   :  { %v4200_v29 = vpop.permute.xlu1 %4199 }
 0x5a1   :  { %v4314_v21 = vsel %vm4259_vm0, %v4200_v29, 0.0  ;;  %v4202_v48 = vpop.permute.xlu0 %4201 }
 0x5a2   :  { %v4317_v51 = vsel %vm4259_vm0, %v4202_v48, 0.0  ;;  %4315 = vadd.xlane.f32.xlu0 %v4314_v21  ;;  %v10442_v48 = vld [vmem:[#allocation62_spill] sm:$0xff] }
 0x5a3   :  { %4318 = vadd.xlane.f32.xlu1 %v4317_v51 }
 0x5a4   :  { %v4204_v15 = vpop.permute.xlu1 %4203 }
 0x5a5   :  { %v4320_v5 = vsel %vm4259_vm0, %v4204_v15, 0.0  ;;  %v4206_v54 = vpop.permute.xlu0 %4205  ;;  %v10443_v15 = vld [vmem:[#allocation210_spill] sm:$0xff] }
 0x5a6   :  { %v4323_v16 = vsel %vm4259_vm0, %v4206_v54, 0.0  ;;  %4321 = vadd.xlane.f32.xlu0 %v4320_v5 }
 0x5a7   :  { %4324 = vadd.xlane.f32.xlu1 %v4323_v16 }
 0x5a8   :  { %v4208_v53 = vpop.permute.xlu1 %4207 }
 0x5a9   :  { %v4326_v42 = vsel %vm4259_vm0, %v4208_v53, 0.0  ;;  %v4210_v55 = vpop.permute.xlu0 %4209  ;;  %v10444_v53 = vld [vmem:[#allocation60_spill] sm:$0xff] }
 0x5aa   :  { %v4329_v6 = vsel %vm4259_vm0, %v4210_v55, 0.0  ;;  %4327 = vadd.xlane.f32.xlu0 %v4326_v42  ;;  %v10445_v55 = vld [vmem:[#allocation220_spill] sm:$0xff] }
 0x5ab   :  { %4330 = vadd.xlane.f32.xlu1 %v4329_v6 }
 0x5ac   :  { %v4212_v13 = vpop.permute.xlu1 %4211 }
 0x5ad   :  { %v4332_v57 = vsel %vm4259_vm0, %v4212_v13, 0.0  ;;  %v4214_v50 = vpop.permute.xlu0 %4213 }
 0x5ae   :  { %v4335_v22 = vsel %vm4259_vm0, %v4214_v50, 0.0  ;;  %4333 = vadd.xlane.f32.xlu0 %v4332_v57  ;;  %v10446_v50 = vld [vmem:[#allocation63_spill] sm:$0xff] }
 0x5af   :  { %4336 = vadd.xlane.f32.xlu1 %v4335_v22 }
 0x5b0   :  { %v4216_v1 = vpop.permute.xlu1 %4215 }
 0x5b1   :  { %v4338_v7 = vsel %vm4259_vm0, %v4216_v1, 0.0  ;;  %v4218_v28 = vpop.permute.xlu0 %4217  ;;  %v10447_v1 = vld [vmem:[#allocation218_spill] sm:$0xff] }
 0x5b2   :  { %v4341_v4 = vsel %vm4259_vm0, %v4218_v28, 0.0  ;;  %4339 = vadd.xlane.f32.xlu0 %v4338_v7 }
 0x5b3   :  { %4342 = vadd.xlane.f32.xlu1 %v4341_v4 }
 0x5b4   :  { %v4220_v44 = vpop.permute.xlu1 %4219 }
 0x5b5   :  { %v4344_v10 = vsel %vm4259_vm0, %v4220_v44, 0.0  ;;  %v4222_v12 = vpop.permute.xlu0 %4221  ;;  %v10448_v44 = vld [vmem:[#allocation208_spill] sm:$0xff] }
 0x5b6   :  { %v4347_v59 = vsel %vm4259_vm0, %v4222_v12, 0.0  ;;  %4345 = vadd.xlane.f32.xlu0 %v4344_v10  ;;  %v10449_v12 = vld [vmem:[#allocation227_spill] sm:$0xff] }
 0x5b7   :  { %4348 = vadd.xlane.f32.xlu1 %v4347_v59 }
 0x5b8   :  { %v4224_v18 = vpop.permute.xlu1 %4223 }
 0x5b9   :  { %v4350_v19 = vsel %vm4259_vm0, %v4224_v18, 0.0  ;;  %v4226_v8 = vpop.permute.xlu0 %4225 }
 0x5ba   :  { %v4353_v30 = vsel %vm4259_vm0, %v4226_v8, 0.0  ;;  %4351 = vadd.xlane.f32.xlu0 %v4350_v19  ;;  %v10450_v19 = vld [vmem:[#allocation217_spill] sm:$0xff] }
 0x5bb   :  { %4354 = vadd.xlane.f32.xlu1 %v4353_v30  ;;  %v10451_v30 = vld [vmem:[#allocation92_spill] sm:$0xff] }
 0x609   :  { %v4262_v36 = vpop.xlane.xlu1 %4261 }
 0x60a   :  { %v4356_v35 = vadd.f32 %v4262_v36, %v10431_v38 }
 0x60b   :  { %v4265_v25 = vpop.xlane.xlu0 %4264 }
 0x60c   :  { %v4357_v60 = vadd.f32 %v4265_v25, %v10432_v62  ;;  %4390 = vperm.xlu0 %4903, %v4356_v35   ;;  %v10452_v25 = vld [vmem:[#allocation215_spill] sm:$0xff] }
 0x60e   :  { %4395 = vperm.xlu1 %4904, %v4357_v60   ;;  %v10453_v60 = vld [vmem:[#allocation93_spill] sm:$0xff] }
 0x60f   :  { %v4271_v46 = vpop.xlane.xlu1 %4270  ;;  %v4268_v9 = vpop.xlane.xlu0 %4267 }
 0x610   :  { %v4358_v40 = vadd.f32 %v4268_v9, %v10433_v24  ;;  %v4359_v32 = vadd.f32 %v4271_v46, %v10434_v23 }
 0x612   :  { %4400 = vperm.xlu1 %4904, %v4358_v40   ;;  %v10454_v40 = vld [vmem:[#allocation66_spill] sm:$0xff] }
 0x613   :  { %v4277_v34 = vpop.xlane.xlu1 %4276  ;;  %v4274_v56 = vpop.xlane.xlu0 %4273 }
 0x614   :  { %v4360_v58 = vadd.f32 %v4274_v56, %v10435_v43  ;;  %v4361_v45 = vadd.f32 %v4277_v34, %v10436_v61  ;;  %v10455_v56 = vld [vmem:[#allocation94_spill] sm:$0xff]  ;;  %v10457_v43 = vld [vmem:[#allocation95_spill] sm:$0xff] }
 0x615   :  { %v10458_v61 = vld [vmem:[#allocation199_spill] sm:$0xff] }
 0x616   :  { %4405 = vperm.xlu1 %4904, %v4359_v32  }
 0x617   :  { %v4283_v63 = vpop.xlane.xlu1 %4282  ;;  %v4280_v3 = vpop.xlane.xlu0 %4279 }
 0x618   :  { %v4362_v49 = vadd.f32 %v4280_v3, %v10438_v37  ;;  %v4363_v33 = vadd.f32 %v4283_v63, %v10440_v0  ;;  %v10456_v63 = vld [vmem:[#allocation190_spill] sm:$0xff] }
 0x61a   :  { %4410 = vperm.xlu1 %4904, %v4360_v58  }
 0x61b   :  { %v4289_v2 = vpop.xlane.xlu1 %4288  ;;  %v4286_v39 = vpop.xlane.xlu0 %4285 }
 0x61c   :  { %v4365_v47 = vadd.f32 %v4289_v2, %v10437_v27  ;;  %v4364_v51 = vadd.f32 %v4286_v39, %v10442_v48  ;;  %v10459_v27 = vld [vmem:[#allocation96_spill] sm:$0xff] }
 0x61e   :  { %4435 = vperm.xlu0 %4903, %v4365_v47   ;;  %4415 = vperm.xlu1 %4904, %v4361_v45  }
 0x61f   :  { %v4292_v20 = vpop.xlane.xlu0 %4291 }
 0x620   :  { %v4295_v11 = vpop.xlane.xlu1 %4294  ;;  %v4366_v42 = vadd.f32 %v4292_v20, %v10444_v53  ;;  %v10460_v20 = vld [vmem:[#allocation204_spill] sm:$0xff] }
 0x621   :  { %v4367_v52 = vadd.f32 %v4295_v11, %v10439_v26 }
 0x622   :  { %4420 = vperm.xlu1 %4904, %v4362_v49   ;;  %v10461_v49 = vld [vmem:[#allocation32_spill] sm:$0xff] }
 0x623   :  { %4445 = vperm.xlu0 %4903, %v4367_v52   ;;  %v4298_v14 = vpop.xlane.xlu0 %4297 }
 0x624   :  { %v4301_v41 = vpop.xlane.xlu1 %4300  ;;  %v4368_v22 = vadd.f32 %v4298_v14, %v10446_v50 }
 0x625   :  { %v4369_v17 = vadd.f32 %v4301_v41, %v10441_v31  ;;  %v10462_v41 = vld [vmem:[#allocation209_spill] sm:$0xff] }
 0x626   :  { %4425 = vperm.xlu1 %4904, %v4363_v33  }
 0x627   :  { %4455 = vperm.xlu0 %4903, %v4369_v17   ;;  %v4304_v21 = vpop.xlane.xlu0 %4303 }
 0x628   :  { %v4307_v29 = vpop.xlane.xlu1 %4306  ;;  %v4370_v10 = vadd.f32 %v4304_v21, %v10448_v44 }
 0x629   :  { %v4371_v5 = vadd.f32 %v4307_v29, %v10443_v15 }
 0x62a   :  { %4430 = vperm.xlu1 %4904, %v4364_v51  }
 0x62b   :  { %4465 = vperm.xlu0 %4903, %v4371_v5   ;;  %v4310_v16 = vpop.xlane.xlu0 %4309 }
 0x62c   :  { %v4313_v54 = vpop.xlane.xlu1 %4312  ;;  %v4372_v8 = vadd.f32 %v4310_v16, %v10450_v19 }
 0x62d   :  { %v4373_v6 = vadd.f32 %v4313_v54, %v10445_v55 }
 0x62e   :  { %4440 = vperm.xlu1 %4904, %v4366_v42  }
 0x62f   :  { %4475 = vperm.xlu0 %4903, %v4373_v6   ;;  %v4316_v57 = vpop.xlane.xlu0 %4315 }
 0x630   :  { %v4319_v13 = vpop.xlane.xlu1 %4318  ;;  %v4374_v62 = vadd.f32 %v4316_v57, %v10452_v25 }
 0x631   :  { %v4375_v7 = vadd.f32 %v4319_v13, %v10447_v1 }
 0x632   :  { %4450 = vperm.xlu1 %4904, %v4368_v22  }
 0x633   :  { %4485 = vperm.xlu0 %4903, %v4375_v7   ;;  %v4322_v4 = vpop.xlane.xlu0 %4321 }
 0x634   :  { %v4325_v28 = vpop.xlane.xlu1 %4324  ;;  %v4376_v34 = vadd.f32 %v4322_v4, %v10454_v40 }
 0x635   :  { %v4377_v59 = vadd.f32 %v4325_v28, %v10449_v12 }
 0x636   :  { %4460 = vperm.xlu1 %4904, %v4370_v10  }
 0x637   :  { %4495 = vperm.xlu0 %4903, %v4377_v59   ;;  %v4328_v38 = vpop.xlane.xlu0 %4327 }
 0x638   :  { %v4331_v18 = vpop.xlane.xlu1 %4330  ;;  %v4378_v3 = vadd.f32 %v4328_v38, %v10456_v63 }
 0x639   :  { %v4379_v36 = vadd.f32 %v4331_v18, %v10451_v30 }
 0x63a   :  { %4470 = vperm.xlu1 %4904, %v4372_v8  }
 0x63b   :  { %4505 = vperm.xlu0 %4903, %v4379_v36   ;;  %v4334_v9 = vpop.xlane.xlu0 %4333 }
 0x63c   :  { %v4337_v35 = vpop.xlane.xlu1 %4336  ;;  %v4380_v45 = vadd.f32 %v4334_v9, %v10458_v61 }
 0x63d   :  { %v4381_v46 = vadd.f32 %v4337_v35, %v10453_v60 }
 0x63e   :  { %4480 = vperm.xlu1 %4904, %v4374_v62  }
 0x63f   :  { %4515 = vperm.xlu0 %4903, %v4381_v46   ;;  %v4340_v2 = vpop.xlane.xlu0 %4339 }
 0x640   :  { %v4343_v24 = vpop.xlane.xlu1 %4342  ;;  %v4382_v37 = vadd.f32 %v4340_v2, %v10460_v20 }
 0x641   :  { %v4383_v23 = vadd.f32 %v4343_v24, %v10455_v56 }
 0x642   :  { %4490 = vperm.xlu1 %4904, %v4376_v34  }
 0x643   :  { %4525 = vperm.xlu0 %4903, %v4383_v23   ;;  %v4346_v11 = vpop.xlane.xlu0 %4345 }
 0x644   :  { %v4349_v32 = vpop.xlane.xlu1 %4348  ;;  %v4384_v26 = vadd.f32 %v4346_v11, %v10461_v49 }
 0x645   :  { %v4385_v58 = vadd.f32 %v4349_v32, %v10457_v43 }
 0x646   :  { %4500 = vperm.xlu1 %4904, %v4378_v3  }
 0x647   :  { %4535 = vperm.xlu0 %4903, %v4385_v58   ;;  %v4352_v52 = vpop.xlane.xlu0 %4351 }
 0x648   :  { %v4355_v39 = vpop.xlane.xlu1 %4354  ;;  %v4386_v14 = vadd.f32 %v4352_v52, %v10462_v41 }
 0x649   :  { %v4387_v47 = vadd.f32 %v4355_v39, %v10459_v27 }
 0x64a   :  { %4510 = vperm.xlu1 %4904, %v4380_v45  }
 0x64b   :  { %4545 = vperm.xlu0 %4903, %v4387_v47  }
 0x64e   :  { %4520 = vperm.xlu1 %4904, %v4382_v37  }
 0x652   :  { %4530 = vperm.xlu1 %4904, %v4384_v26  }
 0x656   :  { %4540 = vperm.xlu1 %4904, %v4386_v14  }
 0x68b   :  { %v4391_v0 = vpop.permute.xlu0 %4390 }
 0x68c   :  { %4549 = vst.msk [vmem:[%s9329_s7] sm:$0xff] %vm4548_vm1, %v4391_v0 }
 0x68d   :  { %v4396_v33 = vpop.permute.xlu1 %4395 }
 0x68e   :  { %4550 = vst.msk [vmem:[%s9329_s7 + $0x8] sm:$0xff] %vm4548_vm1, %v4396_v33 }
 0x691   :  { %v4401_v31 = vpop.permute.xlu1 %4400 }
 0x692   :  { %4551 = vst.msk [vmem:[%s9329_s7 + $0x10] sm:$0xff] %vm4548_vm1, %v4401_v31 }
 0x695   :  { %v4406_v17 = vpop.permute.xlu1 %4405 }
 0x696   :  { %4552 = vst.msk [vmem:[%s9329_s7 + $0x18] sm:$0xff] %vm4548_vm1, %v4406_v17 }
 0x699   :  { %v4411_v29 = vpop.permute.xlu1 %4410 }
 0x69a   :  { %4553 = vst.msk [vmem:[%s9329_s7 + $0x20] sm:$0xff] %vm4548_vm1, %v4411_v29 }
 0x69d   :  { %v4416_v21 = vpop.permute.xlu1 %4415  ;;  %v4436_v48 = vpop.permute.xlu0 %4435 }
 0x69e   :  { %4554 = vst.msk [vmem:[%s9329_s7 + $0x28] sm:$0xff] %vm4548_vm1, %v4416_v21  ;;  %4558 = vst.msk [vmem:[%s9329_s7 + $0x48] sm:$0xff] %vm4548_vm1, %v4436_v48 }
 0x6a1   :  { %v4421_v51 = vpop.permute.xlu1 %4420 }
 0x6a2   :  { %v4446_v15 = vpop.permute.xlu0 %4445  ;;  %4555 = vst.msk [vmem:[%s9329_s7 + $0x30] sm:$0xff] %vm4548_vm1, %v4421_v51 }
 0x6a3   :  { %4560 = vst.msk [vmem:[%s9329_s7 + $0x58] sm:$0xff] %vm4548_vm1, %v4446_v15 }
 0x6a5   :  { %v4426_v5 = vpop.permute.xlu1 %4425 }
 0x6a6   :  { %v4456_v54 = vpop.permute.xlu0 %4455  ;;  %4556 = vst.msk [vmem:[%s9329_s7 + $0x38] sm:$0xff] %vm4548_vm1, %v4426_v5 }
 0x6a7   :  { %4562 = vst.msk [vmem:[%s9329_s7 + $0x68] sm:$0xff] %vm4548_vm1, %v4456_v54 }
 0x6a9   :  { %v4431_v16 = vpop.permute.xlu1 %4430 }
 0x6aa   :  { %v4466_v53 = vpop.permute.xlu0 %4465  ;;  %4557 = vst.msk [vmem:[%s9329_s7 + $0x40] sm:$0xff] %vm4548_vm1, %v4431_v16 }
 0x6ab   :  { %4564 = vst.msk [vmem:[%s9329_s7 + $0x78] sm:$0xff] %vm4548_vm1, %v4466_v53 }
 0x6ad   :  { %v4441_v42 = vpop.permute.xlu1 %4440 }
 0x6ae   :  { %v4476_v55 = vpop.permute.xlu0 %4475  ;;  %4559 = vst.msk [vmem:[%s9329_s7 + $0x50] sm:$0xff] %vm4548_vm1, %v4441_v42 }
 0x6af   :  { %4566 = vst.msk [vmem:[%s9329_s7 + $0x88] sm:$0xff] %vm4548_vm1, %v4476_v55 }
 0x6b1   :  { %v4451_v6 = vpop.permute.xlu1 %4450 }
 0x6b2   :  { %v4486_v13 = vpop.permute.xlu0 %4485  ;;  %4561 = vst.msk [vmem:[%s9329_s7 + $0x60] sm:$0xff] %vm4548_vm1, %v4451_v6 }
 0x6b3   :  { %4568 = vst.msk [vmem:[%s9329_s7 + $0x98] sm:$0xff] %vm4548_vm1, %v4486_v13 }
 0x6b5   :  { %v4461_v57 = vpop.permute.xlu1 %4460 }
 0x6b6   :  { %v4496_v50 = vpop.permute.xlu0 %4495  ;;  %4563 = vst.msk [vmem:[%s9329_s7 + $0x70] sm:$0xff] %vm4548_vm1, %v4461_v57 }
 0x6b7   :  { %4570 = vst.msk [vmem:[%s9329_s7 + $0xa8] sm:$0xff] %vm4548_vm1, %v4496_v50 }
 0x6b9   :  { %v4471_v22 = vpop.permute.xlu1 %4470 }
 0x6ba   :  { %v4506_v1 = vpop.permute.xlu0 %4505  ;;  %4565 = vst.msk [vmem:[%s9329_s7 + $0x80] sm:$0xff] %vm4548_vm1, %v4471_v22 }
 0x6bb   :  { %4572 = vst.msk [vmem:[%s9329_s7 + $0xb8] sm:$0xff] %vm4548_vm1, %v4506_v1 }
 0x6bd   :  { %v4481_v7 = vpop.permute.xlu1 %4480 }
 0x6be   :  { %v4516_v28 = vpop.permute.xlu0 %4515  ;;  %4567 = vst.msk [vmem:[%s9329_s7 + $0x90] sm:$0xff] %vm4548_vm1, %v4481_v7 }
 0x6bf   :  { %4574 = vst.msk [vmem:[%s9329_s7 + $0xc8] sm:$0xff] %vm4548_vm1, %v4516_v28 }
 0x6c1   :  { %v4491_v4 = vpop.permute.xlu1 %4490 }
 0x6c2   :  { %v4526_v44 = vpop.permute.xlu0 %4525  ;;  %4569 = vst.msk [vmem:[%s9329_s7 + $0xa0] sm:$0xff] %vm4548_vm1, %v4491_v4 }
 0x6c3   :  { %4576 = vst.msk [vmem:[%s9329_s7 + $0xd8] sm:$0xff] %vm4548_vm1, %v4526_v44 }
 0x6c5   :  { %v4501_v10 = vpop.permute.xlu1 %4500 }
 0x6c6   :  { %v4536_v12 = vpop.permute.xlu0 %4535  ;;  %4571 = vst.msk [vmem:[%s9329_s7 + $0xb0] sm:$0xff] %vm4548_vm1, %v4501_v10 }
 0x6c7   :  { %4578 = vst.msk [vmem:[%s9329_s7 + $0xe8] sm:$0xff] %vm4548_vm1, %v4536_v12 }
 0x6c9   :  { %v4511_v59 = vpop.permute.xlu1 %4510 }
 0x6ca   :  { %v4546_v18 = vpop.permute.xlu0 %4545  ;;  %4573 = vst.msk [vmem:[%s9329_s7 + $0xc0] sm:$0xff] %vm4548_vm1, %v4511_v59 }
 0x6cb   :  { %4580 = vst.msk [vmem:[%s9329_s7 + $0xf8] sm:$0xff] %vm4548_vm1, %v4546_v18 }
 0x6cd   :  { %v4521_v19 = vpop.permute.xlu1 %4520 }
 0x6ce   :  { %4575 = vst.msk [vmem:[%s9329_s7 + $0xd0] sm:$0xff] %vm4548_vm1, %v4521_v19 }
 0x6d1   :  { %v4531_v8 = vpop.permute.xlu1 %4530 }
 0x6d2   :  { %4577 = vst.msk [vmem:[%s9329_s7 + $0xe0] sm:$0xff] %vm4548_vm1, %v4531_v8 }
 0x6d5   :  { %v4541_v30 = vpop.permute.xlu1 %4540 }
 0x6d6   :  { %4579 = vst.msk [vmem:[%s9329_s7 + $0xf0] sm:$0xff] %vm4548_vm1, %v4541_v30 }

</bundles_post_ra>
